<compile_context>
chip_gen: v7x
topology: tpu7x:2x2x1
jax: 0.10.0
libtpu: 0.0.40
codegen_flags: <defaults>
</compile_context>

<pallas_src>
import functools

import jax
import jax.numpy as jnp
from jax.experimental import pallas as pl
from jax.experimental.pallas import tpu as pltpu


def _alt_filter_kernel(x_ref, spa_w_ref, spa_b_ref, ang_w_ref, ang_b_ref,
                       o_ref, xp_ref, ap_ref, patch_ref, *, an):
    # x_ref     : (B2, H, W, C)               bf16, B2 = nblk * an*an, channel-last
    # spa_w/ang_w: (9*C, C) bf16 im2col weights;  spa_b/ang_b: (1, C) f32
    # o_ref     : (B2, H*W, C)                f32 output block
    # xp_ref    : (B2, H+2, W+2, C)           bf16 scratch (spatial zero-pad)
    # ap_ref    : (nblk, an+2, an+2, H*W, C)  bf16 scratch (angular zero-pad)
    # patch_ref : (B2*H*W, 9*C)               bf16 scratch (im2col patch, reused)
    B2, H, W, C = x_ref.shape
    HW = H * W
    A2 = an * an
    nblk = B2 // A2
    M = B2 * HW
    Cout = spa_w_ref.shape[-1]
    cdt = xp_ref.dtype

    # ---- spatial zero-pad: re-zero only the thin border strips -------------
    xp_ref[:, 0:1, :, :] = jnp.zeros((B2, 1, W + 2, C), cdt)
    xp_ref[:, H + 1:H + 2, :, :] = jnp.zeros((B2, 1, W + 2, C), cdt)
    xp_ref[:, :, 0:1, :] = jnp.zeros((B2, H + 2, 1, C), cdt)
    xp_ref[:, :, W + 1:W + 2, :] = jnp.zeros((B2, H + 2, 1, C), cdt)
    xp_ref[:, 1:1 + H, 1:1 + W, :] = x_ref[...]

    # ---- spatial 3x3 conv + bias + ReLU as ONE im2col matmul (K = 9*C) -----
    for ky in range(3):
        for kx in range(3):
            t = ky * 3 + kx
            patch_ref[:, t * C:(t + 1) * C] = (
                xp_ref[:, ky:ky + H, kx:kx + W, :].reshape(M, C))
    acc = jnp.dot(patch_ref[...], spa_w_ref[...],
                  preferred_element_type=jnp.float32)
    acc = jnp.maximum(acc + spa_b_ref[...], 0.0)

    # ---- angular reshuffle: rows of `acc` are ordered (n, ay, ax, p) with
    # p = hy*W + hx, so the module's view/transpose/view is a pure row
    # regrouping here (no transpose needed). ---------------------------------
    ap_ref[:, 0:1, :, :, :] = jnp.zeros((nblk, 1, an + 2, HW, C), cdt)
    ap_ref[:, an + 1:an + 2, :, :, :] = jnp.zeros((nblk, 1, an + 2, HW, C), cdt)
    ap_ref[:, :, 0:1, :, :] = jnp.zeros((nblk, an + 2, 1, HW, C), cdt)
    ap_ref[:, :, an + 1:an + 2, :, :] = jnp.zeros((nblk, an + 2, 1, HW, C), cdt)
    ap_ref[:, 1:1 + an, 1:1 + an, :, :] = (
        acc.astype(cdt).reshape(nblk, an, an, HW, C))

    # ---- angular 3x3 conv + bias + ReLU as ONE im2col matmul (K = 9*C) -----
    for ky in range(3):
        for kx in range(3):
            t = ky * 3 + kx
            patch_ref[:, t * C:(t + 1) * C] = (
                ap_ref[:, ky:ky + an, kx:kx + an, :, :].reshape(M, C))
    acc2 = jnp.dot(patch_ref[...], ang_w_ref[...],
                   preferred_element_type=jnp.float32)
    acc2 = jnp.maximum(acc2 + ang_b_ref[...], 0.0)

    # Rows of acc2 are ordered (n, ay, ax, p): store as (B2, HW, C).
    # TODO(synk): emit a lane-dense (B2, HW*C) output block instead once the
    # (M, C) -> (B2, HW*C) sublane->lane value fold is verified to lower.
    o_ref[...] = acc2.reshape(B2, HW, Cout).astype(o_ref.dtype)


def _choose_nblk(n, m_per_slice, *, target_m=256, max_m=2048, min_grid=8):
    """Divisor of n: matmul M per step ~ target_m, but keep the grid deep."""
    want = max(1, -(-target_m // m_per_slice))           # ceil(target_m / m)
    want = min(want, max(1, max_m // m_per_slice))        # VMEM cap
    if n >= min_grid:
        want = min(want, max(1, n // min_grid))           # >= min_grid steps
    want = max(1, min(want, n))
    for d in range(want, 0, -1):
        if n % d == 0:
            return d
    return 1


def alt_filter_forward(x, params, an, *, compute_dtype=jnp.bfloat16,
                       target_m=256, min_grid=8):
    """AltFilter forward. x: (N*an*an, 64, h, w) NCHW. Returns the same shape."""
    B, c, h, w = x.shape
    A2 = an * an
    assert B % A2 == 0, "batch must be a multiple of an*an"
    N = B // A2
    HW = h * w

    nblk = _choose_nblk(N, A2 * HW, target_m=target_m, min_grid=min_grid)
    B2 = nblk * A2
    grid = (N // nblk,)

    # One boundary transpose NCHW -> channel-last; matmul operands in bf16.
    x_nhwc = jnp.transpose(x, (0, 2, 3, 1)).astype(compute_dtype)   # (B,h,w,c)
    # HWIO (3,3,Cin,Cout) -> im2col K-major (9*Cin, Cout); row = (ky, kx, ci).
    spa_w = params["spa_w"].reshape(9 * c, c).astype(compute_dtype)
    ang_w = params["ang_w"].reshape(9 * c, c).astype(compute_dtype)
    spa_b = params["spa_b"].reshape(1, c).astype(jnp.float32)
    ang_b = params["ang_b"].reshape(1, c).astype(jnp.float32)

    kernel = functools.partial(_alt_filter_kernel, an=an)
    out = pl.pallas_call(
        kernel,
        out_shape=jax.ShapeDtypeStruct((B, HW, c), x.dtype),
        grid=grid,
        in_specs=[
            pl.BlockSpec((B2, h, w, c), lambda i: (i, 0, 0, 0)),
            pl.BlockSpec((9 * c, c), lambda i: (0, 0)),
            pl.BlockSpec((1, c), lambda i: (0, 0)),
            pl.BlockSpec((9 * c, c), lambda i: (0, 0)),
            pl.BlockSpec((1, c), lambda i: (0, 0)),
        ],
        out_specs=pl.BlockSpec((B2, HW, c), lambda i: (i, 0, 0)),
        scratch_shapes=[
            pltpu.VMEM((B2, h + 2, w + 2, c), compute_dtype),
            pltpu.VMEM((nblk, an + 2, an + 2, HW, c), compute_dtype),
            pltpu.VMEM((B2 * HW, 9 * c), compute_dtype),
        ],
        compiler_params=pltpu.CompilerParams(
            dimension_semantics=("parallel",),
            vmem_limit_bytes=32 * 1024 * 1024),
    )(x_nhwc, spa_w, spa_b, ang_w, ang_b)

    # (N*an*an, h*w, c) -> (N*an*an, c, h, w): single boundary transpose back.
    out = jnp.transpose(out, (0, 2, 1)).reshape(B, c, h, w)
    return out


# ---------------------------------------------------------------------------
# Pure-JAX reference (mirrors the PyTorch module, with the same bf16-operand /
# f32-accumulate im2col matmul math as the kernel) for a correctness check.
# ---------------------------------------------------------------------------
def _ref_conv3x3_relu_nhwc(x, w, b, cdt):
    B, H, W, Cin = x.shape
    Cout = w.shape[-1]
    xp = jnp.pad(x.astype(cdt), ((0, 0), (1, 1), (1, 1), (0, 0)))
    cols = [xp[:, ky:ky + H, kx:kx + W, :].reshape(B * H * W, Cin)
            for ky in range(3) for kx in range(3)]
    patch = jnp.concatenate(cols, axis=1)
    acc = jnp.dot(patch, w.reshape(9 * Cin, Cout).astype(cdt),
                  preferred_element_type=jnp.float32)
    acc = jnp.maximum(acc + b[None, :].astype(jnp.float32), 0.0)
    return acc.reshape(B, H, W, Cout)


def _reference_forward(x, params, an, cdt):
    B, c, h, w = x.shape
    N = B // (an * an)
    out = jnp.transpose(x, (0, 2, 3, 1))
    out = _ref_conv3x3_relu_nhwc(out, params["spa_w"], params["spa_b"], cdt)
    out = jnp.transpose(out, (0, 3, 1, 2))                 # back to NCHW
    out = out.reshape(N, an * an, c, h * w)
    out = jnp.transpose(out, (0, 3, 2, 1))                 # torch.transpose(1,3)
    out = out.reshape(N * h * w, c, an, an)
    out2 = jnp.transpose(out, (0, 2, 3, 1))
    out2 = _ref_conv3x3_relu_nhwc(out2, params["ang_w"], params["ang_b"], cdt)
    out2 = jnp.transpose(out2, (0, 3, 1, 2))
    out2 = out2.reshape(N, h * w, c, an * an)
    out2 = jnp.transpose(out2, (0, 3, 2, 1))
    out2 = out2.reshape(N * an * an, c, h, w)
    return out2


if __name__ == "__main__":
    an = 2
    N_base = 32          # true batch; conv batch is N_base * an * an = 128
    c = 64               # fixed by the module's Conv2d(64, 64, ...)
    h = w = 4

    key = jax.random.PRNGKey(0)
    k_x, k_sw, k_sb, k_aw, k_ab = jax.random.split(key, 5)

    # PyTorch Conv2d weight is (Cout, Cin, 3, 3); we store HWIO (3, 3, Cin, Cout).
    fan_in = c * 3 * 3
    bound = 1.0 / (fan_in ** 0.5)
    params = {
        "spa_w": jax.random.uniform(k_sw, (3, 3, c, c), jnp.float32, -bound, bound),
        "spa_b": jax.random.uniform(k_sb, (c,), jnp.float32, -bound, bound),
        "ang_w": jax.random.uniform(k_aw, (3, 3, c, c), jnp.float32, -bound, bound),
        "ang_b": jax.random.uniform(k_ab, (c,), jnp.float32, -bound, bound),
    }
    x = jax.random.normal(k_x, (N_base * an * an, c, h, w), jnp.float32)

    fwd = jax.jit(functools.partial(alt_filter_forward, an=an))
    out = jax.block_until_ready(fwd(x, params))

    ref = jax.block_until_ready(_reference_forward(x, params, an, jnp.bfloat16))
    assert out.shape == x.shape, (out.shape, x.shape)
    err = float(jnp.max(jnp.abs(out - ref)))
    assert err < 1e-2, f"mismatch vs JAX reference (max abs err {err})"

    print("KERNEL_OK")
</pallas_src>

<mosaic_0001>
module attributes {stable_mosaic.version = 11 : i64} {
  func.func @_alt_filter_kernel(%arg0: i32, %arg1: memref<16x4x4x64xbf16, #tpu.memory_space<vmem>>, %arg2: memref<576x64xbf16, #tpu.memory_space<vmem>>, %arg3: memref<1x64xf32, #tpu.memory_space<vmem>>, %arg4: memref<576x64xbf16, #tpu.memory_space<vmem>>, %arg5: memref<1x64xf32, #tpu.memory_space<vmem>>, %arg6: memref<16x16x64xf32, #tpu.memory_space<vmem>>, %arg7: memref<16x6x6x64xbf16, #tpu.memory_space<vmem>>, %arg8: memref<4x4x4x16x64xbf16, #tpu.memory_space<vmem>>, %arg9: memref<256x576xbf16, #tpu.memory_space<vmem>>) attributes {dimension_semantics = [#tpu.dimension_semantics<parallel>], iteration_bounds = array<i64: 8>, scalar_prefetch = 0 : i64, scratch_operands = 3 : i64, tpu.core_type = #tpu.core_type<tc>, window_params = [{transform_indices = @transform_0, window_bounds = array<i64: 16, 4, 4, 64>}, {pipeline_mode = #tpu.pipeline_mode<synchronous>, transform_indices = @transform_1, window_bounds = array<i64: 576, 64>}, {pipeline_mode = #tpu.pipeline_mode<synchronous>, transform_indices = @transform_2, window_bounds = array<i64: 1, 64>}, {pipeline_mode = #tpu.pipeline_mode<synchronous>, transform_indices = @transform_3, window_bounds = array<i64: 576, 64>}, {pipeline_mode = #tpu.pipeline_mode<synchronous>, transform_indices = @transform_4, window_bounds = array<i64: 1, 64>}, {transform_indices = @transform_5, window_bounds = array<i64: 16, 16, 64>}]} {
    %cst = arith.constant 0.000000e+00 : bf16
    %0 = vector.broadcast %cst : bf16 to vector<16x1x6x64xbf16>
    %c0 = arith.constant 0 : index
    %c0_0 = arith.constant 0 : index
    %c0_1 = arith.constant 0 : index
    %c0_2 = arith.constant 0 : index
    %1 = vector.load %arg7[%c0, %c0_0, %c0_1, %c0_2] : memref<16x6x6x64xbf16, #tpu.memory_space<vmem>>, vector<16x1x6x64xbf16>
    tpu.vector_store %arg7[%c0, %c0_0, %c0_1, %c0_2], %0 {strides = array<i32>} : memref<16x6x6x64xbf16, #tpu.memory_space<vmem>>, vector<16x1x6x64xbf16>,
    %cst_3 = arith.constant 0.000000e+00 : bf16
    %2 = vector.broadcast %cst_3 : bf16 to vector<16x1x6x64xbf16>
    %c0_4 = arith.constant 0 : index
    %c5 = arith.constant 5 : index
    %c0_5 = arith.constant 0 : index
    %c0_6 = arith.constant 0 : index
    %3 = vector.load %arg7[%c0_4, %c5, %c0_5, %c0_6] : memref<16x6x6x64xbf16, #tpu.memory_space<vmem>>, vector<16x1x6x64xbf16>
    tpu.vector_store %arg7[%c0_4, %c5, %c0_5, %c0_6], %2 {strides = array<i32>} : memref<16x6x6x64xbf16, #tpu.memory_space<vmem>>, vector<16x1x6x64xbf16>,
    %cst_7 = arith.constant 0.000000e+00 : bf16
    %4 = vector.broadcast %cst_7 : bf16 to vector<16x6x1x64xbf16>
    %c0_8 = arith.constant 0 : index
    %c0_9 = arith.constant 0 : index
    %c0_10 = arith.constant 0 : index
    %c0_11 = arith.constant 0 : index
    %5 = vector.load %arg7[%c0_8, %c0_9, %c0_10, %c0_11] : memref<16x6x6x64xbf16, #tpu.memory_space<vmem>>, vector<16x6x1x64xbf16>
    tpu.vector_store %arg7[%c0_8, %c0_9, %c0_10, %c0_11], %4 {strides = array<i32>} : memref<16x6x6x64xbf16, #tpu.memory_space<vmem>>, vector<16x6x1x64xbf16>,
    %cst_12 = arith.constant 0.000000e+00 : bf16
    %6 = vector.broadcast %cst_12 : bf16 to vector<16x6x1x64xbf16>
    %c0_13 = arith.constant 0 : index
    %c0_14 = arith.constant 0 : index
    %c5_15 = arith.constant 5 : index
    %c0_16 = arith.constant 0 : index
    %7 = vector.load %arg7[%c0_13, %c0_14, %c5_15, %c0_16] : memref<16x6x6x64xbf16, #tpu.memory_space<vmem>>, vector<16x6x1x64xbf16>
    tpu.vector_store %arg7[%c0_13, %c0_14, %c5_15, %c0_16], %6 {strides = array<i32>} : memref<16x6x6x64xbf16, #tpu.memory_space<vmem>>, vector<16x6x1x64xbf16>,
    %c0_17 = arith.constant 0 : index
    %c0_18 = arith.constant 0 : index
    %c0_19 = arith.constant 0 : index
    %c0_20 = arith.constant 0 : index
    %8 = vector.load %arg1[%c0_17, %c0_18, %c0_19, %c0_20] : memref<16x4x4x64xbf16, #tpu.memory_space<vmem>>, vector<16x4x4x64xbf16>
    %c0_21 = arith.constant 0 : index
    %c1 = arith.constant 1 : index
    %c1_22 = arith.constant 1 : index
    %c0_23 = arith.constant 0 : index
    %9 = vector.load %arg7[%c0_21, %c1, %c1_22, %c0_23] : memref<16x6x6x64xbf16, #tpu.memory_space<vmem>>, vector<16x4x4x64xbf16>
    tpu.vector_store %arg7[%c0_21, %c1, %c1_22, %c0_23], %8 {strides = array<i32>} : memref<16x6x6x64xbf16, #tpu.memory_space<vmem>>, vector<16x4x4x64xbf16>,
    %c0_24 = arith.constant 0 : index
    %c0_25 = arith.constant 0 : index
    %c0_26 = arith.constant 0 : index
    %c0_27 = arith.constant 0 : index
    %10 = vector.load %arg7[%c0_24, %c0_25, %c0_26, %c0_27] : memref<16x6x6x64xbf16, #tpu.memory_space<vmem>>, vector<16x4x4x64xbf16>
    %11 = vector.shape_cast %10 : vector<16x4x4x64xbf16> to vector<256x64xbf16>
    %c0_28 = arith.constant 0 : index
    %c0_29 = arith.constant 0 : index
    %12 = vector.load %arg9[%c0_28, %c0_29] : memref<256x576xbf16, #tpu.memory_space<vmem>>, vector<256x64xbf16>
    tpu.vector_store %arg9[%c0_28, %c0_29], %11 {strides = array<i32>} : memref<256x576xbf16, #tpu.memory_space<vmem>>, vector<256x64xbf16>,
    %c0_30 = arith.constant 0 : index
    %c0_31 = arith.constant 0 : index
    %c1_32 = arith.constant 1 : index
    %c0_33 = arith.constant 0 : index
    %13 = vector.load %arg7[%c0_30, %c0_31, %c1_32, %c0_33] : memref<16x6x6x64xbf16, #tpu.memory_space<vmem>>, vector<16x4x4x64xbf16>
    %14 = vector.shape_cast %13 : vector<16x4x4x64xbf16> to vector<256x64xbf16>
    %c0_34 = arith.constant 0 : index
    %c64 = arith.constant 64 : index
    %15 = vector.load %arg9[%c0_34, %c64] : memref<256x576xbf16, #tpu.memory_space<vmem>>, vector<256x64xbf16>
    tpu.vector_store %arg9[%c0_34, %c64], %14 {strides = array<i32>} : memref<256x576xbf16, #tpu.memory_space<vmem>>, vector<256x64xbf16>,
    %c0_35 = arith.constant 0 : index
    %c0_36 = arith.constant 0 : index
    %c2 = arith.constant 2 : index
    %c0_37 = arith.constant 0 : index
    %16 = vector.load %arg7[%c0_35, %c0_36, %c2, %c0_37] : memref<16x6x6x64xbf16, #tpu.memory_space<vmem>>, vector<16x4x4x64xbf16>
    %17 = vector.shape_cast %16 : vector<16x4x4x64xbf16> to vector<256x64xbf16>
    %c0_38 = arith.constant 0 : index
    %c128 = arith.constant 128 : index
    %18 = vector.load %arg9[%c0_38, %c128] : memref<256x576xbf16, #tpu.memory_space<vmem>>, vector<256x64xbf16>
    tpu.vector_store %arg9[%c0_38, %c128], %17 {strides = array<i32>} : memref<256x576xbf16, #tpu.memory_space<vmem>>, vector<256x64xbf16>,
    %c0_39 = arith.constant 0 : index
    %c1_40 = arith.constant 1 : index
    %c0_41 = arith.constant 0 : index
    %c0_42 = arith.constant 0 : index
    %19 = vector.load %arg7[%c0_39, %c1_40, %c0_41, %c0_42] : memref<16x6x6x64xbf16, #tpu.memory_space<vmem>>, vector<16x4x4x64xbf16>
    %20 = vector.shape_cast %19 : vector<16x4x4x64xbf16> to vector<256x64xbf16>
    %c0_43 = arith.constant 0 : index
    %c192 = arith.constant 192 : index
    %21 = vector.load %arg9[%c0_43, %c192] : memref<256x576xbf16, #tpu.memory_space<vmem>>, vector<256x64xbf16>
    tpu.vector_store %arg9[%c0_43, %c192], %20 {strides = array<i32>} : memref<256x576xbf16, #tpu.memory_space<vmem>>, vector<256x64xbf16>,
    %c0_44 = arith.constant 0 : index
    %c1_45 = arith.constant 1 : index
    %c1_46 = arith.constant 1 : index
    %c0_47 = arith.constant 0 : index
    %22 = vector.load %arg7[%c0_44, %c1_45, %c1_46, %c0_47] : memref<16x6x6x64xbf16, #tpu.memory_space<vmem>>, vector<16x4x4x64xbf16>
    %23 = vector.shape_cast %22 : vector<16x4x4x64xbf16> to vector<256x64xbf16>
    %c0_48 = arith.constant 0 : index
    %c256 = arith.constant 256 : index
    %24 = vector.load %arg9[%c0_48, %c256] : memref<256x576xbf16, #tpu.memory_space<vmem>>, vector<256x64xbf16>
    tpu.vector_store %arg9[%c0_48, %c256], %23 {strides = array<i32>} : memref<256x576xbf16, #tpu.memory_space<vmem>>, vector<256x64xbf16>,
    %c0_49 = arith.constant 0 : index
    %c1_50 = arith.constant 1 : index
    %c2_51 = arith.constant 2 : index
    %c0_52 = arith.constant 0 : index
    %25 = vector.load %arg7[%c0_49, %c1_50, %c2_51, %c0_52] : memref<16x6x6x64xbf16, #tpu.memory_space<vmem>>, vector<16x4x4x64xbf16>
    %26 = vector.shape_cast %25 : vector<16x4x4x64xbf16> to vector<256x64xbf16>
    %c0_53 = arith.constant 0 : index
    %c320 = arith.constant 320 : index
    %27 = vector.load %arg9[%c0_53, %c320] : memref<256x576xbf16, #tpu.memory_space<vmem>>, vector<256x64xbf16>
    tpu.vector_store %arg9[%c0_53, %c320], %26 {strides = array<i32>} : memref<256x576xbf16, #tpu.memory_space<vmem>>, vector<256x64xbf16>,
    %c0_54 = arith.constant 0 : index
    %c2_55 = arith.constant 2 : index
    %c0_56 = arith.constant 0 : index
    %c0_57 = arith.constant 0 : index
    %28 = vector.load %arg7[%c0_54, %c2_55, %c0_56, %c0_57] : memref<16x6x6x64xbf16, #tpu.memory_space<vmem>>, vector<16x4x4x64xbf16>
    %29 = vector.shape_cast %28 : vector<16x4x4x64xbf16> to vector<256x64xbf16>
    %c0_58 = arith.constant 0 : index
    %c384 = arith.constant 384 : index
    %30 = vector.load %arg9[%c0_58, %c384] : memref<256x576xbf16, #tpu.memory_space<vmem>>, vector<256x64xbf16>
    tpu.vector_store %arg9[%c0_58, %c384], %29 {strides = array<i32>} : memref<256x576xbf16, #tpu.memory_space<vmem>>, vector<256x64xbf16>,
    %c0_59 = arith.constant 0 : index
    %c2_60 = arith.constant 2 : index
    %c1_61 = arith.constant 1 : index
    %c0_62 = arith.constant 0 : index
    %31 = vector.load %arg7[%c0_59, %c2_60, %c1_61, %c0_62] : memref<16x6x6x64xbf16, #tpu.memory_space<vmem>>, vector<16x4x4x64xbf16>
    %32 = vector.shape_cast %31 : vector<16x4x4x64xbf16> to vector<256x64xbf16>
    %c0_63 = arith.constant 0 : index
    %c448 = arith.constant 448 : index
    %33 = vector.load %arg9[%c0_63, %c448] : memref<256x576xbf16, #tpu.memory_space<vmem>>, vector<256x64xbf16>
    tpu.vector_store %arg9[%c0_63, %c448], %32 {strides = array<i32>} : memref<256x576xbf16, #tpu.memory_space<vmem>>, vector<256x64xbf16>,
    %c0_64 = arith.constant 0 : index
    %c2_65 = arith.constant 2 : index
    %c2_66 = arith.constant 2 : index
    %c0_67 = arith.constant 0 : index
    %34 = vector.load %arg7[%c0_64, %c2_65, %c2_66, %c0_67] : memref<16x6x6x64xbf16, #tpu.memory_space<vmem>>, vector<16x4x4x64xbf16>
    %35 = vector.shape_cast %34 : vector<16x4x4x64xbf16> to vector<256x64xbf16>
    %c0_68 = arith.constant 0 : index
    %c512 = arith.constant 512 : index
    %36 = vector.load %arg9[%c0_68, %c512] : memref<256x576xbf16, #tpu.memory_space<vmem>>, vector<256x64xbf16>
    tpu.vector_store %arg9[%c0_68, %c512], %35 {strides = array<i32>} : memref<256x576xbf16, #tpu.memory_space<vmem>>, vector<256x64xbf16>,
    %c0_69 = arith.constant 0 : index
    %c0_70 = arith.constant 0 : index
    %37 = vector.load %arg9[%c0_69, %c0_70] : memref<256x576xbf16, #tpu.memory_space<vmem>>, vector<256x576xbf16>
    %c0_71 = arith.constant 0 : index
    %c0_72 = arith.constant 0 : index
    %38 = vector.load %arg2[%c0_71, %c0_72] : memref<576x64xbf16, #tpu.memory_space<vmem>>, vector<576x64xbf16>
    %cst_73 = arith.constant dense<0.000000e+00> : vector<256x64xf32>
    %39 = tpu.matmul %37, %38, %cst_73 {dimension_numbers = #tpu.dot_dimension_numbers<[1], [0], [0], [1], [0, 0, 1, 1], [], []>} : vector<256x576xbf16>, vector<576x64xbf16>, vector<256x64xf32> -> vector<256x64xf32>
    %c0_74 = arith.constant 0 : index
    %c0_75 = arith.constant 0 : index
    %40 = vector.load %arg3[%c0_74, %c0_75] : memref<1x64xf32, #tpu.memory_space<vmem>>, vector<1x64xf32>
    %41 = vector.broadcast %40 : vector<1x64xf32> to vector<256x64xf32>
    %42 = arith.addf %39, %41 : vector<256x64xf32>
    %cst_76 = arith.constant 0.000000e+00 : f32
    %43 = vector.broadcast %cst_76 : f32 to vector<256x64xf32>
    %44 = arith.maximumf %42, %43 : vector<256x64xf32>
    %cst_77 = arith.constant 0.000000e+00 : bf16
    %45 = vector.broadcast %cst_77 : bf16 to vector<4x1x4x16x64xbf16>
    %c0_78 = arith.constant 0 : index
    %c0_79 = arith.constant 0 : index
    %c0_80 = arith.constant 0 : index
    %c0_81 = arith.constant 0 : index
    %c0_82 = arith.constant 0 : index
    %46 = vector.load %arg8[%c0_78, %c0_79, %c0_80, %c0_81, %c0_82] : memref<4x4x4x16x64xbf16, #tpu.memory_space<vmem>>, vector<4x1x4x16x64xbf16>
    tpu.vector_store %arg8[%c0_78, %c0_79, %c0_80, %c0_81, %c0_82], %45 {strides = array<i32>} : memref<4x4x4x16x64xbf16, #tpu.memory_space<vmem>>, vector<4x1x4x16x64xbf16>,
    %cst_83 = arith.constant 0.000000e+00 : bf16
    %47 = vector.broadcast %cst_83 : bf16 to vector<4x1x4x16x64xbf16>
    %c0_84 = arith.constant 0 : index
    %c3 = arith.constant 3 : index
    %c0_85 = arith.constant 0 : index
    %c0_86 = arith.constant 0 : index
    %c0_87 = arith.constant 0 : index
    %48 = vector.load %arg8[%c0_84, %c3, %c0_85, %c0_86, %c0_87] : memref<4x4x4x16x64xbf16, #tpu.memory_space<vmem>>, vector<4x1x4x16x64xbf16>
    tpu.vector_store %arg8[%c0_84, %c3, %c0_85, %c0_86, %c0_87], %47 {strides = array<i32>} : memref<4x4x4x16x64xbf16, #tpu.memory_space<vmem>>, vector<4x1x4x16x64xbf16>,
    %cst_88 = arith.constant 0.000000e+00 : bf16
    %49 = vector.broadcast %cst_88 : bf16 to vector<4x4x1x16x64xbf16>
    %c0_89 = arith.constant 0 : index
    %c0_90 = arith.constant 0 : index
    %c0_91 = arith.constant 0 : index
    %c0_92 = arith.constant 0 : index
    %c0_93 = arith.constant 0 : index
    %50 = vector.load %arg8[%c0_89, %c0_90, %c0_91, %c0_92, %c0_93] : memref<4x4x4x16x64xbf16, #tpu.memory_space<vmem>>, vector<4x4x1x16x64xbf16>
    tpu.vector_store %arg8[%c0_89, %c0_90, %c0_91, %c0_92, %c0_93], %49 {strides = array<i32>} : memref<4x4x4x16x64xbf16, #tpu.memory_space<vmem>>, vector<4x4x1x16x64xbf16>,
    %cst_94 = arith.constant 0.000000e+00 : bf16
    %51 = vector.broadcast %cst_94 : bf16 to vector<4x4x1x16x64xbf16>
    %c0_95 = arith.constant 0 : index
    %c0_96 = arith.constant 0 : index
    %c3_97 = arith.constant 3 : index
    %c0_98 = arith.constant 0 : index
    %c0_99 = arith.constant 0 : index
    %52 = vector.load %arg8[%c0_95, %c0_96, %c3_97, %c0_98, %c0_99] : memref<4x4x4x16x64xbf16, #tpu.memory_space<vmem>>, vector<4x4x1x16x64xbf16>
    tpu.vector_store %arg8[%c0_95, %c0_96, %c3_97, %c0_98, %c0_99], %51 {strides = array<i32>} : memref<4x4x4x16x64xbf16, #tpu.memory_space<vmem>>, vector<4x4x1x16x64xbf16>,
    %53 = arith.truncf %44 : vector<256x64xf32> to vector<256x64xbf16>
    %54 = vector.shape_cast %53 : vector<256x64xbf16> to vector<4x2x2x16x64xbf16>
    %c0_100 = arith.constant 0 : index
    %c1_101 = arith.constant 1 : index
    %c1_102 = arith.constant 1 : index
    %c0_103 = arith.constant 0 : index
    %c0_104 = arith.constant 0 : index
    %55 = vector.load %arg8[%c0_100, %c1_101, %c1_102, %c0_103, %c0_104] : memref<4x4x4x16x64xbf16, #tpu.memory_space<vmem>>, vector<4x2x2x16x64xbf16>
    tpu.vector_store %arg8[%c0_100, %c1_101, %c1_102, %c0_103, %c0_104], %54 {strides = array<i32>} : memref<4x4x4x16x64xbf16, #tpu.memory_space<vmem>>, vector<4x2x2x16x64xbf16>,
    %c0_105 = arith.constant 0 : index
    %c0_106 = arith.constant 0 : index
    %c0_107 = arith.constant 0 : index
    %c0_108 = arith.constant 0 : index
    %c0_109 = arith.constant 0 : index
    %56 = vector.load %arg8[%c0_105, %c0_106, %c0_107, %c0_108, %c0_109] : memref<4x4x4x16x64xbf16, #tpu.memory_space<vmem>>, vector<4x2x2x16x64xbf16>
    %57 = vector.shape_cast %56 : vector<4x2x2x16x64xbf16> to vector<256x64xbf16>
    %c0_110 = arith.constant 0 : index
    %c0_111 = arith.constant 0 : index
    %58 = vector.load %arg9[%c0_110, %c0_111] : memref<256x576xbf16, #tpu.memory_space<vmem>>, vector<256x64xbf16>
    tpu.vector_store %arg9[%c0_110, %c0_111], %57 {strides = array<i32>} : memref<256x576xbf16, #tpu.memory_space<vmem>>, vector<256x64xbf16>,
    %c0_112 = arith.constant 0 : index
    %c0_113 = arith.constant 0 : index
    %c1_114 = arith.constant 1 : index
    %c0_115 = arith.constant 0 : index
    %c0_116 = arith.constant 0 : index
    %59 = vector.load %arg8[%c0_112, %c0_113, %c1_114, %c0_115, %c0_116] : memref<4x4x4x16x64xbf16, #tpu.memory_space<vmem>>, vector<4x2x2x16x64xbf16>
    %60 = vector.shape_cast %59 : vector<4x2x2x16x64xbf16> to vector<256x64xbf16>
    %c0_117 = arith.constant 0 : index
    %c64_118 = arith.constant 64 : index
    %61 = vector.load %arg9[%c0_117, %c64_118] : memref<256x576xbf16, #tpu.memory_space<vmem>>, vector<256x64xbf16>
    tpu.vector_store %arg9[%c0_117, %c64_118], %60 {strides = array<i32>} : memref<256x576xbf16, #tpu.memory_space<vmem>>, vector<256x64xbf16>,
    %c0_119 = arith.constant 0 : index
    %c0_120 = arith.constant 0 : index
    %c2_121 = arith.constant 2 : index
    %c0_122 = arith.constant 0 : index
    %c0_123 = arith.constant 0 : index
    %62 = vector.load %arg8[%c0_119, %c0_120, %c2_121, %c0_122, %c0_123] : memref<4x4x4x16x64xbf16, #tpu.memory_space<vmem>>, vector<4x2x2x16x64xbf16>
    %63 = vector.shape_cast %62 : vector<4x2x2x16x64xbf16> to vector<256x64xbf16>
    %c0_124 = arith.constant 0 : index
    %c128_125 = arith.constant 128 : index
    %64 = vector.load %arg9[%c0_124, %c128_125] : memref<256x576xbf16, #tpu.memory_space<vmem>>, vector<256x64xbf16>
    tpu.vector_store %arg9[%c0_124, %c128_125], %63 {strides = array<i32>} : memref<256x576xbf16, #tpu.memory_space<vmem>>, vector<256x64xbf16>,
    %c0_126 = arith.constant 0 : index
    %c1_127 = arith.constant 1 : index
    %c0_128 = arith.constant 0 : index
    %c0_129 = arith.constant 0 : index
    %c0_130 = arith.constant 0 : index
    %65 = vector.load %arg8[%c0_126, %c1_127, %c0_128, %c0_129, %c0_130] : memref<4x4x4x16x64xbf16, #tpu.memory_space<vmem>>, vector<4x2x2x16x64xbf16>
    %66 = vector.shape_cast %65 : vector<4x2x2x16x64xbf16> to vector<256x64xbf16>
    %c0_131 = arith.constant 0 : index
    %c192_132 = arith.constant 192 : index
    %67 = vector.load %arg9[%c0_131, %c192_132] : memref<256x576xbf16, #tpu.memory_space<vmem>>, vector<256x64xbf16>
    tpu.vector_store %arg9[%c0_131, %c192_132], %66 {strides = array<i32>} : memref<256x576xbf16, #tpu.memory_space<vmem>>, vector<256x64xbf16>,
    %c0_133 = arith.constant 0 : index
    %c1_134 = arith.constant 1 : index
    %c1_135 = arith.constant 1 : index
    %c0_136 = arith.constant 0 : index
    %c0_137 = arith.constant 0 : index
    %68 = vector.load %arg8[%c0_133, %c1_134, %c1_135, %c0_136, %c0_137] : memref<4x4x4x16x64xbf16, #tpu.memory_space<vmem>>, vector<4x2x2x16x64xbf16>
    %69 = vector.shape_cast %68 : vector<4x2x2x16x64xbf16> to vector<256x64xbf16>
    %c0_138 = arith.constant 0 : index
    %c256_139 = arith.constant 256 : index
    %70 = vector.load %arg9[%c0_138, %c256_139] : memref<256x576xbf16, #tpu.memory_space<vmem>>, vector<256x64xbf16>
    tpu.vector_store %arg9[%c0_138, %c256_139], %69 {strides = array<i32>} : memref<256x576xbf16, #tpu.memory_space<vmem>>, vector<256x64xbf16>,
    %c0_140 = arith.constant 0 : index
    %c1_141 = arith.constant 1 : index
    %c2_142 = arith.constant 2 : index
    %c0_143 = arith.constant 0 : index
    %c0_144 = arith.constant 0 : index
    %71 = vector.load %arg8[%c0_140, %c1_141, %c2_142, %c0_143, %c0_144] : memref<4x4x4x16x64xbf16, #tpu.memory_space<vmem>>, vector<4x2x2x16x64xbf16>
    %72 = vector.shape_cast %71 : vector<4x2x2x16x64xbf16> to vector<256x64xbf16>
    %c0_145 = arith.constant 0 : index
    %c320_146 = arith.constant 320 : index
    %73 = vector.load %arg9[%c0_145, %c320_146] : memref<256x576xbf16, #tpu.memory_space<vmem>>, vector<256x64xbf16>
    tpu.vector_store %arg9[%c0_145, %c320_146], %72 {strides = array<i32>} : memref<256x576xbf16, #tpu.memory_space<vmem>>, vector<256x64xbf16>,
    %c0_147 = arith.constant 0 : index
    %c2_148 = arith.constant 2 : index
    %c0_149 = arith.constant 0 : index
    %c0_150 = arith.constant 0 : index
    %c0_151 = arith.constant 0 : index
    %74 = vector.load %arg8[%c0_147, %c2_148, %c0_149, %c0_150, %c0_151] : memref<4x4x4x16x64xbf16, #tpu.memory_space<vmem>>, vector<4x2x2x16x64xbf16>
    %75 = vector.shape_cast %74 : vector<4x2x2x16x64xbf16> to vector<256x64xbf16>
    %c0_152 = arith.constant 0 : index
    %c384_153 = arith.constant 384 : index
    %76 = vector.load %arg9[%c0_152, %c384_153] : memref<256x576xbf16, #tpu.memory_space<vmem>>, vector<256x64xbf16>
    tpu.vector_store %arg9[%c0_152, %c384_153], %75 {strides = array<i32>} : memref<256x576xbf16, #tpu.memory_space<vmem>>, vector<256x64xbf16>,
    %c0_154 = arith.constant 0 : index
    %c2_155 = arith.constant 2 : index
    %c1_156 = arith.constant 1 : index
    %c0_157 = arith.constant 0 : index
    %c0_158 = arith.constant 0 : index
    %77 = vector.load %arg8[%c0_154, %c2_155, %c1_156, %c0_157, %c0_158] : memref<4x4x4x16x64xbf16, #tpu.memory_space<vmem>>, vector<4x2x2x16x64xbf16>
    %78 = vector.shape_cast %77 : vector<4x2x2x16x64xbf16> to vector<256x64xbf16>
    %c0_159 = arith.constant 0 : index
    %c448_160 = arith.constant 448 : index
    %79 = vector.load %arg9[%c0_159, %c448_160] : memref<256x576xbf16, #tpu.memory_space<vmem>>, vector<256x64xbf16>
    tpu.vector_store %arg9[%c0_159, %c448_160], %78 {strides = array<i32>} : memref<256x576xbf16, #tpu.memory_space<vmem>>, vector<256x64xbf16>,
    %c0_161 = arith.constant 0 : index
    %c2_162 = arith.constant 2 : index
    %c2_163 = arith.constant 2 : index
    %c0_164 = arith.constant 0 : index
    %c0_165 = arith.constant 0 : index
    %80 = vector.load %arg8[%c0_161, %c2_162, %c2_163, %c0_164, %c0_165] : memref<4x4x4x16x64xbf16, #tpu.memory_space<vmem>>, vector<4x2x2x16x64xbf16>
    %81 = vector.shape_cast %80 : vector<4x2x2x16x64xbf16> to vector<256x64xbf16>
    %c0_166 = arith.constant 0 : index
    %c512_167 = arith.constant 512 : index
    %82 = vector.load %arg9[%c0_166, %c512_167] : memref<256x576xbf16, #tpu.memory_space<vmem>>, vector<256x64xbf16>
    tpu.vector_store %arg9[%c0_166, %c512_167], %81 {strides = array<i32>} : memref<256x576xbf16, #tpu.memory_space<vmem>>, vector<256x64xbf16>,
    %c0_168 = arith.constant 0 : index
    %c0_169 = arith.constant 0 : index
    %83 = vector.load %arg9[%c0_168, %c0_169] : memref<256x576xbf16, #tpu.memory_space<vmem>>, vector<256x576xbf16>
    %c0_170 = arith.constant 0 : index
    %c0_171 = arith.constant 0 : index
    %84 = vector.load %arg4[%c0_170, %c0_171] : memref<576x64xbf16, #tpu.memory_space<vmem>>, vector<576x64xbf16>
    %cst_172 = arith.constant dense<0.000000e+00> : vector<256x64xf32>
    %85 = tpu.matmul %83, %84, %cst_172 {dimension_numbers = #tpu.dot_dimension_numbers<[1], [0], [0], [1], [0, 0, 1, 1], [], []>} : vector<256x576xbf16>, vector<576x64xbf16>, vector<256x64xf32> -> vector<256x64xf32>
    %c0_173 = arith.constant 0 : index
    %c0_174 = arith.constant 0 : index
    %86 = vector.load %arg5[%c0_173, %c0_174] : memref<1x64xf32, #tpu.memory_space<vmem>>, vector<1x64xf32>
    %87 = vector.broadcast %86 : vector<1x64xf32> to vector<256x64xf32>
    %88 = arith.addf %85, %87 : vector<256x64xf32>
    %cst_175 = arith.constant 0.000000e+00 : f32
    %89 = vector.broadcast %cst_175 : f32 to vector<256x64xf32>
    %90 = arith.maximumf %88, %89 : vector<256x64xf32>
    %91 = vector.shape_cast %90 : vector<256x64xf32> to vector<16x16x64xf32>
    %c0_176 = arith.constant 0 : index
    %c0_177 = arith.constant 0 : index
    %c0_178 = arith.constant 0 : index
    %92 = vector.load %arg6[%c0_176, %c0_177, %c0_178] : memref<16x16x64xf32, #tpu.memory_space<vmem>>, vector<16x16x64xf32>
    tpu.vector_store %arg6[%c0_176, %c0_177, %c0_178], %91 {strides = array<i32>} : memref<16x16x64xf32, #tpu.memory_space<vmem>>, vector<16x16x64xf32>,
    return
  }
  func.func @transform_0(%arg0: i32) -> (i32, i32, i32, i32) {
    %c0_i32 = arith.constant 0 : i32
    %c0_i32_0 = arith.constant 0 : i32
    %c0_i32_1 = arith.constant 0 : i32
    %c0_i32_2 = arith.constant 0 : i32
    return %arg0, %c0_i32, %c0_i32_0, %c0_i32_1 : i32, i32, i32, i32
  }
  func.func @transform_1(%arg0: i32) -> (i32, i32) {
    %c0_i32 = arith.constant 0 : i32
    %c0_i32_0 = arith.constant 0 : i32
    %c0_i32_1 = arith.constant 0 : i32
    return %c0_i32, %c0_i32_0 : i32, i32
  }
  func.func @transform_2(%arg0: i32) -> (i32, i32) {
    %c0_i32 = arith.constant 0 : i32
    %c0_i32_0 = arith.constant 0 : i32
    %c0_i32_1 = arith.constant 0 : i32
    return %c0_i32, %c0_i32_0 : i32, i32
  }
  func.func @transform_3(%arg0: i32) -> (i32, i32) {
    %c0_i32 = arith.constant 0 : i32
    %c0_i32_0 = arith.constant 0 : i32
    %c0_i32_1 = arith.constant 0 : i32
    return %c0_i32, %c0_i32_0 : i32, i32
  }
  func.func @transform_4(%arg0: i32) -> (i32, i32) {
    %c0_i32 = arith.constant 0 : i32
    %c0_i32_0 = arith.constant 0 : i32
    %c0_i32_1 = arith.constant 0 : i32
    return %c0_i32, %c0_i32_0 : i32, i32
  }
  func.func @transform_5(%arg0: i32) -> (i32, i32, i32) {
    %c0_i32 = arith.constant 0 : i32
    %c0_i32_0 = arith.constant 0 : i32
    %c0_i32_1 = arith.constant 0 : i32
    return %arg0, %c0_i32, %c0_i32_0 : i32, i32, i32
  }
}

</mosaic_0001>

<bundles_post_ra>
// kernel: alt_filter_forward.1
= control target key start
LH: loop header
LB: loop body
LE: loop exit
PB: predicated region body
PF: predicated region fallthrough
CT: control target
= control target key end

     0   :  { %s16957_s18 = smov 0   ;;  %s20792_s0 = inlined_call_operand.vmem [shape: bf16[128,4,4,64], index: 0, kind: input, shape index: {}]   ;;  %s20793_s1 = inlined_call_operand.vmem [shape: bf16[576,64], index: 1, kind: input, shape index: {}]   ;;  %s20794_s2 = inlined_call_operand.vmem [shape: f32[1,64], index: 2, kind: input, shape index: {}]   ;;  %s20795_s3 = inlined_call_operand.vmem [shape: bf16[576,64], index: 3, kind: input, shape index: {}]   ;;  %s20796_s4 = inlined_call_operand.vmem [shape: f32[1,64], index: 4, kind: input, shape index: {}]   ;;  %s20797_s5 = inlined_call_operand.vmem [shape: f32[128,16,64], index: 5, kind: output, shape index: {}]  }
   0x1 LB: > { %s15311_s19 = sadd.s32 4294967295, %s16922_s18   ;;  %p15315_p0 = scmp.ge.s32.totalorder %s16922_s18, 1  ;;  %s16922_s18 = sphi %s16957_s18, %s15_s18  }
   0x2   : > { %p189_p1 = scmp.lt.s32.totalorder %s16922_s18, 9 }
   0x4   : > { %p190_p2 = pnand %p15315_p0, %p189_p1 }
   0x6   : > { %193 = sbr.rel (%p190_p2) target bundleno = 1725 (0x6bd), region = 40 }
   0xd   : > { %s15316_s20 = sshll.u32 %s15311_s19, 4  ;;  %vm268_vm0 = vcmask 516096   ;;  %vm269_vm1 = vsmask.f32 256  ;;  %v274_v1 = vld [vmem:[#allocation2 + $0x4] sm:$0x1]  ;;  %v2267_v37 = vlaneseq }
   0xe   : > { %p220_p3 = scmp.lt.s32.totalorder %s15316_s20, 127  ;;  %vm16965_vm2 = vmand %vm268_vm0, %vm269_vm1  ;;  %v277_v2 = vld [vmem:[#allocation2 + $0x8] sm:$0x1]  ;;  %vm559_vm3 = vcmask 518146   ;;  %v280_v5 = vld [vmem:[#allocation2 + $0xc] sm:$0x1] }
   0xf   : > { %v275_v3 = vsel %vm16965_vm2, 0, %v274_v1  ;;  %v278_v4 = vsel %vm16965_vm2, 0, %v277_v2  ;;  %v283_v6 = vld [vmem:[#allocation2 + $0x10] sm:$0x1]  ;;  %vm234_vm4 = vcmask 518144   ;;  %v281_v7 = vsel %vm16965_vm2, 0, %v280_v5 }
  0x10   : > { %s20891_s20 = smov (!%p220_p3, %s15316_s20), 127  ;;  %276 = vst [vmem:[#allocation2 + $0x4] sm:$0x1] %v275_v3  ;;  %279 = vst [vmem:[#allocation2 + $0x8] sm:$0x1] %v278_v4  ;;  %v284_v8 = vsel %vm16965_vm2, 0, %v283_v6 }
  0x11   : > { %vm560_vm5 = vsmask.f32 7946  ;;  %282 = vst [vmem:[#allocation2 + $0xc] sm:$0x1] %v281_v7  ;;  %285 = vst [vmem:[#allocation2 + $0x10] sm:$0x1] %v284_v8 }
  0x12   : > { %vm16979_vm6 = vmand %vm559_vm3, %vm560_vm5  ;;  %v565_v10 = vld [vmem:[#allocation2 + $0x4] sm:$0x4]  ;;  %v568_v11 = vld [vmem:[#allocation2 + $0x8] sm:$0x4]  ;;  %vm1940_vm7 = vsmask.f32 2306 }
  0x13   : > { %s16070_s21 = sshll.u32 %s20891_s20, 3  ;;  %v566_v12 = vsel %vm16979_vm6, 0, %v565_v10  ;;  %v569_v13 = vsel %vm16979_vm6, 0, %v568_v11  ;;  %v571_v14 = vld [vmem:[#allocation2 + $0xc] sm:$0x4]  ;;  %v16924_v17 = vmov 0   ;;  %vm17067_vm8 = vmand %vm234_vm4, %vm1940_vm7 }
  0x14   : > { %s16991_s24 = scalar_lea.vmem %s20792_s0, %s16070_s21  ;;  %567 = vst [vmem:[#allocation2 + $0x4] sm:$0x4] %v566_v12  ;;  %570 = vst [vmem:[#allocation2 + $0x8] sm:$0x4] %v569_v13  ;;  %v572_v15 = vsel %vm16979_vm6, 0, %v571_v14  ;;  %v2268_v59 = vshrl.u32 %v2267_v37, 7 }
  0x15   : > { %v574_v16 = vld [vmem:[#allocation2 + $0x10] sm:$0x4]  ;;  %235 = vst.msk [vmem:[#allocation2] sm:$0x7] %vm234_vm4, %v16924_v17  ;;  %236 = vst.msk [vmem:[#allocation2 + $0x18] sm:$0x7] %vm234_vm4, %v16924_v17 }
  0x16   : > { %237 = vst.msk [vmem:[#allocation2 + $0x30] sm:$0x7] %vm234_vm4, %v16924_v17  ;;  %238 = vst.msk [vmem:[#allocation2 + $0x48] sm:$0x7] %vm234_vm4, %v16924_v17  ;;  %v575_v18 = vsel %vm16979_vm6, 0, %v574_v16  ;;  %s16926_s25 = smov 64  }
  0x17   : > { %239 = vst.msk [vmem:[#allocation2 + $0x60] sm:$0x7] %vm234_vm4, %v16924_v17  ;;  %240 = vst.msk [vmem:[#allocation2 + $0x78] sm:$0x7] %vm234_vm4, %v16924_v17  ;;  %v292_v34 = vld [vmem:[#allocation2 + $0x1c] sm:$0x1] }
  0x18   : > { %241 = vst.msk [vmem:[#allocation2 + $0x90] sm:$0x7] %vm234_vm4, %v16924_v17  ;;  %242 = vst.msk [vmem:[#allocation2 + $0xa8] sm:$0x7] %vm234_vm4, %v16924_v17  ;;  %v293_v38 = vsel %vm16965_vm2, 0, %v292_v34  ;;  %vm5087_vm0 = vcmask 1040384  }
  0x19   : > { %243 = vst.msk [vmem:[#allocation2 + $0xc0] sm:$0x7] %vm234_vm4, %v16924_v17  ;;  %244 = vst.msk [vmem:[#allocation2 + $0xd8] sm:$0x7] %vm234_vm4, %v16924_v17  ;;  %v295_v39 = vld [vmem:[#allocation2 + $0x20] sm:$0x1] }
  0x1a   : > { %245 = vst.msk [vmem:[#allocation2 + $0xf0] sm:$0x7] %vm234_vm4, %v16924_v17  ;;  %246 = vst.msk [vmem:[#allocation2 + $0x108] sm:$0x7] %vm234_vm4, %v16924_v17  ;;  %v298_v40 = vld [vmem:[#allocation2 + $0x24] sm:$0x1] }
  0x1b   : > { %247 = vst.msk [vmem:[#allocation2 + $0x120] sm:$0x7] %vm234_vm4, %v16924_v17  ;;  %248 = vst.msk [vmem:[#allocation2 + $0x138] sm:$0x7] %vm234_vm4, %v16924_v17  ;;  %v1942_v43 = vld [vmem:[#allocation2 + $0x4] sm:$0x7] }
  0x1c   : > { %249 = vst.msk [vmem:[#allocation2 + $0x150] sm:$0x7] %vm234_vm4, %v16924_v17  ;;  %250 = vst.msk [vmem:[#allocation2 + $0x168] sm:$0x7] %vm234_vm4, %v16924_v17  ;;  %v1945_v44 = vld [vmem:[#allocation2 + $0x8] sm:$0x7] }
  0x1d   : > { %252 = vst.msk [vmem:[#allocation2 + $0x14] sm:$0x7] %vm234_vm4, %v16924_v17  ;;  %253 = vst.msk [vmem:[#allocation2 + $0x2c] sm:$0x7] %vm234_vm4, %v16924_v17  ;;  %v16925_v45 = vmov 1983009808  }
  0x1e   : > { %254 = vst.msk [vmem:[#allocation2 + $0x44] sm:$0x7] %vm234_vm4, %v16924_v17  ;;  %255 = vst.msk [vmem:[#allocation2 + $0x5c] sm:$0x7] %vm234_vm4, %v16924_v17  ;;  %v2265_v46 = vunpack.c.l.s4 %v16925_v45  ;;  %v296_v47 = vsel %vm16965_vm2, 0, %v295_v39  ;;  %v299_v51 = vsel %vm16965_vm2, 0, %v298_v40 }
  0x1f   : > { %256 = vst.msk [vmem:[#allocation2 + $0x74] sm:$0x7] %vm234_vm4, %v16924_v17  ;;  %257 = vst.msk [vmem:[#allocation2 + $0x8c] sm:$0x7] %vm234_vm4, %v16924_v17  ;;  %v301_v52 = vld [vmem:[#allocation2 + $0x28] sm:$0x1] }
  0x20   : > { %258 = vst.msk [vmem:[#allocation2 + $0xa4] sm:$0x7] %vm234_vm4, %v16924_v17  ;;  %259 = vst.msk [vmem:[#allocation2 + $0xbc] sm:$0x7] %vm234_vm4, %v16924_v17  ;;  %v302_v56 = vsel %vm16965_vm2, 0, %v301_v52  ;;  %v2266_v1 = vunpack.c.0.s8 %v2265_v46  ;;  %vm5088_vm1 = vcmask 1042434  }
  0x21   : > { %260 = vst.msk [vmem:[#allocation2 + $0xd4] sm:$0x7] %vm234_vm4, %v16924_v17  ;;  %261 = vst.msk [vmem:[#allocation2 + $0xec] sm:$0x7] %vm234_vm4, %v16924_v17  ;;  %v583_v57 = vld [vmem:[#allocation2 + $0x1c] sm:$0x4] }
  0x22   : > { %262 = vst.msk [vmem:[#allocation2 + $0x104] sm:$0x7] %vm234_vm4, %v16924_v17  ;;  %263 = vst.msk [vmem:[#allocation2 + $0x11c] sm:$0x7] %vm234_vm4, %v16924_v17  ;;  %v584_v60 = vsel %vm16979_vm6, 0, %v583_v57  ;;  %v17100_v16 = vsub.s32 %v2266_v1, %v2268_v59  ;;  %vm5092_vm5 = vcmask 1046534  }
  0x23   : > { %264 = vst.msk [vmem:[#allocation2 + $0x134] sm:$0x7] %vm234_vm4, %v16924_v17  ;;  %265 = vst.msk [vmem:[#allocation2 + $0x14c] sm:$0x7] %vm234_vm4, %v16924_v17  ;;  %v586_v61 = vld [vmem:[#allocation2 + $0x20] sm:$0x4] }
  0x24   : > { %266 = vst.msk [vmem:[#allocation2 + $0x164] sm:$0x7] %vm234_vm4, %v16924_v17  ;;  %267 = vst.msk [vmem:[#allocation2 + $0x17c] sm:$0x7] %vm234_vm4, %v16924_v17  ;;  %v589_v62 = vld [vmem:[#allocation2 + $0x24] sm:$0x4] }
  0x25   : > { %573 = vst [vmem:[#allocation2 + $0xc] sm:$0x4] %v572_v15  ;;  %v15322_v19 = vld.sshfl [vmem:[%s16991_s24] sm:$0x3 pattern:$0x76325410]  ;;  %vm5089_vm3 = vmor %vm5087_vm0, %vm5088_vm1 }
  0x26   : > { %576 = vst [vmem:[#allocation2 + $0x10] sm:$0x4] %v575_v18  ;;  %v15323_v20 = vld.sshfl [vmem:[%s16991_s24 + $0x2] sm:$0x3 pattern:$0x76325410] }
  0x27   : > { %v1427_v21 = vshrl.u32 %v15322_v19, 16  ;;  %v1430_v22 = vshll.u32 %v15322_v19, 16  ;;  %v15324_v23 = vld.sshfl [vmem:[%s16991_s24 + $0x4] sm:$0x3 pattern:$0x76325410] }
  0x28   : > { %v1434_v24 = vshrl.u32 %v15323_v20, 16  ;;  %v1437_v25 = vshll.u32 %v15323_v20, 16  ;;  %v15325_v26 = vld.sshfl [vmem:[%s16991_s24 + $0x6] sm:$0x3 pattern:$0x76325410] }
  0x29   : > { %v1429_v27 = vrot.slane %v1427_v21, 7  ;;  %v1441_v28 = vshrl.u32 %v15324_v23, 16  ;;  %v1444_v30 = vshll.u32 %v15324_v23, 16  ;;  %v1448_v31 = vshrl.u32 %v15325_v26, 16  ;;  %294 = vst [vmem:[#allocation2 + $0x1c] sm:$0x1] %v293_v38 }
  0x2a   : > { %v1436_v29 = vrot.slane %v1434_v24, 7  ;;  %v1451_v32 = vshll.u32 %v15325_v26, 16  ;;  %297 = vst [vmem:[#allocation2 + $0x20] sm:$0x1] %v296_v47  ;;  %300 = vst [vmem:[#allocation2 + $0x24] sm:$0x1] %v299_v51 }
  0x2b   : > { %v1432_v35 = vor.u32 %v1430_v22, %v1429_v27  ;;  %v1443_v36 = vrot.slane %v1441_v28, 7  ;;  %v1450_v42 = vrot.slane %v1448_v31, 7  ;;  %303 = vst [vmem:[#allocation2 + $0x28] sm:$0x1] %v302_v56  ;;  %585 = vst [vmem:[#allocation2 + $0x1c] sm:$0x4] %v584_v60 }
  0x2c   : > { %v1439_v41 = vor.u32 %v1437_v25, %v1436_v29  ;;  %v1948_v50 = vld [vmem:[#allocation2 + $0xc] sm:$0x7]  ;;  %v587_v2 = vsel %vm16979_vm6, 0, %v586_v61  ;;  %v590_v3 = vsel %vm16979_vm6, 0, %v589_v62  ;;  %v592_v4 = vld [vmem:[#allocation2 + $0x28] sm:$0x4] }
  0x2d   : > { %v1446_v48 = vor.u32 %v1444_v30, %v1443_v36  ;;  %v1943_v49 = vsel %vm17067_vm8, %v1432_v35, %v1942_v43  ;;  %v1453_v53 = vor.u32 %v1451_v32, %v1450_v42  ;;  %v1951_v55 = vld [vmem:[#allocation2 + $0x10] sm:$0x7]  ;;  %v271_v5 = vld [vmem:[#allocation2] sm:$0x1]  ;;  %588 = vst [vmem:[#allocation2 + $0x20] sm:$0x4] %v587_v2 }
  0x2e   : > { %1944 = vst [vmem:[#allocation2 + $0x4] sm:$0x7] %v1943_v49  ;;  %v1946_v54 = vsel %vm17067_vm8, %v1439_v41, %v1945_v44  ;;  %591 = vst [vmem:[#allocation2 + $0x24] sm:$0x4] %v590_v3  ;;  %v593_v6 = vsel %vm16979_vm6, 0, %v592_v4  ;;  %v272_v8 = vsel %vm16965_vm2, 0, %v271_v5 }
  0x2f   : > { %1947 = vst [vmem:[#allocation2 + $0x8] sm:$0x7] %v1946_v54  ;;  %v1949_v58 = vsel %vm17067_vm8, %v1446_v48, %v1948_v50  ;;  %v1952_v63 = vsel %vm17067_vm8, %v1453_v53, %v1951_v55  ;;  %v15326_v7 = vld.sshfl [vmem:[%s16991_s24 + $0x8] sm:$0x3 pattern:$0x76325410] }
  0x30   : > { %1950 = vst [vmem:[#allocation2 + $0xc] sm:$0x7] %v1949_v58  ;;  %1953 = vst [vmem:[#allocation2 + $0x10] sm:$0x7] %v1952_v63  ;;  %v1455_v11 = vshrl.u32 %v15326_v7, 16  ;;  %v1458_v12 = vshll.u32 %v15326_v7, 16 }
  0x31   : > { %594 = vst [vmem:[#allocation2 + $0x28] sm:$0x4] %v593_v6  ;;  %v15327_v10 = vld.sshfl [vmem:[%s16991_s24 + $0xa] sm:$0x3 pattern:$0x76325410] }
  0x32   : > { %273 = vst [vmem:[#allocation2] sm:$0x1] %v272_v8  ;;  %v15328_v13 = vld.sshfl [vmem:[%s16991_s24 + $0xc] sm:$0x3 pattern:$0x76325410] }
  0x33   : > { %v1462_v14 = vshrl.u32 %v15327_v10, 16  ;;  %v1465_v15 = vshll.u32 %v15327_v10, 16  ;;  %v15329_v18 = vld.sshfl [vmem:[%s16991_s24 + $0xe] sm:$0x3 pattern:$0x76325410] }
  0x34   : > { %v1457_v19 = vrot.slane %v1455_v11, 7  ;;  %v1469_v20 = vshrl.u32 %v15328_v13, 16  ;;  %v1472_v22 = vshll.u32 %v15328_v13, 16  ;;  %v1476_v23 = vshrl.u32 %v15329_v18, 16  ;;  %v1954_v30 = vld [vmem:[#allocation2 + $0x1c] sm:$0x7] }
  0x35   : > { %v1464_v21 = vrot.slane %v1462_v14, 7  ;;  %v1479_v24 = vshll.u32 %v15329_v18, 16  ;;  %v1957_v35 = vld [vmem:[#allocation2 + $0x20] sm:$0x7]  ;;  %v1960_v38 = vld [vmem:[#allocation2 + $0x24] sm:$0x7] }
  0x36   : > { %v16820_v25 = vld.sshfl [vmem:[#allocation2 + $0x4] sm:$0xf pattern:$0x76325410]  ;;  %v1460_v26 = vor.u32 %v1458_v12, %v1457_v19  ;;  %v1471_v27 = vrot.slane %v1469_v20, 7  ;;  %v1478_v29 = vrot.slane %v1476_v23, 7 }
  0x37   : > { %v1467_v28 = vor.u32 %v1465_v15, %v1464_v21  ;;  %v16821_v31 = vld.sshfl [vmem:[#allocation2 + $0xc] sm:$0xf pattern:$0x76325410]  ;;  %v562_v40 = vld [vmem:[#allocation2] sm:$0x4] }
  0x38   : > { %v1474_v32 = vor.u32 %v1472_v22, %v1471_v27  ;;  %v1955_v34 = vsel %vm17067_vm8, %v1460_v26, %v1954_v30  ;;  %v1481_v36 = vor.u32 %v1479_v24, %v1478_v29  ;;  %v1963_v39 = vld [vmem:[#allocation2 + $0x28] sm:$0x7]  ;;  %v563_v42 = vsel %vm16979_vm6, 0, %v562_v40  ;;  %v289_v19 = vld [vmem:[#allocation2 + $0x18] sm:$0x1]  ;;  %s16071_s19 = sshll.u32 %s20891_s20, 4 }
  0x39   : > { %1956 = vst [vmem:[#allocation2 + $0x1c] sm:$0x7] %v1955_v34  ;;  %v1958_v37 = vsel %vm17067_vm8, %v1467_v28, %v1957_v35  ;;  %v15387_v43 = vld.sshfl [vmem:[#allocation2 + $0x4] sm:$0x13 pattern:$0x76325410]  ;;  %v5798_v47 = vcombine.low %v16820_v25, %v16821_v31  ;;  %s20664_s23 = scalar_lea.vmem %s20797_s5, %s16071_s19 }
  0x3a   : > { %1959 = vst [vmem:[#allocation2 + $0x20] sm:$0x7] %v1958_v37  ;;  %v1961_v41 = vsel %vm17067_vm8, %v1474_v32, %v1960_v38  ;;  %v1964_v44 = vsel %vm17067_vm8, %v1481_v36, %v1963_v39  ;;  %564 = vst [vmem:[#allocation2] sm:$0x4] %v563_v42  ;;  %v2710_v46 = vcombine.high %v15387_v43, %v15387_v43  ;;  %vm3207_vm9 = vsmask.f32 1280 }
  0x3b   : > { %1962 = vst [vmem:[#allocation2 + $0x24] sm:$0x7] %v1961_v41  ;;  %v15388_v45 = vld.sshfl [vmem:[#allocation2 + $0x8] sm:$0x13 pattern:$0x76325410]  ;;  %6054 = vrot.lane.b32.xlu0 %v5798_v47, %s16926_s25 }
  0x3c   : > { %1965 = vst [vmem:[#allocation2 + $0x28] sm:$0x7] %v1964_v44  ;;  %v15389_v48 = vld.sshfl [vmem:[#allocation2 + $0xc] sm:$0x13 pattern:$0x76325410]  ;;  %v2718_v49 = vcombine.high %v15388_v45, %v15388_v45 }
  0x3d   : > { %vm3208_vm10 = vsmask.f32 3336  ;;  %v2726_v50 = vcombine.high %v15389_v48, %v15389_v48  ;;  %vm3210_vm12 = vsmask.f32 5392  ;;  %vm3212_vm13 = vsmask.f32 7448 }
  0x3e   : > { %vm3209_vm11 = vmor %vm3207_vm9, %vm3208_vm10  ;;  %v3229_v51 = vshrl.u32 %v15387_v43, 16  ;;  %v3232_v52 = vshll.u32 %v15387_v43, 16  ;;  %v3238_v53 = vshll.u32 %v2710_v46, 16  ;;  %v3243_v54 = vshrl.u32 %v15388_v45, 16  ;;  %v580_v23 = vld [vmem:[#allocation2 + $0x18] sm:$0x4] }
  0x3f   : > { %v3246_v55 = vshll.u32 %v15388_v45, 16  ;;  %v3252_v57 = vshll.u32 %v2718_v49, 16  ;;  %v3257_v58 = vshrl.u32 %v15389_v48, 16  ;;  %v3260_v59 = vshll.u32 %v15389_v48, 16  ;;  %vm3211_vm14 = vmor %vm3209_vm11, %vm3210_vm12 }
  0x40   : > { %v3231_v56 = vrot.slane %v3229_v51, 6  ;;  %v3234_v60 = vrot.slane %v3232_v52, 7  ;;  %v3240_v61 = vrot.slane %v3238_v53, 7  ;;  %v3245_v62 = vrot.slane %v3243_v54, 6  ;;  %vm17115_vm15 = vmor %vm3211_vm14, %vm3212_vm13 }
  0x41   : > { %v3248_v63 = vrot.slane %v3246_v55, 7  ;;  %v16822_v1 = vld.sshfl [vmem:[#allocation2 + $0x1c] sm:$0xf pattern:$0x76325410]  ;;  %v3254_v2 = vrot.slane %v3252_v57, 7 }
  0x42   : > { %v3259_v3 = vrot.slane %v3257_v58, 6  ;;  %v15386_v4 = vld.sshfl [vmem:[#allocation2] sm:$0x13 pattern:$0x76325410]  ;;  %v3235_v5 = vor.u32 %v3234_v60, %v3231_v56  ;;  %v3262_v15 = vrot.slane %v3260_v59, 7 }
  0x43   : > { %v3249_v6 = vor.u32 %v3248_v63, %v3245_v62  ;;  %v16823_v7 = vld.sshfl [vmem:[#allocation2 + $0x24] sm:$0xf pattern:$0x76325410]  ;;  %v2702_v8 = vcombine.high %v15386_v4, %v15386_v4  ;;  %v3215_v11 = vshrl.u32 %v15386_v4, 16  ;;  %v3218_v12 = vshll.u32 %v15386_v4, 16 }
  0x44   : > { %v3236_v13 = vrot.slane %v3235_v5, 2  ;;  %v3266_v18 = vshll.u32 %v2726_v50, 16  ;;  %v3263_v26 = vor.u32 %v3262_v15, %v3259_v3  ;;  %v15391_v28 = vld.sshfl [vmem:[#allocation2 + $0x1c] sm:$0x13 pattern:$0x76325410]  ;;  %v5815_v29 = vcombine.low %v16822_v1, %v16823_v7 }
  0x45   : > { %v3250_v14 = vrot.slane %v3249_v6, 2  ;;  %v3217_v20 = vrot.slane %v3215_v11, 6  ;;  %v3220_v21 = vrot.slane %v3218_v12, 7  ;;  %v3224_v22 = vshll.u32 %v2702_v8, 16  ;;  %v310_v55 = vld [vmem:[#allocation2 + $0x34] sm:$0x1] }
  0x46   : > { %v3241_v24 = vsel %vm17115_vm15, %v3236_v13, %v3240_v61  ;;  %v3268_v27 = vrot.slane %v3266_v18, 7  ;;  %v290_v32 = vsel %vm16965_vm2, 0, %v289_v19  ;;  %v15392_v34 = vld.sshfl [vmem:[#allocation2 + $0x20] sm:$0x13 pattern:$0x76325410]  ;;  %v2742_v38 = vcombine.high %v15391_v28, %v15391_v28  ;;  %6056 = vrot.lane.b32.xlu1 %v5815_v29, %s16926_s25 }
  0x47   : > { %v3255_v25 = vsel %vm17115_vm15, %v3250_v14, %v3254_v2  ;;  %v3221_v30 = vor.u32 %v3220_v21, %v3217_v20  ;;  %v3226_v31 = vrot.slane %v3224_v22, 7  ;;  %v3264_v35 = vrot.slane %v3263_v26, 2  ;;  %291 = vst [vmem:[#allocation2 + $0x18] sm:$0x1] %v290_v32  ;;  %v313_v1 = vld [vmem:[#allocation2 + $0x38] sm:$0x1] }
  0x48   : > { %v581_v36 = vsel %vm16979_vm6, 0, %v580_v23  ;;  %v15393_v37 = vld.sshfl [vmem:[#allocation2 + $0x24] sm:$0x13 pattern:$0x76325410]  ;;  %v2750_v39 = vcombine.high %v15392_v34, %v15392_v34  ;;  %v3285_v42 = vshrl.u32 %v15391_v28, 16 }
  0x49   : > { %v3222_v40 = vrot.slane %v3221_v30, 2  ;;  %582 = vst [vmem:[#allocation2 + $0x18] sm:$0x4] %v581_v36  ;;  %v2758_v41 = vcombine.high %v15393_v37, %v15393_v37  ;;  %v3288_v43 = vshll.u32 %v15391_v28, 16  ;;  %v3269_v44 = vsel %vm17115_vm15, %v3264_v35, %v3268_v27  ;;  %v316_v2 = vld [vmem:[#allocation2 + $0x3c] sm:$0x1] }
  0x4a   : > { %v17130_v45 = vshll.u32 %v2742_v38, 16  ;;  %v3299_v46 = vshrl.u32 %v15392_v34, 16  ;;  %v3302_v47 = vshll.u32 %v15392_v34, 16  ;;  %v4111_v49 = vcombine.low %v3255_v25, %v3269_v44  ;;  %v319_v7 = vld [vmem:[#allocation2 + $0x40] sm:$0x1] }
  0x4b   : > { %v3227_v48 = vsel %vm17115_vm15, %v3222_v40, %v3226_v31  ;;  %v3287_v50 = vrot.slane %v3285_v42, 6  ;;  %v3290_v51 = vrot.slane %v3288_v43, 7  ;;  %v3308_v58 = vshll.u32 %v2750_v39, 16  ;;  %v601_v8 = vld [vmem:[#allocation2 + $0x34] sm:$0x4] }
  0x4c   : > { %v4110_v52 = vcombine.low %v3227_v48, %v3241_v24  ;;  %v3301_v53 = vrot.slane %v3299_v46, 6  ;;  %v3304_v54 = vrot.slane %v3302_v47, 7  ;;  %v4125_v56 = vrot.slane %v4111_v49, %v17100_v16  ;;  %v604_v11 = vld [vmem:[#allocation2 + $0x38] sm:$0x4]  ;;  %v607_v18 = vld [vmem:[#allocation2 + $0x3c] sm:$0x4] }
  0x4d   : > { %v3291_v57 = vor.u32 %v3290_v51, %v3287_v50  ;;  %v3313_v59 = vshrl.u32 %v15393_v37, 16  ;;  %v3316_v62 = vshll.u32 %v15393_v37, 16  ;;  %v3322_v63 = vshll.u32 %v2758_v41, 16  ;;  %v610_v23 = vld [vmem:[#allocation2 + $0x40] sm:$0x4] }
  0x4e   : > { %v4118_v60 = vrot.slane %v4110_v52, %v17100_v16  ;;  %v3305_v61 = vor.u32 %v3304_v54, %v3301_v53  ;;  %v3296_v3 = vrot.slane %v17130_v45, 7  ;;  %v3310_v4 = vrot.slane %v3308_v58, 7  ;;  %v15330_v24 = vld.sshfl [vmem:[%s16991_s24 + $0x10] sm:$0x3 pattern:$0x76325410] }
  0x4f   : > { %v3315_v5 = vrot.slane %v3313_v59, 6  ;;  %v311_v6 = vsel %vm16965_vm2, 0, %v310_v55  ;;  %v3318_v15 = vrot.slane %v3316_v62, 7  ;;  %v3292_v22 = vrot.slane %v3291_v57, 2  ;;  %v307_v49 = vld [vmem:[#allocation2 + $0x30] sm:$0x1] }
  0x50   : > { %v4126_v12 = vcombine.low %v4118_v60, %v4125_v56  ;;  %v15390_v13 = vld.sshfl [vmem:[#allocation2 + $0x18] sm:$0x13 pattern:$0x76325410]  ;;  %v3306_v14 = vrot.slane %v3305_v61, 2  ;;  %v3324_v27 = vrot.slane %v3322_v63, 7 }
  0x51   : > { %312 = vst [vmem:[#allocation2 + $0x34] sm:$0x1] %v311_v6  ;;  %v2734_v19 = vcombine.high %v15390_v13, %v15390_v13  ;;  %v3271_v20 = vshrl.u32 %v15390_v13, 16  ;;  %v3274_v21 = vshll.u32 %v15390_v13, 16  ;;  %v3319_v26 = vor.u32 %v3318_v15, %v3315_v5  ;;  %v598_v50 = vld [vmem:[#allocation2 + $0x30] sm:$0x4] }
  0x52   : > { %4382 = vrot.lane.b32.xlu0 %v4126_v12, %s16926_s25  ;;  %v3311_v25 = vsel %vm17115_vm15, %v3306_v14, %v3310_v4  ;;  %v314_v28 = vsel %vm16965_vm2, 0, %v313_v1  ;;  %v15331_v29 = vld.sshfl [vmem:[%s16991_s24 + $0x12] sm:$0x3 pattern:$0x76325410]  ;;  %v317_v34 = vsel %vm16965_vm2, 0, %v316_v2  ;;  %v3297_v44 = vsel %vm17115_vm15, %v3292_v22, %v3296_v3 }
  0x53   : > { %v3273_v30 = vrot.slane %v3271_v20, 6  ;;  %v3276_v31 = vrot.slane %v3274_v21, 7  ;;  %v3280_v32 = vshll.u32 %v2734_v19, 16  ;;  %315 = vst [vmem:[#allocation2 + $0x38] sm:$0x1] %v314_v28  ;;  %v3320_v36 = vrot.slane %v3319_v26, 2 }
  0x54   : > { %v15332_v35 = vld.sshfl [vmem:[%s16991_s24 + $0x14] sm:$0x3 pattern:$0x76325410]  ;;  %318 = vst [vmem:[#allocation2 + $0x3c] sm:$0x1] %v317_v34 }
  0x55   : > { %v320_v37 = vsel %vm16965_vm2, 0, %v319_v7  ;;  %v602_v38 = vsel %vm16979_vm6, 0, %v601_v8  ;;  %v605_v39 = vsel %vm16979_vm6, 0, %v604_v11  ;;  %v3277_v40 = vor.u32 %v3276_v31, %v3273_v30  ;;  %v328_v51 = vld [vmem:[#allocation2 + $0x4c] sm:$0x1] }
  0x56   : > { %v3282_v41 = vrot.slane %v3280_v32, 7  ;;  %321 = vst [vmem:[#allocation2 + $0x40] sm:$0x1] %v320_v37  ;;  %603 = vst [vmem:[#allocation2 + $0x34] sm:$0x4] %v602_v38  ;;  %v608_v42 = vsel %vm16979_vm6, 0, %v607_v18  ;;  %v3325_v45 = vsel %vm17115_vm15, %v3320_v36, %v3324_v27 }
  0x57   : > { %606 = vst [vmem:[#allocation2 + $0x38] sm:$0x4] %v605_v39  ;;  %v611_v43 = vsel %vm16979_vm6, 0, %v610_v23  ;;  %609 = vst [vmem:[#allocation2 + $0x3c] sm:$0x4] %v608_v42  ;;  %v1483_v47 = vshrl.u32 %v15330_v24, 16  ;;  %v4128_v53 = vcombine.low %v3311_v25, %v3325_v45 }
  0x58   : > { %612 = vst [vmem:[#allocation2 + $0x40] sm:$0x4] %v611_v43  ;;  %v15333_v46 = vld.sshfl [vmem:[%s16991_s24 + $0x16] sm:$0x3 pattern:$0x76325410] }
  0x59   : > { %v1486_v48 = vshll.u32 %v15330_v24, 16  ;;  %v3278_v52 = vrot.slane %v3277_v40, 2  ;;  %v1490_v54 = vshrl.u32 %v15331_v29, 16  ;;  %v1493_v55 = vshll.u32 %v15331_v29, 16  ;;  %v331_v56 = vld [vmem:[#allocation2 + $0x50] sm:$0x1] }
  0x5a   : > { %v1485_v57 = vrot.slane %v1483_v47, 7  ;;  %v1497_v58 = vshrl.u32 %v15332_v35, 16  ;;  %v1500_v59 = vshll.u32 %v15332_v35, 16  ;;  %v1504_v60 = vshrl.u32 %v15333_v46, 16  ;;  %v334_v61 = vld [vmem:[#allocation2 + $0x54] sm:$0x1] }
  0x5b   : > { %v3283_v62 = vsel %vm17115_vm15, %v3278_v52, %v3282_v41  ;;  %v4142_v63 = vrot.slane %v4128_v53, %v17100_v16  ;;  %v1492_v1 = vrot.slane %v1490_v54, 7  ;;  %v1507_v2 = vshll.u32 %v15333_v46, 16  ;;  %v337_v3 = vld [vmem:[#allocation2 + $0x58] sm:$0x1]  ;;  %v619_v4 = vld [vmem:[#allocation2 + $0x4c] sm:$0x4] }
  0x5c   : > { %v4127_v5 = vcombine.low %v3283_v62, %v3297_v44  ;;  %v1488_v6 = vor.u32 %v1486_v48, %v1485_v57  ;;  %v1499_v7 = vrot.slane %v1497_v58, 7  ;;  %v1506_v8 = vrot.slane %v1504_v60, 7  ;;  %v622_v11 = vld [vmem:[#allocation2 + $0x50] sm:$0x4]  ;;  %v625_v12 = vld [vmem:[#allocation2 + $0x54] sm:$0x4] }
  0x5d   : > { %v628_v13 = vld [vmem:[#allocation2 + $0x58] sm:$0x4]  ;;  %v1495_v14 = vor.u32 %v1493_v55, %v1492_v1  ;;  %v308_v15 = vsel %vm16965_vm2, 0, %v307_v49  ;;  %v599_v18 = vsel %vm16979_vm6, 0, %v598_v50  ;;  %v329_v19 = vsel %vm16965_vm2, 0, %v328_v51 }
  0x5e   : > { %v325_v20 = vld [vmem:[#allocation2 + $0x48] sm:$0x1]  ;;  %v4135_v21 = vrot.slane %v4127_v5, %v17100_v16  ;;  %v1502_v22 = vor.u32 %v1500_v59, %v1499_v7  ;;  %v1509_v23 = vor.u32 %v1507_v2, %v1506_v8  ;;  %v1966_v24 = vld [vmem:[#allocation2 + $0x34] sm:$0x7]  ;;  %v1969_v25 = vld [vmem:[#allocation2 + $0x38] sm:$0x7] }
  0x5f   : > { %309 = vst [vmem:[#allocation2 + $0x30] sm:$0x1] %v308_v15  ;;  %600 = vst [vmem:[#allocation2 + $0x30] sm:$0x4] %v599_v18  ;;  %v332_v26 = vsel %vm16965_vm2, 0, %v331_v56  ;;  %v1967_v27 = vsel %vm17067_vm8, %v1488_v6, %v1966_v24  ;;  %v1970_v28 = vsel %vm17067_vm8, %v1495_v14, %v1969_v25  ;;  %v335_v31 = vsel %vm16965_vm2, 0, %v334_v61 }
  0x60   : > { %330 = vst [vmem:[#allocation2 + $0x4c] sm:$0x1] %v329_v19  ;;  %v1972_v29 = vld [vmem:[#allocation2 + $0x3c] sm:$0x7]  ;;  %v1975_v30 = vld [vmem:[#allocation2 + $0x40] sm:$0x7]  ;;  %v4143_v34 = vcombine.low %v4135_v21, %v4142_v63 }
  0x61   : > { %333 = vst [vmem:[#allocation2 + $0x50] sm:$0x1] %v332_v26  ;;  %v338_v32 = vsel %vm16965_vm2, 0, %v337_v3  ;;  %1968 = vst [vmem:[#allocation2 + $0x34] sm:$0x7] %v1967_v27  ;;  %v1973_v35 = vsel %vm17067_vm8, %v1502_v22, %v1972_v29  ;;  %v1976_v36 = vsel %vm17067_vm8, %v1509_v23, %v1975_v30  ;;  %v620_v37 = vsel %vm16979_vm6, 0, %v619_v4 }
  0x62   : > { %1971 = vst [vmem:[#allocation2 + $0x38] sm:$0x7] %v1970_v28  ;;  %336 = vst [vmem:[#allocation2 + $0x54] sm:$0x1] %v335_v31  ;;  %v623_v39 = vsel %vm16979_vm6, 0, %v622_v11  ;;  %v626_v40 = vsel %vm16979_vm6, 0, %v625_v12  ;;  %4384 = vrot.lane.b32.xlu1 %v4143_v34, %s16926_s25 }
  0x63   : > { %339 = vst [vmem:[#allocation2 + $0x58] sm:$0x1] %v338_v32  ;;  %v15334_v38 = vld.sshfl [vmem:[%s16991_s24 + $0x18] sm:$0x3 pattern:$0x76325410] }
  0x64   : > { %1974 = vst [vmem:[#allocation2 + $0x3c] sm:$0x7] %v1973_v35  ;;  %1977 = vst [vmem:[#allocation2 + $0x40] sm:$0x7] %v1976_v36  ;;  %v629_v41 = vsel %vm16979_vm6, 0, %v628_v13  ;;  %v1511_v42 = vshrl.u32 %v15334_v38, 16 }
  0x65   : > { %621 = vst [vmem:[#allocation2 + $0x4c] sm:$0x4] %v620_v37  ;;  %624 = vst [vmem:[#allocation2 + $0x50] sm:$0x4] %v623_v39  ;;  %v326_v44 = vsel %vm16965_vm2, 0, %v325_v20  ;;  %v1514_v48 = vshll.u32 %v15334_v38, 16 }
  0x66   : > { %627 = vst [vmem:[#allocation2 + $0x54] sm:$0x4] %v626_v40  ;;  %630 = vst [vmem:[#allocation2 + $0x58] sm:$0x4] %v629_v41  ;;  %v1513_v47 = vrot.slane %v1511_v42, 7  ;;  %vm5090_vm4 = vcmask 1044484  }
  0x67   : > { %v15335_v43 = vld.sshfl [vmem:[%s16991_s24 + $0x1a] sm:$0x3 pattern:$0x76325410]  ;;  %327 = vst [vmem:[#allocation2 + $0x48] sm:$0x1] %v326_v44  ;;  %vm5091_vm7 = vmor %vm5089_vm3, %vm5090_vm4 }
  0x68   : > { %v15336_v45 = vld.sshfl [vmem:[%s16991_s24 + $0x1c] sm:$0x3 pattern:$0x76325410]  ;;  %v1518_v46 = vshrl.u32 %v15335_v43, 16  ;;  %v1521_v49 = vshll.u32 %v15335_v43, 16  ;;  %v1516_v60 = vor.u32 %v1514_v48, %v1513_v47 }
  0x69   : > { %v1525_v50 = vshrl.u32 %v15336_v45, 16  ;;  %v15394_v51 = vld.sshfl [vmem:[#allocation2 + $0x30] sm:$0x13 pattern:$0x76325410]  ;;  %v1528_v53 = vshll.u32 %v15336_v45, 16 }
  0x6a   : > { %v1520_v52 = vrot.slane %v1518_v46, 7  ;;  %v2766_v54 = vcombine.high %v15394_v51, %v15394_v51  ;;  %v3327_v55 = vshrl.u32 %v15394_v51, 16  ;;  %v3330_v56 = vshll.u32 %v15394_v51, 16  ;;  %v616_v29 = vld [vmem:[#allocation2 + $0x48] sm:$0x4] }
  0x6b   : > { %v1527_v57 = vrot.slane %v1525_v50, 7  ;;  %v16824_v58 = vld.sshfl [vmem:[#allocation2 + $0x34] sm:$0xf pattern:$0x76325410]  ;;  %vm2550_vm9 = vcmask 523264  }
  0x6c   : > { %v16825_v59 = vld.sshfl [vmem:[#allocation2 + $0x3c] sm:$0xf pattern:$0x76325410]  ;;  %v1523_v61 = vor.u32 %v1521_v49, %v1520_v52  ;;  %v3329_v63 = vrot.slane %v3327_v55, 6  ;;  %v3332_v1 = vrot.slane %v3330_v56, 7 }
  0x6d   : > { %v15395_v62 = vld.sshfl [vmem:[#allocation2 + $0x34] sm:$0x13 pattern:$0x76325410]  ;;  %v1530_v2 = vor.u32 %v1528_v53, %v1527_v57  ;;  %v3336_v5 = vshll.u32 %v2766_v54, 16  ;;  %v5832_v14 = vcombine.low %v16824_v58, %v16825_v59  ;;  %13633 = vst.msk [vmem:[#allocation3] sm:$0xff] %vm2550_vm9, %v16924_v17 }
  0x6e   : > { %v15396_v3 = vld.sshfl [vmem:[#allocation2 + $0x38] sm:$0x13 pattern:$0x76325410]  ;;  %v2774_v4 = vcombine.high %v15395_v62, %v15395_v62  ;;  %v3341_v6 = vshrl.u32 %v15395_v62, 16  ;;  %v3333_v11 = vor.u32 %v3332_v1, %v3329_v63  ;;  %v3344_v12 = vshll.u32 %v15395_v62, 16 }
  0x6f   : > { %v15397_v7 = vld.sshfl [vmem:[#allocation2 + $0x3c] sm:$0x13 pattern:$0x76325410]  ;;  %v2782_v8 = vcombine.high %v15396_v3, %v15396_v3  ;;  %v3355_v13 = vshrl.u32 %v15396_v3, 16  ;;  %v3338_v18 = vrot.slane %v3336_v5, 7  ;;  %6058 = vrot.lane.b32.xlu0 %v5832_v14, %s16926_s25 }
  0x70   : > { %v2790_v15 = vcombine.high %v15397_v7, %v15397_v7  ;;  %v3343_v19 = vrot.slane %v3341_v6, 6  ;;  %v15337_v20 = vld.sshfl [vmem:[%s16991_s24 + $0x1e] sm:$0x3 pattern:$0x76325410]  ;;  %v3334_v21 = vrot.slane %v3333_v11, 2 }
  0x71   : > { %v3346_v22 = vrot.slane %v3344_v12, 7  ;;  %v3350_v23 = vshll.u32 %v2774_v4, 16  ;;  %v3357_v24 = vrot.slane %v3355_v13, 6  ;;  %v3358_v25 = vshll.u32 %v15396_v3, 16  ;;  %v1978_v35 = vld [vmem:[#allocation2 + $0x4c] sm:$0x7] }
  0x72   : > { %v3364_v26 = vshll.u32 %v2782_v8, 16  ;;  %v3369_v27 = vshrl.u32 %v15397_v7, 16  ;;  %v3372_v28 = vshll.u32 %v15397_v7, 16  ;;  %v3339_v30 = vsel %vm17115_vm15, %v3334_v21, %v3338_v18  ;;  %v1981_v36 = vld [vmem:[#allocation2 + $0x50] sm:$0x7]  ;;  %13634 = vst.msk [vmem:[#allocation3 + $0x8] sm:$0xff] %vm2550_vm9, %v16924_v17 }
  0x73   : > { %v3347_v31 = vor.u32 %v3346_v22, %v3343_v19  ;;  %v3352_v32 = vrot.slane %v3350_v23, 7  ;;  %v3378_v34 = vshll.u32 %v2790_v15, 16  ;;  %v346_v37 = vld [vmem:[#allocation2 + $0x64] sm:$0x1]  ;;  %v3360_v38 = vrot.slane %v3358_v25, 7  ;;  %13635 = vst.msk [vmem:[#allocation3 + $0x10] sm:$0xff] %vm2550_vm9, %v16924_v17 }
  0x74   : > { %v3366_v39 = vrot.slane %v3364_v26, 7  ;;  %v3371_v40 = vrot.slane %v3369_v27, 6  ;;  %v3374_v41 = vrot.slane %v3372_v28, 7  ;;  %v1984_v42 = vld [vmem:[#allocation2 + $0x54] sm:$0x7]  ;;  %v1532_v46 = vshrl.u32 %v15337_v20, 16 }
  0x75   : > { %v349_v43 = vld [vmem:[#allocation2 + $0x68] sm:$0x1]  ;;  %v3348_v44 = vrot.slane %v3347_v31, 2  ;;  %v3380_v45 = vrot.slane %v3378_v34, 7  ;;  %v1535_v47 = vshll.u32 %v15337_v20, 16  ;;  %v3361_v49 = vor.u32 %v3360_v38, %v3357_v24  ;;  %13636 = vst.msk [vmem:[#allocation3 + $0x18] sm:$0xff] %vm2550_vm9, %v16924_v17 }
  0x76   : > { %v352_v48 = vld [vmem:[#allocation2 + $0x6c] sm:$0x1]  ;;  %v3375_v50 = vor.u32 %v3374_v41, %v3371_v40  ;;  %v1979_v51 = vsel %vm17067_vm8, %v1516_v60, %v1978_v35  ;;  %v1982_v52 = vsel %vm17067_vm8, %v1523_v61, %v1981_v36  ;;  %v1987_v53 = vld [vmem:[#allocation2 + $0x58] sm:$0x7]  ;;  %v355_v54 = vld [vmem:[#allocation2 + $0x70] sm:$0x1]  ;;  %v1985_v59 = vsel %vm17067_vm8, %v1530_v2, %v1984_v42 }
  0x77   : > { %v637_v55 = vld [vmem:[#allocation2 + $0x64] sm:$0x4]  ;;  %v640_v56 = vld [vmem:[#allocation2 + $0x68] sm:$0x4]  ;;  %v3353_v57 = vsel %vm17115_vm15, %v3348_v44, %v3352_v32  ;;  %v1534_v58 = vrot.slane %v1532_v46, 7  ;;  %v617_v62 = vsel %vm16979_vm6, 0, %v616_v29 }
  0x78   : > { %1980 = vst [vmem:[#allocation2 + $0x4c] sm:$0x7] %v1979_v51  ;;  %1983 = vst [vmem:[#allocation2 + $0x50] sm:$0x7] %v1982_v52  ;;  %v3362_v63 = vrot.slane %v3361_v49, 2  ;;  %v3376_v61 = vrot.slane %v3375_v50, 2  ;;  %v4144_v1 = vcombine.low %v3339_v30, %v3353_v57 }
  0x79   : > { %v17217_v60 = vld.sshfl [vmem:[%s16991_s24 + $0x20] sm:$0x3 pattern:$0x76325410]  ;;  %1986 = vst [vmem:[#allocation2 + $0x54] sm:$0x7] %v1985_v59  ;;  %v1537_v5 = vor.u32 %v1535_v47, %v1534_v58 }
  0x7a   : > { %618 = vst [vmem:[#allocation2 + $0x48] sm:$0x4] %v617_v62  ;;  %v347_v3 = vsel %vm16965_vm2, 0, %v346_v37  ;;  %v643_v4 = vld [vmem:[#allocation2 + $0x6c] sm:$0x4]  ;;  %v350_v2 = vsel %vm16965_vm2, 0, %v349_v43  ;;  %v3367_v11 = vsel %vm17115_vm15, %v3362_v63, %v3366_v39  ;;  %v3381_v12 = vsel %vm17115_vm15, %v3376_v61, %v3380_v45 }
  0x7b   : > { %348 = vst [vmem:[#allocation2 + $0x64] sm:$0x1] %v347_v3  ;;  %v353_v6 = vsel %vm16965_vm2, 0, %v352_v48  ;;  %v356_v7 = vsel %vm16965_vm2, 0, %v355_v54  ;;  %v646_v8 = vld [vmem:[#allocation2 + $0x70] sm:$0x4]  ;;  %v4152_v13 = vrot.slane %v4144_v1, %v17100_v16  ;;  %v4145_v18 = vcombine.low %v3367_v11, %v3381_v12 }
  0x7c   : > { %351 = vst [vmem:[#allocation2 + $0x68] sm:$0x1] %v350_v2  ;;  %354 = vst [vmem:[#allocation2 + $0x6c] sm:$0x1] %v353_v6  ;;  %v638_v14 = vsel %vm16979_vm6, 0, %v637_v55  ;;  %v1988_v19 = vsel %vm17067_vm8, %v1537_v5, %v1987_v53  ;;  %v641_v20 = vsel %vm16979_vm6, 0, %v640_v56 }
  0x7d   : > { %357 = vst [vmem:[#allocation2 + $0x70] sm:$0x1] %v356_v7  ;;  %v17235_v15 = vld.sshfl [vmem:[%s16991_s24 + $0x22] sm:$0x3 pattern:$0x76325410]  ;;  %v4159_v24 = vrot.slane %v4145_v18, %v17100_v16 }
  0x7e   : > { %639 = vst [vmem:[#allocation2 + $0x64] sm:$0x4] %v638_v14  ;;  %v644_v21 = vsel %vm16979_vm6, 0, %v643_v4  ;;  %1989 = vst [vmem:[#allocation2 + $0x58] sm:$0x7] %v1988_v19  ;;  %v647_v22 = vsel %vm16979_vm6, 0, %v646_v8 }
  0x7f   : > { %642 = vst [vmem:[#allocation2 + $0x68] sm:$0x4] %v641_v20  ;;  %645 = vst [vmem:[#allocation2 + $0x6c] sm:$0x4] %v644_v21  ;;  %v1539_v23 = vshrl.u32 %v17217_v60, 16  ;;  %v1542_v25 = vshll.u32 %v17217_v60, 16  ;;  %v4160_v29 = vcombine.low %v4152_v13, %v4159_v24 }
  0x80   : > { %648 = vst [vmem:[#allocation2 + $0x70] sm:$0x4] %v647_v22  ;;  %v1546_v26 = vshrl.u32 %v17235_v15, 16  ;;  %v1549_v27 = vshll.u32 %v17235_v15, 16  ;;  %v343_v20 = vld [vmem:[#allocation2 + $0x60] sm:$0x1] }
  0x81   : > { %v16826_v28 = vld.sshfl [vmem:[#allocation2 + $0x4c] sm:$0xf pattern:$0x76325410]  ;;  %4386 = vrot.lane.b32.xlu1 %v4160_v29, %s16926_s25  ;;  %v1541_v8 = vrot.slane %v1539_v23, 7  ;;  %13637 = vst.msk [vmem:[#allocation3 + $0x80] sm:$0xff] %vm2550_vm9, %v16924_v17 }
  0x82   : > { %v15398_v30 = vld.sshfl [vmem:[#allocation2 + $0x48] sm:$0x13 pattern:$0x76325410]  ;;  %v1548_v11 = vrot.slane %v1546_v26, 7  ;;  %13638 = vst.msk [vmem:[#allocation3 + $0x88] sm:$0xff] %vm2550_vm9, %v16924_v17 }
  0x83   : > { %v15399_v31 = vld.sshfl [vmem:[#allocation2 + $0x4c] sm:$0x13 pattern:$0x76325410]  ;;  %v2798_v32 = vcombine.high %v15398_v30, %v15398_v30  ;;  %v3383_v34 = vshrl.u32 %v15398_v30, 16  ;;  %v3386_v35 = vshll.u32 %v15398_v30, 16  ;;  %v1544_v30 = vor.u32 %v1542_v25, %v1541_v8 }
  0x84   : > { %v15400_v36 = vld.sshfl [vmem:[#allocation2 + $0x50] sm:$0x13 pattern:$0x76325410]  ;;  %v2806_v37 = vcombine.high %v15399_v31, %v15399_v31  ;;  %v3397_v38 = vshrl.u32 %v15399_v31, 16  ;;  %v3400_v39 = vshll.u32 %v15399_v31, 16  ;;  %v1551_v31 = vor.u32 %v1549_v27, %v1548_v11 }
  0x85   : > { %v15401_v40 = vld.sshfl [vmem:[#allocation2 + $0x54] sm:$0x13 pattern:$0x76325410]  ;;  %v2814_v41 = vcombine.high %v15400_v36, %v15400_v36  ;;  %v3385_v42 = vrot.slane %v3383_v34, 6  ;;  %v3388_v43 = vrot.slane %v3386_v35, 7 }
  0x86   : > { %v16827_v44 = vld.sshfl [vmem:[#allocation2 + $0x54] sm:$0xf pattern:$0x76325410]  ;;  %v2822_v45 = vcombine.high %v15401_v40, %v15401_v40  ;;  %v3392_v46 = vshll.u32 %v2798_v32, 16  ;;  %v3399_v47 = vrot.slane %v3397_v38, 6 }
  0x87   : > { %v3389_v48 = vor.u32 %v3388_v43, %v3385_v42  ;;  %v3402_v49 = vrot.slane %v3400_v39, 7  ;;  %v3406_v50 = vshll.u32 %v2806_v37, 16  ;;  %v3411_v51 = vshrl.u32 %v15400_v36, 16  ;;  %v1990_v12 = vld [vmem:[#allocation2 + $0x64] sm:$0x7]  ;;  %13639 = vst.msk [vmem:[#allocation3 + $0x90] sm:$0xff] %vm2550_vm9, %v16924_v17 }
  0x88   : > { %v3394_v52 = vrot.slane %v3392_v46, 7  ;;  %v3414_v53 = vshll.u32 %v15400_v36, 16  ;;  %v3420_v54 = vshll.u32 %v2814_v41, 16  ;;  %v5849_v62 = vcombine.low %v16826_v28, %v16827_v44  ;;  %v1993_v19 = vld [vmem:[#allocation2 + $0x68] sm:$0x7]  ;;  %13640 = vst.msk [vmem:[#allocation3 + $0x98] sm:$0xff] %vm2550_vm9, %v16924_v17 }
  0x89   : > { %v15340_v55 = vld.sshfl [vmem:[%s16991_s24 + $0x24] sm:$0x3 pattern:$0x76325410]  ;;  %v3390_v56 = vrot.slane %v3389_v48, 2  ;;  %v3403_v57 = vor.u32 %v3402_v49, %v3399_v47  ;;  %v3408_v58 = vrot.slane %v3406_v50, 7  ;;  %v1991_v25 = vsel %vm17067_vm8, %v1544_v30, %v1990_v12 }
  0x8a   : > { %v3413_v59 = vrot.slane %v3411_v51, 6  ;;  %v3416_v60 = vrot.slane %v3414_v53, 7  ;;  %v3422_v63 = vrot.slane %v3420_v54, 7  ;;  %v3425_v61 = vshrl.u32 %v15401_v40, 16  ;;  %6060 = vrot.lane.b32.xlu0 %v5849_v62, %s16926_s25  ;;  %v634_v21 = vld [vmem:[#allocation2 + $0x60] sm:$0x4] }
  0x8b   : > { %v15341_v1 = vld.sshfl [vmem:[%s16991_s24 + $0x26] sm:$0x3 pattern:$0x76325410]  ;;  %v3395_v3 = vsel %vm17115_vm15, %v3390_v56, %v3394_v52  ;;  %v3404_v4 = vrot.slane %v3403_v57, 2  ;;  %v3428_v5 = vshll.u32 %v15401_v40, 16  ;;  %v1994_v47 = vsel %vm17067_vm8, %v1551_v31, %v1993_v19 }
  0x8c   : > { %v3434_v2 = vshll.u32 %v2822_v45, 16  ;;  %v3417_v6 = vor.u32 %v3416_v60, %v3413_v59  ;;  %v3427_v7 = vrot.slane %v3425_v61, 6  ;;  %v1553_v18 = vshrl.u32 %v15340_v55, 16  ;;  %v364_v22 = vld [vmem:[#allocation2 + $0x7c] sm:$0x1]  ;;  %13641 = vst.msk [vmem:[#allocation3 + $0x100] sm:$0xff] %vm2550_vm9, %v16924_v17 }
  0x8d   : > { %v3409_v13 = vsel %vm17115_vm15, %v3404_v4, %v3408_v58  ;;  %v3430_v14 = vrot.slane %v3428_v5, 7  ;;  %v367_v24 = vld [vmem:[#allocation2 + $0x80] sm:$0x1]  ;;  %v1996_v32 = vld [vmem:[#allocation2 + $0x6c] sm:$0x7]  ;;  %v1556_v35 = vshll.u32 %v15340_v55, 16 }
  0x8e   : > { %v3436_v15 = vrot.slane %v3434_v2, 7  ;;  %v3418_v28 = vrot.slane %v3417_v6, 2  ;;  %v4161_v29 = vcombine.low %v3395_v3, %v3409_v13  ;;  %v370_v34 = vld [vmem:[#allocation2 + $0x84] sm:$0x1]  ;;  %v1555_v26 = vrot.slane %v1553_v18, 7  ;;  %13642 = vst.msk [vmem:[#allocation3 + $0x108] sm:$0xff] %vm2550_vm9, %v16924_v17 }
  0x8f   : > { %v3431_v23 = vor.u32 %v3430_v14, %v3427_v7  ;;  %v1560_v36 = vshrl.u32 %v15341_v1, 16  ;;  %v373_v37 = vld [vmem:[#allocation2 + $0x88] sm:$0x1]  ;;  %v655_v38 = vld [vmem:[#allocation2 + $0x7c] sm:$0x4]  ;;  %v1563_v41 = vshll.u32 %v15341_v1, 16 }
  0x90   : > { %v3423_v39 = vsel %vm17115_vm15, %v3418_v28, %v3422_v63  ;;  %v4169_v40 = vrot.slane %v4161_v29, %v17100_v16  ;;  %v1999_v27 = vld [vmem:[#allocation2 + $0x70] sm:$0x7]  ;;  %v658_v42 = vld [vmem:[#allocation2 + $0x80] sm:$0x4]  ;;  %v661_v43 = vld [vmem:[#allocation2 + $0x84] sm:$0x4]  ;;  %v1558_v45 = vor.u32 %v1556_v35, %v1555_v26 }
  0x91   : > { %v3432_v44 = vrot.slane %v3431_v23, 2  ;;  %v1562_v46 = vrot.slane %v1560_v36, 7  ;;  %1992 = vst [vmem:[#allocation2 + $0x64] sm:$0x7] %v1991_v25  ;;  %1995 = vst [vmem:[#allocation2 + $0x68] sm:$0x7] %v1994_v47 }
  0x92   : > { %v15342_v48 = vld.sshfl [vmem:[%s16991_s24 + $0x28] sm:$0x3 pattern:$0x76325410]  ;;  %v344_v50 = vsel %vm16965_vm2, 0, %v343_v20  ;;  %v635_v51 = vsel %vm16979_vm6, 0, %v634_v21  ;;  %v1997_v57 = vsel %vm17067_vm8, %v1558_v45, %v1996_v32 }
  0x93   : > { %v15343_v49 = vld.sshfl [vmem:[%s16991_s24 + $0x2a] sm:$0x3 pattern:$0x76325410]  ;;  %v365_v52 = vsel %vm16965_vm2, 0, %v364_v22  ;;  %v368_v53 = vsel %vm16965_vm2, 0, %v367_v24  ;;  %v3437_v55 = vsel %vm17115_vm15, %v3432_v44, %v3436_v15  ;;  %v1565_v56 = vor.u32 %v1563_v41, %v1562_v46 }
  0x94   : > { %v664_v54 = vld [vmem:[#allocation2 + $0x88] sm:$0x4]  ;;  %345 = vst [vmem:[#allocation2 + $0x60] sm:$0x1] %v344_v50  ;;  %636 = vst [vmem:[#allocation2 + $0x60] sm:$0x4] %v635_v51  ;;  %v4162_v62 = vcombine.low %v3423_v39, %v3437_v55 }
  0x95   : > { %366 = vst [vmem:[#allocation2 + $0x7c] sm:$0x1] %v365_v52  ;;  %369 = vst [vmem:[#allocation2 + $0x80] sm:$0x1] %v368_v53  ;;  %v371_v58 = vsel %vm16965_vm2, 0, %v370_v34  ;;  %v374_v60 = vsel %vm16965_vm2, 0, %v373_v37  ;;  %v2000_v1 = vsel %vm17067_vm8, %v1565_v56, %v1999_v27 }
  0x96   : > { %v17282_v59 = vld.sshfl [vmem:[%s16991_s24 + $0x2c] sm:$0x3 pattern:$0x76325410]  ;;  %1998 = vst [vmem:[#allocation2 + $0x6c] sm:$0x7] %v1997_v57  ;;  %v4176_v2 = vrot.slane %v4162_v62, %v17100_v16 }
  0x97   : > { %372 = vst [vmem:[#allocation2 + $0x84] sm:$0x1] %v371_v58  ;;  %v656_v63 = vsel %vm16979_vm6, 0, %v655_v38  ;;  %v659_v61 = vsel %vm16979_vm6, 0, %v658_v42  ;;  %375 = vst [vmem:[#allocation2 + $0x88] sm:$0x1] %v374_v60 }
  0x98   : > { %657 = vst [vmem:[#allocation2 + $0x7c] sm:$0x4] %v656_v63  ;;  %660 = vst [vmem:[#allocation2 + $0x80] sm:$0x4] %v659_v61  ;;  %v662_v3 = vsel %vm16979_vm6, 0, %v661_v43  ;;  %v665_v4 = vsel %vm16979_vm6, 0, %v664_v54  ;;  %v4177_v15 = vcombine.low %v4169_v40, %v4176_v2 }
  0x99   : > { %v17297_v5 = vld.sshfl [vmem:[%s16991_s24 + $0x2e] sm:$0x3 pattern:$0x76325410]  ;;  %2001 = vst [vmem:[#allocation2 + $0x70] sm:$0x7] %v2000_v1 }
  0x9a   : > { %663 = vst [vmem:[#allocation2 + $0x84] sm:$0x4] %v662_v3  ;;  %666 = vst [vmem:[#allocation2 + $0x88] sm:$0x4] %v665_v4  ;;  %v1567_v6 = vshrl.u32 %v15342_v48, 16  ;;  %v1570_v7 = vshll.u32 %v15342_v48, 16  ;;  %4388 = vrot.lane.b32.xlu1 %v4177_v15, %s16926_s25 }
  0x9b   : > { %v1574_v8 = vshrl.u32 %v15343_v49, 16  ;;  %v1577_v11 = vshll.u32 %v15343_v49, 16  ;;  %v1581_v12 = vshrl.u32 %v17282_v59, 16  ;;  %v1584_v13 = vshll.u32 %v17282_v59, 16  ;;  %v361_v60 = vld [vmem:[#allocation2 + $0x78] sm:$0x1] }
  0x9c   : > { %v1588_v14 = vshrl.u32 %v17297_v5, 16  ;;  %v15403_v18 = vld.sshfl [vmem:[#allocation2 + $0x64] sm:$0x13 pattern:$0x76325410]  ;;  %v1569_v28 = vrot.slane %v1567_v6, 7 }
  0x9d   : > { %v16828_v19 = vld.sshfl [vmem:[#allocation2 + $0x64] sm:$0xf pattern:$0x76325410]  ;;  %v3453_v20 = vshrl.u32 %v15403_v18, 16  ;;  %v3456_v21 = vshll.u32 %v15403_v18, 16  ;;  %v2838_v24 = vcombine.high %v15403_v18, %v15403_v18 }
  0x9e   : > { %v15402_v22 = vld.sshfl [vmem:[#allocation2 + $0x60] sm:$0x13 pattern:$0x76325410]  ;;  %v1576_v29 = vrot.slane %v1574_v8, 7  ;;  %v1572_v35 = vor.u32 %v1570_v7, %v1569_v28  ;;  %v1583_v3 = vrot.slane %v1581_v12, 7 }
  0x9f   : > { %v15404_v30 = vld.sshfl [vmem:[#allocation2 + $0x68] sm:$0x13 pattern:$0x76325410]  ;;  %v2830_v31 = vcombine.high %v15402_v22, %v15402_v22  ;;  %v3439_v23 = vshrl.u32 %v15402_v22, 16  ;;  %v3442_v26 = vshll.u32 %v15402_v22, 16 }
  0xa0   : > { %v15405_v32 = vld.sshfl [vmem:[#allocation2 + $0x6c] sm:$0x13 pattern:$0x76325410]  ;;  %v2846_v34 = vcombine.high %v15404_v30, %v15404_v30  ;;  %v3455_v39 = vrot.slane %v3453_v20, 6  ;;  %v1579_v40 = vor.u32 %v1577_v11, %v1576_v29  ;;  %v3458_v27 = vrot.slane %v3456_v21, 7 }
  0xa1   : > { %v16829_v36 = vld.sshfl [vmem:[#allocation2 + $0x6c] sm:$0xf pattern:$0x76325410]  ;;  %v2854_v37 = vcombine.high %v15405_v32, %v15405_v32  ;;  %v3448_v38 = vshll.u32 %v2830_v31, 16  ;;  %v3441_v41 = vrot.slane %v3439_v23, 6  ;;  %v1586_v12 = vor.u32 %v1584_v13, %v1583_v3 }
  0xa2   : > { %v3444_v25 = vrot.slane %v3442_v26, 7  ;;  %v3462_v42 = vshll.u32 %v2838_v24, 16  ;;  %v3467_v44 = vshrl.u32 %v15404_v30, 16  ;;  %v3470_v45 = vshll.u32 %v15404_v30, 16  ;;  %v2002_v54 = vld [vmem:[#allocation2 + $0x7c] sm:$0x7] }
  0xa3   : > { %v3450_v43 = vrot.slane %v3448_v38, 7  ;;  %v3459_v47 = vor.u32 %v3458_v27, %v3455_v39  ;;  %v3476_v49 = vshll.u32 %v2846_v34, 16  ;;  %v5866_v50 = vcombine.low %v16828_v19, %v16829_v36  ;;  %v2005_v62 = vld [vmem:[#allocation2 + $0x80] sm:$0x7]  ;;  %v2008_v4 = vld [vmem:[#allocation2 + $0x84] sm:$0x7] }
  0xa4   : > { %v3445_v46 = vor.u32 %v3444_v25, %v3441_v41  ;;  %v3464_v48 = vrot.slane %v3462_v42, 7  ;;  %v3469_v51 = vrot.slane %v3467_v44, 6  ;;  %v3472_v52 = vrot.slane %v3470_v45, 7  ;;  %v652_v2 = vld [vmem:[#allocation2 + $0x78] sm:$0x4]  ;;  %13643 = vst.msk [vmem:[#allocation3 + $0x110] sm:$0xff] %vm2550_vm9, %v16924_v17 }
  0xa5   : > { %v3481_v53 = vshrl.u32 %v15405_v32, 16  ;;  %v3460_v56 = vrot.slane %v3459_v47, 2  ;;  %v3478_v57 = vrot.slane %v3476_v49, 7  ;;  %v3484_v58 = vshll.u32 %v15405_v32, 16  ;;  %6062 = vrot.lane.b32.xlu0 %v5866_v50, %s16926_s25  ;;  %v382_v6 = vld [vmem:[#allocation2 + $0x94] sm:$0x1] }
  0xa6   : > { %v3446_v55 = vrot.slane %v3445_v46, 2  ;;  %v3473_v63 = vor.u32 %v3472_v52, %v3469_v51  ;;  %v3490_v1 = vshll.u32 %v2854_v37, 16  ;;  %v1590_v15 = vrot.slane %v1588_v14, 7  ;;  %v385_v18 = vld [vmem:[#allocation2 + $0x98] sm:$0x1]  ;;  %13644 = vst.msk [vmem:[#allocation3 + $0x118] sm:$0xff] %vm2550_vm9, %v16924_v17 }
  0xa7   : > { %v3483_v61 = vrot.slane %v3481_v53, 6  ;;  %v3465_v8 = vsel %vm17115_vm15, %v3460_v56, %v3464_v48  ;;  %v3486_v11 = vrot.slane %v3484_v58, 7  ;;  %v388_v19 = vld [vmem:[#allocation2 + $0x9c] sm:$0x1]  ;;  %v391_v20 = vld [vmem:[#allocation2 + $0xa0] sm:$0x1]  ;;  %v2003_v34 = vsel %vm17067_vm8, %v1572_v35, %v2002_v54 }
  0xa8   : > { %v3451_v7 = vsel %vm17115_vm15, %v3446_v55, %v3450_v43  ;;  %v673_v21 = vld [vmem:[#allocation2 + $0x94] sm:$0x4]  ;;  %v3474_v22 = vrot.slane %v3473_v63, 2  ;;  %v3492_v24 = vrot.slane %v3490_v1, 7  ;;  %v2011_v28 = vld [vmem:[#allocation2 + $0x88] sm:$0x7]  ;;  %v2006_v14 = vsel %vm17067_vm8, %v1579_v40, %v2005_v62 }
  0xa9   : > { %v676_v29 = vld [vmem:[#allocation2 + $0x98] sm:$0x4]  ;;  %v679_v30 = vld [vmem:[#allocation2 + $0x9c] sm:$0x4]  ;;  %v3487_v31 = vor.u32 %v3486_v11, %v3483_v61  ;;  %v1591_v32 = vshll.u32 %v17297_v5, 16  ;;  %v4178_v59 = vcombine.low %v3451_v7, %v3465_v8  ;;  %v2009_v13 = vsel %vm17067_vm8, %v1586_v12, %v2008_v4  ;;  %13645 = vst.msk [vmem:[#allocation3 + $0x180] sm:$0xff] %vm2550_vm9, %v16924_v17 }
  0xaa   : > { %v17317_v23 = vld.sshfl [vmem:[%s16991_s24 + $0x30] sm:$0x3 pattern:$0x76325410]  ;;  %v3479_v26 = vsel %vm17115_vm15, %v3474_v22, %v3478_v57  ;;  %2004 = vst [vmem:[#allocation2 + $0x7c] sm:$0x7] %v2003_v34 }
  0xab   : > { %2007 = vst [vmem:[#allocation2 + $0x80] sm:$0x7] %v2006_v14  ;;  %v362_v5 = vsel %vm16965_vm2, 0, %v361_v60  ;;  %v3488_v35 = vrot.slane %v3487_v31, 2  ;;  %v1593_v37 = vor.u32 %v1591_v32, %v1590_v15  ;;  %2010 = vst [vmem:[#allocation2 + $0x84] sm:$0x7] %v2009_v13  ;;  %v4186_v49 = vrot.slane %v4178_v59, %v17100_v16 }
  0xac   : > { %v17326_v36 = vld.sshfl [vmem:[%s16991_s24 + $0x32] sm:$0x3 pattern:$0x76325410]  ;;  %363 = vst [vmem:[#allocation2 + $0x78] sm:$0x1] %v362_v5 }
  0xad   : > { %v653_v38 = vsel %vm16979_vm6, 0, %v652_v2  ;;  %v383_v39 = vsel %vm16965_vm2, 0, %v382_v6  ;;  %v682_v40 = vld [vmem:[#allocation2 + $0xa0] sm:$0x4]  ;;  %v386_v41 = vsel %vm16965_vm2, 0, %v385_v18  ;;  %v389_v25 = vsel %vm16965_vm2, 0, %v388_v19 }
  0xae   : > { %654 = vst [vmem:[#allocation2 + $0x78] sm:$0x4] %v653_v38  ;;  %384 = vst [vmem:[#allocation2 + $0x94] sm:$0x1] %v383_v39  ;;  %v392_v27 = vsel %vm16965_vm2, 0, %v391_v20  ;;  %v674_v42 = vsel %vm16979_vm6, 0, %v673_v21  ;;  %v3493_v43 = vsel %vm17115_vm15, %v3488_v35, %v3492_v24  ;;  %v2012_v44 = vsel %vm17067_vm8, %v1593_v37, %v2011_v28 }
  0xaf   : > { %387 = vst [vmem:[#allocation2 + $0x98] sm:$0x1] %v386_v41  ;;  %390 = vst [vmem:[#allocation2 + $0x9c] sm:$0x1] %v389_v25  ;;  %v677_v45 = vsel %vm16979_vm6, 0, %v676_v29  ;;  %v680_v46 = vsel %vm16979_vm6, 0, %v679_v30  ;;  %v4179_v48 = vcombine.low %v3479_v26, %v3493_v43 }
  0xb0   : > { %393 = vst [vmem:[#allocation2 + $0xa0] sm:$0x1] %v392_v27  ;;  %675 = vst [vmem:[#allocation2 + $0x94] sm:$0x4] %v674_v42  ;;  %v683_v50 = vsel %vm16979_vm6, 0, %v682_v40  ;;  %v1595_v52 = vshrl.u32 %v17317_v23, 16 }
  0xb1   : > { %v17349_v47 = vld.sshfl [vmem:[%s16991_s24 + $0x34] sm:$0x3 pattern:$0x76325410]  ;;  %2013 = vst [vmem:[#allocation2 + $0x88] sm:$0x7] %v2012_v44  ;;  %v4193_v57 = vrot.slane %v4179_v48, %v17100_v16 }
  0xb2   : > { %678 = vst [vmem:[#allocation2 + $0x98] sm:$0x4] %v677_v45  ;;  %681 = vst [vmem:[#allocation2 + $0x9c] sm:$0x4] %v680_v46  ;;  %v1598_v53 = vshll.u32 %v17317_v23, 16  ;;  %v1602_v54 = vshrl.u32 %v17326_v36, 16 }
  0xb3   : > { %v17355_v51 = vld.sshfl [vmem:[%s16991_s24 + $0x36] sm:$0x3 pattern:$0x76325410]  ;;  %684 = vst [vmem:[#allocation2 + $0xa0] sm:$0x4] %v683_v50  ;;  %v4194_v61 = vcombine.low %v4186_v49, %v4193_v57 }
  0xb4   : > { %v1605_v55 = vshll.u32 %v17326_v36, 16  ;;  %v1609_v56 = vshrl.u32 %v17349_v47, 16  ;;  %v1597_v58 = vrot.slane %v1595_v52, 7  ;;  %v1612_v62 = vshll.u32 %v17349_v47, 16  ;;  %v379_v42 = vld [vmem:[#allocation2 + $0x90] sm:$0x1] }
  0xb5   : > { %v1616_v60 = vshrl.u32 %v17355_v51, 16  ;;  %v16830_v63 = vld.sshfl [vmem:[#allocation2 + $0x7c] sm:$0xf pattern:$0x76325410]  ;;  %4390 = vrot.lane.b32.xlu1 %v4194_v61, %s16926_s25  ;;  %v1604_v46 = vrot.slane %v1602_v54, 7 }
  0xb6   : > { %v15407_v1 = vld.sshfl [vmem:[#allocation2 + $0x7c] sm:$0x13 pattern:$0x76325410]  ;;  %v1600_v28 = vor.u32 %v1598_v53, %v1597_v58  ;;  %v670_v50 = vld [vmem:[#allocation2 + $0x90] sm:$0x4] }
  0xb7   : > { %v15406_v3 = vld.sshfl [vmem:[#allocation2 + $0x78] sm:$0x13 pattern:$0x76325410]  ;;  %v3509_v4 = vshrl.u32 %v15407_v1, 16  ;;  %v3512_v2 = vshll.u32 %v15407_v1, 16  ;;  %v2870_v8 = vcombine.high %v15407_v1, %v15407_v1 }
  0xb8   : > { %v15408_v6 = vld.sshfl [vmem:[#allocation2 + $0x80] sm:$0x13 pattern:$0x76325410]  ;;  %v2862_v7 = vcombine.high %v15406_v3, %v15406_v3  ;;  %v3495_v11 = vshrl.u32 %v15406_v3, 16  ;;  %v3498_v15 = vshll.u32 %v15406_v3, 16 }
  0xb9   : > { %v16831_v18 = vld.sshfl [vmem:[#allocation2 + $0x84] sm:$0xf pattern:$0x76325410]  ;;  %v2878_v19 = vcombine.high %v15408_v6, %v15408_v6  ;;  %v3511_v20 = vrot.slane %v3509_v4, 6  ;;  %v3514_v21 = vrot.slane %v3512_v2, 7  ;;  %v1607_v2 = vor.u32 %v1605_v55, %v1604_v46 }
  0xba   : > { %v15409_v22 = vld.sshfl [vmem:[#allocation2 + $0x84] sm:$0x13 pattern:$0x76325410]  ;;  %v3497_v24 = vrot.slane %v3495_v11, 6  ;;  %v3500_v12 = vrot.slane %v3498_v15, 7  ;;  %v5883_v26 = vcombine.low %v16830_v63, %v16831_v18 }
  0xbb   : > { %v2886_v29 = vcombine.high %v15409_v22, %v15409_v22  ;;  %v3504_v30 = vshll.u32 %v2862_v7, 16  ;;  %v3515_v31 = vor.u32 %v3514_v21, %v3511_v20  ;;  %v3518_v34 = vshll.u32 %v2870_v8, 16  ;;  %v2014_v48 = vld [vmem:[#allocation2 + $0x94] sm:$0x7]  ;;  %v2017_v49 = vld [vmem:[#allocation2 + $0x98] sm:$0x7] }
  0xbc   : > { %v3501_v32 = vor.u32 %v3500_v12, %v3497_v24  ;;  %v3523_v14 = vshrl.u32 %v15408_v6, 16  ;;  %v3526_v23 = vshll.u32 %v15408_v6, 16  ;;  %v3532_v5 = vshll.u32 %v2878_v19, 16  ;;  %6064 = vrot.lane.b32.xlu0 %v5883_v26, %s16926_s25  ;;  %v400_v52 = vld [vmem:[#allocation2 + $0xac] sm:$0x1]  ;;  %13646 = vst.msk [vmem:[#allocation3 + $0x188] sm:$0xff] %vm2550_vm9, %v16924_v17 }
  0xbd   : > { %v3506_v59 = vrot.slane %v3504_v30, 7  ;;  %v3516_v13 = vrot.slane %v3515_v31, 2  ;;  %v3520_v37 = vrot.slane %v3518_v34, 7  ;;  %v3537_v41 = vshrl.u32 %v15409_v22, 16  ;;  %v2020_v63 = vld [vmem:[#allocation2 + $0x9c] sm:$0x7] }
  0xbe   : > { %v3502_v35 = vrot.slane %v3501_v32, 2  ;;  %v3525_v38 = vrot.slane %v3523_v14, 6  ;;  %v3528_v39 = vrot.slane %v3526_v23, 7  ;;  %v3534_v40 = vrot.slane %v3532_v5, 7  ;;  %v403_v61 = vld [vmem:[#allocation2 + $0xb0] sm:$0x1] }
  0xbf   : > { %v3540_v25 = vshll.u32 %v15409_v22, 16  ;;  %v3546_v27 = vshll.u32 %v2886_v29, 16  ;;  %v3521_v44 = vsel %vm17115_vm15, %v3516_v13, %v3520_v37  ;;  %v3539_v53 = vrot.slane %v3537_v41, 6  ;;  %v406_v1 = vld [vmem:[#allocation2 + $0xb4] sm:$0x1]  ;;  %13647 = vst.msk [vmem:[#allocation3 + $0x190] sm:$0xff] %vm2550_vm9, %v16924_v17 }
  0xc0   : > { %v3507_v43 = vsel %vm17115_vm15, %v3502_v35, %v3506_v59  ;;  %v3529_v45 = vor.u32 %v3528_v39, %v3525_v38  ;;  %v409_v3 = vld [vmem:[#allocation2 + $0xb8] sm:$0x1]  ;;  %v1611_v6 = vrot.slane %v1609_v56, 7  ;;  %v1618_v54 = vrot.slane %v1616_v60, 7  ;;  %v2023_v7 = vld [vmem:[#allocation2 + $0xa0] sm:$0x7] }
  0xc1   : > { %v3542_v57 = vrot.slane %v3540_v25, 7  ;;  %v3548_v58 = vrot.slane %v3546_v27, 7  ;;  %v691_v8 = vld [vmem:[#allocation2 + $0xac] sm:$0x4]  ;;  %v4195_v15 = vcombine.low %v3507_v43, %v3521_v44  ;;  %v1619_v18 = vshll.u32 %v17355_v51, 16  ;;  %13648 = vst.msk [vmem:[#allocation3 + $0x198] sm:$0xff] %vm2550_vm9, %v16924_v17 }
  0xc2   : > { %v3530_v4 = vrot.slane %v3529_v45, 2  ;;  %v2015_v19 = vsel %vm17067_vm8, %v1600_v28, %v2014_v48  ;;  %v694_v20 = vld [vmem:[#allocation2 + $0xb0] sm:$0x4]  ;;  %v697_v21 = vld [vmem:[#allocation2 + $0xb4] sm:$0x4]  ;;  %v1614_v55 = vor.u32 %v1612_v62, %v1611_v6  ;;  %v2018_v56 = vsel %vm17067_vm8, %v1607_v2, %v2017_v49  ;;  %13650 = vst.msk [vmem:[#allocation3 + $0x60] sm:$0xff] %vm2550_vm9, %v16924_v17 }
  0xc3   : > { %v3543_v11 = vor.u32 %v3542_v57, %v3539_v53  ;;  %2016 = vst [vmem:[#allocation2 + $0x94] sm:$0x7] %v2015_v19  ;;  %v380_v60 = vsel %vm16965_vm2, 0, %v379_v42  ;;  %v1621_v12 = vor.u32 %v1619_v18, %v1618_v54  ;;  %2019 = vst [vmem:[#allocation2 + $0x98] sm:$0x7] %v2018_v56  ;;  %v671_v28 = vsel %vm16979_vm6, 0, %v670_v50 }
  0xc4   : > { %v3535_v36 = vsel %vm17115_vm15, %v3530_v4, %v3534_v40  ;;  %v15350_v22 = vld.sshfl [vmem:[%s16991_s24 + $0x38] sm:$0x3 pattern:$0x76325410]  ;;  %381 = vst [vmem:[#allocation2 + $0x90] sm:$0x1] %v380_v60  ;;  %v2021_v29 = vsel %vm17067_vm8, %v1614_v55, %v2020_v63  ;;  %v4203_v5 = vrot.slane %v4195_v15, %v17100_v16 }
  0xc5   : > { %v15351_v51 = vld.sshfl [vmem:[%s16991_s24 + $0x3a] sm:$0x3 pattern:$0x76325410]  ;;  %v3544_v24 = vrot.slane %v3543_v11, 2  ;;  %v401_v47 = vsel %vm16965_vm2, 0, %v400_v52  ;;  %v2024_v14 = vsel %vm17067_vm8, %v1621_v12, %v2023_v7 }
  0xc6   : > { %v700_v62 = vld [vmem:[#allocation2 + $0xb8] sm:$0x4]  ;;  %672 = vst [vmem:[#allocation2 + $0x90] sm:$0x4] %v671_v28  ;;  %402 = vst [vmem:[#allocation2 + $0xac] sm:$0x1] %v401_v47 }
  0xc7   : > { %v404_v30 = vsel %vm16965_vm2, 0, %v403_v61  ;;  %v407_v31 = vsel %vm16965_vm2, 0, %v406_v1  ;;  %v410_v32 = vsel %vm16965_vm2, 0, %v409_v3  ;;  %v3549_v34 = vsel %vm17115_vm15, %v3544_v24, %v3548_v58  ;;  %2022 = vst [vmem:[#allocation2 + $0x9c] sm:$0x7] %v2021_v29  ;;  %13651 = vst.msk [vmem:[#allocation3 + $0x68] sm:$0xff] %vm2550_vm9, %v16924_v17 }
  0xc8   : > { %405 = vst [vmem:[#allocation2 + $0xb0] sm:$0x1] %v404_v30  ;;  %408 = vst [vmem:[#allocation2 + $0xb4] sm:$0x1] %v407_v31  ;;  %v692_v23 = vsel %vm16979_vm6, 0, %v691_v8  ;;  %v695_v26 = vsel %vm16979_vm6, 0, %v694_v20  ;;  %v4196_v13 = vcombine.low %v3535_v36, %v3549_v34 }
  0xc9   : > { %411 = vst [vmem:[#allocation2 + $0xb8] sm:$0x1] %v410_v32  ;;  %v17409_v59 = vld.sshfl [vmem:[%s16991_s24 + $0x3c] sm:$0x3 pattern:$0x76325410] }
  0xca   : > { %2025 = vst [vmem:[#allocation2 + $0xa0] sm:$0x7] %v2024_v14  ;;  %693 = vst [vmem:[#allocation2 + $0xac] sm:$0x4] %v692_v23  ;;  %v698_v35 = vsel %vm16979_vm6, 0, %v697_v21  ;;  %v701_v37 = vsel %vm16979_vm6, 0, %v700_v62  ;;  %v4210_v27 = vrot.slane %v4196_v13, %v17100_v16 }
  0xcb   : > { %696 = vst [vmem:[#allocation2 + $0xb0] sm:$0x4] %v695_v26  ;;  %v17417_v38 = vld.sshfl [vmem:[%s16991_s24 + $0x3e] sm:$0x3 pattern:$0x76325410] }
  0xcc   : > { %699 = vst [vmem:[#allocation2 + $0xb4] sm:$0x4] %v698_v35  ;;  %702 = vst [vmem:[#allocation2 + $0xb8] sm:$0x4] %v701_v37  ;;  %v1623_v39 = vshrl.u32 %v15350_v22, 16  ;;  %v1626_v40 = vshll.u32 %v15350_v22, 16  ;;  %v4211_v46 = vcombine.low %v4203_v5, %v4210_v27 }
  0xcd   : > { %v1630_v41 = vshrl.u32 %v15351_v51, 16  ;;  %v1633_v25 = vshll.u32 %v15351_v51, 16  ;;  %v1637_v42 = vshrl.u32 %v17409_v59, 16  ;;  %v1640_v43 = vshll.u32 %v17409_v59, 16  ;;  %v397_v34 = vld [vmem:[#allocation2 + $0xa8] sm:$0x1] }
  0xce   : > { %v1644_v44 = vshrl.u32 %v17417_v38, 16  ;;  %v15411_v45 = vld.sshfl [vmem:[#allocation2 + $0x94] sm:$0x13 pattern:$0x76325410]  ;;  %v1625_v53 = vrot.slane %v1623_v39, 7  ;;  %4392 = vrot.lane.b32.xlu1 %v4211_v46, %s16926_s25 }
  0xcf   : > { %v16832_v48 = vld.sshfl [vmem:[#allocation2 + $0x94] sm:$0xf pattern:$0x76325410]  ;;  %v3565_v49 = vshrl.u32 %v15411_v45, 16  ;;  %v3568_v50 = vshll.u32 %v15411_v45, 16  ;;  %v2902_v61 = vcombine.high %v15411_v45, %v15411_v45 }
  0xd0   : > { %v15410_v52 = vld.sshfl [vmem:[#allocation2 + $0x90] sm:$0x13 pattern:$0x76325410]  ;;  %v1632_v57 = vrot.slane %v1630_v41, 7  ;;  %v1628_v8 = vor.u32 %v1626_v40, %v1625_v53  ;;  %v1639_v59 = vrot.slane %v1637_v42, 7 }
  0xd1   : > { %v15412_v58 = vld.sshfl [vmem:[#allocation2 + $0x98] sm:$0x13 pattern:$0x76325410]  ;;  %v2894_v63 = vcombine.high %v15410_v52, %v15410_v52  ;;  %v3551_v4 = vshrl.u32 %v15410_v52, 16  ;;  %v3554_v2 = vshll.u32 %v15410_v52, 16 }
  0xd2   : > { %v16833_v1 = vld.sshfl [vmem:[#allocation2 + $0x9c] sm:$0xf pattern:$0x76325410]  ;;  %v2910_v3 = vcombine.high %v15412_v58, %v15412_v58  ;;  %v3567_v7 = vrot.slane %v3565_v49, 6  ;;  %v1635_v11 = vor.u32 %v1633_v25, %v1632_v57  ;;  %v3570_v21 = vrot.slane %v3568_v50, 7 }
  0xd3   : > { %v15413_v6 = vld.sshfl [vmem:[#allocation2 + $0x9c] sm:$0x13 pattern:$0x76325410]  ;;  %v3560_v54 = vshll.u32 %v2894_v63, 16  ;;  %v3553_v18 = vrot.slane %v3551_v4, 6  ;;  %v5900_v56 = vcombine.low %v16832_v48, %v16833_v1  ;;  %v1642_v50 = vor.u32 %v1640_v43, %v1639_v59 }
  0xd4   : > { %v2918_v15 = vcombine.high %v15413_v6, %v15413_v6  ;;  %v3556_v19 = vrot.slane %v3554_v2, 7  ;;  %v3574_v36 = vshll.u32 %v2902_v61, 16  ;;  %v3579_v55 = vshrl.u32 %v15412_v58, 16  ;;  %v2026_v32 = vld [vmem:[#allocation2 + $0xac] sm:$0x7]  ;;  %13652 = vst.msk [vmem:[#allocation3 + $0x70] sm:$0xff] %vm2550_vm9, %v16924_v17 }
  0xd5   : > { %v3562_v20 = vrot.slane %v3560_v54, 7  ;;  %v3582_v22 = vshll.u32 %v15412_v58, 16  ;;  %v3588_v51 = vshll.u32 %v2910_v3, 16  ;;  %v3571_v24 = vor.u32 %v3570_v21, %v3567_v7  ;;  %6066 = vrot.lane.b32.xlu0 %v5900_v56, %s16926_s25  ;;  %v2029_v13 = vld [vmem:[#allocation2 + $0xb0] sm:$0x7]  ;;  %13653 = vst.msk [vmem:[#allocation3 + $0x78] sm:$0xff] %vm2550_vm9, %v16924_v17 }
  0xd6   : > { %v3557_v60 = vor.u32 %v3556_v19, %v3553_v18  ;;  %v3576_v12 = vrot.slane %v3574_v36, 7  ;;  %v3581_v28 = vrot.slane %v3579_v55, 6  ;;  %v3593_v47 = vshrl.u32 %v15413_v6, 16  ;;  %v688_v5 = vld [vmem:[#allocation2 + $0xa8] sm:$0x4]  ;;  %13654 = vst.msk [vmem:[#allocation3 + $0xe0] sm:$0xff] %vm2550_vm9, %v16924_v17 }
  0xd7   : > { %v3584_v29 = vrot.slane %v3582_v22, 7  ;;  %v3590_v30 = vrot.slane %v3588_v51, 7  ;;  %v3596_v31 = vshll.u32 %v15413_v6, 16  ;;  %v3572_v14 = vrot.slane %v3571_v24, 2  ;;  %v2032_v41 = vld [vmem:[#allocation2 + $0xb4] sm:$0x7] }
  0xd8   : > { %v3558_v62 = vrot.slane %v3557_v60, 2  ;;  %v3595_v23 = vrot.slane %v3593_v47, 6  ;;  %v3602_v26 = vshll.u32 %v2918_v15, 16  ;;  %v1646_v40 = vrot.slane %v1644_v44, 7  ;;  %v2035_v25 = vld [vmem:[#allocation2 + $0xb8] sm:$0x7] }
  0xd9   : > { %v3585_v37 = vor.u32 %v3584_v29, %v3581_v28  ;;  %v3598_v39 = vrot.slane %v3596_v31, 7  ;;  %v418_v27 = vld [vmem:[#allocation2 + $0xc4] sm:$0x1]  ;;  %v421_v45 = vld [vmem:[#allocation2 + $0xc8] sm:$0x1]  ;;  %v3577_v48 = vsel %vm17115_vm15, %v3572_v14, %v3576_v12  ;;  %v1647_v42 = vshll.u32 %v17417_v38, 16 }
  0xda   : > { %v3563_v35 = vsel %vm17115_vm15, %v3558_v62, %v3562_v20  ;;  %v424_v46 = vld [vmem:[#allocation2 + $0xcc] sm:$0x1]  ;;  %v3604_v49 = vrot.slane %v3602_v26, 7  ;;  %v427_v52 = vld [vmem:[#allocation2 + $0xd0] sm:$0x1]  ;;  %v2027_v61 = vsel %vm17067_vm8, %v1628_v8, %v2026_v32  ;;  %v2030_v38 = vsel %vm17067_vm8, %v1635_v11, %v2029_v13  ;;  %13655 = vst.msk [vmem:[#allocation3 + $0xe8] sm:$0xff] %vm2550_vm9, %v16924_v17 }
  0xdb   : > { %v709_v53 = vld [vmem:[#allocation2 + $0xc4] sm:$0x4]  ;;  %v712_v57 = vld [vmem:[#allocation2 + $0xc8] sm:$0x4]  ;;  %v3586_v58 = vrot.slane %v3585_v37, 2  ;;  %v3599_v44 = vor.u32 %v3598_v39, %v3595_v23  ;;  %v4212_v63 = vcombine.low %v3563_v35, %v3577_v48  ;;  %v1649_v2 = vor.u32 %v1647_v42, %v1646_v40  ;;  %13656 = vst.msk [vmem:[#allocation3 + $0xf0] sm:$0xff] %vm2550_vm9, %v16924_v17 }
  0xdc   : > { %v715_v1 = vld [vmem:[#allocation2 + $0xcc] sm:$0x4]  ;;  %v718_v3 = vld [vmem:[#allocation2 + $0xd0] sm:$0x4]  ;;  %2028 = vst [vmem:[#allocation2 + $0xac] sm:$0x7] %v2027_v61  ;;  %v2033_v43 = vsel %vm17067_vm8, %v1642_v50, %v2032_v41 }
  0xdd   : > { %v15354_v4 = vld.sshfl [vmem:[%s16991_s24 + $0x40] sm:$0x3 pattern:$0x76325410]  ;;  %v398_v6 = vsel %vm16965_vm2, 0, %v397_v34  ;;  %v3591_v8 = vsel %vm17115_vm15, %v3586_v58, %v3590_v30  ;;  %v3600_v15 = vrot.slane %v3599_v44, 2  ;;  %v4220_v18 = vrot.slane %v4212_v63, %v17100_v16 }
  0xde   : > { %v17440_v54 = vld.sshfl [vmem:[%s16991_s24 + $0x42] sm:$0x3 pattern:$0x76325410]  ;;  %2031 = vst [vmem:[#allocation2 + $0xb0] sm:$0x7] %v2030_v38  ;;  %v2036_v20 = vsel %vm17067_vm8, %v1649_v2, %v2035_v25 }
  0xdf   : > { %v17443_v7 = vld.sshfl [vmem:[%s16991_s24 + $0x44] sm:$0x3 pattern:$0x76325410]  ;;  %2034 = vst [vmem:[#allocation2 + $0xb4] sm:$0x7] %v2033_v43  ;;  %v3605_v56 = vsel %vm17115_vm15, %v3600_v15, %v3604_v49 }
  0xe0   : > { %399 = vst [vmem:[#allocation2 + $0xa8] sm:$0x1] %v398_v6  ;;  %v689_v11 = vsel %vm16979_vm6, 0, %v688_v5  ;;  %v419_v21 = vsel %vm16965_vm2, 0, %v418_v27  ;;  %v422_v36 = vsel %vm16965_vm2, 0, %v421_v45  ;;  %v425_v55 = vsel %vm16965_vm2, 0, %v424_v46 }
  0xe1   : > { %v17451_v19 = vld.sshfl [vmem:[%s16991_s24 + $0x46] sm:$0x3 pattern:$0x76325410]  ;;  %690 = vst [vmem:[#allocation2 + $0xa8] sm:$0x4] %v689_v11  ;;  %v4213_v24 = vcombine.low %v3591_v8, %v3605_v56 }
  0xe2   : > { %2037 = vst [vmem:[#allocation2 + $0xb8] sm:$0x7] %v2036_v20  ;;  %420 = vst [vmem:[#allocation2 + $0xc4] sm:$0x1] %v419_v21  ;;  %v428_v60 = vsel %vm16965_vm2, 0, %v427_v52  ;;  %v710_v22 = vsel %vm16979_vm6, 0, %v709_v53 }
  0xe3   : > { %423 = vst [vmem:[#allocation2 + $0xc8] sm:$0x1] %v422_v36  ;;  %426 = vst [vmem:[#allocation2 + $0xcc] sm:$0x1] %v425_v55  ;;  %v713_v51 = vsel %vm16979_vm6, 0, %v712_v57  ;;  %v716_v12 = vsel %vm16979_vm6, 0, %v715_v1  ;;  %v4227_v32 = vrot.slane %v4213_v24, %v17100_v16 }
  0xe4   : > { %429 = vst [vmem:[#allocation2 + $0xd0] sm:$0x1] %v428_v60  ;;  %711 = vst [vmem:[#allocation2 + $0xc4] sm:$0x4] %v710_v22  ;;  %v719_v28 = vsel %vm16979_vm6, 0, %v718_v3  ;;  %v1651_v47 = vshrl.u32 %v15354_v4, 16 }
  0xe5   : > { %714 = vst [vmem:[#allocation2 + $0xc8] sm:$0x4] %v713_v51  ;;  %717 = vst [vmem:[#allocation2 + $0xcc] sm:$0x4] %v716_v12  ;;  %v1654_v62 = vshll.u32 %v15354_v4, 16  ;;  %v1658_v29 = vshrl.u32 %v17440_v54, 16  ;;  %v4228_v59 = vcombine.low %v4220_v18, %v4227_v32 }
  0xe6   : > { %720 = vst [vmem:[#allocation2 + $0xd0] sm:$0x4] %v719_v28  ;;  %v1661_v30 = vshll.u32 %v17440_v54, 16  ;;  %v1665_v31 = vshrl.u32 %v17443_v7, 16  ;;  %v1653_v34 = vrot.slane %v1651_v47, 7  ;;  %v1668_v14 = vshll.u32 %v17443_v7, 16 }
  0xe7   : > { %v1672_v23 = vshrl.u32 %v17451_v19, 16  ;;  %v15415_v26 = vld.sshfl [vmem:[#allocation2 + $0xac] sm:$0x13 pattern:$0x76325410]  ;;  %4394 = vrot.lane.b32.xlu1 %v4228_v59, %s16926_s25  ;;  %v1660_v12 = vrot.slane %v1658_v29, 7 }
  0xe8   : > { %v16834_v13 = vld.sshfl [vmem:[#allocation2 + $0xac] sm:$0xf pattern:$0x76325410]  ;;  %v2934_v35 = vcombine.high %v15415_v26, %v15415_v26  ;;  %v3621_v37 = vshrl.u32 %v15415_v26, 16  ;;  %v3624_v39 = vshll.u32 %v15415_v26, 16  ;;  %v1656_v49 = vor.u32 %v1654_v62, %v1653_v34 }
  0xe9   : > { %v15414_v5 = vld.sshfl [vmem:[#allocation2 + $0xa8] sm:$0x13 pattern:$0x76325410]  ;;  %v415_v60 = vld [vmem:[#allocation2 + $0xc0] sm:$0x1] }
  0xea   : > { %v16835_v40 = vld.sshfl [vmem:[#allocation2 + $0xb4] sm:$0xf pattern:$0x76325410]  ;;  %v2926_v41 = vcombine.high %v15414_v5, %v15414_v5  ;;  %v3607_v25 = vshrl.u32 %v15414_v5, 16  ;;  %v3610_v27 = vshll.u32 %v15414_v5, 16 }
  0xeb   : > { %v15416_v45 = vld.sshfl [vmem:[#allocation2 + $0xb0] sm:$0x13 pattern:$0x76325410]  ;;  %v3623_v46 = vrot.slane %v3621_v37, 6  ;;  %v3626_v48 = vrot.slane %v3624_v39, 7  ;;  %v5917_v61 = vcombine.low %v16834_v13, %v16835_v40  ;;  %v1663_v40 = vor.u32 %v1661_v30, %v1660_v12 }
  0xec   : > { %v15417_v50 = vld.sshfl [vmem:[#allocation2 + $0xb4] sm:$0x13 pattern:$0x76325410]  ;;  %v2942_v42 = vcombine.high %v15416_v45, %v15416_v45  ;;  %v3609_v52 = vrot.slane %v3607_v25, 6  ;;  %v3612_v53 = vrot.slane %v3610_v27, 7 }
  0xed   : > { %v2950_v57 = vcombine.high %v15417_v50, %v15417_v50  ;;  %v3616_v58 = vshll.u32 %v2926_v41, 16  ;;  %v3627_v44 = vor.u32 %v3626_v48, %v3623_v46  ;;  %v3630_v63 = vshll.u32 %v2934_v35, 16  ;;  %6068 = vrot.lane.b32.xlu0 %v5917_v61, %s16926_s25  ;;  %v2038_v56 = vld [vmem:[#allocation2 + $0xc4] sm:$0x7]  ;;  %v2041_v28 = vld [vmem:[#allocation2 + $0xc8] sm:$0x7] }
  0xee   : > { %v3613_v1 = vor.u32 %v3612_v53, %v3609_v52  ;;  %v3635_v3 = vshrl.u32 %v15416_v45, 16  ;;  %v3638_v4 = vshll.u32 %v15416_v45, 16  ;;  %v3644_v6 = vshll.u32 %v2942_v42, 16  ;;  %v2044_v47 = vld [vmem:[#allocation2 + $0xcc] sm:$0x7]  ;;  %13657 = vst.msk [vmem:[#allocation3 + $0xf8] sm:$0xff] %vm2550_vm9, %v16924_v17 }
  0xef   : > { %v3618_v2 = vrot.slane %v3616_v58, 7  ;;  %v3628_v38 = vrot.slane %v3627_v44, 2  ;;  %v3632_v43 = vrot.slane %v3630_v63, 7  ;;  %v3649_v11 = vshrl.u32 %v15417_v50, 16  ;;  %v706_v62 = vld [vmem:[#allocation2 + $0xc0] sm:$0x4] }
  0xf0   : > { %v3614_v8 = vrot.slane %v3613_v1, 2  ;;  %v3637_v15 = vrot.slane %v3635_v3, 6  ;;  %v3640_v18 = vrot.slane %v3638_v4, 7  ;;  %v3646_v21 = vrot.slane %v3644_v6, 7  ;;  %v436_v32 = vld [vmem:[#allocation2 + $0xdc] sm:$0x1] }
  0xf1   : > { %v17483_v20 = vsel %vm17115_vm15, %v3628_v38, %v3632_v43  ;;  %v3652_v36 = vshll.u32 %v15417_v50, 16  ;;  %v3658_v55 = vshll.u32 %v2950_v57, 16  ;;  %v3651_v24 = vrot.slane %v3649_v11, 6  ;;  %v2047_v13 = vld [vmem:[#allocation2 + $0xd0] sm:$0x7]  ;;  %13658 = vst.msk [vmem:[#allocation3 + $0x160] sm:$0xff] %vm2550_vm9, %v16924_v17 }
  0xf2   : > { %v3619_v22 = vsel %vm17115_vm15, %v3614_v8, %v3618_v2  ;;  %v3641_v51 = vor.u32 %v3640_v18, %v3637_v15  ;;  %v1667_v59 = vrot.slane %v1665_v31, 7  ;;  %v439_v5 = vld [vmem:[#allocation2 + $0xe0] sm:$0x1]  ;;  %v442_v35 = vld [vmem:[#allocation2 + $0xe4] sm:$0x1]  ;;  %v1674_v41 = vrot.slane %v1672_v23, 7 }
  0xf3   : > { %v3654_v34 = vrot.slane %v3652_v36, 7  ;;  %v3660_v26 = vrot.slane %v3658_v55, 7  ;;  %v445_v37 = vld [vmem:[#allocation2 + $0xe8] sm:$0x1]  ;;  %v1675_v29 = vshll.u32 %v17451_v19, 16  ;;  %v4229_v46 = vcombine.low %v3619_v22, %v17483_v20  ;;  %13659 = vst.msk [vmem:[#allocation3 + $0x168] sm:$0xff] %vm2550_vm9, %v16924_v17 }
  0xf4   : > { %v3642_v39 = vrot.slane %v3641_v51, 2  ;;  %v727_v25 = vld [vmem:[#allocation2 + $0xdc] sm:$0x4]  ;;  %v730_v27 = vld [vmem:[#allocation2 + $0xe0] sm:$0x4]  ;;  %v1670_v31 = vor.u32 %v1668_v14, %v1667_v59  ;;  %v2039_v48 = vsel %vm17067_vm8, %v1656_v49, %v2038_v56  ;;  %v2042_v19 = vsel %vm17067_vm8, %v1663_v40, %v2041_v28  ;;  %13660 = vst.msk [vmem:[#allocation3 + $0x170] sm:$0xff] %vm2550_vm9, %v16924_v17 }
  0xf5   : > { %v3655_v45 = vor.u32 %v3654_v34, %v3651_v24  ;;  %v733_v50 = vld [vmem:[#allocation2 + $0xe4] sm:$0x4]  ;;  %v15358_v42 = vld.sshfl [vmem:[%s16991_s24 + $0x48] sm:$0x3 pattern:$0x76325410]  ;;  %v1677_v30 = vor.u32 %v1675_v29, %v1674_v41  ;;  %v4237_v43 = vrot.slane %v4229_v46, %v17100_v16 }
  0xf6   : > { %v3647_v54 = vsel %vm17115_vm15, %v3642_v39, %v3646_v21  ;;  %2040 = vst [vmem:[#allocation2 + $0xc4] sm:$0x7] %v2039_v48  ;;  %v416_v23 = vsel %vm16965_vm2, 0, %v415_v60  ;;  %2043 = vst [vmem:[#allocation2 + $0xc8] sm:$0x7] %v2042_v19  ;;  %v2045_v14 = vsel %vm17067_vm8, %v1670_v31, %v2044_v47  ;;  %v707_v49 = vsel %vm16979_vm6, 0, %v706_v62 }
  0xf7   : > { %v17503_v52 = vld.sshfl [vmem:[%s16991_s24 + $0x4a] sm:$0x3 pattern:$0x76325410]  ;;  %v3656_v7 = vrot.slane %v3655_v45, 2  ;;  %v437_v53 = vsel %vm16965_vm2, 0, %v436_v32  ;;  %v2048_v58 = vsel %vm17067_vm8, %v1677_v30, %v2047_v13 }
  0xf8   : > { %417 = vst [vmem:[#allocation2 + $0xc0] sm:$0x1] %v416_v23  ;;  %v736_v57 = vld [vmem:[#allocation2 + $0xe8] sm:$0x4]  ;;  %2046 = vst [vmem:[#allocation2 + $0xcc] sm:$0x7] %v2045_v14 }
  0xf9   : > { %708 = vst [vmem:[#allocation2 + $0xc0] sm:$0x4] %v707_v49  ;;  %438 = vst [vmem:[#allocation2 + $0xdc] sm:$0x1] %v437_v53  ;;  %v440_v44 = vsel %vm16965_vm2, 0, %v439_v5  ;;  %v443_v63 = vsel %vm16965_vm2, 0, %v442_v35  ;;  %v3661_v1 = vsel %vm17115_vm15, %v3656_v7, %v3660_v26 }
  0xfa   : > { %v446_v61 = vsel %vm16965_vm2, 0, %v445_v37  ;;  %2049 = vst [vmem:[#allocation2 + $0xd0] sm:$0x7] %v2048_v58  ;;  %441 = vst [vmem:[#allocation2 + $0xe0] sm:$0x1] %v440_v44  ;;  %v728_v3 = vsel %vm16979_vm6, 0, %v727_v25  ;;  %v4230_v38 = vcombine.low %v3647_v54, %v3661_v1 }
  0xfb   : > { %444 = vst [vmem:[#allocation2 + $0xe4] sm:$0x1] %v443_v63  ;;  %447 = vst [vmem:[#allocation2 + $0xe8] sm:$0x1] %v446_v61  ;;  %v731_v4 = vsel %vm16979_vm6, 0, %v730_v27  ;;  %v734_v2 = vsel %vm16979_vm6, 0, %v733_v50 }
  0xfc   : > { %729 = vst [vmem:[#allocation2 + $0xdc] sm:$0x4] %v728_v3  ;;  %732 = vst [vmem:[#allocation2 + $0xe0] sm:$0x4] %v731_v4  ;;  %v737_v6 = vsel %vm16979_vm6, 0, %v736_v57  ;;  %v1679_v15 = vshrl.u32 %v15358_v42, 16  ;;  %v4244_v20 = vrot.slane %v4230_v38, %v17100_v16 }
  0xfd   : > { %735 = vst [vmem:[#allocation2 + $0xe4] sm:$0x4] %v734_v2  ;;  %v17531_v8 = vld.sshfl [vmem:[%s16991_s24 + $0x4c] sm:$0x3 pattern:$0x76325410] }
  0xfe   : > { %738 = vst [vmem:[#allocation2 + $0xe8] sm:$0x4] %v737_v6  ;;  %v1682_v18 = vshll.u32 %v15358_v42, 16  ;;  %v1686_v11 = vshrl.u32 %v17503_v52, 16  ;;  %v1681_v21 = vrot.slane %v1679_v15, 7  ;;  %v1689_v36 = vshll.u32 %v17503_v52, 16 }
  0xff   : > { %v1693_v55 = vshrl.u32 %v17531_v8, 16  ;;  %v15419_v56 = vld.sshfl [vmem:[#allocation2 + $0xc4] sm:$0x13 pattern:$0x76325410]  ;;  %v4245_v60 = vcombine.low %v4237_v43, %v4244_v20  ;;  %13661 = vst.msk [vmem:[#allocation3 + $0x178] sm:$0xff] %vm2550_vm9, %v16924_v17 }
 0x100   : > { %v16836_v22 = vld.sshfl [vmem:[#allocation2 + $0xc4] sm:$0xf pattern:$0x76325410]  ;;  %v3677_v51 = vshrl.u32 %v15419_v56, 16  ;;  %v3680_v24 = vshll.u32 %v15419_v56, 16  ;;  %v2966_v28 = vcombine.high %v15419_v56, %v15419_v56  ;;  %v1684_v5 = vor.u32 %v1682_v18, %v1681_v21 }
 0x101   : > { %v15418_v12 = vld.sshfl [vmem:[#allocation2 + $0xc0] sm:$0x13 pattern:$0x76325410]  ;;  %4396 = vrot.lane.b32.xlu1 %v4245_v60, %s16926_s25  ;;  %v1688_v1 = vrot.slane %v1686_v11, 7  ;;  %v1695_v18 = vrot.slane %v1693_v55, 7 }
 0x102   : > { %v16837_v47 = vld.sshfl [vmem:[#allocation2 + $0xcc] sm:$0xf pattern:$0x76325410]  ;;  %v2958_v62 = vcombine.high %v15418_v12, %v15418_v12  ;;  %v3663_v32 = vshrl.u32 %v15418_v12, 16  ;;  %v3666_v34 = vshll.u32 %v15418_v12, 16 }
 0x103   : > { %v15420_v26 = vld.sshfl [vmem:[#allocation2 + $0xc8] sm:$0x13 pattern:$0x76325410]  ;;  %v3679_v59 = vrot.slane %v3677_v51, 6  ;;  %v3682_v13 = vrot.slane %v3680_v24, 7  ;;  %v5934_v45 = vcombine.low %v16836_v22, %v16837_v47  ;;  %v1691_v22 = vor.u32 %v1689_v36, %v1688_v1 }
 0x104   : > { %v15421_v35 = vld.sshfl [vmem:[#allocation2 + $0xcc] sm:$0x13 pattern:$0x76325410]  ;;  %v2974_v37 = vcombine.high %v15420_v26, %v15420_v26  ;;  %v3665_v39 = vrot.slane %v3663_v32, 6  ;;  %v3668_v40 = vrot.slane %v3666_v34, 7 }
 0x105   : > { %v2982_v41 = vcombine.high %v15421_v35, %v15421_v35  ;;  %v3672_v29 = vshll.u32 %v2958_v62, 16  ;;  %v3683_v25 = vor.u32 %v3682_v13, %v3679_v59  ;;  %v3686_v27 = vshll.u32 %v2966_v28, 16  ;;  %v15361_v19 = vld.sshfl [vmem:[%s16991_s24 + $0x4e] sm:$0x3 pattern:$0x76325410]  ;;  %6070 = vrot.lane.b32.xlu0 %v5934_v45, %s16926_s25 }
 0x106   : > { %v3669_v46 = vor.u32 %v3668_v40, %v3665_v39  ;;  %v3691_v31 = vshrl.u32 %v15420_v26, 16  ;;  %v3694_v48 = vshll.u32 %v15420_v26, 16  ;;  %v3700_v30 = vshll.u32 %v2974_v37, 16  ;;  %v2050_v3 = vld [vmem:[#allocation2 + $0xdc] sm:$0x7]  ;;  %13662 = vst.msk [vmem:[#allocation3 + $0x1e0] sm:$0xff] %vm2550_vm9, %v16924_v17 }
 0x107   : > { %v3674_v50 = vrot.slane %v3672_v29, 7  ;;  %v3684_v42 = vrot.slane %v3683_v25, 2  ;;  %v3688_v54 = vrot.slane %v3686_v27, 7  ;;  %v3705_v14 = vshrl.u32 %v15421_v35, 16  ;;  %v433_v4 = vld [vmem:[#allocation2 + $0xd8] sm:$0x1] }
 0x108   : > { %v3670_v23 = vrot.slane %v3669_v46, 2  ;;  %v3693_v52 = vrot.slane %v3691_v31, 6  ;;  %v3696_v7 = vrot.slane %v3694_v48, 7  ;;  %v3702_v53 = vrot.slane %v3700_v30, 7  ;;  %v724_v2 = vld [vmem:[#allocation2 + $0xd8] sm:$0x4] }
 0x109   : > { %v3689_v49 = vsel %vm17115_vm15, %v3684_v42, %v3688_v54  ;;  %v3708_v57 = vshll.u32 %v15421_v35, 16  ;;  %v3714_v58 = vshll.u32 %v2982_v41, 16  ;;  %v3707_v61 = vrot.slane %v3705_v14, 6  ;;  %v454_v38 = vld [vmem:[#allocation2 + $0xf4] sm:$0x1]  ;;  %13663 = vst.msk [vmem:[#allocation3 + $0x1e8] sm:$0xff] %vm2550_vm9, %v16924_v17 }
 0x10a   : > { %v3675_v44 = vsel %vm17115_vm15, %v3670_v23, %v3674_v50  ;;  %v3697_v63 = vor.u32 %v3696_v7, %v3693_v52  ;;  %v2053_v20 = vld [vmem:[#allocation2 + $0xe0] sm:$0x7]  ;;  %v457_v21 = vld [vmem:[#allocation2 + $0xf8] sm:$0x1]  ;;  %v460_v56 = vld [vmem:[#allocation2 + $0xfc] sm:$0x1]  ;;  %v2051_v55 = vsel %vm17067_vm8, %v1684_v5, %v2050_v3 }
 0x10b   : > { %v3710_v43 = vrot.slane %v3708_v57, 7  ;;  %v3716_v6 = vrot.slane %v3714_v58, 7  ;;  %v4246_v15 = vcombine.low %v3675_v44, %v3689_v49  ;;  %v1696_v51 = vshll.u32 %v17531_v8, 16  ;;  %v2056_v12 = vld [vmem:[#allocation2 + $0xe4] sm:$0x7]  ;;  %13664 = vst.msk [vmem:[#allocation3 + $0x1f0] sm:$0xff] %vm2550_vm9, %v16924_v17 }
 0x10c   : > { %v3698_v60 = vrot.slane %v3697_v63, 2  ;;  %v1700_v24 = vshrl.u32 %v15361_v19, 16  ;;  %v463_v11 = vld [vmem:[#allocation2 + $0x100] sm:$0x1]  ;;  %v745_v28 = vld [vmem:[#allocation2 + $0xf4] sm:$0x4]  ;;  %v2054_v35 = vsel %vm17067_vm8, %v1691_v22, %v2053_v20 }
 0x10d   : > { %v748_v47 = vld [vmem:[#allocation2 + $0xf8] sm:$0x4]  ;;  %v3711_v62 = vor.u32 %v3710_v43, %v3707_v61  ;;  %v4254_v32 = vrot.slane %v4246_v15, %v17100_v16  ;;  %v1703_v34 = vshll.u32 %v15361_v19, 16  ;;  %v2059_v26 = vld [vmem:[#allocation2 + $0xe8] sm:$0x7]  ;;  %v1698_v36 = vor.u32 %v1696_v51, %v1695_v18  ;;  %13665 = vst.msk [vmem:[#allocation3 + $0x1f8] sm:$0xff] %vm2550_vm9, %v16924_v17 }
 0x10e   : > { %v751_v59 = vld [vmem:[#allocation2 + $0xfc] sm:$0x4]  ;;  %v3703_v8 = vsel %vm17115_vm15, %v3698_v60, %v3702_v53  ;;  %v1702_v13 = vrot.slane %v1700_v24, 7  ;;  %2052 = vst [vmem:[#allocation2 + $0xdc] sm:$0x7] %v2051_v55  ;;  %v434_v5 = vsel %vm16965_vm2, 0, %v433_v4 }
 0x10f   : > { %v15362_v37 = vld.sshfl [vmem:[%s16991_s24 + $0x50] sm:$0x3 pattern:$0x76325410]  ;;  %v3712_v40 = vrot.slane %v3711_v62, 2  ;;  %v725_v41 = vsel %vm16979_vm6, 0, %v724_v2  ;;  %v2057_v46 = vsel %vm17067_vm8, %v1698_v36, %v2056_v12 }
 0x110   : > { %v17554_v39 = vld.sshfl [vmem:[%s16991_s24 + $0x52] sm:$0x3 pattern:$0x76325410]  ;;  %2055 = vst [vmem:[#allocation2 + $0xe0] sm:$0x7] %v2054_v35  ;;  %v1705_v45 = vor.u32 %v1703_v34, %v1702_v13 }
 0x111   : > { %v455_v29 = vsel %vm16965_vm2, 0, %v454_v38  ;;  %v754_v25 = vld [vmem:[#allocation2 + $0x100] sm:$0x4]  ;;  %435 = vst [vmem:[#allocation2 + $0xd8] sm:$0x1] %v434_v5  ;;  %v458_v31 = vsel %vm16965_vm2, 0, %v457_v21  ;;  %v3717_v42 = vsel %vm17115_vm15, %v3712_v40, %v3716_v6 }
 0x112   : > { %v17563_v27 = vld.sshfl [vmem:[%s16991_s24 + $0x54] sm:$0x3 pattern:$0x76325410]  ;;  %726 = vst [vmem:[#allocation2 + $0xd8] sm:$0x4] %v725_v41  ;;  %v4247_v23 = vcombine.low %v3703_v8, %v3717_v42  ;;  %v2060_v52 = vsel %vm17067_vm8, %v1705_v45, %v2059_v26 }
 0x113   : > { %456 = vst [vmem:[#allocation2 + $0xf4] sm:$0x1] %v455_v29  ;;  %v461_v48 = vsel %vm16965_vm2, 0, %v460_v56  ;;  %2058 = vst [vmem:[#allocation2 + $0xe4] sm:$0x7] %v2057_v46  ;;  %v464_v54 = vsel %vm16965_vm2, 0, %v463_v11 }
 0x114   : > { %v17572_v50 = vld.sshfl [vmem:[%s16991_s24 + $0x56] sm:$0x3 pattern:$0x76325410]  ;;  %459 = vst [vmem:[#allocation2 + $0xf8] sm:$0x1] %v458_v31  ;;  %v4261_v44 = vrot.slane %v4247_v23, %v17100_v16 }
 0x115   : > { %462 = vst [vmem:[#allocation2 + $0xfc] sm:$0x1] %v461_v48  ;;  %v746_v30 = vsel %vm16979_vm6, 0, %v745_v28  ;;  %v749_v19 = vsel %vm16979_vm6, 0, %v748_v47  ;;  %465 = vst [vmem:[#allocation2 + $0x100] sm:$0x1] %v464_v54 }
 0x116   : > { %747 = vst [vmem:[#allocation2 + $0xf4] sm:$0x4] %v746_v30  ;;  %750 = vst [vmem:[#allocation2 + $0xf8] sm:$0x4] %v749_v19  ;;  %v752_v7 = vsel %vm16979_vm6, 0, %v751_v59  ;;  %v755_v14 = vsel %vm16979_vm6, 0, %v754_v25  ;;  %v4262_v4 = vcombine.low %v4254_v32, %v4261_v44 }
 0x117   : > { %2061 = vst [vmem:[#allocation2 + $0xe8] sm:$0x7] %v2060_v52  ;;  %753 = vst [vmem:[#allocation2 + $0xfc] sm:$0x4] %v752_v7  ;;  %v1707_v49 = vshrl.u32 %v15362_v37, 16  ;;  %v1710_v53 = vshll.u32 %v15362_v37, 16 }
 0x118   : > { %756 = vst [vmem:[#allocation2 + $0x100] sm:$0x4] %v755_v14  ;;  %v1714_v57 = vshrl.u32 %v17554_v39, 16  ;;  %v1717_v58 = vshll.u32 %v17554_v39, 16  ;;  %v1721_v63 = vshrl.u32 %v17563_v27, 16  ;;  %v1724_v61 = vshll.u32 %v17563_v27, 16  ;;  %4398 = vrot.lane.b32.xlu1 %v4262_v4, %s16926_s25 }
 0x119   : > { %v1728_v1 = vshrl.u32 %v17572_v50, 16  ;;  %v15423_v3 = vld.sshfl [vmem:[#allocation2 + $0xdc] sm:$0x13 pattern:$0x76325410]  ;;  %v1709_v18 = vrot.slane %v1707_v49, 7 }
 0x11a   : > { %v16838_v2 = vld.sshfl [vmem:[#allocation2 + $0xdc] sm:$0xf pattern:$0x76325410]  ;;  %v3733_v38 = vshrl.u32 %v15423_v3, 16  ;;  %v3736_v43 = vshll.u32 %v15423_v3, 16  ;;  %v2998_v15 = vcombine.high %v15423_v3, %v15423_v3 }
 0x11b   : > { %v15422_v6 = vld.sshfl [vmem:[#allocation2 + $0xd8] sm:$0x13 pattern:$0x76325410]  ;;  %v1716_v20 = vrot.slane %v1714_v57, 7  ;;  %v1712_v12 = vor.u32 %v1710_v53, %v1709_v18  ;;  %v1723_v52 = vrot.slane %v1721_v63, 7 }
 0x11c   : > { %v15424_v21 = vld.sshfl [vmem:[#allocation2 + $0xe0] sm:$0x13 pattern:$0x76325410]  ;;  %v2990_v56 = vcombine.high %v15422_v6, %v15422_v6  ;;  %v3719_v51 = vshrl.u32 %v15422_v6, 16  ;;  %v3722_v24 = vshll.u32 %v15422_v6, 16 }
 0x11d   : > { %v15425_v60 = vld.sshfl [vmem:[#allocation2 + $0xe4] sm:$0x13 pattern:$0x76325410]  ;;  %v3006_v22 = vcombine.high %v15424_v21, %v15424_v21  ;;  %v3735_v62 = vrot.slane %v3733_v38, 6  ;;  %v1719_v32 = vor.u32 %v1717_v58, %v1716_v20  ;;  %v3738_v26 = vrot.slane %v3736_v43, 7 }
 0x11e   : > { %v16839_v11 = vld.sshfl [vmem:[#allocation2 + $0xe4] sm:$0xf pattern:$0x76325410]  ;;  %v3014_v28 = vcombine.high %v15425_v60, %v15425_v60  ;;  %v3728_v47 = vshll.u32 %v2990_v56, 16  ;;  %v3721_v34 = vrot.slane %v3719_v51, 6  ;;  %v1726_v18 = vor.u32 %v1724_v61, %v1723_v52 }
 0x11f   : > { %v3724_v55 = vrot.slane %v3722_v24, 7  ;;  %v3742_v59 = vshll.u32 %v2998_v15, 16  ;;  %v3747_v36 = vshrl.u32 %v15424_v21, 16  ;;  %v3750_v13 = vshll.u32 %v15424_v21, 16  ;;  %v2062_v42 = vld [vmem:[#allocation2 + $0xf4] sm:$0x7] }
 0x120   : > { %v3730_v8 = vrot.slane %v3728_v47, 7  ;;  %v3739_v37 = vor.u32 %v3738_v26, %v3735_v62  ;;  %v3756_v40 = vshll.u32 %v3006_v22, 16  ;;  %v5951_v5 = vcombine.low %v16838_v2, %v16839_v11  ;;  %v451_v54 = vld [vmem:[#allocation2 + $0xf0] sm:$0x1]  ;;  %v2065_v7 = vld [vmem:[#allocation2 + $0xf8] sm:$0x7] }
 0x121   : > { %v3725_v35 = vor.u32 %v3724_v55, %v3721_v34  ;;  %v3744_v39 = vrot.slane %v3742_v59, 7  ;;  %v3749_v41 = vrot.slane %v3747_v36, 6  ;;  %v3752_v29 = vrot.slane %v3750_v13, 7  ;;  %v742_v14 = vld [vmem:[#allocation2 + $0xf0] sm:$0x4]  ;;  %13667 = vst.msk [vmem:[#allocation3 + $0x20] sm:$0xff] %vm2550_vm9, %v16924_v17 }
 0x122   : > { %v3761_v25 = vshrl.u32 %v15425_v60, 16  ;;  %v3740_v46 = vrot.slane %v3739_v37, 2  ;;  %v3758_v31 = vrot.slane %v3756_v40, 7  ;;  %v3764_v48 = vshll.u32 %v15425_v60, 16  ;;  %6072 = vrot.lane.b32.xlu0 %v5951_v5, %s16926_s25  ;;  %v472_v49 = vld [vmem:[#allocation2 + $0x10c] sm:$0x1] }
 0x123   : > { %v3726_v45 = vrot.slane %v3725_v35, 2  ;;  %v3753_v30 = vor.u32 %v3752_v29, %v3749_v41  ;;  %v3770_v23 = vshll.u32 %v3014_v28, 16  ;;  %v1730_v44 = vrot.slane %v1728_v1, 7  ;;  %v2068_v3 = vld [vmem:[#allocation2 + $0xfc] sm:$0x7]  ;;  %13668 = vst.msk [vmem:[#allocation3 + $0x40] sm:$0xff] %vm2550_vm9, %v16924_v17 }
 0x124   : > { %v3763_v19 = vrot.slane %v3761_v25, 6  ;;  %v3745_v57 = vsel %vm17115_vm15, %v3740_v46, %v3744_v39  ;;  %v3766_v58 = vrot.slane %v3764_v48, 7  ;;  %v475_v4 = vld [vmem:[#allocation2 + $0x110] sm:$0x1]  ;;  %v478_v2 = vld [vmem:[#allocation2 + $0x114] sm:$0x1]  ;;  %v2063_v22 = vsel %vm17067_vm8, %v1712_v12, %v2062_v42 }
 0x125   : > { %v3731_v53 = vsel %vm17115_vm15, %v3726_v45, %v3730_v8  ;;  %v481_v38 = vld [vmem:[#allocation2 + $0x118] sm:$0x1]  ;;  %v763_v43 = vld [vmem:[#allocation2 + $0x10c] sm:$0x4]  ;;  %v3754_v6 = vrot.slane %v3753_v30, 2  ;;  %v3772_v15 = vrot.slane %v3770_v23, 7  ;;  %v2066_v51 = vsel %vm17067_vm8, %v1719_v32, %v2065_v7 }
 0x126   : > { %v4263_v63 = vcombine.low %v3731_v53, %v3745_v57  ;;  %v2071_v20 = vld [vmem:[#allocation2 + $0x100] sm:$0x7]  ;;  %v766_v21 = vld [vmem:[#allocation2 + $0x110] sm:$0x4]  ;;  %v769_v56 = vld [vmem:[#allocation2 + $0x114] sm:$0x4]  ;;  %v3767_v60 = vor.u32 %v3766_v58, %v3763_v19  ;;  %v2069_v11 = vsel %vm17067_vm8, %v1726_v18, %v2068_v3 }
 0x127   : > { %v1731_v1 = vshll.u32 %v17572_v50, 16  ;;  %v17608_v24 = vld.sshfl [vmem:[%s16991_s24 + $0x58] sm:$0x3 pattern:$0x76325410]  ;;  %v3759_v27 = vsel %vm17115_vm15, %v3754_v6, %v3758_v31  ;;  %v452_v50 = vsel %vm16965_vm2, 0, %v451_v54 }
 0x128   : > { %v4271_v61 = vrot.slane %v4263_v63, %v17100_v16  ;;  %2064 = vst [vmem:[#allocation2 + $0xf4] sm:$0x7] %v2063_v22  ;;  %2067 = vst [vmem:[#allocation2 + $0xf8] sm:$0x7] %v2066_v51  ;;  %v3768_v47 = vrot.slane %v3767_v60, 2  ;;  %v743_v32 = vsel %vm16979_vm6, 0, %v742_v14 }
 0x129   : > { %v17618_v28 = vld.sshfl [vmem:[%s16991_s24 + $0x5a] sm:$0x3 pattern:$0x76325410]  ;;  %v1733_v62 = vor.u32 %v1731_v1, %v1730_v44  ;;  %2070 = vst [vmem:[#allocation2 + $0xfc] sm:$0x7] %v2069_v11 }
 0x12a   : > { %v17621_v12 = vld.sshfl [vmem:[%s16991_s24 + $0x5c] sm:$0x3 pattern:$0x76325410]  ;;  %453 = vst [vmem:[#allocation2 + $0xf0] sm:$0x1] %v452_v50  ;;  %v3773_v13 = vsel %vm17115_vm15, %v3768_v47, %v3772_v15 }
 0x12b   : > { %v473_v34 = vsel %vm16965_vm2, 0, %v472_v49  ;;  %v772_v55 = vld [vmem:[#allocation2 + $0x118] sm:$0x4]  ;;  %744 = vst [vmem:[#allocation2 + $0xf0] sm:$0x4] %v743_v32  ;;  %v476_v26 = vsel %vm16965_vm2, 0, %v475_v4  ;;  %v2072_v35 = vsel %vm17067_vm8, %v1733_v62, %v2071_v20  ;;  %v4264_v5 = vcombine.low %v3759_v27, %v3773_v13 }
 0x12c   : > { %474 = vst [vmem:[#allocation2 + $0x10c] sm:$0x1] %v473_v34  ;;  %v479_v59 = vsel %vm16965_vm2, 0, %v478_v2  ;;  %v482_v8 = vsel %vm16965_vm2, 0, %v481_v38  ;;  %v764_v36 = vsel %vm16979_vm6, 0, %v763_v43  ;;  %v767_v37 = vsel %vm16979_vm6, 0, %v766_v21 }
 0x12d   : > { %477 = vst [vmem:[#allocation2 + $0x110] sm:$0x1] %v476_v26  ;;  %480 = vst [vmem:[#allocation2 + $0x114] sm:$0x1] %v479_v59  ;;  %v770_v39 = vsel %vm16979_vm6, 0, %v769_v56  ;;  %v773_v41 = vsel %vm16979_vm6, 0, %v772_v55  ;;  %v4278_v42 = vrot.slane %v4264_v5, %v17100_v16 }
 0x12e   : > { %483 = vst [vmem:[#allocation2 + $0x118] sm:$0x1] %v482_v8  ;;  %765 = vst [vmem:[#allocation2 + $0x10c] sm:$0x4] %v764_v36  ;;  %v1735_v29 = vshrl.u32 %v17608_v24, 16  ;;  %v1738_v25 = vshll.u32 %v17608_v24, 16 }
 0x12f   : > { %v17644_v40 = vld.sshfl [vmem:[%s16991_s24 + $0x5e] sm:$0x3 pattern:$0x76325410]  ;;  %2073 = vst [vmem:[#allocation2 + $0x100] sm:$0x7] %v2072_v35  ;;  %v4279_v52 = vcombine.low %v4271_v61, %v4278_v42 }
 0x130   : > { %768 = vst [vmem:[#allocation2 + $0x110] sm:$0x4] %v767_v37  ;;  %771 = vst [vmem:[#allocation2 + $0x114] sm:$0x4] %v770_v39  ;;  %v1742_v45 = vshrl.u32 %v17618_v28, 16  ;;  %v1745_v46 = vshll.u32 %v17618_v28, 16 }
 0x131   : > { %774 = vst [vmem:[#allocation2 + $0x118] sm:$0x4] %v773_v41  ;;  %v1749_v31 = vshrl.u32 %v17621_v12, 16  ;;  %v1752_v48 = vshll.u32 %v17621_v12, 16  ;;  %v1737_v54 = vrot.slane %v1735_v29, 7  ;;  %v1756_v30 = vshrl.u32 %v17644_v40, 16  ;;  %4400 = vrot.lane.b32.xlu1 %v4279_v52, %s16926_s25 }
 0x132   : > { %v1759_v19 = vshll.u32 %v17644_v40, 16  ;;  %v16840_v23 = vld.sshfl [vmem:[#allocation2 + $0xf4] sm:$0xf pattern:$0x76325410]  ;;  %v1744_v39 = vrot.slane %v1742_v45, 7 }
 0x133   : > { %v15427_v7 = vld.sshfl [vmem:[#allocation2 + $0xf4] sm:$0x13 pattern:$0x76325410]  ;;  %v1740_v20 = vor.u32 %v1738_v25, %v1737_v54  ;;  %v469_v36 = vld [vmem:[#allocation2 + $0x108] sm:$0x1] }
 0x134   : > { %v15426_v14 = vld.sshfl [vmem:[#allocation2 + $0xf0] sm:$0x13 pattern:$0x76325410]  ;;  %v3789_v49 = vshrl.u32 %v15427_v7, 16  ;;  %v3792_v53 = vshll.u32 %v15427_v7, 16  ;;  %v3030_v44 = vcombine.high %v15427_v7, %v15427_v7 }
 0x135   : > { %v15428_v57 = vld.sshfl [vmem:[#allocation2 + $0xf8] sm:$0x13 pattern:$0x76325410]  ;;  %v3022_v58 = vcombine.high %v15426_v14, %v15426_v14  ;;  %v3775_v3 = vshrl.u32 %v15426_v14, 16  ;;  %v3778_v4 = vshll.u32 %v15426_v14, 16 }
 0x136   : > { %v16841_v2 = vld.sshfl [vmem:[#allocation2 + $0xfc] sm:$0xf pattern:$0x76325410]  ;;  %v3038_v38 = vcombine.high %v15428_v57, %v15428_v57  ;;  %v3791_v43 = vrot.slane %v3789_v49, 6  ;;  %v3794_v6 = vrot.slane %v3792_v53, 7 }
 0x137   : > { %v15429_v15 = vld.sshfl [vmem:[#allocation2 + $0xfc] sm:$0x13 pattern:$0x76325410]  ;;  %v3777_v63 = vrot.slane %v3775_v3, 6  ;;  %v3780_v18 = vrot.slane %v3778_v4, 7  ;;  %v5968_v27 = vcombine.low %v16840_v23, %v16841_v2 }
 0x138   : > { %v3046_v21 = vcombine.high %v15429_v15, %v15429_v15  ;;  %v3784_v56 = vshll.u32 %v3022_v58, 16  ;;  %v3795_v60 = vor.u32 %v3794_v6, %v3791_v43  ;;  %v3798_v22 = vshll.u32 %v3030_v44, 16  ;;  %v2074_v5 = vld [vmem:[#allocation2 + $0x10c] sm:$0x7]  ;;  %v2077_v41 = vld [vmem:[#allocation2 + $0x110] sm:$0x7] }
 0x139   : > { %v3781_v1 = vor.u32 %v3780_v18, %v3777_v63  ;;  %v3803_v51 = vshrl.u32 %v15428_v57, 16  ;;  %v3806_v24 = vshll.u32 %v15428_v57, 16  ;;  %v3812_v50 = vshll.u32 %v3038_v38, 16  ;;  %6074 = vrot.lane.b32.xlu0 %v5968_v27, %s16926_s25  ;;  %v760_v29 = vld [vmem:[#allocation2 + $0x108] sm:$0x4]  ;;  %13671 = vst.msk [vmem:[#allocation3 + $0xa0] sm:$0xff] %vm2550_vm9, %v16924_v17 }
 0x13a   : > { %v3786_v61 = vrot.slane %v3784_v56, 7  ;;  %v3796_v11 = vrot.slane %v3795_v60, 2  ;;  %v3800_v62 = vrot.slane %v3798_v22, 7  ;;  %v3817_v26 = vshrl.u32 %v15429_v15, 16  ;;  %v490_v25 = vld [vmem:[#allocation2 + $0x124] sm:$0x1] }
 0x13b   : > { %v3782_v47 = vrot.slane %v3781_v1, 2  ;;  %v3805_v32 = vrot.slane %v3803_v51, 6  ;;  %v3808_v34 = vrot.slane %v3806_v24, 7  ;;  %v3814_v55 = vrot.slane %v3812_v50, 7  ;;  %v493_v42 = vld [vmem:[#allocation2 + $0x128] sm:$0x1] }
 0x13c   : > { %v3820_v59 = vshll.u32 %v15429_v15, 16  ;;  %v3826_v8 = vshll.u32 %v3046_v21, 16  ;;  %v3801_v35 = vsel %vm17115_vm15, %v3796_v11, %v3800_v62  ;;  %v3819_v54 = vrot.slane %v3817_v26, 6  ;;  %v2080_v14 = vld [vmem:[#allocation2 + $0x114] sm:$0x7]  ;;  %13672 = vst.msk [vmem:[#allocation3 + $0xc0] sm:$0xff] %vm2550_vm9, %v16924_v17 }
 0x13d   : > { %v3787_v13 = vsel %vm17115_vm15, %v3782_v47, %v3786_v61  ;;  %v3809_v37 = vor.u32 %v3808_v34, %v3805_v32  ;;  %v496_v49 = vld [vmem:[#allocation2 + $0x12c] sm:$0x1]  ;;  %v499_v53 = vld [vmem:[#allocation2 + $0x130] sm:$0x1]  ;;  %v1747_v58 = vor.u32 %v1745_v46, %v1744_v39  ;;  %v1751_v45 = vrot.slane %v1749_v31, 7  ;;  %13675 = vst.msk [vmem:[#allocation3 + $0x120] sm:$0xff] %vm2550_vm9, %v16924_v17 }
 0x13e   : > { %v3822_v23 = vrot.slane %v3820_v59, 7  ;;  %v3828_v52 = vrot.slane %v3826_v8, 7  ;;  %v4280_v7 = vcombine.low %v3787_v13, %v3801_v35  ;;  %v1758_v44 = vrot.slane %v1756_v30, 7  ;;  %v2083_v3 = vld [vmem:[#allocation2 + $0x118] sm:$0x7]  ;;  %13676 = vst.msk [vmem:[#allocation3 + $0x140] sm:$0xff] %vm2550_vm9, %v16924_v17 }
 0x13f   : > { %v3810_v57 = vrot.slane %v3809_v37, 2  ;;  %v781_v4 = vld [vmem:[#allocation2 + $0x124] sm:$0x4]  ;;  %v784_v2 = vld [vmem:[#allocation2 + $0x128] sm:$0x4]  ;;  %v2075_v6 = vsel %vm17067_vm8, %v1740_v20, %v2074_v5  ;;  %v470_v15 = vsel %vm16965_vm2, 0, %v469_v36  ;;  %v1754_v31 = vor.u32 %v1752_v48, %v1751_v45 }
 0x140   : > { %v3823_v38 = vor.u32 %v3822_v23, %v3819_v54  ;;  %v4288_v43 = vrot.slane %v4280_v7, %v17100_v16  ;;  %v15370_v28 = vld.sshfl [vmem:[%s16991_s24 + $0x60] sm:$0x3 pattern:$0x76325410]  ;;  %v1761_v30 = vor.u32 %v1759_v19, %v1758_v44  ;;  %2076 = vst [vmem:[#allocation2 + $0x10c] sm:$0x7] %v2075_v6  ;;  %v2078_v63 = vsel %vm17067_vm8, %v1747_v58, %v2077_v41 }
 0x141   : > { %v3815_v46 = vsel %vm17115_vm15, %v3810_v57, %v3814_v55  ;;  %471 = vst [vmem:[#allocation2 + $0x108] sm:$0x1] %v470_v15  ;;  %v787_v18 = vld [vmem:[#allocation2 + $0x12c] sm:$0x4]  ;;  %2079 = vst [vmem:[#allocation2 + $0x110] sm:$0x7] %v2078_v63  ;;  %v2081_v19 = vsel %vm17067_vm8, %v1754_v31, %v2080_v14 }
 0x142   : > { %v15371_v20 = vld.sshfl [vmem:[%s16991_s24 + $0x62] sm:$0x3 pattern:$0x76325410]  ;;  %v3824_v56 = vrot.slane %v3823_v38, 2  ;;  %v761_v60 = vsel %vm16979_vm6, 0, %v760_v29  ;;  %v2084_v1 = vsel %vm17067_vm8, %v1761_v30, %v2083_v3 }
 0x143   : > { %v15372_v21 = vld.sshfl [vmem:[%s16991_s24 + $0x64] sm:$0x3 pattern:$0x76325410]  ;;  %v491_v12 = vsel %vm16965_vm2, 0, %v490_v25  ;;  %v494_v40 = vsel %vm16965_vm2, 0, %v493_v42 }
 0x144   : > { %v790_v48 = vld [vmem:[#allocation2 + $0x130] sm:$0x4]  ;;  %762 = vst [vmem:[#allocation2 + $0x108] sm:$0x4] %v761_v60  ;;  %492 = vst [vmem:[#allocation2 + $0x124] sm:$0x1] %v491_v12  ;;  %v3829_v27 = vsel %vm17115_vm15, %v3824_v56, %v3828_v52 }
 0x145   : > { %495 = vst [vmem:[#allocation2 + $0x128] sm:$0x1] %v494_v40  ;;  %v497_v22 = vsel %vm16965_vm2, 0, %v496_v49  ;;  %v500_v51 = vsel %vm16965_vm2, 0, %v499_v53  ;;  %2082 = vst [vmem:[#allocation2 + $0x114] sm:$0x7] %v2081_v19  ;;  %v4281_v47 = vcombine.low %v3815_v46, %v3829_v27 }
 0x146   : > { %v17698_v24 = vld.sshfl [vmem:[%s16991_s24 + $0x66] sm:$0x3 pattern:$0x76325410]  ;;  %2085 = vst [vmem:[#allocation2 + $0x118] sm:$0x7] %v2084_v1 }
 0x147   : > { %498 = vst [vmem:[#allocation2 + $0x12c] sm:$0x1] %v497_v22  ;;  %501 = vst [vmem:[#allocation2 + $0x130] sm:$0x1] %v500_v51  ;;  %v782_v61 = vsel %vm16979_vm6, 0, %v781_v4  ;;  %v785_v11 = vsel %vm16979_vm6, 0, %v784_v2  ;;  %v4295_v36 = vrot.slane %v4281_v47, %v17100_v16 }
 0x148   : > { %v788_v50 = vsel %vm16979_vm6, 0, %v787_v18  ;;  %783 = vst [vmem:[#allocation2 + $0x124] sm:$0x4] %v782_v61  ;;  %786 = vst [vmem:[#allocation2 + $0x128] sm:$0x4] %v785_v11  ;;  %v791_v62 = vsel %vm16979_vm6, 0, %v790_v48 }
 0x149   : > { %789 = vst [vmem:[#allocation2 + $0x12c] sm:$0x4] %v788_v50  ;;  %v1763_v32 = vshrl.u32 %v15370_v28, 16  ;;  %v1766_v34 = vshll.u32 %v15370_v28, 16  ;;  %792 = vst [vmem:[#allocation2 + $0x130] sm:$0x4] %v791_v62  ;;  %v4296_v5 = vcombine.low %v4288_v43, %v4295_v36 }
 0x14a   : > { %v1770_v55 = vshrl.u32 %v15371_v20, 16  ;;  %v1773_v26 = vshll.u32 %v15371_v20, 16  ;;  %v1777_v59 = vshrl.u32 %v15372_v21, 16  ;;  %v1780_v8 = vshll.u32 %v15372_v21, 16  ;;  %v487_v1 = vld [vmem:[#allocation2 + $0x120] sm:$0x1] }
 0x14b   : > { %v1765_v13 = vrot.slane %v1763_v32, 7  ;;  %v1784_v35 = vshrl.u32 %v17698_v24, 16  ;;  %v1787_v37 = vshll.u32 %v17698_v24, 16  ;;  %4402 = vrot.lane.b32.xlu1 %v4296_v5, %s16926_s25  ;;  %v778_v50 = vld [vmem:[#allocation2 + $0x120] sm:$0x4]  ;;  %13679 = vst.msk [vmem:[#allocation3 + $0x1a0] sm:$0xff] %vm2550_vm9, %v16924_v17 }
 0x14c   : > { %v15431_v39 = vld.sshfl [vmem:[#allocation2 + $0x10c] sm:$0x13 pattern:$0x76325410]  ;;  %v1772_v54 = vrot.slane %v1770_v55, 7  ;;  %v1779_v23 = vrot.slane %v1777_v59, 7 }
 0x14d   : > { %v16842_v41 = vld.sshfl [vmem:[#allocation2 + $0x10c] sm:$0xf pattern:$0x76325410]  ;;  %v3845_v29 = vshrl.u32 %v15431_v39, 16  ;;  %v3848_v25 = vshll.u32 %v15431_v39, 16  ;;  %v3062_v14 = vcombine.high %v15431_v39, %v15431_v39  ;;  %v1768_v49 = vor.u32 %v1766_v34, %v1765_v13 }
 0x14e   : > { %v15430_v42 = vld.sshfl [vmem:[#allocation2 + $0x108] sm:$0x13 pattern:$0x76325410]  ;;  %v1775_v45 = vor.u32 %v1773_v26, %v1772_v54  ;;  %v1782_v44 = vor.u32 %v1780_v8, %v1779_v23  ;;  %v1786_v34 = vrot.slane %v1784_v35, 7  ;;  %13680 = vst.msk [vmem:[#allocation3 + $0x1c0] sm:$0xff] %vm2550_vm9, %v16924_v17 }
 0x14f   : > { %v16843_v52 = vld.sshfl [vmem:[#allocation2 + $0x114] sm:$0xf pattern:$0x76325410]  ;;  %v3054_v7 = vcombine.high %v15430_v42, %v15430_v42  ;;  %v3831_v57 = vshrl.u32 %v15430_v42, 16  ;;  %v3834_v58 = vshll.u32 %v15430_v42, 16 }
 0x150   : > { %v15432_v53 = vld.sshfl [vmem:[#allocation2 + $0x110] sm:$0x13 pattern:$0x76325410]  ;;  %v3847_v38 = vrot.slane %v3845_v29, 6  ;;  %v3850_v28 = vrot.slane %v3848_v25, 7  ;;  %v5985_v46 = vcombine.low %v16842_v41, %v16843_v52  ;;  %v1789_v52 = vor.u32 %v1787_v37, %v1786_v34 }
 0x151   : > { %v15433_v3 = vld.sshfl [vmem:[#allocation2 + $0x114] sm:$0x13 pattern:$0x76325410]  ;;  %v3070_v4 = vcombine.high %v15432_v53, %v15432_v53  ;;  %v3840_v2 = vshll.u32 %v3054_v7, 16  ;;  %v3833_v6 = vrot.slane %v3831_v57, 6 }
 0x152   : > { %v3078_v43 = vcombine.high %v15433_v3, %v15433_v3  ;;  %v3836_v15 = vrot.slane %v3834_v58, 7  ;;  %v3854_v30 = vshll.u32 %v3062_v14, 16  ;;  %v3859_v63 = vshrl.u32 %v15432_v53, 16  ;;  %6076 = vrot.lane.b32.xlu0 %v5985_v46, %s16926_s25  ;;  %v2086_v19 = vld [vmem:[#allocation2 + $0x124] sm:$0x7]  ;;  %13684 = vst.msk [vmem:[#allocation3 + $0x38] sm:$0xff] %vm2550_vm9, %v16924_v17 }
 0x153   : > { %v3842_v31 = vrot.slane %v3840_v2, 7  ;;  %v3851_v20 = vor.u32 %v3850_v28, %v3847_v38  ;;  %v3862_v21 = vshll.u32 %v15432_v53, 16  ;;  %v3868_v56 = vshll.u32 %v3070_v4, 16  ;;  %v2089_v11 = vld [vmem:[#allocation2 + $0x128] sm:$0x7]  ;;  %13685 = vst.msk [vmem:[#allocation3 + $0x58] sm:$0xff] %vm2550_vm9, %v16924_v17 }
 0x154   : > { %v3837_v18 = vor.u32 %v3836_v15, %v3833_v6  ;;  %v3856_v60 = vrot.slane %v3854_v30, 7  ;;  %v3861_v12 = vrot.slane %v3859_v63, 6  ;;  %v3873_v40 = vshrl.u32 %v15433_v3, 16  ;;  %v2092_v55 = vld [vmem:[#allocation2 + $0x12c] sm:$0x7]  ;;  %13688 = vst.msk [vmem:[#allocation3 + $0xb8] sm:$0xff] %vm2550_vm9, %v16924_v17 }
 0x155   : > { %v3876_v48 = vshll.u32 %v15433_v3, 16  ;;  %v3852_v51 = vrot.slane %v3851_v20, 2  ;;  %v3864_v27 = vrot.slane %v3862_v21, 7  ;;  %v3870_v61 = vrot.slane %v3868_v56, 7  ;;  %v508_v26 = vld [vmem:[#allocation2 + $0x13c] sm:$0x1] }
 0x156   : > { %v3838_v22 = vrot.slane %v3837_v18, 2  ;;  %v3875_v47 = vrot.slane %v3873_v40, 6  ;;  %v3882_v32 = vshll.u32 %v3078_v43, 16  ;;  %v511_v59 = vld [vmem:[#allocation2 + $0x140] sm:$0x1]  ;;  %v2087_v5 = vsel %vm17067_vm8, %v1768_v49, %v2086_v19  ;;  %13689 = vst.msk [vmem:[#allocation3 + $0xd8] sm:$0xff] %vm2550_vm9, %v16924_v17 }
 0x157   : > { %v3878_v62 = vrot.slane %v3876_v48, 7  ;;  %v514_v8 = vld [vmem:[#allocation2 + $0x144] sm:$0x1]  ;;  %v3857_v13 = vsel %vm17115_vm15, %v3852_v51, %v3856_v60  ;;  %v3865_v39 = vor.u32 %v3864_v27, %v3861_v12  ;;  %v2095_v41 = vld [vmem:[#allocation2 + $0x130] sm:$0x7]  ;;  %v2090_v49 = vsel %vm17067_vm8, %v1775_v45, %v2089_v11  ;;  %13692 = vst.msk [vmem:[#allocation3 + $0x138] sm:$0xff] %vm2550_vm9, %v16924_v17 }
 0x158   : > { %v3843_v36 = vsel %vm17115_vm15, %v3838_v22, %v3842_v31  ;;  %v517_v29 = vld [vmem:[#allocation2 + $0x148] sm:$0x1]  ;;  %v799_v25 = vld [vmem:[#allocation2 + $0x13c] sm:$0x4]  ;;  %v802_v35 = vld [vmem:[#allocation2 + $0x140] sm:$0x4]  ;;  %v2093_v58 = vsel %vm17067_vm8, %v1782_v44, %v2092_v55  ;;  %v2096_v37 = vsel %vm17067_vm8, %v1789_v52, %v2095_v41 }
 0x159   : > { %v3879_v42 = vor.u32 %v3878_v62, %v3875_v47  ;;  %v3884_v54 = vrot.slane %v3882_v32, 7  ;;  %v4297_v23 = vcombine.low %v3843_v36, %v3857_v13  ;;  %2088 = vst [vmem:[#allocation2 + $0x124] sm:$0x7] %v2087_v5  ;;  %v805_v7 = vld [vmem:[#allocation2 + $0x144] sm:$0x4]  ;;  %v3866_v57 = vrot.slane %v3865_v39, 2 }
 0x15a   : > { %v808_v14 = vld [vmem:[#allocation2 + $0x148] sm:$0x4]  ;;  %v15374_v53 = vld.sshfl [vmem:[%s16991_s24 + $0x68] sm:$0x3 pattern:$0x76325410] }
 0x15b   : > { %v488_v3 = vsel %vm16965_vm2, 0, %v487_v1  ;;  %v17731_v4 = vld.sshfl [vmem:[%s16991_s24 + $0x6a] sm:$0x3 pattern:$0x76325410]  ;;  %v3880_v2 = vrot.slane %v3879_v42, 2  ;;  %v4305_v24 = vrot.slane %v4297_v23, %v17100_v16  ;;  %v3871_v44 = vsel %vm17115_vm15, %v3866_v57, %v3870_v61 }
 0x15c   : > { %2091 = vst [vmem:[#allocation2 + $0x128] sm:$0x7] %v2090_v49  ;;  %2094 = vst [vmem:[#allocation2 + $0x12c] sm:$0x7] %v2093_v58  ;;  %v779_v45 = vsel %vm16979_vm6, 0, %v778_v50  ;;  %v509_v43 = vsel %vm16965_vm2, 0, %v508_v26 }
 0x15d   : > { %489 = vst [vmem:[#allocation2 + $0x120] sm:$0x1] %v488_v3  ;;  %v17739_v38 = vld.sshfl [vmem:[%s16991_s24 + $0x6c] sm:$0x3 pattern:$0x76325410]  ;;  %v3885_v28 = vsel %vm17115_vm15, %v3880_v2, %v3884_v54 }
 0x15e   : > { %2097 = vst [vmem:[#allocation2 + $0x130] sm:$0x7] %v2096_v37  ;;  %780 = vst [vmem:[#allocation2 + $0x120] sm:$0x4] %v779_v45  ;;  %v512_v6 = vsel %vm16965_vm2, 0, %v511_v59  ;;  %v515_v15 = vsel %vm16965_vm2, 0, %v514_v8  ;;  %v4298_v63 = vcombine.low %v3871_v44, %v3885_v28 }
 0x15f   : > { %510 = vst [vmem:[#allocation2 + $0x13c] sm:$0x1] %v509_v43  ;;  %513 = vst [vmem:[#allocation2 + $0x140] sm:$0x1] %v512_v6  ;;  %v518_v46 = vsel %vm16965_vm2, 0, %v517_v29  ;;  %v800_v31 = vsel %vm16979_vm6, 0, %v799_v25 }
 0x160   : > { %516 = vst [vmem:[#allocation2 + $0x144] sm:$0x1] %v515_v15  ;;  %v803_v30 = vsel %vm16979_vm6, 0, %v802_v35  ;;  %519 = vst [vmem:[#allocation2 + $0x148] sm:$0x1] %v518_v46  ;;  %v806_v18 = vsel %vm16979_vm6, 0, %v805_v7  ;;  %v4312_v48 = vrot.slane %v4298_v63, %v17100_v16 }
 0x161   : > { %801 = vst [vmem:[#allocation2 + $0x13c] sm:$0x4] %v800_v31  ;;  %804 = vst [vmem:[#allocation2 + $0x140] sm:$0x4] %v803_v30  ;;  %v809_v20 = vsel %vm16979_vm6, 0, %v808_v14  ;;  %v1791_v21 = vshrl.u32 %v15374_v53, 16 }
 0x162   : > { %807 = vst [vmem:[#allocation2 + $0x144] sm:$0x4] %v806_v18  ;;  %810 = vst [vmem:[#allocation2 + $0x148] sm:$0x4] %v809_v20  ;;  %v1794_v56 = vshll.u32 %v15374_v53, 16  ;;  %v1798_v60 = vshrl.u32 %v17731_v4, 16  ;;  %v4313_v61 = vcombine.low %v4305_v24, %v4312_v48 }
 0x163   : > { %v1801_v12 = vshll.u32 %v17731_v4, 16  ;;  %v1805_v40 = vshrl.u32 %v17739_v38, 16  ;;  %v15435_v19 = vld.sshfl [vmem:[#allocation2 + $0x124] sm:$0x13 pattern:$0x76325410] }
 0x164   : > { %v3094_v1 = vcombine.high %v15435_v19, %v15435_v19  ;;  %v3901_v22 = vshrl.u32 %v15435_v19, 16  ;;  %v3904_v51 = vshll.u32 %v15435_v19, 16  ;;  %v1793_v27 = vrot.slane %v1791_v21, 7  ;;  %4404 = vrot.lane.b32.xlu1 %v4313_v61, %s16926_s25  ;;  %v505_v46 = vld [vmem:[#allocation2 + $0x138] sm:$0x1]  ;;  %13693 = vst.msk [vmem:[#allocation3 + $0x158] sm:$0xff] %vm2550_vm9, %v16924_v17 }
 0x165   : > { %v16844_v11 = vld.sshfl [vmem:[#allocation2 + $0x124] sm:$0xf pattern:$0x76325410]  ;;  %v1800_v26 = vrot.slane %v1798_v60, 7  ;;  %v1807_v20 = vrot.slane %v1805_v40, 7 }
 0x166   : > { %v16845_v50 = vld.sshfl [vmem:[#allocation2 + $0x12c] sm:$0xf pattern:$0x76325410]  ;;  %v3903_v47 = vrot.slane %v3901_v22, 6  ;;  %v3906_v62 = vrot.slane %v3904_v51, 7  ;;  %v1796_v55 = vor.u32 %v1794_v56, %v1793_v27 }
 0x167   : > { %v15434_v32 = vld.sshfl [vmem:[#allocation2 + $0x120] sm:$0x13 pattern:$0x76325410]  ;;  %v3910_v34 = vshll.u32 %v3094_v1, 16  ;;  %v6002_v35 = vcombine.low %v16844_v11, %v16845_v50  ;;  %v1803_v18 = vor.u32 %v1801_v12, %v1800_v26  ;;  %v1808_v19 = vshll.u32 %v17739_v38, 16 }
 0x168   : > { %v15436_v59 = vld.sshfl [vmem:[#allocation2 + $0x128] sm:$0x13 pattern:$0x76325410]  ;;  %v3086_v8 = vcombine.high %v15434_v32, %v15434_v32  ;;  %v3887_v36 = vshrl.u32 %v15434_v32, 16  ;;  %v3890_v13 = vshll.u32 %v15434_v32, 16  ;;  %v3907_v41 = vor.u32 %v3906_v62, %v3903_v47 }
 0x169   : > { %v15437_v39 = vld.sshfl [vmem:[#allocation2 + $0x12c] sm:$0x13 pattern:$0x76325410]  ;;  %v3102_v5 = vcombine.high %v15436_v59, %v15436_v59  ;;  %v3912_v29 = vrot.slane %v3910_v34, 7  ;;  %v3915_v25 = vshrl.u32 %v15436_v59, 16  ;;  %6078 = vrot.lane.b32.xlu0 %v6002_v35, %s16926_s25 }
 0x16a   : > { %v3110_v42 = vcombine.high %v15437_v39, %v15437_v39  ;;  %v3889_v54 = vrot.slane %v3887_v36, 6  ;;  %v3892_v23 = vrot.slane %v3890_v13, 7  ;;  %v3896_v52 = vshll.u32 %v3086_v8, 16  ;;  %v2098_v28 = vld [vmem:[#allocation2 + $0x13c] sm:$0x7]  ;;  %13696 = vst.msk [vmem:[#allocation3 + $0x1b8] sm:$0xff] %vm2550_vm9, %v16924_v17 }
 0x16b   : > { %v3908_v7 = vrot.slane %v3907_v41, 2  ;;  %v3917_v14 = vrot.slane %v3915_v25, 6  ;;  %v3918_v53 = vshll.u32 %v15436_v59, 16  ;;  %v3924_v58 = vshll.u32 %v3102_v5, 16  ;;  %v796_v31 = vld [vmem:[#allocation2 + $0x138] sm:$0x4] }
 0x16c   : > { %v15377_v57 = vld.sshfl [vmem:[%s16991_s24 + $0x6e] sm:$0x3 pattern:$0x76325410]  ;;  %v3893_v49 = vor.u32 %v3892_v23, %v3889_v54  ;;  %v3929_v3 = vshrl.u32 %v15437_v39, 16  ;;  %v3932_v4 = vshll.u32 %v15437_v39, 16  ;;  %v2099_v12 = vsel %vm17067_vm8, %v1796_v55, %v2098_v28 }
 0x16d   : > { %v3898_v2 = vrot.slane %v3896_v52, 7  ;;  %v3913_v24 = vsel %vm17115_vm15, %v3908_v7, %v3912_v29  ;;  %v3920_v37 = vrot.slane %v3918_v53, 7  ;;  %v3938_v45 = vshll.u32 %v3110_v42, 16  ;;  %v2101_v21 = vld [vmem:[#allocation2 + $0x140] sm:$0x7]  ;;  %13697 = vst.msk [vmem:[#allocation3 + $0x1d8] sm:$0xff] %vm2550_vm9, %v16924_v17 }
 0x16e   : > { %v3894_v44 = vrot.slane %v3893_v49, 2  ;;  %v3926_v43 = vrot.slane %v3924_v58, 7  ;;  %v3931_v6 = vrot.slane %v3929_v3, 6  ;;  %v3934_v15 = vrot.slane %v3932_v4, 7  ;;  %v526_v56 = vld [vmem:[#allocation2 + $0x154] sm:$0x1] }
 0x16f   : > { %v3921_v30 = vor.u32 %v3920_v37, %v3917_v14  ;;  %v3940_v63 = vrot.slane %v3938_v45, 7  ;;  %v1812_v1 = vshrl.u32 %v15377_v57, 16  ;;  %v2104_v22 = vld [vmem:[#allocation2 + $0x144] sm:$0x7]  ;;  %v529_v51 = vld [vmem:[#allocation2 + $0x158] sm:$0x1]  ;;  %v1810_v59 = vor.u32 %v1808_v19, %v1807_v20 }
 0x170   : > { %v3899_v60 = vsel %vm17115_vm15, %v3894_v44, %v3898_v2  ;;  %v3935_v48 = vor.u32 %v3934_v15, %v3931_v6  ;;  %v532_v27 = vld [vmem:[#allocation2 + $0x15c] sm:$0x1]  ;;  %v535_v61 = vld [vmem:[#allocation2 + $0x160] sm:$0x1]  ;;  %v1815_v47 = vshll.u32 %v15377_v57, 16  ;;  %v2102_v8 = vsel %vm17067_vm8, %v1803_v18, %v2101_v21  ;;  %13666 = vst.msk [vmem:[#allocation3] sm:$0xff] %vm2550_vm9, %v16924_v17 }
 0x171   : > { %v3922_v11 = vrot.slane %v3921_v30, 2  ;;  %v4314_v50 = vcombine.low %v3899_v60, %v3913_v24  ;;  %v2107_v40 = vld [vmem:[#allocation2 + $0x148] sm:$0x7]  ;;  %v817_v62 = vld [vmem:[#allocation2 + $0x154] sm:$0x4]  ;;  %v1814_v38 = vrot.slane %v1812_v1, 7  ;;  %v2105_v42 = vsel %vm17067_vm8, %v1810_v59, %v2104_v22 }
 0x172   : > { %v820_v32 = vld [vmem:[#allocation2 + $0x158] sm:$0x4]  ;;  %v823_v34 = vld [vmem:[#allocation2 + $0x15c] sm:$0x4]  ;;  %v3936_v26 = vrot.slane %v3935_v48, 2  ;;  %v506_v5 = vsel %vm16965_vm2, 0, %v505_v46 }
 0x173   : > { %2100 = vst [vmem:[#allocation2 + $0x13c] sm:$0x7] %v2099_v12  ;;  %v826_v36 = vld [vmem:[#allocation2 + $0x160] sm:$0x4]  ;;  %v3927_v39 = vsel %vm17115_vm15, %v3922_v11, %v3926_v43  ;;  %v4322_v55 = vrot.slane %v4314_v50, %v17100_v16  ;;  %2103 = vst [vmem:[#allocation2 + $0x140] sm:$0x7] %v2102_v8  ;;  %v1817_v35 = vor.u32 %v1815_v47, %v1814_v38 }
 0x174   : > { %v15378_v13 = vld.sshfl [vmem:[%s16991_s24 + $0x70] sm:$0x3 pattern:$0x76325410]  ;;  %v797_v41 = vsel %vm16979_vm6, 0, %v796_v31  ;;  %v3941_v25 = vsel %vm17115_vm15, %v3936_v26, %v3940_v63  ;;  %v527_v54 = vsel %vm16965_vm2, 0, %v526_v56 }
 0x175   : > { %v15379_v29 = vld.sshfl [vmem:[%s16991_s24 + $0x72] sm:$0x3 pattern:$0x76325410]  ;;  %507 = vst [vmem:[#allocation2 + $0x138] sm:$0x1] %v506_v5  ;;  %v4315_v52 = vcombine.low %v3927_v39, %v3941_v25  ;;  %v2108_v57 = vsel %vm17067_vm8, %v1817_v35, %v2107_v40 }
 0x176   : > { %798 = vst [vmem:[#allocation2 + $0x138] sm:$0x4] %v797_v41  ;;  %v17793_v23 = vld.sshfl [vmem:[%s16991_s24 + $0x74] sm:$0x3 pattern:$0x76325410] }
 0x177   : > { %2106 = vst [vmem:[#allocation2 + $0x144] sm:$0x7] %v2105_v42  ;;  %528 = vst [vmem:[#allocation2 + $0x154] sm:$0x1] %v527_v54  ;;  %v530_v7 = vsel %vm16965_vm2, 0, %v529_v51  ;;  %v533_v14 = vsel %vm16965_vm2, 0, %v532_v27  ;;  %v4329_v4 = vrot.slane %v4315_v52, %v17100_v16 }
 0x178   : > { %v536_v53 = vsel %vm16965_vm2, 0, %v535_v61  ;;  %531 = vst [vmem:[#allocation2 + $0x158] sm:$0x1] %v530_v7  ;;  %534 = vst [vmem:[#allocation2 + $0x15c] sm:$0x1] %v533_v14  ;;  %v818_v49 = vsel %vm16979_vm6, 0, %v817_v62 }
 0x179   : > { %537 = vst [vmem:[#allocation2 + $0x160] sm:$0x1] %v536_v53  ;;  %v821_v58 = vsel %vm16979_vm6, 0, %v820_v32  ;;  %v824_v3 = vsel %vm16979_vm6, 0, %v823_v34  ;;  %2109 = vst [vmem:[#allocation2 + $0x148] sm:$0x7] %v2108_v57  ;;  %v4330_v15 = vcombine.low %v4322_v55, %v4329_v4 }
 0x17a   : > { %819 = vst [vmem:[#allocation2 + $0x154] sm:$0x4] %v818_v49  ;;  %822 = vst [vmem:[#allocation2 + $0x158] sm:$0x4] %v821_v58  ;;  %v827_v2 = vsel %vm16979_vm6, 0, %v826_v36  ;;  %v1819_v24 = vshrl.u32 %v15378_v13, 16 }
 0x17b   : > { %825 = vst [vmem:[#allocation2 + $0x15c] sm:$0x4] %v824_v3  ;;  %v1822_v37 = vshll.u32 %v15378_v13, 16  ;;  %828 = vst [vmem:[#allocation2 + $0x160] sm:$0x4] %v827_v2  ;;  %v1826_v45 = vshrl.u32 %v15379_v29, 16  ;;  %4406 = vrot.lane.b32.xlu1 %v4330_v15, %s16926_s25 }
 0x17c   : > { %v1829_v44 = vshll.u32 %v15379_v29, 16  ;;  %v1833_v43 = vshrl.u32 %v17793_v23, 16  ;;  %v1836_v6 = vshll.u32 %v17793_v23, 16  ;;  %v1821_v20 = vrot.slane %v1819_v24, 7  ;;  %v16683_v38 = vld [vmem:[%s20793_s1 + $0x40] sm:$0xff]   ;;  %13669 = vst.msk [vmem:[#allocation3 + $0x60] sm:$0xff] %vm2550_vm9, %v16924_v17 }
 0x17d   : > { %v15439_v28 = vld.sshfl [vmem:[#allocation2 + $0x13c] sm:$0x13 pattern:$0x76325410]  ;;  %v1828_v21 = vrot.slane %v1826_v45, 7  ;;  %16072 = vmatprep.subr.bf16.mxu0 %v16683_v38  ;;  %v16684_v35 = vld [vmem:[%s20793_s1] sm:$0xff]  }
 0x17e   : > { %v16846_v46 = vld.sshfl [vmem:[#allocation2 + $0x13c] sm:$0xf pattern:$0x76325410]  ;;  %v3957_v31 = vshrl.u32 %v15439_v28, 16  ;;  %v3960_v30 = vshll.u32 %v15439_v28, 16  ;;  %v3126_v18 = vcombine.high %v15439_v28, %v15439_v28  ;;  %v1824_v51 = vor.u32 %v1822_v37, %v1821_v20  ;;  %16073 = vmatpush3.bf16.msra.mxu0 %v16684_v35 }
 0x17f   : > { %v15438_v63 = vld.sshfl [vmem:[#allocation2 + $0x138] sm:$0x13 pattern:$0x76325410]  ;;  %v17815_v47 = vor.u32 %v1829_v44, %v1828_v21  ;;  %v1835_v49 = vrot.slane %v1833_v43, 7  ;;  %13670 = vst.msk [vmem:[#allocation3 + $0x80] sm:$0xff] %vm2550_vm9, %v16924_v17 }
 0x180   : > { %v15440_v56 = vld.sshfl [vmem:[#allocation2 + $0x140] sm:$0x13 pattern:$0x76325410]  ;;  %v3118_v60 = vcombine.high %v15438_v63, %v15438_v63  ;;  %v3943_v1 = vshrl.u32 %v15438_v63, 16  ;;  %v3946_v22 = vshll.u32 %v15438_v63, 16 }
 0x181   : > { %v15441_v48 = vld.sshfl [vmem:[#allocation2 + $0x144] sm:$0x13 pattern:$0x76325410]  ;;  %v3134_v19 = vcombine.high %v15440_v56, %v15440_v56  ;;  %v3959_v50 = vrot.slane %v3957_v31, 6  ;;  %v3962_v62 = vrot.slane %v3960_v30, 7  ;;  %v1838_v20 = vor.u32 %v1836_v6, %v1835_v49 }
 0x182   : > { %v16847_v27 = vld.sshfl [vmem:[#allocation2 + $0x144] sm:$0xf pattern:$0x76325410]  ;;  %v3142_v61 = vcombine.high %v15441_v48, %v15441_v48  ;;  %v3952_v11 = vshll.u32 %v3118_v60, 16  ;;  %v3945_v12 = vrot.slane %v3943_v1, 6 }
 0x183   : > { %v3948_v40 = vrot.slane %v3946_v22, 7  ;;  %v3966_v32 = vshll.u32 %v3126_v18, 16  ;;  %v3971_v26 = vshrl.u32 %v15440_v56, 16  ;;  %v3974_v59 = vshll.u32 %v15440_v56, 16  ;;  %v2110_v58 = vld [vmem:[#allocation2 + $0x154] sm:$0x7] }
 0x184   : > { %v3954_v34 = vrot.slane %v3952_v11, 7  ;;  %v3963_v36 = vor.u32 %v3962_v62, %v3959_v50  ;;  %v3980_v39 = vshll.u32 %v3134_v19, 16  ;;  %v15381_v55 = vld.sshfl [vmem:[%s16991_s24 + $0x76] sm:$0x3 pattern:$0x76325410]  ;;  %v6019_v5 = vcombine.low %v16846_v46, %v16847_v27 }
 0x185   : > { %v3949_v8 = vor.u32 %v3948_v40, %v3945_v12  ;;  %v3968_v13 = vrot.slane %v3966_v32, 7  ;;  %v3973_v41 = vrot.slane %v3971_v26, 6  ;;  %v3976_v29 = vrot.slane %v3974_v59, 7  ;;  %v523_v3 = vld [vmem:[#allocation2 + $0x150] sm:$0x1]  ;;  %13673 = vst.msk [vmem:[#allocation3 + $0xe0] sm:$0xff] %vm2550_vm9, %v16924_v17 }
 0x186   : > { %v3985_v25 = vshrl.u32 %v15441_v48, 16  ;;  %v3964_v54 = vrot.slane %v3963_v36, 2  ;;  %v3982_v52 = vrot.slane %v3980_v39, 7  ;;  %v3988_v7 = vshll.u32 %v15441_v48, 16  ;;  %6080 = vrot.lane.b32.xlu0 %v6019_v5, %s16926_s25  ;;  %v814_v4 = vld [vmem:[#allocation2 + $0x150] sm:$0x4] }
 0x187   : > { %v3950_v42 = vrot.slane %v3949_v8, 2  ;;  %v3977_v14 = vor.u32 %v3976_v29, %v3973_v41  ;;  %v3994_v57 = vshll.u32 %v3142_v61, 16  ;;  %v1840_v45 = vshrl.u32 %v15381_v55, 16  ;;  %v2113_v44 = vld [vmem:[#allocation2 + $0x158] sm:$0x7]  ;;  %13674 = vst.msk [vmem:[#allocation3 + $0x100] sm:$0xff] %vm2550_vm9, %v16924_v17 }
 0x188   : > { %v3987_v53 = vrot.slane %v3985_v25, 6  ;;  %v3969_v24 = vsel %vm17115_vm15, %v3964_v54, %v3968_v13  ;;  %v3990_v37 = vrot.slane %v3988_v7, 7  ;;  %v2116_v15 = vld [vmem:[#allocation2 + $0x15c] sm:$0x7]  ;;  %v544_v28 = vld [vmem:[#allocation2 + $0x16c] sm:$0x1]  ;;  %v2111_v22 = vsel %vm17067_vm8, %v1824_v51, %v2110_v58 }
 0x189   : > { %v3955_v2 = vsel %vm17115_vm15, %v3950_v42, %v3954_v34  ;;  %v547_v46 = vld [vmem:[#allocation2 + $0x170] sm:$0x1]  ;;  %v550_v31 = vld [vmem:[#allocation2 + $0x174] sm:$0x1]  ;;  %v553_v30 = vld [vmem:[#allocation2 + $0x178] sm:$0x1]  ;;  %v2114_v23 = vsel %vm17067_vm8, %v17815_v47, %v2113_v44  ;;  %v2117_v6 = vsel %vm17067_vm8, %v1838_v20, %v2116_v15 }
 0x18a   : > { %v3978_v43 = vrot.slane %v3977_v14, 2  ;;  %v3996_v63 = vrot.slane %v3994_v57, 7  ;;  %v4331_v18 = vcombine.low %v3955_v2, %v3969_v24  ;;  %v2119_v21 = vld [vmem:[#allocation2 + $0x160] sm:$0x7]  ;;  %v835_v56 = vld [vmem:[#allocation2 + $0x16c] sm:$0x4]  ;;  %v3991_v48 = vor.u32 %v3990_v37, %v3987_v53 }
 0x18b   : > { %v838_v60 = vld [vmem:[#allocation2 + $0x170] sm:$0x4]  ;;  %v1842_v19 = vrot.slane %v1840_v45, 7  ;;  %v1843_v1 = vshll.u32 %v15381_v55, 16  ;;  %2112 = vst [vmem:[#allocation2 + $0x154] sm:$0x7] %v2111_v22 }
 0x18c   : > { %v17834_v27 = vld.sshfl [vmem:[%s16991_s24 + $0x78] sm:$0x3 pattern:$0x76325410]  ;;  %v3983_v61 = vsel %vm17115_vm15, %v3978_v43, %v3982_v52  ;;  %v4339_v11 = vrot.slane %v4331_v18, %v17100_v16  ;;  %v841_v50 = vld [vmem:[#allocation2 + $0x174] sm:$0x4] }
 0x18d   : > { %v17845_v12 = vld.sshfl [vmem:[%s16991_s24 + $0x7a] sm:$0x3 pattern:$0x76325410]  ;;  %v3992_v51 = vrot.slane %v3991_v48, 2  ;;  %v1845_v62 = vor.u32 %v1843_v1, %v1842_v19  ;;  %v524_v32 = vsel %vm16965_vm2, 0, %v523_v3 }
 0x18e   : > { %v17848_v40 = vld.sshfl [vmem:[%s16991_s24 + $0x7c] sm:$0x3 pattern:$0x76325410]  ;;  %2115 = vst [vmem:[#allocation2 + $0x158] sm:$0x7] %v2114_v23 }
 0x18f   : > { %2118 = vst [vmem:[#allocation2 + $0x15c] sm:$0x7] %v2117_v6  ;;  %v815_v34 = vsel %vm16979_vm6, 0, %v814_v4  ;;  %v844_v47 = vld [vmem:[#allocation2 + $0x178] sm:$0x4]  ;;  %v545_v26 = vsel %vm16965_vm2, 0, %v544_v28  ;;  %v3997_v36 = vsel %vm17115_vm15, %v3992_v51, %v3996_v63  ;;  %v2120_v13 = vsel %vm17067_vm8, %v1845_v62, %v2119_v21 }
 0x190   : > { %525 = vst [vmem:[#allocation2 + $0x150] sm:$0x1] %v524_v32  ;;  %816 = vst [vmem:[#allocation2 + $0x150] sm:$0x4] %v815_v34  ;;  %v548_v59 = vsel %vm16965_vm2, 0, %v547_v46  ;;  %v551_v38 = vsel %vm16965_vm2, 0, %v550_v31  ;;  %v4332_v41 = vcombine.low %v3983_v61, %v3997_v36 }
 0x191   : > { %v554_v8 = vsel %vm16965_vm2, 0, %v553_v30  ;;  %546 = vst [vmem:[#allocation2 + $0x16c] sm:$0x1] %v545_v26  ;;  %549 = vst [vmem:[#allocation2 + $0x170] sm:$0x1] %v548_v59  ;;  %v836_v39 = vsel %vm16979_vm6, 0, %v835_v56 }
 0x192   : > { %552 = vst [vmem:[#allocation2 + $0x174] sm:$0x1] %v551_v38  ;;  %555 = vst [vmem:[#allocation2 + $0x178] sm:$0x1] %v554_v8  ;;  %v839_v55 = vsel %vm16979_vm6, 0, %v838_v60  ;;  %v842_v29 = vsel %vm16979_vm6, 0, %v841_v50  ;;  %v4346_v53 = vrot.slane %v4332_v41, %v17100_v16 }
 0x193   : > { %v17871_v5 = vld.sshfl [vmem:[%s16991_s24 + $0x7e] sm:$0x3 pattern:$0x76325410]  ;;  %2121 = vst [vmem:[#allocation2 + $0x160] sm:$0x7] %v2120_v13 }
 0x194   : > { %837 = vst [vmem:[#allocation2 + $0x16c] sm:$0x4] %v836_v39  ;;  %840 = vst [vmem:[#allocation2 + $0x170] sm:$0x4] %v839_v55  ;;  %v845_v25 = vsel %vm16979_vm6, 0, %v844_v47  ;;  %v1847_v35 = vshrl.u32 %v17834_v27, 16  ;;  %v4347_v2 = vcombine.low %v4339_v11, %v4346_v53 }
 0x195   : > { %v16685_v42 = vld [vmem:[%s20793_s1 + $0x48] sm:$0xff]   ;;  %843 = vst [vmem:[#allocation2 + $0x174] sm:$0x4] %v842_v29  ;;  %846 = vst [vmem:[#allocation2 + $0x178] sm:$0x4] %v845_v25  ;;  %v1850_v54 = vshll.u32 %v17834_v27, 16 }
 0x196   : > { %v1854_v52 = vshrl.u32 %v17845_v12, 16  ;;  %v1857_v7 = vshll.u32 %v17845_v12, 16  ;;  %v1861_v14 = vshrl.u32 %v17848_v40, 16  ;;  %v1849_v57 = vrot.slane %v1847_v35, 7  ;;  %16074 = vmatprep.subr.bf16.mxu0 %v16685_v42  ;;  %v16686_v3 = vld [vmem:[%s20793_s1 + $0x8] sm:$0xff]   ;;  %4408 = vrot.lane.b32.xlu1 %v4347_v2, %s16926_s25  ;;  %v16687_v27 = vld [vmem:[%s20793_s1 + $0x50] sm:$0xff]  }
 0x197   : > { %v1864_v49 = vshll.u32 %v17848_v40, 16  ;;  %v1868_v58 = vshrl.u32 %v17871_v5, 16  ;;  %v15443_v4 = vld.sshfl [vmem:[#allocation2 + $0x154] sm:$0x13 pattern:$0x76325410]  ;;  %16075 = vmatpush3.bf16.msra.mxu0 %v16686_v3 }
 0x198   : > { %v16848_v24 = vld.sshfl [vmem:[#allocation2 + $0x154] sm:$0xf pattern:$0x76325410]  ;;  %v4013_v45 = vshrl.u32 %v15443_v4, 16  ;;  %v4016_v44 = vshll.u32 %v15443_v4, 16  ;;  %v3158_v46 = vcombine.high %v15443_v4, %v15443_v4  ;;  %v1852_v48 = vor.u32 %v1850_v54, %v1849_v57  ;;  %16076 = vmatprep.subr.bf16.mxu0 %v16687_v27 }
 0x199   : > { %v15442_v37 = vld.sshfl [vmem:[#allocation2 + $0x150] sm:$0x13 pattern:$0x76325410]  ;;  %v541_v41 = vld [vmem:[#allocation2 + $0x168] sm:$0x1] }
 0x19a   : > { %v15444_v15 = vld.sshfl [vmem:[#allocation2 + $0x158] sm:$0x13 pattern:$0x76325410]  ;;  %v3150_v28 = vcombine.high %v15442_v37, %v15442_v37  ;;  %v3999_v31 = vshrl.u32 %v15442_v37, 16  ;;  %v4002_v30 = vshll.u32 %v15442_v37, 16 }
 0x19b   : > { %v16849_v43 = vld.sshfl [vmem:[#allocation2 + $0x15c] sm:$0xf pattern:$0x76325410]  ;;  %v3166_v63 = vcombine.high %v15444_v15, %v15444_v15  ;;  %v4015_v18 = vrot.slane %v4013_v45, 6  ;;  %v4018_v20 = vrot.slane %v4016_v44, 7 }
 0x19c   : > { %v15445_v21 = vld.sshfl [vmem:[#allocation2 + $0x15c] sm:$0x13 pattern:$0x76325410]  ;;  %v4001_v56 = vrot.slane %v3999_v31, 6  ;;  %v4004_v60 = vrot.slane %v4002_v30, 7  ;;  %v6036_v51 = vcombine.low %v16848_v24, %v16849_v43 }
 0x19d   : > { %v3174_v19 = vcombine.high %v15445_v21, %v15445_v21  ;;  %v4008_v1 = vshll.u32 %v3150_v28, 16  ;;  %v4019_v22 = vor.u32 %v4018_v20, %v4015_v18  ;;  %v4022_v11 = vshll.u32 %v3158_v46, 16  ;;  %v16688_v50 = vld [vmem:[%s20793_s1 + $0x10] sm:$0xff]   ;;  %v2122_v54 = vld [vmem:[#allocation2 + $0x16c] sm:$0x7]  ;;  %v16690_v30 = vld [vmem:[%s20793_s1 + $0x18] sm:$0xff]  }
 0x19e   : > { %v4005_v61 = vor.u32 %v4004_v60, %v4001_v56  ;;  %v4027_v23 = vshrl.u32 %v15444_v15, 16  ;;  %v4030_v6 = vshll.u32 %v15444_v15, 16  ;;  %v4036_v34 = vshll.u32 %v3166_v63, 16  ;;  %16077 = vmatpush3.bf16.msra.mxu0 %v16688_v50  ;;  %6082 = vrot.lane.b32.xlu0 %v6036_v51, %s16926_s25  ;;  %v2125_v53 = vld [vmem:[#allocation2 + $0x170] sm:$0x7]  ;;  %v16689_v15 = vld [vmem:[%s20793_s1 + $0x58] sm:$0xff]  }
 0x19f   : > { %v4010_v62 = vrot.slane %v4008_v1, 7  ;;  %v4020_v32 = vrot.slane %v4019_v22, 2  ;;  %v4024_v26 = vrot.slane %v4022_v11, 7  ;;  %v4041_v13 = vshrl.u32 %v15445_v21, 16  ;;  %v832_v57 = vld [vmem:[#allocation2 + $0x168] sm:$0x4]  ;;  %16078 = vmatprep.subr.bf16.mxu0 %v16689_v15 }
 0x1a0   : > { %v4006_v47 = vrot.slane %v4005_v61, 2  ;;  %v4029_v59 = vrot.slane %v4027_v23, 6  ;;  %v4032_v38 = vrot.slane %v4030_v6, 7  ;;  %v4038_v36 = vrot.slane %v4036_v34, 7  ;;  %v286_v3 = vld [vmem:[#allocation2 + $0x14] sm:$0x1] }
 0x1a1   : > { %v17898_v8 = vld.sshfl [vmem:[#allocation2 + $0x8] sm:$0x13 pattern:$0x76325410]  ;;  %v4044_v39 = vshll.u32 %v15445_v21, 16  ;;  %v4050_v55 = vshll.u32 %v3174_v19, 16  ;;  %v4025_v25 = vsel %vm17115_vm15, %v4020_v32, %v4024_v26  ;;  %v2123_v20 = vsel %vm17067_vm8, %v1852_v48, %v2122_v54 }
 0x1a2   : > { %v4011_v29 = vsel %vm17115_vm15, %v4006_v47, %v4010_v62  ;;  %v4033_v35 = vor.u32 %v4032_v38, %v4029_v59  ;;  %v1856_v42 = vrot.slane %v1854_v52, 7  ;;  %v4043_v4 = vrot.slane %v4041_v13, 6  ;;  %v2128_v37 = vld [vmem:[#allocation2 + $0x174] sm:$0x7]  ;;  %v2131_v21 = vld [vmem:[#allocation2 + $0x178] sm:$0x7]  ;;  %16079 = vmatpush3.bf16.msra.mxu0 %v16690_v30 }
 0x1a3   : > { %v4046_v2 = vrot.slane %v4044_v39, 7  ;;  %v4348_v24 = vcombine.low %v4011_v29, %v4025_v25  ;;  %v577_v45 = vld [vmem:[#allocation2 + $0x14] sm:$0x4]  ;;  %v9758_v44 = vcombine.high %v17898_v8, %v17898_v8  ;;  %v1863_v46 = vrot.slane %v1861_v14, 7  ;;  %v16691_v12 = vld [vmem:[%s20793_s1 + $0x60] sm:$0xff]   ;;  %13677 = vst.msk [vmem:[#allocation3 + $0x160] sm:$0xff] %vm2550_vm9, %v16924_v17 }
 0x1a4   : > { %v4034_v28 = vrot.slane %v4033_v35, 2  ;;  %v1859_v52 = vor.u32 %v1857_v7, %v1856_v42  ;;  %v1870_v31 = vrot.slane %v1868_v58, 7  ;;  %v4052_v63 = vrot.slane %v4050_v55, 7  ;;  %2124 = vst [vmem:[#allocation2 + $0x16c] sm:$0x7] %v2123_v20  ;;  %v16692_v60 = vld [vmem:[%s20793_s1 + $0x20] sm:$0xff]   ;;  %16080 = vmatprep.subr.bf16.mxu0 %v16691_v12 }
 0x1a5   : > { %v4047_v43 = vor.u32 %v4046_v2, %v4043_v4  ;;  %v1871_v18 = vshll.u32 %v17871_v5, 16  ;;  %v1866_v14 = vor.u32 %v1864_v49, %v1863_v46  ;;  %v542_v5 = vsel %vm16965_vm2, 0, %v541_v41  ;;  %v15771_v56 = vld.sshfl [vmem:[#allocation2 + $0xc] sm:$0x13 pattern:$0x76325410] }
 0x1a6   : > { %v4039_v7 = vsel %vm17115_vm15, %v4034_v28, %v4038_v36  ;;  %v2126_v58 = vsel %vm17067_vm8, %v1859_v52, %v2125_v53  ;;  %543 = vst [vmem:[#allocation2 + $0x168] sm:$0x1] %v542_v5  ;;  %v833_v40 = vsel %vm16979_vm6, 0, %v832_v57  ;;  %v287_v49 = vsel %vm16965_vm2, 0, %v286_v3  ;;  %16081 = vmatpush3.bf16.msra.mxu0 %v16692_v60  ;;  %13678 = vst.msk [vmem:[#allocation3 + $0x180] sm:$0xff] %vm2550_vm9, %v16924_v17 }
 0x1a7   : > { %v4048_v48 = vrot.slane %v4047_v43, 2  ;;  %v1873_v19 = vor.u32 %v1871_v18, %v1870_v31  ;;  %2127 = vst [vmem:[#allocation2 + $0x170] sm:$0x7] %v2126_v58  ;;  %v4356_v1 = vrot.slane %v4348_v24, %v17100_v16  ;;  %v2129_v22 = vsel %vm17067_vm8, %v1866_v14, %v2128_v37  ;;  %834 = vst [vmem:[#allocation2 + $0x168] sm:$0x4] %v833_v40 }
 0x1a8   : > { %288 = vst [vmem:[#allocation2 + $0x14] sm:$0x1] %v287_v49  ;;  %v578_v27 = vsel %vm16979_vm6, 0, %v577_v45  ;;  %v9766_v11 = vcombine.high %v15771_v56, %v15771_v56  ;;  %2130 = vst [vmem:[#allocation2 + $0x174] sm:$0x7] %v2129_v22  ;;  %v10264_v50 = vshrl.u32 %v17898_v8, 16 }
 0x1a9   : > { %v17945_v61 = vld.sshfl [vmem:[#allocation2 + $0x10] sm:$0x13 pattern:$0x76325410]  ;;  %v4053_v23 = vsel %vm17115_vm15, %v4048_v48, %v4052_v63  ;;  %v2132_v6 = vsel %vm17067_vm8, %v1873_v19, %v2131_v21  ;;  %579 = vst [vmem:[#allocation2 + $0x14] sm:$0x4] %v578_v27  ;;  %vm18007_vm8 = vmor %vm5091_vm7, %vm5092_vm5 }
 0x1aa   : > { %v10267_v51 = vshll.u32 %v17898_v8, 16  ;;  %v4349_v62 = vcombine.low %v4039_v7, %v4053_v23  ;;  %2133 = vst [vmem:[#allocation2 + $0x178] sm:$0x7] %v2132_v6  ;;  %v10273_v32 = vshll.u32 %v9758_v44, 16  ;;  %v10278_v34 = vshrl.u32 %v15771_v56, 16  ;;  %13681 = vst.msk [vmem:[#allocation3 + $0x1e0] sm:$0xff] %vm2550_vm9, %v16924_v17 }
 0x1ab   : > { %v10281_v47 = vshll.u32 %v15771_v56, 16  ;;  %v17953_v26 = vld.sshfl [vmem:[#allocation2 + $0x4] sm:$0x12 pattern:$0x76325410]  ;;  %v10266_v59 = vrot.slane %v10264_v50, 6  ;;  %v9774_v4 = vcombine.high %v17945_v61, %v17945_v61 }
 0x1ac   : > { %v10269_v38 = vrot.slane %v10267_v51, 7  ;;  %v17955_v36 = vshll.u32 %v9766_v11, 16  ;;  %v10292_v33 = vshrl.u32 %v17945_v61, 16  ;;  %v4363_v8 = vrot.slane %v4349_v62, %v17100_v16  ;;  %v16693_v50 = vld [vmem:[%s20793_s1 + $0x68] sm:$0xff]   ;;  %13683 = vst.msk [vmem:[#allocation3 + $0x18] sm:$0xff] %vm2550_vm9, %v16924_v17  ;;  %13686 = vst.msk [vmem:[#allocation3 + $0x78] sm:$0xff] %vm2550_vm9, %v16924_v17 }
 0x1ad   : > { %v17958_v13 = vld.sshfl [vmem:[#allocation2 + $0x8] sm:$0x12 pattern:$0x76325410]  ;;  %v10275_v55 = vrot.slane %v10273_v32, 7  ;;  %v10280_v41 = vrot.slane %v10278_v34, 6  ;;  %v8093_v37 = vcombine.high %v17953_v26, %v17953_v26  ;;  %16082 = vmatprep.subr.bf16.mxu0 %v16693_v50 }
 0x1ae   : > { %v17960_v39 = vld.sshfl [vmem:[#allocation2 + $0xc] sm:$0x12 pattern:$0x76325410]  ;;  %v10283_v29 = vrot.slane %v10281_v47, 7  ;;  %v10270_v35 = vor.u32 %v10269_v38, %v10266_v59  ;;  %v4364_v42 = vcombine.low %v4356_v1, %v4363_v8  ;;  %v10289_v24 = vrot.slane %v17955_v36, 7 }
 0x1af   : > { %v15447_v25 = vld.sshfl [vmem:[#allocation2 + $0x16c] sm:$0x13 pattern:$0x76325410]  ;;  %v8101_v28 = vcombine.high %v17958_v13, %v17958_v13  ;;  %v8109_v52 = vcombine.high %v17960_v39, %v17960_v39  ;;  %13687 = vst.msk [vmem:[#allocation3 + $0x98] sm:$0xff] %vm2550_vm9, %v16924_v17  ;;  %13690 = vst.msk [vmem:[#allocation3 + $0xf8] sm:$0xff] %vm2550_vm9, %v16924_v17 }
 0x1b0   : > { %v16850_v54 = vld.sshfl [vmem:[#allocation2 + $0x16c] sm:$0xf pattern:$0x76325410]  ;;  %v4069_v53 = vshrl.u32 %v15447_v25, 16  ;;  %v4072_v57 = vshll.u32 %v15447_v25, 16  ;;  %4410 = vrot.lane.b32.xlu1 %v4364_v42, %s16926_s25  ;;  %v3190_v15 = vcombine.high %v15447_v25, %v15447_v25  ;;  %v10284_v12 = vor.u32 %v10283_v29, %v10280_v41 }
 0x1b1   : > { %v15446_v3 = vld.sshfl [vmem:[#allocation2 + $0x168] sm:$0x13 pattern:$0x76325410]  ;;  %v10271_v2 = vrot.slane %v10270_v35, 2  ;;  %v10294_v42 = vrot.slane %v10292_v33, 6 }
 0x1b2   : > { %v15448_v45 = vld.sshfl [vmem:[#allocation2 + $0x170] sm:$0x13 pattern:$0x76325410]  ;;  %v3182_v44 = vcombine.high %v15446_v3, %v15446_v3  ;;  %v4055_v30 = vshrl.u32 %v15446_v3, 16  ;;  %v4058_v43 = vshll.u32 %v15446_v3, 16 }
 0x1b3   : > { %v16851_v46 = vld.sshfl [vmem:[#allocation2 + $0x174] sm:$0xf pattern:$0x76325410]  ;;  %v3198_v31 = vcombine.high %v15448_v45, %v15448_v45  ;;  %v4071_v20 = vrot.slane %v4069_v53, 6  ;;  %v17975_v21 = vsel %vm17115_vm15, %v10271_v2, %v10275_v55  ;;  %v4074_v56 = vrot.slane %v4072_v57, 7 }
 0x1b4   : > { %v15449_v63 = vld.sshfl [vmem:[#allocation2 + $0x174] sm:$0x13 pattern:$0x76325410]  ;;  %v4064_v18 = vshll.u32 %v3182_v44, 16  ;;  %v4057_v14 = vrot.slane %v4055_v30, 6  ;;  %v6053_v19 = vcombine.low %v16850_v54, %v16851_v46 }
 0x1b5   : > { %v3206_v7 = vcombine.high %v15449_v63, %v15449_v63  ;;  %v4060_v58 = vrot.slane %v4058_v43, 7  ;;  %v4078_v60 = vshll.u32 %v3190_v15, 16  ;;  %v4083_v48 = vshrl.u32 %v15448_v45, 16  ;;  %13691 = vst.msk [vmem:[#allocation3 + $0x118] sm:$0xff] %vm2550_vm9, %v16924_v17  ;;  %13694 = vst.msk [vmem:[#allocation3 + $0x178] sm:$0xff] %vm2550_vm9, %v16924_v17 }
 0x1b6   : > { %v4066_v5 = vrot.slane %v4064_v18, 7  ;;  %v4086_v49 = vshll.u32 %v15448_v45, 16  ;;  %v4092_v1 = vshll.u32 %v3198_v31, 16  ;;  %v4075_v27 = vor.u32 %v4074_v56, %v4071_v20  ;;  %6084 = vrot.lane.b32.xlu0 %v6053_v19, %s16926_s25  ;;  %v16694_v45 = vld [vmem:[%s20793_s1 + $0x28] sm:$0xff]   ;;  %13695 = vst.msk [vmem:[#allocation3 + $0x198] sm:$0xff] %vm2550_vm9, %v16924_v17  ;;  %13698 = vst.msk [vmem:[#allocation3 + $0x1f8] sm:$0xff] %vm2550_vm9, %v16924_v17 }
 0x1b7   : > { %v4061_v40 = vor.u32 %v4060_v58, %v4057_v14  ;;  %v15773_v22 = vld.sshfl [vmem:[#allocation2 + $0x14] sm:$0x13 pattern:$0x76325410]  ;;  %v4080_v11 = vrot.slane %v4078_v60, 7  ;;  %v4085_v23 = vrot.slane %v4083_v48, 6  ;;  %16083 = vmatpush3.bf16.msra.mxu0 %v16694_v45 }
 0x1b8   : > { %v4097_v6 = vshrl.u32 %v15449_v63, 16  ;;  %v4088_v62 = vrot.slane %v4086_v49, 7  ;;  %v4094_v32 = vrot.slane %v4092_v1, 7  ;;  %v4100_v34 = vshll.u32 %v15449_v63, 16 }
 0x1b9   : > { %v4062_v51 = vrot.slane %v4061_v40, 2  ;;  %v4076_v47 = vrot.slane %v4075_v27, 2  ;;  %v4106_v38 = vshll.u32 %v3206_v7, 16  ;;  %v9782_v36 = vcombine.high %v15773_v22, %v15773_v22  ;;  %v16695_v7 = vld [vmem:[%s20793_s1 + $0x70] sm:$0xff]   ;;  %v595_v27 = vld [vmem:[#allocation2 + $0x2c] sm:$0x4] }
 0x1ba   : > { %v4099_v59 = vrot.slane %v4097_v6, 6  ;;  %v4089_v55 = vor.u32 %v4088_v62, %v4085_v23  ;;  %v4102_v41 = vrot.slane %v4100_v34, 7  ;;  %v10285_v29 = vrot.slane %v10284_v12, 2  ;;  %16084 = vmatprep.subr.bf16.mxu0 %v16695_v7 }
 0x1bb   : > { %v4067_v8 = vsel %vm17115_vm15, %v4062_v51, %v4066_v5  ;;  %v4081_v25 = vsel %vm17115_vm15, %v4076_v47, %v4080_v11  ;;  %v4108_v35 = vrot.slane %v4106_v38, 7  ;;  %v10295_v54 = vshll.u32 %v17945_v61, 16  ;;  %v15645_v63 = vld.sshfl [vmem:[#allocation2 + $0x10] sm:$0x12 pattern:$0x76325410] }
 0x1bc   : > { %v4090_v53 = vrot.slane %v4089_v55, 2  ;;  %v4103_v57 = vor.u32 %v4102_v41, %v4099_v59  ;;  %v4365_v3 = vcombine.low %v4067_v8, %v4081_v25  ;;  %v10290_v2 = vsel %vm17115_vm15, %v10285_v29, %v10289_v24  ;;  %v16698_v38 = vld [vmem:[%s20793_s1 + $0x30] sm:$0xff]   ;;  %v15775_v55 = vld.sshfl [vmem:[#allocation2 + $0x24] sm:$0x13 pattern:$0x76325410] }
 0x1bd   : > { %v10297_v44 = vrot.slane %v10295_v54, 7  ;;  %v10301_v15 = vshll.u32 %v9774_v4, 16  ;;  %v10306_v46 = vshrl.u32 %v15773_v22, 16  ;;  %v10309_v31 = vshll.u32 %v15773_v22, 16  ;;  %v304_v22 = vld [vmem:[#allocation2 + $0x2c] sm:$0x1]  ;;  %16085 = vmatpush3.bf16.msra.mxu0 %v16698_v38 }
 0x1be   : > { %v4095_v30 = vsel %vm17115_vm15, %v4090_v53, %v4094_v32  ;;  %v4104_v33 = vrot.slane %v4103_v57, 2  ;;  %v4373_v61 = vrot.slane %v4365_v3, %v17100_v16  ;;  %v10315_v43 = vshll.u32 %v9782_v36, 16  ;;  %v15776_v25 = vld.sshfl [vmem:[#allocation2 + $0x28] sm:$0x13 pattern:$0x76325410] }
 0x1bf   : > { %v10298_v18 = vor.u32 %v10297_v44, %v10294_v42  ;;  %v10303_v20 = vrot.slane %v10301_v15, 7  ;;  %v10308_v24 = vrot.slane %v10306_v46, 6  ;;  %v10311_v12 = vrot.slane %v10309_v31, 7 }
 0x1c0   : > { %v4109_v4 = vsel %vm17115_vm15, %v4104_v33, %v4108_v35  ;;  %v10317_v14 = vrot.slane %v10315_v43, 7  ;;  %v11159_v58 = vcombine.low %v17975_v21, %v10290_v2  ;;  %v8117_v19 = vcombine.high %v15645_v63, %v15645_v63  ;;  %v15646_v2 = vld.sshfl [vmem:[#allocation2 + $0x1c] sm:$0x12 pattern:$0x76325410] }
 0x1c1   : > { %v4366_v5 = vcombine.low %v4095_v30, %v4109_v4  ;;  %v10299_v56 = vrot.slane %v10298_v18, 2  ;;  %v10312_v60 = vor.u32 %v10311_v12, %v10308_v24  ;;  %v15706_v21 = vrot.slane %v17953_v26, 9  ;;  %v15647_v31 = vld.sshfl [vmem:[#allocation2 + $0x20] sm:$0x12 pattern:$0x76325410] }
 0x1c2   : > { %v11167_v48 = vrot.slane %v11159_v58, %v17100_v16  ;;  %v8600_v23 = vrot.slane %v8093_v37, 7  ;;  %v15707_v6 = vrot.slane %v17958_v13, 9  ;;  %v8604_v50 = vrot.slane %v8101_v28, 7 }
 0x1c3   : > { %v4380_v40 = vrot.slane %v4366_v5, %v17100_v16  ;;  %v10304_v49 = vsel %vm17115_vm15, %v10299_v56, %v10303_v20  ;;  %v10313_v1 = vrot.slane %v10312_v60, 2  ;;  %v15708_v51 = vrot.slane %v17960_v39, 9  ;;  %v15774_v28 = vld.sshfl [vmem:[#allocation2 + $0x20] sm:$0x13 pattern:$0x76325410] }
 0x1c4   : > { %v8608_v34 = vrot.slane %v8109_v52, 7  ;;  %v15709_v47 = vrot.slane %v15645_v63, 9  ;;  %v8601_v26 = vsel %vm18007_vm8, %v15706_v21, %v8600_v23  ;;  %v8605_v37 = vsel %vm18007_vm8, %v15707_v6, %v8604_v50  ;;  %v18042_v30 = vld.sshfl [vmem:[#allocation2 + $0x24] sm:$0x12 pattern:$0x76325410] }
 0x1c5   : > { %v4381_v62 = vcombine.low %v4373_v61, %v4380_v40  ;;  %v10318_v32 = vsel %vm17115_vm15, %v10313_v1, %v10317_v14  ;;  %v8612_v13 = vrot.slane %v8117_v19, 7  ;;  %v8854_v52 = vcombine.low %v8601_v26, %v8605_v37 }
 0x1c6   : > { %v11160_v59 = vcombine.low %v10304_v49, %v10318_v32  ;;  %v8609_v39 = vsel %vm18007_vm8, %v15708_v51, %v8608_v34  ;;  %v305_v36 = vsel %vm16965_vm2, 0, %v304_v22  ;;  %v596_v8 = vsel %vm16979_vm6, 0, %v595_v27 }
 0x1c7   : > { %4412 = vrot.lane.b32.xlu1 %v4381_v62, %s16926_s25  ;;  %v8613_v29 = vsel %vm18007_vm8, %v15709_v47, %v8612_v13  ;;  %306 = vst [vmem:[#allocation2 + $0x2c] sm:$0x1] %v305_v36  ;;  %597 = vst [vmem:[#allocation2 + $0x2c] sm:$0x4] %v596_v8  ;;  %v9790_v35 = vcombine.high %v15774_v28, %v15774_v28  ;;  %v9798_v42 = vcombine.high %v15775_v55, %v15775_v55  ;;  %v322_v13 = vld [vmem:[#allocation2 + $0x44] sm:$0x1] }
 0x1c8   : > { %v11174_v41 = vrot.slane %v11160_v59, %v17100_v16  ;;  %v8855_v54 = vcombine.low %v8609_v39, %v8613_v29  ;;  %v8862_v53 = vrot.slane %v8854_v52, %v17100_v16  ;;  %v9806_v57 = vcombine.high %v15776_v25, %v15776_v25  ;;  %v613_v36 = vld [vmem:[#allocation2 + $0x44] sm:$0x4]  ;;  %v16701_v8 = vld [vmem:[%s20793_s1 + $0x78] sm:$0xff]  }
 0x1c9   : > { %v10320_v3 = vshrl.u32 %v15774_v28, 16  ;;  %v10323_v44 = vshll.u32 %v15774_v28, 16  ;;  %v10329_v15 = vshll.u32 %v9790_v35, 16  ;;  %v10334_v46 = vshrl.u32 %v15775_v55, 16  ;;  %16086 = vmatprep.subr.bf16.mxu0 %v16701_v8 }
 0x1ca   : > { %v11175_v45 = vcombine.low %v11167_v48, %v11174_v41  ;;  %v8869_v33 = vrot.slane %v8855_v54, %v17100_v16  ;;  %v10337_v43 = vshll.u32 %v15775_v55, 16  ;;  %v10343_v63 = vshll.u32 %v9798_v42, 16  ;;  %v15649_v48 = vld.sshfl [vmem:[#allocation2 + $0x28] sm:$0x12 pattern:$0x76325410] }
 0x1cb   : > { %v10322_v61 = vrot.slane %v10320_v3, 6  ;;  %v10325_v18 = vrot.slane %v10323_v44, 7  ;;  %v10331_v20 = vrot.slane %v10329_v15, 7  ;;  %v10336_v24 = vrot.slane %v10334_v46, 6  ;;  %v16702_v3 = vld [vmem:[%s20793_s1 + $0x38] sm:$0xff]  }
 0x1cc   : > { %11431 = vrot.lane.b32.xlu0 %v11175_v45, %s16926_s25  ;;  %v10348_v12 = vshrl.u32 %v15776_v25, 16  ;;  %v8870_v7 = vcombine.low %v8862_v53, %v8869_v33  ;;  %v10339_v4 = vrot.slane %v10337_v43, 7  ;;  %v10345_v14 = vrot.slane %v10343_v63, 7  ;;  %16087 = vmatpush3.bf16.msra.mxu0 %v16702_v3 }
 0x1cd   : > { %v10351_v58 = vshll.u32 %v15776_v25, 16  ;;  %v10326_v5 = vor.u32 %v10325_v18, %v10322_v61  ;;  %v10357_v60 = vshll.u32 %v9806_v57, 16  ;;  %v8125_v19 = vcombine.high %v15646_v2, %v15646_v2  ;;  %v15778_v57 = vld.sshfl [vmem:[#allocation2 + $0x38] sm:$0x13 pattern:$0x76325410] }
 0x1ce   : > { %v10350_v56 = vrot.slane %v10348_v12, 6  ;;  %9126 = vrot.lane.b32.xlu1 %v8870_v7, %s16926_s25  ;;  %v15777_v40 = vld.sshfl [vmem:[#allocation2 + $0x2c] sm:$0x13 pattern:$0x76325410]  ;;  %v10340_v49 = vor.u32 %v10339_v4, %v10336_v24  ;;  %v8133_v21 = vcombine.high %v15647_v31, %v15647_v31  ;;  %v8141_v22 = vcombine.high %v18042_v30, %v18042_v30 }
 0x1cf   : > { %v10353_v1 = vrot.slane %v10351_v58, 7  ;;  %v9814_v27 = vcombine.high %v15777_v40, %v15777_v40  ;;  %v10327_v23 = vrot.slane %v10326_v5, 2  ;;  %v10359_v6 = vrot.slane %v10357_v60, 7 }
 0x1d0   : > { %v10362_v50 = vshrl.u32 %v15777_v40, 16  ;;  %v10341_v51 = vrot.slane %v10340_v49, 2  ;;  %v10365_v32 = vshll.u32 %v15777_v40, 16  ;;  %v8149_v34 = vcombine.high %v15649_v48, %v15649_v48 }
 0x1d1   : > { %v10354_v62 = vor.u32 %v10353_v1, %v10350_v56  ;;  %v10332_v47 = vsel %vm17115_vm15, %v10327_v23, %v10331_v20  ;;  %v10371_v26 = vshll.u32 %v9814_v27, 16  ;;  %v15710_v37 = vrot.slane %v15646_v2, 9  ;;  %v15779_v46 = vld.sshfl [vmem:[#allocation2 + $0x3c] sm:$0x13 pattern:$0x76325410] }
 0x1d2   : > { %v10364_v59 = vrot.slane %v10362_v50, 6  ;;  %v10346_v28 = vsel %vm17115_vm15, %v10341_v51, %v10345_v14  ;;  %v10367_v39 = vrot.slane %v10365_v32, 7  ;;  %v8616_v52 = vrot.slane %v8125_v19, 7 }
 0x1d3   : > { %v10355_v38 = vrot.slane %v10354_v62, 2  ;;  %v10373_v55 = vrot.slane %v10371_v26, 7  ;;  %v11176_v41 = vcombine.low %v10332_v47, %v10346_v28  ;;  %v15711_v29 = vrot.slane %v15647_v31, 9 }
 0x1d4   : > { %v8620_v25 = vrot.slane %v8133_v21, 7  ;;  %v10368_v42 = vor.u32 %v10367_v39, %v10364_v59  ;;  %v8617_v54 = vsel %vm18007_vm8, %v15710_v37, %v8616_v52  ;;  %v15712_v53 = vrot.slane %v18042_v30, 9  ;;  %v15780_v18 = vld.sshfl [vmem:[#allocation2 + $0x40] sm:$0x13 pattern:$0x76325410] }
 0x1d5   : > { %v10360_v35 = vsel %vm17115_vm15, %v10355_v38, %v10359_v6  ;;  %v11184_v2 = vrot.slane %v11176_v41, %v17100_v16  ;;  %v8624_v44 = vrot.slane %v8141_v22, 7  ;;  %v15713_v15 = vrot.slane %v15649_v48, 9  ;;  %v15650_v48 = vld.sshfl [vmem:[#allocation2 + $0x34] sm:$0x12 pattern:$0x76325410] }
 0x1d6   : > { %v8621_v45 = vsel %vm18007_vm8, %v15711_v29, %v8620_v25  ;;  %v10369_v31 = vrot.slane %v10368_v42, 2  ;;  %v8628_v33 = vrot.slane %v8149_v34, 7  ;;  %v323_v30 = vsel %vm16965_vm2, 0, %v322_v13  ;;  %v16705_v13 = vld [vmem:[%s20793_s1 + $0x100] sm:$0xff]  }
 0x1d7   : > { %v8871_v61 = vcombine.low %v8617_v54, %v8621_v45  ;;  %v8625_v43 = vsel %vm18007_vm8, %v15712_v53, %v8624_v44  ;;  %324 = vst [vmem:[#allocation2 + $0x44] sm:$0x1] %v323_v30  ;;  %v614_v63 = vsel %vm16979_vm6, 0, %v613_v36  ;;  %v9822_v20 = vcombine.high %v15778_v57, %v15778_v57  ;;  %16560 = vmatprep.subr.bf16.mxu0 %v16705_v13 }
 0x1d8   : > { %v9830_v24 = vcombine.high %v15779_v46, %v15779_v46  ;;  %v10374_v12 = vsel %vm17115_vm15, %v10369_v31, %v10373_v55  ;;  %v8629_v7 = vsel %vm18007_vm8, %v15713_v15, %v8628_v33  ;;  %615 = vst [vmem:[#allocation2 + $0x44] sm:$0x4] %v614_v63  ;;  %v9838_v14 = vcombine.high %v15780_v18, %v15780_v18  ;;  %v15651_v21 = vld.sshfl [vmem:[#allocation2 + $0x38] sm:$0x12 pattern:$0x76325410] }
 0x1d9   : > { %v8879_v4 = vrot.slane %v8871_v61, %v17100_v16  ;;  %v11177_v58 = vcombine.low %v10360_v35, %v10374_v12  ;;  %v8872_v5 = vcombine.low %v8625_v43, %v8629_v7  ;;  %v10376_v56 = vshrl.u32 %v15778_v57, 16  ;;  %v15652_v50 = vld.sshfl [vmem:[#allocation2 + $0x3c] sm:$0x12 pattern:$0x76325410] }
 0x1da   : > { %v10379_v60 = vshll.u32 %v15778_v57, 16  ;;  %v10385_v19 = vshll.u32 %v9822_v20, 16  ;;  %v10390_v40 = vshrl.u32 %v15779_v46, 16  ;;  %v10393_v49 = vshll.u32 %v15779_v46, 16  ;;  %v340_v33 = vld [vmem:[#allocation2 + $0x5c] sm:$0x1] }
 0x1db   : > { %v10399_v1 = vshll.u32 %v9830_v24, 16  ;;  %v11191_v22 = vrot.slane %v11177_v58, %v17100_v16  ;;  %v8886_v27 = vrot.slane %v8872_v5, %v17100_v16  ;;  %v10378_v23 = vrot.slane %v10376_v56, 6  ;;  %v15653_v52 = vld.sshfl [vmem:[#allocation2 + $0x40] sm:$0x12 pattern:$0x76325410] }
 0x1dc   : > { %v10381_v6 = vrot.slane %v10379_v60, 7  ;;  %v10387_v51 = vrot.slane %v10385_v19, 7  ;;  %v10392_v62 = vrot.slane %v10390_v40, 6  ;;  %v10395_v32 = vrot.slane %v10393_v49, 7 }
 0x1dd   : > { %v10401_v34 = vrot.slane %v10399_v1, 7  ;;  %v11192_v47 = vcombine.low %v11184_v2, %v11191_v22  ;;  %v8887_v59 = vcombine.low %v8879_v4, %v8886_v27  ;;  %v10404_v37 = vshrl.u32 %v15780_v18, 16  ;;  %v15782_v56 = vld.sshfl [vmem:[#allocation2 + $0x50] sm:$0x13 pattern:$0x76325410] }
 0x1de   : > { %v10382_v26 = vor.u32 %v10381_v6, %v10378_v23  ;;  %v10396_v28 = vor.u32 %v10395_v32, %v10392_v62  ;;  %v10407_v38 = vshll.u32 %v15780_v18, 16  ;;  %v10413_v39 = vshll.u32 %v9838_v14, 16  ;;  %v631_v18 = vld [vmem:[#allocation2 + $0x5c] sm:$0x4] }
 0x1df   : > { %v8157_v36 = vcombine.high %v15650_v48, %v15650_v48  ;;  %11433 = vrot.lane.b32.xlu0 %v11192_v47, %s16926_s25  ;;  %9128 = vrot.lane.b32.xlu1 %v8887_v59, %s16926_s25  ;;  %v15781_v8 = vld.sshfl [vmem:[#allocation2 + $0x44] sm:$0x13 pattern:$0x76325410]  ;;  %v10406_v41 = vrot.slane %v10404_v37, 6  ;;  %v8165_v29 = vcombine.high %v15651_v21, %v15651_v21  ;;  %v8173_v25 = vcombine.high %v15652_v50, %v15652_v50 }
 0x1e0   : > { %v10383_v55 = vrot.slane %v10382_v26, 2  ;;  %v9846_v35 = vcombine.high %v15781_v8, %v15781_v8  ;;  %v10397_v42 = vrot.slane %v10396_v28, 2  ;;  %v10409_v54 = vrot.slane %v10407_v38, 7 }
 0x1e1   : > { %v10415_v53 = vrot.slane %v10413_v39, 7  ;;  %v10418_v3 = vshrl.u32 %v15781_v8, 16  ;;  %v10421_v2 = vshll.u32 %v15781_v8, 16  ;;  %v8181_v45 = vcombine.high %v15653_v52, %v15653_v52 }
 0x1e2   : > { %v10388_v57 = vsel %vm17115_vm15, %v10383_v55, %v10387_v51  ;;  %v10402_v44 = vsel %vm17115_vm15, %v10397_v42, %v10401_v34  ;;  %v10410_v15 = vor.u32 %v10409_v54, %v10406_v41  ;;  %v10427_v46 = vshll.u32 %v9846_v35, 16  ;;  %v15783_v49 = vld.sshfl [vmem:[#allocation2 + $0x54] sm:$0x13 pattern:$0x76325410] }
 0x1e3   : > { %v15714_v31 = vrot.slane %v15650_v48, 9  ;;  %v10420_v61 = vrot.slane %v10418_v3, 6  ;;  %v10423_v30 = vrot.slane %v10421_v2, 7  ;;  %v11193_v43 = vcombine.low %v10388_v57, %v10402_v44 }
 0x1e4   : > { %v8632_v63 = vrot.slane %v8157_v36, 7  ;;  %v10411_v20 = vrot.slane %v10410_v15, 2  ;;  %v10429_v24 = vrot.slane %v10427_v46, 7  ;;  %v15715_v12 = vrot.slane %v15651_v21, 9 }
 0x1e5   : > { %v8636_v7 = vrot.slane %v8165_v29, 7  ;;  %v10424_v4 = vor.u32 %v10423_v30, %v10420_v61  ;;  %v11201_v14 = vrot.slane %v11193_v43, %v17100_v16  ;;  %v15716_v5 = vrot.slane %v15652_v50, 9  ;;  %v15784_v50 = vld.sshfl [vmem:[#allocation2 + $0x58] sm:$0x13 pattern:$0x76325410] }
 0x1e6   : > { %v8633_v58 = vsel %vm18007_vm8, %v15714_v31, %v8632_v63  ;;  %v10416_v60 = vsel %vm17115_vm15, %v10411_v20, %v10415_v53  ;;  %v8640_v19 = vrot.slane %v8173_v25, 7  ;;  %v15717_v40 = vrot.slane %v15653_v52, 9  ;;  %v15654_v38 = vld.sshfl [vmem:[#allocation2 + $0x4c] sm:$0x12 pattern:$0x76325410] }
 0x1e7   : > { %v8637_v48 = vsel %vm18007_vm8, %v15715_v12, %v8636_v7  ;;  %v10425_v1 = vrot.slane %v10424_v4, 2  ;;  %v8644_v21 = vrot.slane %v8181_v45, 7  ;;  %v341_v27 = vsel %vm16965_vm2, 0, %v340_v33 }
 0x1e8   : > { %v8888_v22 = vcombine.low %v8633_v58, %v8637_v48  ;;  %v8641_v23 = vsel %vm18007_vm8, %v15716_v5, %v8640_v19  ;;  %342 = vst [vmem:[#allocation2 + $0x5c] sm:$0x1] %v341_v27  ;;  %v632_v6 = vsel %vm16979_vm6, 0, %v631_v18  ;;  %v9854_v51 = vcombine.high %v15782_v56, %v15782_v56 }
 0x1e9   : > { %v9862_v62 = vcombine.high %v15783_v49, %v15783_v49  ;;  %v10430_v32 = vsel %vm17115_vm15, %v10425_v1, %v10429_v24  ;;  %v8645_v34 = vsel %vm18007_vm8, %v15717_v40, %v8644_v21  ;;  %633 = vst [vmem:[#allocation2 + $0x5c] sm:$0x4] %v632_v6  ;;  %v9870_v59 = vcombine.high %v15784_v50, %v15784_v50  ;;  %v15655_v55 = vld.sshfl [vmem:[#allocation2 + $0x50] sm:$0x12 pattern:$0x76325410] }
 0x1ea   : > { %v8896_v47 = vrot.slane %v8888_v22, %v17100_v16  ;;  %v11194_v26 = vcombine.low %v10416_v60, %v10430_v32  ;;  %v8889_v37 = vcombine.low %v8641_v23, %v8645_v34  ;;  %v10432_v13 = vshrl.u32 %v15782_v56, 16  ;;  %v15656_v42 = vld.sshfl [vmem:[#allocation2 + $0x54] sm:$0x12 pattern:$0x76325410] }
 0x1eb   : > { %v10435_v28 = vshll.u32 %v15782_v56, 16  ;;  %v10441_v39 = vshll.u32 %v9854_v51, 16  ;;  %v10446_v52 = vshrl.u32 %v15783_v49, 16  ;;  %v10449_v36 = vshll.u32 %v15783_v49, 16  ;;  %v358_v1 = vld [vmem:[#allocation2 + $0x74] sm:$0x1] }
 0x1ec   : > { %v10455_v8 = vshll.u32 %v9862_v62, 16  ;;  %v11208_v41 = vrot.slane %v11194_v26, %v17100_v16  ;;  %v8903_v29 = vrot.slane %v8889_v37, %v17100_v16  ;;  %v10434_v25 = vrot.slane %v10432_v13, 6  ;;  %v15657_v61 = vld.sshfl [vmem:[#allocation2 + $0x58] sm:$0x12 pattern:$0x76325410] }
 0x1ed   : > { %v10437_v35 = vrot.slane %v10435_v28, 7  ;;  %v10443_v54 = vrot.slane %v10441_v39, 7  ;;  %v10448_v53 = vrot.slane %v10446_v52, 6  ;;  %v10451_v57 = vrot.slane %v10449_v36, 7  ;;  %v649_v32 = vld [vmem:[#allocation2 + $0x74] sm:$0x4] }
 0x1ee   : > { %v10457_v3 = vrot.slane %v10455_v8, 7  ;;  %v11209_v2 = vcombine.low %v11201_v14, %v11208_v41  ;;  %v8904_v45 = vcombine.low %v8896_v47, %v8903_v29  ;;  %v10460_v15 = vshrl.u32 %v15784_v50, 16  ;;  %v15786_v37 = vld.sshfl [vmem:[#allocation2 + $0x68] sm:$0x13 pattern:$0x76325410] }
 0x1ef   : > { %v10438_v44 = vor.u32 %v10437_v35, %v10434_v25  ;;  %v10452_v46 = vor.u32 %v10451_v57, %v10448_v53  ;;  %v10463_v31 = vshll.u32 %v15784_v50, 16  ;;  %v10469_v33 = vshll.u32 %v9870_v59, 16  ;;  %v15787_v52 = vld.sshfl [vmem:[#allocation2 + $0x6c] sm:$0x13 pattern:$0x76325410] }
 0x1f0   : > { %v8189_v30 = vcombine.high %v15654_v38, %v15654_v38  ;;  %11435 = vrot.lane.b32.xlu0 %v11209_v2, %s16926_s25  ;;  %9130 = vrot.lane.b32.xlu1 %v8904_v45, %s16926_s25  ;;  %v15785_v43 = vld.sshfl [vmem:[#allocation2 + $0x5c] sm:$0x13 pattern:$0x76325410]  ;;  %v10462_v18 = vrot.slane %v10460_v15, 6  ;;  %v8197_v20 = vcombine.high %v15655_v55, %v15655_v55  ;;  %v8205_v24 = vcombine.high %v15656_v42, %v15656_v42 }
 0x1f1   : > { %v10439_v63 = vrot.slane %v10438_v44, 2  ;;  %v9878_v12 = vcombine.high %v15785_v43, %v15785_v43  ;;  %v10453_v7 = vrot.slane %v10452_v46, 2  ;;  %v10465_v4 = vrot.slane %v10463_v31, 7 }
 0x1f2   : > { %v10471_v14 = vrot.slane %v10469_v33, 7  ;;  %v10474_v5 = vshrl.u32 %v15785_v43, 16  ;;  %v10477_v56 = vshll.u32 %v15785_v43, 16  ;;  %v8213_v60 = vcombine.high %v15657_v61, %v15657_v61 }
 0x1f3   : > { %v10444_v58 = vsel %vm17115_vm15, %v10439_v63, %v10443_v54  ;;  %v10458_v48 = vsel %vm17115_vm15, %v10453_v7, %v10457_v3  ;;  %v10466_v19 = vor.u32 %v10465_v4, %v10462_v18  ;;  %v10483_v40 = vshll.u32 %v9878_v12, 16  ;;  %v15788_v35 = vld.sshfl [vmem:[#allocation2 + $0x70] sm:$0x13 pattern:$0x76325410] }
 0x1f4   : > { %v15718_v49 = vrot.slane %v15654_v38, 9  ;;  %v10476_v21 = vrot.slane %v10474_v5, 6  ;;  %v10479_v22 = vrot.slane %v10477_v56, 7  ;;  %v11210_v27 = vcombine.low %v10444_v58, %v10458_v48 }
 0x1f5   : > { %v8648_v23 = vrot.slane %v8189_v30, 7  ;;  %v10467_v6 = vrot.slane %v10466_v19, 2  ;;  %v10485_v50 = vrot.slane %v10483_v40, 7  ;;  %v15719_v51 = vrot.slane %v15655_v55, 9 }
 0x1f6   : > { %v8652_v62 = vrot.slane %v8197_v20, 7  ;;  %v10480_v34 = vor.u32 %v10479_v22, %v10476_v21  ;;  %v11218_v47 = vrot.slane %v11210_v27, %v17100_v16  ;;  %v15720_v26 = vrot.slane %v15656_v42, 9  ;;  %v15658_v31 = vld.sshfl [vmem:[#allocation2 + $0x64] sm:$0x12 pattern:$0x76325410] }
 0x1f7   : > { %v8649_v59 = vsel %vm18007_vm8, %v15718_v49, %v8648_v23  ;;  %v10472_v13 = vsel %vm17115_vm15, %v10467_v6, %v10471_v14  ;;  %v8656_v38 = vrot.slane %v8205_v24, 7  ;;  %v15721_v39 = vrot.slane %v15657_v61, 9  ;;  %v15659_v63 = vld.sshfl [vmem:[#allocation2 + $0x68] sm:$0x12 pattern:$0x76325410] }
 0x1f8   : > { %v8653_v28 = vsel %vm18007_vm8, %v15719_v51, %v8652_v62  ;;  %v10481_v36 = vrot.slane %v10480_v34, 2  ;;  %v8660_v8 = vrot.slane %v8213_v60, 7  ;;  %v359_v41 = vsel %vm16965_vm2, 0, %v358_v1 }
 0x1f9   : > { %v8905_v55 = vcombine.low %v8649_v59, %v8653_v28  ;;  %v8657_v29 = vsel %vm18007_vm8, %v15720_v26, %v8656_v38  ;;  %360 = vst [vmem:[#allocation2 + $0x74] sm:$0x1] %v359_v41  ;;  %v650_v25 = vsel %vm16979_vm6, 0, %v649_v32  ;;  %v9886_v42 = vcombine.high %v15786_v37, %v15786_v37 }
 0x1fa   : > { %v9894_v54 = vcombine.high %v15787_v52, %v15787_v52  ;;  %v10486_v53 = vsel %vm17115_vm15, %v10481_v36, %v10485_v50  ;;  %v8661_v57 = vsel %vm18007_vm8, %v15721_v39, %v8660_v8  ;;  %651 = vst [vmem:[#allocation2 + $0x74] sm:$0x4] %v650_v25  ;;  %v9902_v2 = vcombine.high %v15788_v35, %v15788_v35  ;;  %v15660_v7 = vld.sshfl [vmem:[#allocation2 + $0x6c] sm:$0x12 pattern:$0x76325410] }
 0x1fb   : > { %v8913_v3 = vrot.slane %v8905_v55, %v17100_v16  ;;  %v11211_v45 = vcombine.low %v10472_v13, %v10486_v53  ;;  %v8906_v44 = vcombine.low %v8657_v29, %v8661_v57  ;;  %v10488_v15 = vshrl.u32 %v15786_v37, 16  ;;  %v15661_v21 = vld.sshfl [vmem:[#allocation2 + $0x70] sm:$0x12 pattern:$0x76325410] }
 0x1fc   : > { %v10491_v46 = vshll.u32 %v15786_v37, 16  ;;  %v10497_v33 = vshll.u32 %v9886_v42, 16  ;;  %v10502_v61 = vshrl.u32 %v15787_v52, 16  ;;  %v10505_v30 = vshll.u32 %v15787_v52, 16  ;;  %v376_v36 = vld [vmem:[#allocation2 + $0x8c] sm:$0x1] }
 0x1fd   : > { %v10511_v43 = vshll.u32 %v9894_v54, 16  ;;  %v11225_v18 = vrot.slane %v11211_v45, %v17100_v16  ;;  %v8920_v20 = vrot.slane %v8906_v44, %v17100_v16  ;;  %v10490_v24 = vrot.slane %v10488_v15, 6  ;;  %v667_v25 = vld [vmem:[#allocation2 + $0x8c] sm:$0x4] }
 0x1fe   : > { %v10493_v12 = vrot.slane %v10491_v46, 7  ;;  %v10499_v4 = vrot.slane %v10497_v33, 7  ;;  %v10504_v14 = vrot.slane %v10502_v61, 6  ;;  %v10507_v58 = vrot.slane %v10505_v30, 7 }
 0x1ff   : > { %v10513_v5 = vrot.slane %v10511_v43, 7  ;;  %v11226_v56 = vcombine.low %v11218_v47, %v11225_v18  ;;  %v8921_v60 = vcombine.low %v8913_v3, %v8920_v20  ;;  %v10516_v19 = vshrl.u32 %v15788_v35, 16  ;;  %v15790_v44 = vld.sshfl [vmem:[#allocation2 + $0x80] sm:$0x13 pattern:$0x76325410] }
 0x200   : > { %v10494_v48 = vor.u32 %v10493_v12, %v10490_v24  ;;  %v10508_v40 = vor.u32 %v10507_v58, %v10504_v14  ;;  %v10519_v49 = vshll.u32 %v15788_v35, 16  ;;  %v10525_v1 = vshll.u32 %v9902_v2, 16  ;;  %v15791_v61 = vld.sshfl [vmem:[#allocation2 + $0x84] sm:$0x13 pattern:$0x76325410] }
 0x201   : > { %v8221_v22 = vcombine.high %v15658_v31, %v15658_v31  ;;  %11437 = vrot.lane.b32.xlu0 %v11226_v56, %s16926_s25  ;;  %9132 = vrot.lane.b32.xlu1 %v8921_v60, %s16926_s25  ;;  %v15789_v27 = vld.sshfl [vmem:[#allocation2 + $0x74] sm:$0x13 pattern:$0x76325410]  ;;  %v10518_v6 = vrot.slane %v10516_v19, 6  ;;  %v8229_v50 = vcombine.high %v15659_v63, %v15659_v63  ;;  %v8237_v51 = vcombine.high %v15660_v7, %v15660_v7 }
 0x202   : > { %v10495_v23 = vrot.slane %v10494_v48, 2  ;;  %v9910_v62 = vcombine.high %v15789_v27, %v15789_v27  ;;  %v10509_v32 = vrot.slane %v10508_v40, 2  ;;  %v10521_v34 = vrot.slane %v10519_v49, 7 }
 0x203   : > { %v10527_v47 = vrot.slane %v10525_v1, 7  ;;  %v10530_v26 = vshrl.u32 %v15789_v27, 16  ;;  %v10533_v37 = vshll.u32 %v15789_v27, 16  ;;  %v8245_v13 = vcombine.high %v15661_v21, %v15661_v21 }
 0x204   : > { %v10500_v59 = vsel %vm17115_vm15, %v10495_v23, %v10499_v4  ;;  %v10514_v28 = vsel %vm17115_vm15, %v10509_v32, %v10513_v5  ;;  %v10522_v38 = vor.u32 %v10521_v34, %v10518_v6  ;;  %v10539_v39 = vshll.u32 %v9910_v62, 16  ;;  %v15792_v12 = vld.sshfl [vmem:[#allocation2 + $0x88] sm:$0x13 pattern:$0x76325410] }
 0x205   : > { %v15722_v52 = vrot.slane %v15658_v31, 9  ;;  %v10532_v8 = vrot.slane %v10530_v26, 6  ;;  %v10535_v55 = vrot.slane %v10533_v37, 7  ;;  %v11227_v41 = vcombine.low %v10500_v59, %v10514_v28 }
 0x206   : > { %v8664_v29 = vrot.slane %v8221_v22, 7  ;;  %v10523_v35 = vrot.slane %v10522_v38, 2  ;;  %v10541_v42 = vrot.slane %v10539_v39, 7  ;;  %v15723_v54 = vrot.slane %v15659_v63, 9 }
 0x207   : > { %v8668_v53 = vrot.slane %v8229_v50, 7  ;;  %v10536_v57 = vor.u32 %v10535_v55, %v10532_v8  ;;  %v11235_v3 = vrot.slane %v11227_v41, %v17100_v16  ;;  %v15724_v45 = vrot.slane %v15660_v7, 9  ;;  %v15662_v49 = vld.sshfl [vmem:[#allocation2 + $0x7c] sm:$0x12 pattern:$0x76325410] }
 0x208   : > { %v8665_v2 = vsel %vm18007_vm8, %v15722_v52, %v8664_v29  ;;  %v10528_v15 = vsel %vm17115_vm15, %v10523_v35, %v10527_v47  ;;  %v8672_v31 = vrot.slane %v8237_v51, 7  ;;  %v15725_v33 = vrot.slane %v15661_v21, 9  ;;  %v15663_v23 = vld.sshfl [vmem:[#allocation2 + $0x80] sm:$0x12 pattern:$0x76325410] }
 0x209   : > { %v8669_v46 = vsel %vm18007_vm8, %v15723_v54, %v8668_v53  ;;  %v10537_v30 = vrot.slane %v10536_v57, 2  ;;  %v8676_v43 = vrot.slane %v8245_v13, 7  ;;  %v377_v18 = vsel %vm16965_vm2, 0, %v376_v36 }
 0x20a   : > { %v8922_v63 = vcombine.low %v8665_v2, %v8669_v46  ;;  %v8673_v20 = vsel %vm18007_vm8, %v15724_v45, %v8672_v31  ;;  %378 = vst [vmem:[#allocation2 + $0x8c] sm:$0x1] %v377_v18  ;;  %v668_v24 = vsel %vm16979_vm6, 0, %v667_v25  ;;  %v9918_v7 = vcombine.high %v15790_v44, %v15790_v44 }
 0x20b   : > { %v9926_v4 = vcombine.high %v15791_v61, %v15791_v61  ;;  %v10542_v14 = vsel %vm17115_vm15, %v10537_v30, %v10541_v42  ;;  %v8677_v58 = vsel %vm18007_vm8, %v15725_v33, %v8676_v43  ;;  %669 = vst [vmem:[#allocation2 + $0x8c] sm:$0x4] %v668_v24  ;;  %v9934_v56 = vcombine.high %v15792_v12, %v15792_v12  ;;  %v15664_v32 = vld.sshfl [vmem:[#allocation2 + $0x84] sm:$0x12 pattern:$0x76325410] }
 0x20c   : > { %v8930_v5 = vrot.slane %v8922_v63, %v17100_v16  ;;  %v11228_v60 = vcombine.low %v10528_v15, %v10542_v14  ;;  %v8923_v48 = vcombine.low %v8673_v20, %v8677_v58  ;;  %v10544_v19 = vshrl.u32 %v15790_v44, 16  ;;  %v15665_v8 = vld.sshfl [vmem:[#allocation2 + $0x88] sm:$0x12 pattern:$0x76325410] }
 0x20d   : > { %v10547_v40 = vshll.u32 %v15790_v44, 16  ;;  %v10553_v1 = vshll.u32 %v9918_v7, 16  ;;  %v10558_v21 = vshrl.u32 %v15791_v61, 16  ;;  %v10561_v22 = vshll.u32 %v15791_v61, 16  ;;  %v394_v30 = vld [vmem:[#allocation2 + $0xa4] sm:$0x1] }
 0x20e   : > { %v10567_v27 = vshll.u32 %v9926_v4, 16  ;;  %v11242_v6 = vrot.slane %v11228_v60, %v17100_v16  ;;  %v8937_v50 = vrot.slane %v8923_v48, %v17100_v16  ;;  %v10546_v51 = vrot.slane %v10544_v19, 6  ;;  %v685_v24 = vld [vmem:[#allocation2 + $0xa4] sm:$0x4] }
 0x20f   : > { %v10549_v62 = vrot.slane %v10547_v40, 7  ;;  %v10555_v34 = vrot.slane %v10553_v1, 7  ;;  %v10560_v47 = vrot.slane %v10558_v21, 6  ;;  %v10563_v59 = vrot.slane %v10561_v22, 7 }
 0x210   : > { %v10569_v26 = vrot.slane %v10567_v27, 7  ;;  %v11243_v37 = vcombine.low %v11235_v3, %v11242_v6  ;;  %v8938_v13 = vcombine.low %v8930_v5, %v8937_v50  ;;  %v10572_v38 = vshrl.u32 %v15792_v12, 16  ;;  %v15794_v48 = vld.sshfl [vmem:[#allocation2 + $0x98] sm:$0x13 pattern:$0x76325410] }
 0x211   : > { %v10550_v28 = vor.u32 %v10549_v62, %v10546_v51  ;;  %v10564_v39 = vor.u32 %v10563_v59, %v10560_v47  ;;  %v10575_v52 = vshll.u32 %v15792_v12, 16  ;;  %v10581_v36 = vshll.u32 %v9934_v56, 16  ;;  %v15795_v21 = vld.sshfl [vmem:[#allocation2 + $0x9c] sm:$0x13 pattern:$0x76325410] }
 0x212   : > { %v8253_v55 = vcombine.high %v15662_v49, %v15662_v49  ;;  %11439 = vrot.lane.b32.xlu0 %v11243_v37, %s16926_s25  ;;  %9134 = vrot.lane.b32.xlu1 %v8938_v13, %s16926_s25  ;;  %v15793_v41 = vld.sshfl [vmem:[#allocation2 + $0x8c] sm:$0x13 pattern:$0x76325410]  ;;  %v10574_v25 = vrot.slane %v10572_v38, 6  ;;  %v8261_v35 = vcombine.high %v15663_v23, %v15663_v23  ;;  %v8269_v42 = vcombine.high %v15664_v32, %v15664_v32 }
 0x213   : > { %v10551_v29 = vrot.slane %v10550_v28, 2  ;;  %v9942_v54 = vcombine.high %v15793_v41, %v15793_v41  ;;  %v10565_v53 = vrot.slane %v10564_v39, 2  ;;  %v10577_v57 = vrot.slane %v10575_v52, 7 }
 0x214   : > { %v10583_v3 = vrot.slane %v10581_v36, 7  ;;  %v10586_v45 = vshrl.u32 %v15793_v41, 16  ;;  %v10589_v44 = vshll.u32 %v15793_v41, 16  ;;  %v8277_v15 = vcombine.high %v15665_v8, %v15665_v8 }
 0x215   : > { %v10556_v2 = vsel %vm17115_vm15, %v10551_v29, %v10555_v34  ;;  %v10570_v46 = vsel %vm17115_vm15, %v10565_v53, %v10569_v26  ;;  %v10578_v31 = vor.u32 %v10577_v57, %v10574_v25  ;;  %v10595_v33 = vshll.u32 %v9942_v54, 16  ;;  %v15796_v62 = vld.sshfl [vmem:[#allocation2 + $0xa0] sm:$0x13 pattern:$0x76325410] }
 0x216   : > { %v15726_v61 = vrot.slane %v15662_v49, 9  ;;  %v10588_v43 = vrot.slane %v10586_v45, 6  ;;  %v10591_v63 = vrot.slane %v10589_v44, 7  ;;  %v11244_v18 = vcombine.low %v10556_v2, %v10570_v46 }
 0x217   : > { %v8680_v20 = vrot.slane %v8253_v55, 7  ;;  %v10579_v12 = vrot.slane %v10578_v31, 2  ;;  %v10597_v7 = vrot.slane %v10595_v33, 7  ;;  %v15727_v4 = vrot.slane %v15663_v23, 9 }
 0x218   : > { %v8684_v14 = vrot.slane %v8261_v35, 7  ;;  %v10592_v58 = vor.u32 %v10591_v63, %v10588_v43  ;;  %v11252_v5 = vrot.slane %v11244_v18, %v17100_v16  ;;  %v15728_v60 = vrot.slane %v15664_v32, 9  ;;  %v15666_v41 = vld.sshfl [vmem:[#allocation2 + $0x94] sm:$0x12 pattern:$0x76325410] }
 0x219   : > { %v8681_v56 = vsel %vm18007_vm8, %v15726_v61, %v8680_v20  ;;  %v10584_v19 = vsel %vm17115_vm15, %v10579_v12, %v10583_v3  ;;  %v8688_v49 = vrot.slane %v8269_v42, 7  ;;  %v15729_v1 = vrot.slane %v15665_v8, 9  ;;  %v15667_v54 = vld.sshfl [vmem:[#allocation2 + $0x98] sm:$0x12 pattern:$0x76325410] }
 0x21a   : > { %v8685_v40 = vsel %vm18007_vm8, %v15727_v4, %v8684_v14  ;;  %v10593_v22 = vrot.slane %v10592_v58, 2  ;;  %v8692_v27 = vrot.slane %v8277_v15, 7  ;;  %v395_v6 = vsel %vm16965_vm2, 0, %v394_v30 }
 0x21b   : > { %v8939_v23 = vcombine.low %v8681_v56, %v8685_v40  ;;  %v8689_v50 = vsel %vm18007_vm8, %v15728_v60, %v8688_v49  ;;  %396 = vst [vmem:[#allocation2 + $0xa4] sm:$0x1] %v395_v6  ;;  %v686_v51 = vsel %vm16979_vm6, 0, %v685_v24  ;;  %v9950_v32 = vcombine.high %v15794_v48, %v15794_v48 }
 0x21c   : > { %v9958_v34 = vcombine.high %v15795_v21, %v15795_v21  ;;  %v10598_v47 = vsel %vm17115_vm15, %v10593_v22, %v10597_v7  ;;  %v8693_v59 = vsel %vm18007_vm8, %v15729_v1, %v8692_v27  ;;  %687 = vst [vmem:[#allocation2 + $0xa4] sm:$0x4] %v686_v51  ;;  %v9966_v37 = vcombine.high %v15796_v62, %v15796_v62  ;;  %v15668_v46 = vld.sshfl [vmem:[#allocation2 + $0x9c] sm:$0x12 pattern:$0x76325410] }
 0x21d   : > { %v8947_v26 = vrot.slane %v8939_v23, %v17100_v16  ;;  %v11245_v13 = vcombine.low %v10584_v19, %v10598_v47  ;;  %v8940_v28 = vcombine.low %v8689_v50, %v8693_v59  ;;  %v10600_v38 = vshrl.u32 %v15794_v48, 16  ;;  %v18189_v14 = vld.sshfl [vmem:[#allocation2 + $0xa0] sm:$0x12 pattern:$0x76325410] }
 0x21e   : > { %v10603_v39 = vshll.u32 %v15794_v48, 16  ;;  %v10609_v52 = vshll.u32 %v9950_v32, 16  ;;  %v10614_v36 = vshrl.u32 %v15795_v21, 16  ;;  %v10617_v8 = vshll.u32 %v15795_v21, 16 }
 0x21f   : > { %v10623_v55 = vshll.u32 %v9958_v34, 16  ;;  %v11259_v29 = vrot.slane %v11245_v13, %v17100_v16  ;;  %v8954_v25 = vrot.slane %v8940_v28, %v17100_v16  ;;  %v10602_v35 = vrot.slane %v10600_v38, 6  ;;  %v18199_v6 = vld.sshfl [vmem:[#allocation2] sm:$0x12 pattern:$0x76325410] }
 0x220   : > { %v10605_v42 = vrot.slane %v10603_v39, 7  ;;  %v10611_v53 = vrot.slane %v10609_v52, 7  ;;  %v10616_v57 = vrot.slane %v10614_v36, 6  ;;  %v10619_v3 = vrot.slane %v10617_v8, 7 }
 0x221   : > { %v11260_v2 = vcombine.low %v11252_v5, %v11259_v29  ;;  %v8955_v45 = vcombine.low %v8947_v26, %v8954_v25  ;;  %v10628_v15 = vshrl.u32 %v15796_v62, 16  ;;  %v10625_v33 = vrot.slane %v10623_v55, 7  ;;  %v18217_v52 = vld.sshfl [vmem:[#allocation2 + $0xc] sm:$0x12 pattern:$0x76325410] }
 0x222   : > { %v10606_v44 = vor.u32 %v10605_v42, %v10602_v35  ;;  %v10620_v31 = vor.u32 %v10619_v3, %v10616_v57  ;;  %v10631_v61 = vshll.u32 %v15796_v62, 16  ;;  %v10637_v30 = vshll.u32 %v9966_v37, 16  ;;  %v18206_v37 = vld.sshfl [vmem:[#allocation2 + $0x8] sm:$0x12 pattern:$0x76325410] }
 0x223   : > { %11441 = vrot.lane.b32.xlu0 %v11260_v2, %s16926_s25  ;;  %9136 = vrot.lane.b32.xlu1 %v8955_v45, %s16926_s25  ;;  %v15797_v43 = vld.sshfl [vmem:[#allocation2 + $0xa4] sm:$0x13 pattern:$0x76325410]  ;;  %v10630_v18 = vrot.slane %v10628_v15, 6  ;;  %v8285_v20 = vcombine.high %v15666_v41, %v15666_v41  ;;  %v8293_v24 = vcombine.high %v15667_v54, %v15667_v54  ;;  %v8301_v58 = vcombine.high %v15668_v46, %v15668_v46 }
 0x224   : > { %v10607_v63 = vrot.slane %v10606_v44, 2  ;;  %v9974_v12 = vcombine.high %v15797_v43, %v15797_v43  ;;  %v10621_v7 = vrot.slane %v10620_v31, 2  ;;  %v10633_v4 = vrot.slane %v10631_v61, 7 }
 0x225   : > { %v10639_v56 = vrot.slane %v10637_v30, 7  ;;  %v10642_v60 = vshrl.u32 %v15797_v43, 16  ;;  %v10645_v48 = vshll.u32 %v15797_v43, 16  ;;  %v15730_v1 = vrot.slane %v15666_v41, 9 }
 0x226   : > { %v10612_v5 = vsel %vm17115_vm15, %v10607_v63, %v10611_v53  ;;  %v10626_v19 = vsel %vm17115_vm15, %v10621_v7, %v10625_v33  ;;  %v10634_v40 = vor.u32 %v10633_v4, %v10630_v18  ;;  %v18195_v49 = vshll.u32 %v9974_v12, 16  ;;  %v18232_v42 = vld.sshfl [vmem:[#allocation2 + $0x4] sm:$0x12 pattern:$0x76325410] }
 0x227   : > { %v10644_v21 = vrot.slane %v10642_v60, 6  ;;  %v10647_v22 = vrot.slane %v10645_v48, 7  ;;  %v8309_v27 = vcombine.high %v18189_v14, %v18189_v14  ;;  %v8696_v23 = vrot.slane %v8285_v20, 7  ;;  %v6055_v48 = vpop.permute.xlu0 %6054 }
 0x228   : > { %v10635_v50 = vrot.slane %v10634_v40, 2  ;;  %v11261_v51 = vcombine.low %v10612_v5, %v10626_v19  ;;  %v15731_v62 = vrot.slane %v15667_v54, 9  ;;  %v8700_v32 = vrot.slane %v8293_v24, 7 }
 0x229   : > { %v10648_v34 = vor.u32 %v10647_v22, %v10644_v21  ;;  %v10653_v47 = vrot.slane %v18195_v49, 7  ;;  %v18204_v59 = vsel %vm18007_vm8, %v15730_v1, %v8696_v23  ;;  %v15732_v26 = vrot.slane %v15668_v46, 9  ;;  %v15454_v2 = vld.sshfl [vmem:[#allocation2 + $0x18] sm:$0x12 pattern:$0x76325410] }
 0x22a   : > { %v18210_v13 = vsel %vm17115_vm15, %v10635_v50, %v10639_v56  ;;  %v18214_v28 = vsel %vm18007_vm8, %v15731_v62, %v8700_v32  ;;  %v8704_v38 = vrot.slane %v8301_v58, 7  ;;  %v15733_v39 = vrot.slane %v18189_v14, 9  ;;  %v15456_v31 = vld.sshfl [vmem:[#allocation2 + $0x20] sm:$0x12 pattern:$0x76325410] }
 0x22b   : > { %v10649_v36 = vrot.slane %v10648_v34, 2  ;;  %v8708_v8 = vrot.slane %v8309_v27, 7  ;;  %v8956_v55 = vcombine.low %v18204_v59, %v18214_v28  ;;  %v18222_v41 = vrot.slane %v11261_v51, %v17100_v16  ;;  %v15457_v24 = vld.sshfl [vmem:[#allocation2 + $0x24] sm:$0x12 pattern:$0x76325410] }
 0x22c   : > { %v18226_v29 = vsel %vm18007_vm8, %v15732_v26, %v8704_v38  ;;  %v4582_v25 = vcombine.high %v18199_v6, %v18199_v6  ;;  %v4598_v35 = vcombine.high %v18206_v37, %v18206_v37  ;;  %v4606_v3 = vcombine.high %v18217_v52, %v18217_v52  ;;  %v16852_v58 = vld.sshfl [vmem:[#allocation2 + $0x8] sm:$0xf pattern:$0x76325410]  ;;  %v412_v38 = vld [vmem:[#allocation2 + $0xbc] sm:$0x1] }
 0x22d   : > { %v10654_v54 = vsel %vm17115_vm15, %v10649_v36, %v10653_v47  ;;  %v8709_v53 = vsel %vm18007_vm8, %v15733_v39, %v8708_v8  ;;  %v8964_v57 = vrot.slane %v8956_v55, %v17100_v16  ;;  %v15514_v15 = vrot.slane %v18199_v6, 9  ;;  %v16853_v40 = vld.sshfl [vmem:[#allocation2] sm:$0xf pattern:$0x76325410] }
 0x22e   : > { %v11262_v45 = vcombine.low %v18210_v13, %v10654_v54  ;;  %v8957_v44 = vcombine.low %v18226_v29, %v8709_v53  ;;  %v5096_v46 = vrot.slane %v4582_v25, 7  ;;  %v15516_v33 = vrot.slane %v18206_v37, 9  ;;  %v16854_v49 = vld.sshfl [vmem:[#allocation2 + $0x20] sm:$0xf pattern:$0x76325410]  ;;  %v18401_v37 = vpop.permute.xlu1 %6056  ;;  %v4383_v29 = vpop.permute.xlu0 %4382 }
 0x22f   : > { %v5104_v61 = vrot.slane %v4598_v35, 7  ;;  %v15517_v17 = vrot.slane %v18217_v52, 9  ;;  %v5108_v30 = vrot.slane %v4606_v3, 7  ;;  %v4590_v20 = vcombine.high %v18232_v42, %v18232_v42  ;;  %v703_v39 = vld [vmem:[#allocation2 + $0xbc] sm:$0x4] }
 0x230   : > { %v11276_v43 = vrot.slane %v11262_v45, %v17100_v16  ;;  %v8971_v63 = vrot.slane %v8957_v44, %v17100_v16  ;;  %v5097_v18 = vsel %vm18007_vm8, %v15514_v15, %v5096_v46  ;;  %vm4430_vm10 = vcmask 1048064   ;;  %v15455_v23 = vld.sshfl [vmem:[#allocation2 + $0x1c] sm:$0x12 pattern:$0x76325410] }
 0x231   : > { %v5105_v12 = vsel %vm18007_vm8, %v15516_v33, %v5104_v61  ;;  %v5109_v7 = vsel %vm18007_vm8, %v15517_v17, %v5108_v30  ;;  %v15515_v4 = vrot.slane %v18232_v42, 9  ;;  %v4614_v14 = vcombine.high %v15454_v2, %v15454_v2  ;;  %v16855_v32 = vld.sshfl [vmem:[#allocation2 + $0x18] sm:$0xf pattern:$0x76325410] }
 0x232   : > { %v11277_v5 = vcombine.low %v18222_v41, %v11276_v43  ;;  %v8972_v56 = vcombine.low %v8964_v57, %v8971_v63  ;;  %v5351_v60 = vcombine.low %v5105_v12, %v5109_v7  ;;  %v5100_v19 = vrot.slane %v4590_v20, 7  ;;  %v15798_v35 = vld.sshfl [vmem:[#allocation2 + $0xb0] sm:$0x13 pattern:$0x76325410]  ;;  %v4385_v63 = vpop.permute.xlu1 %4384 }
 0x233   : > { %v4630_v1 = vcombine.high %v15456_v31, %v15456_v31  ;;  %v4638_v21 = vcombine.high %v15457_v24, %v15457_v24  ;;  %v15518_v22 = vrot.slane %v15454_v2, 9  ;;  %v5112_v27 = vrot.slane %v4614_v14, 7  ;;  %v15799_v57 = vld.sshfl [vmem:[#allocation2 + $0xb4] sm:$0x13 pattern:$0x76325410] }
 0x234   : > { %11443 = vrot.lane.b32.xlu0 %v11277_v5, %s16926_s25  ;;  %9138 = vrot.lane.b32.xlu1 %v8972_v56, %s16926_s25  ;;  %v5365_v6 = vrot.slane %v5351_v60, %v17100_v16  ;;  %v5101_v50 = vsel %vm18007_vm8, %v15515_v4, %v5100_v19  ;;  %v15520_v51 = vrot.slane %v15456_v31, 9  ;;  %v15521_v62 = vrot.slane %v15457_v24, 9  ;;  %v15800_v15 = vld.sshfl [vmem:[#allocation2 + $0xb8] sm:$0x13 pattern:$0x76325410] }
 0x235   : > { %v5350_v34 = vcombine.low %v5097_v18, %v5101_v50  ;;  %v5113_v47 = vsel %vm18007_vm8, %v15518_v22, %v5112_v27  ;;  %v5120_v59 = vrot.slane %v4630_v1, 7  ;;  %v5124_v26 = vrot.slane %v4638_v21, 7  ;;  %v18418_v30 = vld.sshfl [vmem:[#allocation2 + $0xac] sm:$0x12 pattern:$0x76325410] }
 0x236   : > { %v4622_v13 = vcombine.high %v15455_v23, %v15455_v23  ;;  %v15519_v28 = vrot.slane %v15455_v23, 9  ;;  %v2278_v25 = vcombine.low %v16853_v40, %v16852_v58  ;;  %v413_v54 = vsel %vm16965_vm2, 0, %v412_v38  ;;  %v18420_v43 = vld.sshfl [vmem:[#allocation2 + $0xb0] sm:$0x12 pattern:$0x76325410] }
 0x237   : > { %v5358_v52 = vrot.slane %v5350_v34, %v17100_v16  ;;  %v5121_v36 = vsel %vm18007_vm8, %v15520_v51, %v5120_v59  ;;  %v5125_v8 = vsel %vm18007_vm8, %v15521_v62, %v5124_v26  ;;  %v704_v53 = vsel %vm16979_vm6, 0, %v703_v39  ;;  %414 = vst [vmem:[#allocation2 + $0xbc] sm:$0x1] %v413_v54  ;;  %v16722_v51 = vld [vmem:[%s20793_s1 + $0xc0] sm:$0xff]  }
 0x238   : > { %v5368_v55 = vcombine.low %v5121_v36, %v5125_v8  ;;  %v5116_v41 = vrot.slane %v4622_v13, 7  ;;  %v9982_v3 = vcombine.high %v15798_v35, %v15798_v35  ;;  %2551 = vst.msk [vmem:[#allocation4] sm:$0xff] %vm2550_vm9, %v2278_v25  ;;  %v2295_v44 = vcombine.low %v16855_v32, %v16854_v49  ;;  %705 = vst [vmem:[#allocation2 + $0xbc] sm:$0x4] %v704_v53  ;;  %v16723_v25 = vld [vmem:[%s20793_s1 + $0x80] sm:$0xff]  }
 0x239   : > { %v5366_v42 = vcombine.low %v5358_v52, %v5365_v6  ;;  %v9990_v46 = vcombine.high %v15799_v57, %v15799_v57  ;;  %4431 = vst.msk [vmem:[#allocation4] sm:$0xff] %vm4430_vm10, %v4383_v29  ;;  %v9998_v33 = vcombine.high %v15800_v15, %v15800_v15  ;;  %v10656_v61 = vshrl.u32 %v15798_v35, 16  ;;  %v18424_v7 = vld.sshfl [vmem:[#allocation2 + $0xb4] sm:$0x12 pattern:$0x76325410]  ;;  %16184 = vmatprep.subr.bf16.mxu1 %v16722_v51 }
 0x23a   : > { %v5382_v2 = vrot.slane %v5368_v55, %v17100_v16  ;;  %v5117_v45 = vsel %vm18007_vm8, %v15519_v28, %v5116_v41  ;;  %v10659_v17 = vshll.u32 %v15798_v35, 16  ;;  %2552 = vst.msk [vmem:[#allocation4 + $0x28] sm:$0xff] %vm2550_vm9, %v2295_v44  ;;  %v10665_v18 = vshll.u32 %v9982_v3, 16  ;;  %16185 = vmatpush3.bf16.msra.mxu1 %v16723_v25 }
 0x23b   : > { %5638 = vst.msk [vmem:[#allocation4 + $0x8] sm:$0xff] %vm2550_vm9, %v5366_v42  ;;  %v5367_v31 = vcombine.low %v5113_v47, %v5117_v45  ;;  %v10670_v20 = vshrl.u32 %v15799_v57, 16  ;;  %v10673_v24 = vshll.u32 %v15799_v57, 16  ;;  %v10679_v12 = vshll.u32 %v9990_v46, 16 }
 0x23c   : > { %6102 = vst.msk [vmem:[#allocation4 + $0x8] sm:$0xff] %vm4430_vm10, %v6055_v48  ;;  %v18426_v4 = vld.sshfl [vmem:[#allocation2 + $0xb8] sm:$0x12 pattern:$0x76325410]  ;;  %4432 = vst.msk [vmem:[#allocation4 + $0x28] sm:$0xff] %vm4430_vm10, %v4385_v63  ;;  %v8317_v6 = vcombine.high %v18418_v30, %v18418_v30  ;;  %v8325_v50 = vcombine.high %v18420_v43, %v18420_v43  ;;  %v8333_v47 = vcombine.high %v18424_v7, %v18424_v7 }
 0x23d   : > { %v5375_v14 = vrot.slane %v5367_v31, %v17100_v16  ;;  %v10658_v58 = vrot.slane %v10656_v61, 6  ;;  %v10661_v5 = vrot.slane %v10659_v17, 7  ;;  %v10684_v56 = vshrl.u32 %v15800_v15, 16  ;;  %v16819_v17 = vld [vmem:[%s20793_s1 + $0x100] sm:$0xff]  }
 0x23e   : > { %v10667_v60 = vrot.slane %v10665_v18, 7  ;;  %v10672_v48 = vrot.slane %v10670_v20, 6  ;;  %v10675_v19 = vrot.slane %v10673_v24, 7  ;;  %v10681_v40 = vrot.slane %v10679_v12, 7 }
 0x23f   : > { %v5383_v49 = vcombine.low %v5375_v14, %v5382_v2  ;;  %v10662_v1 = vor.u32 %v10661_v5, %v10658_v58  ;;  %v10686_v21 = vrot.slane %v10684_v56, 6  ;;  %v10687_v22 = vshll.u32 %v15800_v15, 16  ;;  %v15801_v62 = vld.sshfl [vmem:[#allocation2 + $0xbc] sm:$0x13 pattern:$0x76325410] }
 0x240   : > { %v10676_v27 = vor.u32 %v10675_v19, %v10672_v48  ;;  %v10693_v23 = vshll.u32 %v9998_v33, 16  ;;  %v8341_v59 = vcombine.high %v18426_v4, %v18426_v4  ;;  %v10006_v26 = vcombine.high %v15801_v62, %v15801_v62  ;;  %v12695_v39 = vld [vmem:[#allocation4] sm:$0xff]  ;;  %v15458_v41 = vld.sshfl [vmem:[#allocation2 + $0x30] sm:$0x12 pattern:$0x76325410] }
 0x241   : > { %5639 = vst.msk [vmem:[#allocation4 + $0x30] sm:$0xff] %vm2550_vm9, %v5383_v49  ;;  %v10663_v32 = vrot.slane %v10662_v1, 2  ;;  %v10689_v34 = vrot.slane %v10687_v22, 7  ;;  %v10698_v38 = vshrl.u32 %v15801_v62, 16  ;;  %v10701_v8 = vshll.u32 %v15801_v62, 16  ;;  %v16724_v15 = vld [vmem:[%s20793_s1 + $0x108] sm:$0xff]  }
 0x242   : > { %6103 = vst.msk [vmem:[#allocation4 + $0x30] sm:$0xff] %vm4430_vm10, %v18401_v37  ;;  %v10677_v13 = vrot.slane %v10676_v27, 2  ;;  %v10695_v28 = vrot.slane %v10693_v23, 7  ;;  %v15734_v55 = vrot.slane %v18418_v30, 9  ;;  %v10707_v42 = vshll.u32 %v10006_v26, 16  ;;  %v16727_v30 = vld [vmem:[%s20793_s1 + $0xc8] sm:$0xff]  }
 0x243   : > { %v10668_v52 = vsel %vm17115_vm15, %v10663_v32, %v10667_v60  ;;  %v10690_v36 = vor.u32 %v10689_v34, %v10686_v21  ;;  %v12696_v29 = vld [vmem:[#allocation4 + $0x8] sm:$0xff]  ;;  %v10700_v35 = vrot.slane %v10698_v38, 6  ;;  %v8712_v54 = vrot.slane %v8317_v6, 7  ;;  %16186 = vmatprep.subr.bf16.mxu1 %v16727_v30 }
 0x244   : > { %v10682_v37 = vsel %vm17115_vm15, %v10677_v13, %v10681_v40  ;;  %v15459_v53 = vld.sshfl [vmem:[#allocation2 + $0x34] sm:$0x12 pattern:$0x76325410]  ;;  %13150 = vmatprep.mubr.bf16.mxu0 %v12696_v29  ;;  %v10703_v3 = vrot.slane %v10701_v8, 7  ;;  %v15735_v45 = vrot.slane %v18420_v43, 9  ;;  %v4646_v58 = vcombine.high %v15458_v41, %v15458_v41 }
 0x245   : > { %v10691_v57 = vrot.slane %v10690_v36, 2  ;;  %v11278_v2 = vcombine.low %v10668_v52, %v10682_v37  ;;  %v15460_v44 = vld.sshfl [vmem:[#allocation2 + $0x38] sm:$0x12 pattern:$0x76325410]  ;;  %13151 = vmatmul.mubr.bf16.vlgmr.msra.gmra.mrb[0].mxu0 %v12695_v39  ;;  %v10709_v46 = vrot.slane %v10707_v42, 7  ;;  %v18458_v31 = vsel %vm18007_vm8, %v15734_v55, %v8712_v54 }
 0x246   : > { %v8716_v33 = vrot.slane %v8325_v50, 7  ;;  %v15736_v61 = vrot.slane %v18424_v7, 9  ;;  %16561 = vmatpush3.bf16.msra.mxu0 %v16819_v17  ;;  %v10704_v63 = vor.u32 %v10703_v3, %v10700_v35  ;;  %v8720_v20 = vrot.slane %v8333_v47, 7  ;;  %v12700_v27 = vld [vmem:[#allocation4 + $0x28] sm:$0xff] }
 0x247   : > { %v10696_v43 = vsel %vm17115_vm15, %v10691_v57, %v10695_v28  ;;  %v11286_v18 = vrot.slane %v11278_v2, %v17100_v16  ;;  %v15461_v24 = vld.sshfl [vmem:[#allocation2 + $0x3c] sm:$0x12 pattern:$0x76325410]  ;;  %16562 = vmatprep.subr.bf16.mxu0 %v16724_v15  ;;  %v15737_v7 = vrot.slane %v18426_v4, 9  ;;  %v8724_v14 = vrot.slane %v8341_v59, 7 }
 0x248   : > { %v18472_v12 = vsel %vm18007_vm8, %v15735_v45, %v8716_v33  ;;  %v10705_v5 = vrot.slane %v10704_v63, 2  ;;  %v18477_v56 = vsel %vm18007_vm8, %v15736_v61, %v8720_v20  ;;  %v4654_v48 = vcombine.high %v15459_v53, %v15459_v53  ;;  %v16856_v4 = vld.sshfl [vmem:[#allocation2 + $0x30] sm:$0xf pattern:$0x76325410] }
 0x249   : > { %v8973_v60 = vcombine.low %v18458_v31, %v18472_v12  ;;  %v12701_v19 = vld [vmem:[#allocation4 + $0x30] sm:$0xff]  ;;  %v8725_v40 = vsel %vm18007_vm8, %v15737_v7, %v8724_v14  ;;  %v4662_v49 = vcombine.high %v15460_v44, %v15460_v44  ;;  %v4670_v1 = vcombine.high %v15461_v24, %v15461_v24  ;;  %v16857_v22 = vld.sshfl [vmem:[#allocation2 + $0x38] sm:$0xf pattern:$0x76325410]  ;;  %v16728_v14 = vld [vmem:[%s20793_s1 + $0x88] sm:$0xff]  }
 0x24a   : > { %v15522_v21 = vrot.slane %v15458_v41, 9  ;;  %13158 = vmatprep.mubr.bf16.mxu0 %v12701_v19  ;;  %16563 = vmatpush3.bf16.msra.mxu0 %v16724_v15  ;;  %v10710_v23 = vsel %vm17115_vm15, %v10705_v5, %v10709_v46  ;;  %v8974_v6 = vcombine.low %v18477_v56, %v8725_v40  ;;  %v5128_v51 = vrot.slane %v4646_v58, 7  ;;  %v15462_v62 = vld.sshfl [vmem:[#allocation2 + $0x48] sm:$0x12 pattern:$0x76325410] }
 0x24b   : > { %v8981_v50 = vrot.slane %v8973_v60, %v17100_v16  ;;  %v11279_v32 = vcombine.low %v10696_v43, %v10710_v23  ;;  %v15523_v34 = vrot.slane %v15459_v53, 9  ;;  %v5132_v47 = vrot.slane %v4654_v48, 7  ;;  %v15463_v39 = vld.sshfl [vmem:[#allocation2 + $0x4c] sm:$0x12 pattern:$0x76325410]  ;;  %16187 = vmatpush3.bf16.msra.mxu1 %v16728_v14  ;;  %v6059_v23 = vpop.permute.xlu0 %6058 }
 0x24c   : > { %v15524_v59 = vrot.slane %v15460_v44, 9  ;;  %v8988_v26 = vrot.slane %v8974_v6, %v17100_v16  ;;  %v5129_v13 = vsel %vm18007_vm8, %v15522_v21, %v5128_v51  ;;  %v5136_v28 = vrot.slane %v4662_v49, 7  ;;  %v15464_v55 = vld.sshfl [vmem:[#allocation2 + $0x50] sm:$0x12 pattern:$0x76325410] }
 0x24d   : > { %v15525_v38 = vrot.slane %v15461_v24, 9  ;;  %13159 = vmatmul.mubr.bf16.gmra.mrb[4].mxu0 %v12700_v27  ;;  %v11293_v52 = vrot.slane %v11279_v32, %v17100_v16  ;;  %v5133_v36 = vsel %vm18007_vm8, %v15523_v34, %v5132_v47  ;;  %v5140_v8 = vrot.slane %v4670_v1, 7  ;;  %v15465_v37 = vld.sshfl [vmem:[#allocation2 + $0x54] sm:$0x12 pattern:$0x76325410] }
 0x24e   : > { %v8989_v41 = vcombine.low %v8981_v50, %v8988_v26  ;;  %v5137_v29 = vsel %vm18007_vm8, %v15524_v59, %v5136_v28  ;;  %v5384_v25 = vcombine.low %v5129_v13, %v5133_v36  ;;  %v4678_v54 = vcombine.high %v15462_v62, %v15462_v62  ;;  %v16858_v57 = vld.sshfl [vmem:[#allocation2 + $0x48] sm:$0xf pattern:$0x76325410]  ;;  %v430_v46 = vld [vmem:[#allocation2 + $0xd4] sm:$0x1] }
 0x24f   : > { %v11294_v35 = vcombine.low %v11286_v18, %v11293_v52  ;;  %v5141_v42 = vsel %vm18007_vm8, %v15525_v38, %v5140_v8  ;;  %v4686_v53 = vcombine.high %v15463_v39, %v15463_v39  ;;  %v2312_v45 = vcombine.low %v16856_v4, %v16857_v22  ;;  %v16859_v15 = vld.sshfl [vmem:[#allocation2 + $0x50] sm:$0xf pattern:$0x76325410]  ;;  %v721_v43 = vld [vmem:[#allocation2 + $0xd4] sm:$0x4]  ;;  %v4387_v18 = vpop.permute.xlu1 %4386 }
 0x250   : > { %9140 = vrot.lane.b32.xlu1 %v8989_v41, %s16926_s25  ;;  %v5385_v3 = vcombine.low %v5137_v29, %v5141_v42  ;;  %v5392_v2 = vrot.slane %v5384_v25, %v17100_v16  ;;  %v4694_v44 = vcombine.high %v15464_v55, %v15464_v55  ;;  %v4702_v33 = vcombine.high %v15465_v37, %v15465_v37  ;;  %v15802_v49 = vld.sshfl [vmem:[#allocation2 + $0xc8] sm:$0x13 pattern:$0x76325410]  ;;  %v16731_v29 = vld [vmem:[%s20793_s1 + $0xd0] sm:$0xff]  }
 0x251   : > { %11445 = vrot.lane.b32.xlu0 %v11294_v35, %s16926_s25  ;;  %v15526_v61 = vrot.slane %v15462_v62, 9  ;;  %v5144_v17 = vrot.slane %v4678_v54, 7  ;;  %v15527_v30 = vrot.slane %v15463_v39, 9  ;;  %2553 = vst.msk [vmem:[#allocation4 + $0x50] sm:$0xff] %vm2550_vm9, %v2312_v45  ;;  %v5148_v20 = vrot.slane %v4686_v53, 7  ;;  %16188 = vmatprep.subr.bf16.mxu1 %v16731_v29 }
 0x252   : > { %v5399_v63 = vrot.slane %v5385_v3, %v17100_v16  ;;  %v15528_v24 = vrot.slane %v15464_v55, 9  ;;  %v5152_v7 = vrot.slane %v4694_v44, 7  ;;  %4433 = vst.msk [vmem:[#allocation4 + $0x50] sm:$0xff] %vm4430_vm10, %v4387_v18  ;;  %v15529_v5 = vrot.slane %v15465_v37, 9  ;;  %v16735_v18 = vld [vmem:[%s20793_s1 + $0xd8] sm:$0xff]  }
 0x253   : > { %v5145_v58 = vsel %vm18007_vm8, %v15526_v61, %v5144_v17  ;;  %v5156_v60 = vrot.slane %v4702_v33, 7  ;;  %v5149_v19 = vsel %vm18007_vm8, %v15527_v30, %v5148_v20  ;;  %v431_v4 = vsel %vm16965_vm2, 0, %v430_v46  ;;  %v15803_v27 = vld.sshfl [vmem:[#allocation2 + $0xcc] sm:$0x13 pattern:$0x76325410]  ;;  %v4389_v39 = vpop.permute.xlu1 %4388  ;;  %v6061_v33 = vpop.permute.xlu0 %6060 }
 0x254   : > { %v5400_v48 = vcombine.low %v5392_v2, %v5399_v63  ;;  %v5153_v40 = vsel %vm18007_vm8, %v15528_v24, %v5152_v7  ;;  %v5401_v21 = vcombine.low %v5145_v58, %v5149_v19  ;;  %v722_v22 = vsel %vm16979_vm6, 0, %v721_v43  ;;  %432 = vst [vmem:[#allocation2 + $0xd4] sm:$0x1] %v431_v4  ;;  %v16732_v46 = vld [vmem:[%s20793_s1 + $0x90] sm:$0xff]  }
 0x255   : > { %v5157_v1 = vsel %vm18007_vm8, %v15529_v5, %v5156_v60  ;;  %v2329_v50 = vcombine.low %v16858_v57, %v16859_v15  ;;  %723 = vst [vmem:[#allocation2 + $0xd4] sm:$0x4] %v722_v22  ;;  %v15804_v51 = vld.sshfl [vmem:[#allocation2 + $0xd0] sm:$0x13 pattern:$0x76325410]  ;;  %v10014_v62 = vcombine.high %v15802_v49, %v15802_v49  ;;  %v10022_v32 = vcombine.high %v15803_v27, %v15803_v27 }
 0x256   : > { %5640 = vst.msk [vmem:[#allocation4 + $0x58] sm:$0xff] %vm2550_vm9, %v5400_v48  ;;  %v5402_v6 = vcombine.low %v5153_v40, %v5157_v1  ;;  %v5409_v34 = vrot.slane %v5401_v21, %v17100_v16  ;;  %v10030_v47 = vcombine.high %v15804_v51, %v15804_v51  ;;  %v10712_v59 = vshrl.u32 %v15802_v49, 16  ;;  %v18521_v13 = vld.sshfl [vmem:[#allocation2 + $0xc4] sm:$0x12 pattern:$0x76325410]  ;;  %16189 = vmatpush3.bf16.msra.mxu1 %v16732_v46 }
 0x257   : > { %6104 = vst.msk [vmem:[#allocation4 + $0x58] sm:$0xff] %vm4430_vm10, %v6059_v23  ;;  %v10715_v26 = vshll.u32 %v15802_v49, 16  ;;  %v18523_v28 = vld.sshfl [vmem:[#allocation2 + $0xc8] sm:$0x12 pattern:$0x76325410]  ;;  %v8349_v30 = vcombine.high %v18521_v13, %v18521_v13  ;;  %16190 = vmatprep.subr.bf16.mxu1 %v16735_v18 }
 0x258   : > { %v5416_v38 = vrot.slane %v5402_v6, %v17100_v16  ;;  %2554 = vst.msk [vmem:[#allocation4 + $0x78] sm:$0xff] %vm2550_vm9, %v2329_v50  ;;  %v10721_v52 = vshll.u32 %v10014_v62, 16  ;;  %v10726_v36 = vshrl.u32 %v15803_v27, 16  ;;  %v10729_v8 = vshll.u32 %v15803_v27, 16 }
 0x259   : > { %v18527_v55 = vld.sshfl [vmem:[#allocation2 + $0xcc] sm:$0x12 pattern:$0x76325410]  ;;  %4434 = vst.msk [vmem:[#allocation4 + $0x78] sm:$0xff] %vm4430_vm10, %v4389_v39  ;;  %v10714_v25 = vrot.slane %v10712_v59, 6  ;;  %v8357_v43 = vcombine.high %v18523_v28, %v18523_v28 }
 0x25a   : > { %v18529_v41 = vld.sshfl [vmem:[#allocation2 + $0xd0] sm:$0x12 pattern:$0x76325410]  ;;  %v10717_v37 = vrot.slane %v10715_v26, 7  ;;  %v10735_v35 = vshll.u32 %v10022_v32, 16  ;;  %v5417_v54 = vcombine.low %v5409_v34, %v5416_v38  ;;  %v8365_v14 = vcombine.high %v18527_v55, %v18527_v55 }
 0x25b   : > { %v10740_v42 = vshrl.u32 %v15804_v51, 16  ;;  %v10723_v53 = vrot.slane %v10721_v52, 7  ;;  %v10728_v57 = vrot.slane %v10726_v36, 6  ;;  %v10731_v3 = vrot.slane %v10729_v8, 7  ;;  %v12705_v63 = vld [vmem:[#allocation4 + $0x50] sm:$0xff] }
 0x25c   : > { %v10718_v2 = vor.u32 %v10717_v37, %v10714_v25  ;;  %v10737_v45 = vrot.slane %v10735_v35, 7  ;;  %v10743_v15 = vshll.u32 %v15804_v51, 16  ;;  %5641 = vst.msk [vmem:[#allocation4 + $0x80] sm:$0xff] %vm2550_vm9, %v5417_v54  ;;  %v10749_v17 = vshll.u32 %v10030_v47, 16 }
 0x25d   : > { %v10742_v44 = vrot.slane %v10740_v42, 6  ;;  %v10732_v61 = vor.u32 %v10731_v3, %v10728_v57  ;;  %6105 = vst.msk [vmem:[#allocation4 + $0x80] sm:$0xff] %vm4430_vm10, %v6061_v33  ;;  %v15805_v20 = vld.sshfl [vmem:[#allocation2 + $0xd4] sm:$0x13 pattern:$0x76325410]  ;;  %v8373_v58 = vcombine.high %v18529_v41, %v18529_v41 }
 0x25e   : > { %v10719_v24 = vrot.slane %v10718_v2, 2  ;;  %v10745_v7 = vrot.slane %v10743_v15, 7  ;;  %v10038_v5 = vcombine.high %v15805_v20, %v15805_v20  ;;  %v10751_v48 = vrot.slane %v10749_v17, 7  ;;  %v12706_v40 = vld [vmem:[#allocation4 + $0x58] sm:$0xff] }
 0x25f   : > { %v10733_v60 = vrot.slane %v10732_v61, 2  ;;  %v10754_v19 = vshrl.u32 %v15805_v20, 16  ;;  %v10757_v21 = vshll.u32 %v15805_v20, 16  ;;  %v15738_v4 = vrot.slane %v18521_v13, 9  ;;  %13166 = vmatprep.mubr.bf16.mxu0 %v12706_v40 }
 0x260   : > { %v10724_v49 = vsel %vm17115_vm15, %v10719_v24, %v10723_v53  ;;  %v10746_v1 = vor.u32 %v10745_v7, %v10742_v44  ;;  %v15466_v22 = vld.sshfl [vmem:[#allocation2 + $0x60] sm:$0x12 pattern:$0x76325410]  ;;  %v10763_v6 = vshll.u32 %v10038_v5, 16  ;;  %v8728_v50 = vrot.slane %v8349_v30, 7  ;;  %13167 = vmatmul.mubr.bf16.gmra.mrb[8].mxu0 %v12705_v63 }
 0x261   : > { %v10738_v27 = vsel %vm17115_vm15, %v10733_v60, %v10737_v45  ;;  %v10756_v23 = vrot.slane %v10754_v19, 6  ;;  %v15467_v51 = vld.sshfl [vmem:[#allocation2 + $0x64] sm:$0x12 pattern:$0x76325410]  ;;  %v10759_v32 = vrot.slane %v10757_v21, 7  ;;  %v4710_v42 = vcombine.high %v15466_v22, %v15466_v22 }
 0x262   : > { %v10747_v62 = vrot.slane %v10746_v1, 2  ;;  %v11295_v34 = vcombine.low %v10724_v49, %v10738_v27  ;;  %v15739_v47 = vrot.slane %v18523_v28, 9  ;;  %v15468_v59 = vld.sshfl [vmem:[#allocation2 + $0x68] sm:$0x12 pattern:$0x76325410]  ;;  %v18559_v13 = vsel %vm18007_vm8, %v15738_v4, %v8728_v50 }
 0x263   : > { %v10765_v26 = vrot.slane %v10763_v6, 7  ;;  %v8732_v38 = vrot.slane %v8357_v43, 7  ;;  %v15740_v39 = vrot.slane %v18527_v55, 9  ;;  %v10760_v36 = vor.u32 %v10759_v32, %v10756_v23  ;;  %v12710_v2 = vld [vmem:[#allocation4 + $0x78] sm:$0xff] }
 0x264   : > { %v10752_v52 = vsel %vm17115_vm15, %v10747_v62, %v10751_v48  ;;  %v11303_v8 = vrot.slane %v11295_v34, %v17100_v16  ;;  %v8736_v29 = vrot.slane %v8365_v14, 7  ;;  %v15469_v25 = vld.sshfl [vmem:[#allocation2 + $0x6c] sm:$0x12 pattern:$0x76325410]  ;;  %v15741_v37 = vrot.slane %v18529_v41, 9 }
 0x265   : > { %v18567_v28 = vsel %vm18007_vm8, %v15739_v47, %v8732_v38  ;;  %v8740_v35 = vrot.slane %v8373_v58, 7  ;;  %v10761_v54 = vrot.slane %v10760_v36, 2  ;;  %v4718_v57 = vcombine.high %v15467_v51, %v15467_v51  ;;  %v12711_v3 = vld [vmem:[#allocation4 + $0x80] sm:$0xff]  ;;  %v448_v38 = vld [vmem:[#allocation2 + $0xec] sm:$0x1] }
 0x266   : > { %v18572_v55 = vsel %vm18007_vm8, %v15740_v39, %v8736_v29  ;;  %v8990_v53 = vcombine.low %v18559_v13, %v18567_v28  ;;  %v4726_v44 = vcombine.high %v15468_v59, %v15468_v59  ;;  %v4734_v15 = vcombine.high %v15469_v25, %v15469_v25  ;;  %v16860_v41 = vld.sshfl [vmem:[#allocation2 + $0x60] sm:$0xf pattern:$0x76325410]  ;;  %13174 = vmatprep.mubr.bf16.mxu0 %v12711_v3  ;;  %v739_v29 = vld [vmem:[#allocation2 + $0xec] sm:$0x4] }
 0x267   : > { %v8741_v45 = vsel %vm18007_vm8, %v15741_v37, %v8740_v35  ;;  %v15530_v46 = vrot.slane %v15466_v22, 9  ;;  %v16861_v33 = vld.sshfl [vmem:[#allocation2 + $0x68] sm:$0xf pattern:$0x76325410]  ;;  %v10766_v61 = vsel %vm17115_vm15, %v10761_v54, %v10765_v26  ;;  %v5160_v43 = vrot.slane %v4710_v42, 7  ;;  %v4391_v35 = vpop.permute.xlu1 %4390 }
 0x268   : > { %v8991_v17 = vcombine.low %v18572_v55, %v8741_v45  ;;  %v8998_v30 = vrot.slane %v8990_v53, %v17100_v16  ;;  %v15470_v63 = vld.sshfl [vmem:[#allocation2 + $0x78] sm:$0x12 pattern:$0x76325410]  ;;  %v11296_v18 = vcombine.low %v10752_v52, %v10766_v61  ;;  %v15531_v20 = vrot.slane %v15467_v51, 9  ;;  %13175 = vmatmul.mubr.bf16.gmra.mrb[12].mxu0 %v12710_v2 }
 0x269   : > { %v5164_v24 = vrot.slane %v4718_v57, 7  ;;  %v15532_v7 = vrot.slane %v15468_v59, 9  ;;  %v5161_v58 = vsel %vm18007_vm8, %v15530_v46, %v5160_v43  ;;  %v5168_v5 = vrot.slane %v4726_v44, 7  ;;  %v16739_v57 = vld [vmem:[%s20793_s1 + $0xe0] sm:$0xff]  }
 0x26a   : > { %v9005_v14 = vrot.slane %v8991_v17, %v17100_v16  ;;  %v15533_v60 = vrot.slane %v15469_v25, 9  ;;  %v15471_v48 = vld.sshfl [vmem:[#allocation2 + $0x7c] sm:$0x12 pattern:$0x76325410]  ;;  %v11310_v19 = vrot.slane %v11296_v18, %v17100_v16  ;;  %v5172_v49 = vrot.slane %v4734_v15, 7 }
 0x26b   : > { %v5165_v40 = vsel %vm18007_vm8, %v15531_v20, %v5164_v24  ;;  %v15472_v1 = vld.sshfl [vmem:[#allocation2 + $0x80] sm:$0x12 pattern:$0x76325410]  ;;  %v5169_v22 = vsel %vm18007_vm8, %v15532_v7, %v5168_v5  ;;  %v4742_v51 = vcombine.high %v15470_v63, %v15470_v63  ;;  %v4750_v62 = vcombine.high %v15471_v48, %v15471_v48  ;;  %v16736_v25 = vld [vmem:[%s20793_s1 + $0x98] sm:$0xff]  }
 0x26c   : > { %v18588_v21 = vld.sshfl [vmem:[#allocation2 + $0x78] sm:$0xf pattern:$0x76325410]  ;;  %v9006_v4 = vcombine.low %v8998_v30, %v9005_v14  ;;  %v5418_v27 = vcombine.low %v5161_v58, %v5165_v40  ;;  %v11311_v6 = vcombine.low %v11303_v8, %v11310_v19  ;;  %v5173_v50 = vsel %vm18007_vm8, %v15533_v60, %v5172_v49  ;;  %16191 = vmatpush3.bf16.msra.mxu1 %v16736_v25 }
 0x26d   : > { %v15473_v23 = vld.sshfl [vmem:[#allocation2 + $0x84] sm:$0x12 pattern:$0x76325410]  ;;  %v5419_v32 = vcombine.low %v5169_v22, %v5173_v50  ;;  %v2346_v47 = vcombine.low %v16860_v41, %v16861_v33  ;;  %v4758_v59 = vcombine.high %v15472_v1, %v15472_v1  ;;  %v15534_v52 = vrot.slane %v15470_v63, 9  ;;  %16192 = vmatprep.subr.bf16.mxu1 %v16739_v57  ;;  %v6063_v63 = vpop.permute.xlu0 %6062 }
 0x26e   : > { %9142 = vrot.lane.b32.xlu1 %v9006_v4, %s16926_s25  ;;  %v5426_v34 = vrot.slane %v5418_v27, %v17100_v16  ;;  %v16863_v26 = vld.sshfl [vmem:[#allocation2 + $0x80] sm:$0xf pattern:$0x76325410]  ;;  %11447 = vrot.lane.b32.xlu0 %v11311_v6, %s16926_s25  ;;  %v4766_v39 = vcombine.high %v15473_v23, %v15473_v23  ;;  %v5176_v36 = vrot.slane %v4742_v51, 7  ;;  %v15535_v8 = vrot.slane %v15471_v48, 9 }
 0x26f   : > { %v5433_v37 = vrot.slane %v5419_v32, %v17100_v16  ;;  %2555 = vst.msk [vmem:[#allocation4 + $0xa0] sm:$0xff] %vm2550_vm9, %v2346_v47  ;;  %v5180_v42 = vrot.slane %v4750_v62, 7  ;;  %v15536_v54 = vrot.slane %v15472_v1, 9  ;;  %v5184_v53 = vrot.slane %v4758_v59, 7  ;;  %v4393_v1 = vpop.permute.xlu1 %4392  ;;  %v16740_v6 = vld [vmem:[%s20793_s1 + $0xa0] sm:$0xff]  }
 0x270   : > { %4435 = vst.msk [vmem:[#allocation4 + $0xa0] sm:$0xff] %vm4430_vm10, %v4391_v35  ;;  %v5177_v3 = vsel %vm18007_vm8, %v15534_v52, %v5176_v36  ;;  %v15537_v2 = vrot.slane %v15473_v23, 9  ;;  %v5188_v45 = vrot.slane %v4766_v39, 7  ;;  %v449_v17 = vsel %vm16965_vm2, 0, %v448_v38  ;;  %16193 = vmatpush3.bf16.msra.mxu1 %v16740_v6 }
 0x271   : > { %v5434_v44 = vcombine.low %v5426_v34, %v5433_v37  ;;  %v5181_v15 = vsel %vm18007_vm8, %v15535_v8, %v5180_v42  ;;  %v5185_v46 = vsel %vm18007_vm8, %v15536_v54, %v5184_v53  ;;  %v15806_v41 = vld.sshfl [vmem:[#allocation2 + $0xe0] sm:$0x13 pattern:$0x76325410]  ;;  %v740_v30 = vsel %vm16979_vm6, 0, %v739_v29  ;;  %v16743_v8 = vld [vmem:[%s20793_s1 + $0xe8] sm:$0xff]   ;;  %v6065_v29 = vpop.permute.xlu0 %6064 }
 0x272   : > { %v5189_v33 = vsel %vm18007_vm8, %v15537_v2, %v5188_v45  ;;  %v5435_v61 = vcombine.low %v5177_v3, %v5181_v15  ;;  %v15807_v43 = vld.sshfl [vmem:[#allocation2 + $0xe4] sm:$0x13 pattern:$0x76325410]  ;;  %v2363_v20 = vcombine.low %v18588_v21, %v16863_v26  ;;  %450 = vst [vmem:[#allocation2 + $0xec] sm:$0x1] %v449_v17  ;;  %v10046_v7 = vcombine.high %v15806_v41, %v15806_v41 }
 0x273   : > { %5642 = vst.msk [vmem:[#allocation4 + $0xa8] sm:$0xff] %vm2550_vm9, %v5434_v44  ;;  %v5436_v18 = vcombine.low %v5185_v46, %v5189_v33  ;;  %741 = vst [vmem:[#allocation2 + $0xec] sm:$0x4] %v740_v30  ;;  %v10054_v14 = vcombine.high %v15807_v43, %v15807_v43  ;;  %v10768_v60 = vshrl.u32 %v15806_v41, 16  ;;  %v10771_v48 = vshll.u32 %v15806_v41, 16  ;;  %16194 = vmatprep.subr.bf16.mxu1 %v16743_v8 }
 0x274   : > { %v15808_v24 = vld.sshfl [vmem:[#allocation2 + $0xe8] sm:$0x13 pattern:$0x76325410]  ;;  %6106 = vst.msk [vmem:[#allocation4 + $0xa8] sm:$0xff] %vm4430_vm10, %v6063_v63  ;;  %v5443_v58 = vrot.slane %v5435_v61, %v17100_v16  ;;  %v10777_v21 = vshll.u32 %v10046_v7, 16 }
 0x275   : > { %v10062_v5 = vcombine.high %v15808_v24, %v15808_v24  ;;  %v18622_v19 = vld.sshfl [vmem:[#allocation2 + $0xdc] sm:$0x12 pattern:$0x76325410]  ;;  %v5450_v49 = vrot.slane %v5436_v18, %v17100_v16  ;;  %2556 = vst.msk [vmem:[#allocation4 + $0xc8] sm:$0xff] %vm2550_vm9, %v2363_v20  ;;  %v10782_v4 = vshrl.u32 %v15807_v43, 16 }
 0x276   : > { %v18624_v40 = vld.sshfl [vmem:[#allocation2 + $0xe0] sm:$0x12 pattern:$0x76325410]  ;;  %v10785_v22 = vshll.u32 %v15807_v43, 16  ;;  %4436 = vst.msk [vmem:[#allocation4 + $0xc8] sm:$0xff] %vm4430_vm10, %v4393_v1  ;;  %v8381_v35 = vcombine.high %v18622_v19, %v18622_v19 }
 0x277   : > { %v18628_v27 = vld.sshfl [vmem:[#allocation2 + $0xe4] sm:$0x12 pattern:$0x76325410]  ;;  %v10770_v50 = vrot.slane %v10768_v60, 6  ;;  %v10773_v51 = vrot.slane %v10771_v48, 7  ;;  %v5451_v34 = vcombine.low %v5443_v58, %v5450_v49  ;;  %v8389_v42 = vcombine.high %v18624_v40, %v18624_v40 }
 0x278   : > { %v18630_v23 = vld.sshfl [vmem:[#allocation2 + $0xe8] sm:$0x12 pattern:$0x76325410]  ;;  %v10791_v62 = vshll.u32 %v10054_v14, 16  ;;  %v10796_v32 = vshrl.u32 %v15808_v24, 16  ;;  %v8397_v2 = vcombine.high %v18628_v27, %v18628_v27 }
 0x279   : > { %v10779_v47 = vrot.slane %v10777_v21, 7  ;;  %v10784_v59 = vrot.slane %v10782_v4, 6  ;;  %v10787_v26 = vrot.slane %v10785_v22, 7  ;;  %v10774_v38 = vor.u32 %v10773_v51, %v10770_v50  ;;  %5643 = vst.msk [vmem:[#allocation4 + $0xd0] sm:$0xff] %vm2550_vm9, %v5451_v34  ;;  %v12715_v54 = vld [vmem:[#allocation4 + $0xa0] sm:$0xff] }
 0x27a   : > { %v10793_v39 = vrot.slane %v10791_v62, 7  ;;  %v10798_v52 = vrot.slane %v10796_v32, 6  ;;  %v10799_v36 = vshll.u32 %v15808_v24, 16  ;;  %v10805_v37 = vshll.u32 %v10062_v5, 16  ;;  %6107 = vst.msk [vmem:[#allocation4 + $0xd0] sm:$0xff] %vm4430_vm10, %v6065_v29 }
 0x27b   : > { %v10788_v25 = vor.u32 %v10787_v26, %v10784_v59  ;;  %v15809_v53 = vld.sshfl [vmem:[#allocation2 + $0xec] sm:$0x13 pattern:$0x76325410]  ;;  %v10775_v57 = vrot.slane %v10774_v38, 2  ;;  %v8405_v45 = vcombine.high %v18630_v23, %v18630_v23  ;;  %v15742_v43 = vrot.slane %v18622_v19, 9 }
 0x27c   : > { %v10801_v3 = vrot.slane %v10799_v36, 7  ;;  %v10070_v44 = vcombine.high %v15809_v53, %v15809_v53  ;;  %v10807_v46 = vrot.slane %v10805_v37, 7  ;;  %v10810_v41 = vshrl.u32 %v15809_v53, 16  ;;  %v12716_v33 = vld [vmem:[#allocation4 + $0xa8] sm:$0xff] }
 0x27d   : > { %v10789_v15 = vrot.slane %v10788_v25, 2  ;;  %v10780_v61 = vsel %vm17115_vm15, %v10775_v57, %v10779_v47  ;;  %v10813_v30 = vshll.u32 %v15809_v53, 16  ;;  %v15474_v63 = vld.sshfl [vmem:[#allocation2 + $0x90] sm:$0x12 pattern:$0x76325410]  ;;  %13182 = vmatprep.mubr.bf16.mxu0 %v12716_v33 }
 0x27e   : > { %v10802_v17 = vor.u32 %v10801_v3, %v10798_v52  ;;  %v10812_v20 = vrot.slane %v10810_v41, 6  ;;  %v10819_v24 = vshll.u32 %v10070_v44, 16  ;;  %v8744_v7 = vrot.slane %v8381_v35, 7  ;;  %13183 = vmatmul.mubr.bf16.gmra.mrb[16].mxu0 %v12715_v54  ;;  %v12720_v26 = vld [vmem:[#allocation4 + $0xc8] sm:$0xff] }
 0x27f   : > { %v10794_v18 = vsel %vm17115_vm15, %v10789_v15, %v10793_v39  ;;  %v15475_v14 = vld.sshfl [vmem:[#allocation2 + $0x94] sm:$0x12 pattern:$0x76325410]  ;;  %v10815_v5 = vrot.slane %v10813_v30, 7  ;;  %v15743_v48 = vrot.slane %v18624_v40, 9  ;;  %v4774_v47 = vcombine.high %v15474_v63, %v15474_v63 }
 0x280   : > { %v10803_v58 = vrot.slane %v10802_v17, 2  ;;  %v11312_v60 = vcombine.low %v10780_v61, %v10794_v18  ;;  %v15476_v49 = vld.sshfl [vmem:[#allocation2 + $0x98] sm:$0x12 pattern:$0x76325410]  ;;  %v10821_v1 = vrot.slane %v10819_v24, 7  ;;  %v18657_v19 = vsel %vm18007_vm8, %v15742_v43, %v8744_v7 }
 0x281   : > { %v8748_v21 = vrot.slane %v8389_v42, 7  ;;  %v15744_v4 = vrot.slane %v18628_v27, 9  ;;  %v10816_v6 = vor.u32 %v10815_v5, %v10812_v20  ;;  %v8752_v51 = vrot.slane %v8397_v2, 7  ;;  %v12721_v36 = vld [vmem:[#allocation4 + $0xd0] sm:$0xff]  ;;  %v16744_v18 = vld [vmem:[%s20793_s1 + $0xa8] sm:$0xff]  }
 0x282   : > { %v10808_v22 = vsel %vm17115_vm15, %v10803_v58, %v10807_v46  ;;  %v11320_v50 = vrot.slane %v11312_v60, %v17100_v16  ;;  %v15477_v62 = vld.sshfl [vmem:[#allocation2 + $0x9c] sm:$0x12 pattern:$0x76325410]  ;;  %v15745_v32 = vrot.slane %v18630_v23, 9  ;;  %v8756_v34 = vrot.slane %v8405_v45, 7  ;;  %13190 = vmatprep.mubr.bf16.mxu0 %v12721_v36  ;;  %v4395_v60 = vpop.permute.xlu1 %4394  ;;  %16195 = vmatpush3.bf16.msra.mxu1 %v16744_v18 }
 0x283   : > { %v18665_v40 = vsel %vm18007_vm8, %v15743_v48, %v8748_v21  ;;  %v16864_v59 = vld.sshfl [vmem:[#allocation2 + $0x90] sm:$0xf pattern:$0x76325410]  ;;  %v10817_v38 = vrot.slane %v10816_v6, 2  ;;  %v18670_v27 = vsel %vm18007_vm8, %v15744_v4, %v8752_v51  ;;  %v4782_v52 = vcombine.high %v15475_v14, %v15475_v14 }
 0x284   : > { %v9007_v39 = vcombine.low %v18657_v19, %v18665_v40  ;;  %v8757_v8 = vsel %vm18007_vm8, %v15745_v32, %v8756_v34  ;;  %v4790_v29 = vcombine.high %v15476_v49, %v15476_v49  ;;  %v4798_v25 = vcombine.high %v15477_v62, %v15477_v62  ;;  %v16865_v53 = vld.sshfl [vmem:[#allocation2 + $0x98] sm:$0xf pattern:$0x76325410] }
 0x285   : > { %v15538_v23 = vrot.slane %v15474_v63, 9  ;;  %v10822_v37 = vsel %vm17115_vm15, %v10817_v38, %v10821_v1  ;;  %v9008_v35 = vcombine.low %v18670_v27, %v8757_v8  ;;  %v5192_v54 = vrot.slane %v4774_v47, 7  ;;  %v15478_v57 = vld.sshfl [vmem:[#allocation2 + $0xa8] sm:$0x12 pattern:$0x76325410]  ;;  %v6067_v8 = vpop.permute.xlu0 %6066 }
 0x286   : > { %v9015_v42 = vrot.slane %v9007_v39, %v17100_v16  ;;  %v11313_v3 = vcombine.low %v10808_v22, %v10822_v37  ;;  %v15539_v2 = vrot.slane %v15475_v14, 9  ;;  %v5196_v45 = vrot.slane %v4782_v52, 7  ;;  %13191 = vmatmul.mubr.bf16.gmra.mrb[20].mxu0 %v12720_v26  ;;  %v16866_v43 = vld.sshfl [vmem:[#allocation2 + $0xa8] sm:$0xf pattern:$0x76325410] }
 0x287   : > { %v15540_v44 = vrot.slane %v15476_v49, 9  ;;  %v9022_v15 = vrot.slane %v9008_v35, %v17100_v16  ;;  %v5193_v46 = vsel %vm18007_vm8, %v15538_v23, %v5192_v54  ;;  %v5200_v41 = vrot.slane %v4790_v29, 7  ;;  %v16867_v63 = vld.sshfl [vmem:[#allocation2 + $0xb0] sm:$0xf pattern:$0x76325410] }
 0x288   : > { %v15541_v33 = vrot.slane %v15477_v62, 9  ;;  %v11327_v61 = vrot.slane %v11313_v3, %v17100_v16  ;;  %v5197_v17 = vsel %vm18007_vm8, %v15539_v2, %v5196_v45  ;;  %v5204_v30 = vrot.slane %v4798_v25, 7  ;;  %v466_v14 = vld [vmem:[#allocation2 + $0x104] sm:$0x1]  ;;  %v757_v1 = vld [vmem:[#allocation2 + $0x104] sm:$0x4] }
 0x289   : > { %v9023_v20 = vcombine.low %v9015_v42, %v9022_v15  ;;  %v5201_v24 = vsel %vm18007_vm8, %v15540_v44, %v5200_v41  ;;  %v5452_v7 = vcombine.low %v5193_v46, %v5197_v17  ;;  %v4806_v48 = vcombine.high %v15478_v57, %v15478_v57  ;;  %v15810_v51 = vld.sshfl [vmem:[#allocation2 + $0xf8] sm:$0x13 pattern:$0x76325410]  ;;  %v4397_v42 = vpop.permute.xlu1 %4396 }
 0x28a   : > { %v11328_v58 = vcombine.low %v11320_v50, %v11327_v61  ;;  %v5205_v5 = vsel %vm18007_vm8, %v15541_v33, %v5204_v30  ;;  %v15542_v49 = vrot.slane %v15478_v57, 9  ;;  %v2380_v22 = vcombine.low %v16864_v59, %v16865_v53  ;;  %v15811_v32 = vld.sshfl [vmem:[#allocation2 + $0xfc] sm:$0x13 pattern:$0x76325410] }
 0x28b   : > { %9144 = vrot.lane.b32.xlu1 %v9023_v20, %s16926_s25  ;;  %v5453_v21 = vcombine.low %v5201_v24, %v5205_v5  ;;  %v5460_v4 = vrot.slane %v5452_v7, %v17100_v16  ;;  %v5470_v6 = vcombine.low %v18472_v12, %v18477_v56  ;;  %v5208_v50 = vrot.slane %v4806_v48, 7  ;;  %v15812_v26 = vld.sshfl [vmem:[#allocation2 + $0x100] sm:$0x13 pattern:$0x76325410]  ;;  %v6069_v5 = vpop.permute.xlu0 %6068 }
 0x28c   : > { %11449 = vrot.lane.b32.xlu0 %v11328_v58, %s16926_s25  ;;  %v467_v62 = vsel %vm16965_vm2, 0, %v466_v14  ;;  %2557 = vst.msk [vmem:[#allocation4 + $0xf0] sm:$0xff] %vm2550_vm9, %v2380_v22  ;;  %v758_v59 = vsel %vm16979_vm6, 0, %v757_v1  ;;  %v10078_v12 = vcombine.high %v15810_v51, %v15810_v51  ;;  %v2397_v38 = vcombine.low %v16866_v43, %v16867_v63  ;;  %v16747_v58 = vld [vmem:[%s20793_s1 + $0xf0] sm:$0xff]  }
 0x28d   : > { %v5467_v34 = vrot.slane %v5453_v21, %v17100_v16  ;;  %v5484_v47 = vrot.slane %v5470_v6, %v17100_v16  ;;  %468 = vst [vmem:[#allocation2 + $0x104] sm:$0x1] %v467_v62  ;;  %4437 = vst.msk [vmem:[#allocation4 + $0xf0] sm:$0xff] %vm4430_vm10, %v4395_v60  ;;  %v5209_v56 = vsel %vm18007_vm8, %v15542_v49, %v5208_v50  ;;  %v10824_v25 = vshrl.u32 %v15810_v51, 16 }
 0x28e   : > { %759 = vst [vmem:[#allocation2 + $0x104] sm:$0x4] %v758_v59  ;;  %v10086_v39 = vcombine.high %v15811_v32, %v15811_v32  ;;  %v10094_v52 = vcombine.high %v15812_v26, %v15812_v26  ;;  %v5469_v29 = vcombine.low %v5209_v56, %v18458_v31  ;;  %v10827_v23 = vshll.u32 %v15810_v51, 16  ;;  %2558 = vst.msk [vmem:[#allocation4 + $0x118] sm:$0xff] %vm2550_vm9, %v2397_v38 }
 0x28f   : > { %v5468_v36 = vcombine.low %v5460_v4, %v5467_v34  ;;  %v18709_v37 = vld.sshfl [vmem:[#allocation2 + $0xf4] sm:$0x12 pattern:$0x76325410]  ;;  %v10833_v54 = vshll.u32 %v10078_v12, 16  ;;  %v10838_v53 = vshrl.u32 %v15811_v32, 16  ;;  %16196 = vmatprep.subr.bf16.mxu1 %v16747_v58 }
 0x290   : > { %v18711_v35 = vld.sshfl [vmem:[#allocation2 + $0xf8] sm:$0x12 pattern:$0x76325410]  ;;  %v10841_v57 = vshll.u32 %v15811_v32, 16  ;;  %v10847_v3 = vshll.u32 %v10086_v39, 16  ;;  %v5477_v31 = vrot.slane %v5469_v29, %v17100_v16  ;;  %v8413_v7 = vcombine.high %v18709_v37, %v18709_v37 }
 0x291   : > { %v18714_v2 = vld.sshfl [vmem:[#allocation2 + $0xfc] sm:$0x12 pattern:$0x76325410]  ;;  %5644 = vst.msk [vmem:[#allocation4 + $0xf8] sm:$0xff] %vm2550_vm9, %v5468_v36  ;;  %v10826_v44 = vrot.slane %v10824_v25, 6  ;;  %v8421_v14 = vcombine.high %v18711_v35, %v18711_v35 }
 0x292   : > { %v18716_v45 = vld.sshfl [vmem:[#allocation2 + $0x100] sm:$0x12 pattern:$0x76325410]  ;;  %4438 = vst.msk [vmem:[#allocation4 + $0x118] sm:$0xff] %vm4430_vm10, %v4397_v42  ;;  %v10829_v15 = vrot.slane %v10827_v23, 7  ;;  %v5485_v30 = vcombine.low %v5477_v31, %v5484_v47  ;;  %v8429_v1 = vcombine.high %v18714_v2, %v18714_v2 }
 0x293   : > { %v10852_v46 = vshrl.u32 %v15812_v26, 16  ;;  %6108 = vst.msk [vmem:[#allocation4 + $0xf8] sm:$0xff] %vm4430_vm10, %v6067_v8  ;;  %v10835_v41 = vrot.slane %v10833_v54, 7  ;;  %v10840_v33 = vrot.slane %v10838_v53, 6  ;;  %v10843_v61 = vrot.slane %v10841_v57, 7 }
 0x294   : > { %v10849_v17 = vrot.slane %v10847_v3, 7  ;;  %v10830_v43 = vor.u32 %v10829_v15, %v10826_v44  ;;  %v10855_v18 = vshll.u32 %v15812_v26, 16  ;;  %v10861_v24 = vshll.u32 %v10094_v52, 16  ;;  %5645 = vst.msk [vmem:[#allocation4 + $0x120] sm:$0xff] %vm2550_vm9, %v5485_v30  ;;  %v12725_v50 = vld [vmem:[#allocation4 + $0xf0] sm:$0xff]  ;;  %v16749_v15 = vld [vmem:[%s20793_s1 + $0xf8] sm:$0xff]  }
 0x295   : > { %v10854_v63 = vrot.slane %v10852_v46, 6  ;;  %v10844_v20 = vor.u32 %v10843_v61, %v10840_v33  ;;  %v15813_v60 = vld.sshfl [vmem:[#allocation2 + $0x104] sm:$0x13 pattern:$0x76325410]  ;;  %v8437_v21 = vcombine.high %v18716_v45, %v18716_v45  ;;  %6109 = vst.msk [vmem:[#allocation4 + $0x120] sm:$0xff] %vm4430_vm10, %v6069_v5 }
 0x296   : > { %v10831_v48 = vrot.slane %v10830_v43, 2  ;;  %v10857_v49 = vrot.slane %v10855_v18, 7  ;;  %v10102_v4 = vcombine.high %v15813_v60, %v15813_v60  ;;  %v10863_v6 = vrot.slane %v10861_v24, 7  ;;  %v16748_v52 = vld [vmem:[%s20793_s1 + $0xb0] sm:$0xff]  }
 0x297   : > { %v10845_v22 = vrot.slane %v10844_v20, 2  ;;  %v10866_v51 = vshrl.u32 %v15813_v60, 16  ;;  %v10869_v34 = vshll.u32 %v15813_v60, 16  ;;  %v15746_v47 = vrot.slane %v18709_v37, 9  ;;  %16197 = vmatpush3.bf16.msra.mxu1 %v16748_v52 }
 0x298   : > { %v10836_v62 = vsel %vm17115_vm15, %v10831_v48, %v10835_v41  ;;  %v10858_v32 = vor.u32 %v10857_v49, %v10854_v63  ;;  %v15482_v59 = vld.sshfl [vmem:[#allocation2 + $0xc0] sm:$0x12 pattern:$0x76325410]  ;;  %v10875_v56 = vshll.u32 %v10102_v4, 16  ;;  %v8760_v38 = vrot.slane %v8413_v7, 7  ;;  %16198 = vmatprep.subr.bf16.mxu1 %v16749_v15 }
 0x299   : > { %v10850_v26 = vsel %vm17115_vm15, %v10845_v22, %v10849_v17  ;;  %v10868_v12 = vrot.slane %v10866_v51, 6  ;;  %v16868_v39 = vld.sshfl [vmem:[#allocation2 + $0xc0] sm:$0xf pattern:$0x76325410]  ;;  %v10871_v8 = vrot.slane %v10869_v34, 7  ;;  %v4838_v33 = vcombine.high %v15482_v59, %v15482_v59  ;;  %v4399_v51 = vpop.permute.xlu1 %4398 }
 0x29a   : > { %v10859_v36 = vrot.slane %v10858_v32, 2  ;;  %v11329_v29 = vcombine.low %v10836_v62, %v10850_v26  ;;  %v15747_v25 = vrot.slane %v18711_v35, 9  ;;  %v12726_v23 = vld [vmem:[#allocation4 + $0xf8] sm:$0xff]  ;;  %v10877_v42 = vrot.slane %v10875_v56, 7 }
 0x29b   : > { %v18746_v37 = vsel %vm18007_vm8, %v15746_v47, %v8760_v38  ;;  %v8764_v54 = vrot.slane %v8421_v14, 7  ;;  %v15748_v53 = vrot.slane %v18714_v2, 9  ;;  %13198 = vmatprep.mubr.bf16.mxu0 %v12726_v23  ;;  %v10872_v3 = vor.u32 %v10871_v8, %v10868_v12  ;;  %v16869_v35 = vld.sshfl [vmem:[#allocation2 + $0xc8] sm:$0xf pattern:$0x76325410] }
 0x29c   : > { %v10864_v57 = vsel %vm17115_vm15, %v10859_v36, %v10863_v6  ;;  %v18752_v31 = vrot.slane %v11329_v29, %v17100_v16  ;;  %v8768_v44 = vrot.slane %v8429_v1, 7  ;;  %13199 = vmatmul.mubr.bf16.gmra.mrb[24].mxu0 %v12725_v50  ;;  %v15749_v2 = vrot.slane %v18716_v45, 9  ;;  %v15486_v63 = vld.sshfl [vmem:[#allocation2 + $0xd8] sm:$0x12 pattern:$0x76325410]  ;;  %v6071_v29 = vpop.permute.xlu0 %6070 }
 0x29d   : > { %v18759_v46 = vsel %vm18007_vm8, %v15747_v25, %v8764_v54  ;;  %v8772_v41 = vrot.slane %v8437_v21, 7  ;;  %v10873_v61 = vrot.slane %v10872_v3, 2  ;;  %v15546_v43 = vrot.slane %v15482_v59, 9  ;;  %v12731_v14 = vld [vmem:[#allocation4 + $0x120] sm:$0xff]  ;;  %v484_v48 = vld [vmem:[#allocation2 + $0x11c] sm:$0x1]  ;;  %v4401_v15 = vpop.permute.xlu1 %4400 }
 0x29e   : > { %v18764_v17 = vsel %vm18007_vm8, %v15748_v53, %v8768_v44  ;;  %v9024_v30 = vcombine.low %v18746_v37, %v18759_v46  ;;  %v5224_v20 = vrot.slane %v4838_v33, 7  ;;  %v5487_v45 = vcombine.low %v18567_v28, %v18572_v55  ;;  %v16870_v24 = vld.sshfl [vmem:[#allocation2 + $0xd8] sm:$0xf pattern:$0x76325410]  ;;  %13206 = vmatprep.mubr.bf16.mxu0 %v12731_v14 }
 0x29f   : > { %v8773_v18 = vsel %vm18007_vm8, %v15749_v2, %v8772_v41  ;;  %v16871_v7 = vld.sshfl [vmem:[#allocation2 + $0xe0] sm:$0xf pattern:$0x76325410]  ;;  %v10878_v58 = vsel %vm17115_vm15, %v10873_v61, %v10877_v42  ;;  %v4870_v4 = vcombine.high %v15486_v63, %v15486_v63  ;;  %v12730_v28 = vld [vmem:[#allocation4 + $0x118] sm:$0xff]  ;;  %v2414_v6 = vcombine.low %v16868_v39, %v16869_v35 }
 0x2a0   : > { %v9025_v5 = vcombine.low %v18764_v17, %v8773_v18  ;;  %v9032_v60 = vrot.slane %v9024_v30, %v17100_v16  ;;  %v11330_v49 = vcombine.low %v10864_v57, %v10878_v58  ;;  %v5225_v1 = vsel %vm18007_vm8, %v15546_v43, %v5224_v20  ;;  %v775_v62 = vld [vmem:[#allocation2 + $0x11c] sm:$0x4]  ;;  %v15814_v26 = vld.sshfl [vmem:[#allocation2 + $0x110] sm:$0x13 pattern:$0x76325410] }
 0x2a1   : > { %v5501_v21 = vrot.slane %v5487_v45, %v17100_v16  ;;  %v5486_v22 = vcombine.low %v5225_v1, %v18559_v13  ;;  %v15550_v50 = vrot.slane %v15486_v63, 9  ;;  %v16750_v32 = vld [vmem:[%s20793_s1 + $0xb8] sm:$0xff]   ;;  %v5240_v47 = vrot.slane %v4870_v4, 7  ;;  %2559 = vst.msk [vmem:[#allocation4 + $0x140] sm:$0xff] %vm2550_vm9, %v2414_v6 }
 0x2a2   : > { %v9039_v55 = vrot.slane %v9025_v5, %v17100_v16  ;;  %v11344_v34 = vrot.slane %v11330_v49, %v17100_v16  ;;  %v5504_v59 = vcombine.low %v18665_v40, %v18670_v27  ;;  %v485_v13 = vsel %vm16965_vm2, 0, %v484_v48  ;;  %v15815_v38 = vld.sshfl [vmem:[#allocation2 + $0x114] sm:$0x13 pattern:$0x76325410]  ;;  %16199 = vmatpush3.bf16.msra.mxu1 %v16750_v32  ;;  %4439 = vst.msk [vmem:[#allocation4 + $0x140] sm:$0xff] %vm4430_vm10, %v4399_v51  ;;  %v6073_v48 = vpop.permute.xlu0 %6072 }
 0x2a3   : > { %v5494_v56 = vrot.slane %v5486_v22, %v17100_v16  ;;  %v5241_v52 = vsel %vm18007_vm8, %v15550_v50, %v5240_v47  ;;  %486 = vst [vmem:[#allocation2 + $0x11c] sm:$0x1] %v485_v13  ;;  %v776_v27 = vsel %vm16979_vm6, 0, %v775_v62  ;;  %v2431_v23 = vcombine.low %v16870_v24, %v16871_v7 }
 0x2a4   : > { %v9040_v12 = vcombine.low %v9032_v60, %v9039_v55  ;;  %13207 = vmatmul.mubr.bf16.gmra.mrb[28].mxu0 %v12730_v28  ;;  %v11345_v39 = vcombine.low %v18752_v31, %v11344_v34  ;;  %v5518_v40 = vrot.slane %v5504_v59, %v17100_v16  ;;  %v15816_v36 = vld.sshfl [vmem:[#allocation2 + $0x118] sm:$0x13 pattern:$0x76325410]  ;;  %v5503_v25 = vcombine.low %v5241_v52, %v18657_v19 }
 0x2a5   : > { %v5502_v8 = vcombine.low %v5494_v56, %v5501_v21  ;;  %777 = vst [vmem:[#allocation2 + $0x11c] sm:$0x4] %v776_v27  ;;  %v10110_v42 = vcombine.high %v15814_v26, %v15814_v26  ;;  %v10118_v54 = vcombine.high %v15815_v38, %v15815_v38  ;;  %v10126_v53 = vcombine.high %v15816_v36, %v15816_v36  ;;  %v15686_v31 = vld.sshfl [vmem:[#allocation2 + $0x10c] sm:$0x12 pattern:$0x76325410] }
 0x2a6   : > { %9146 = vrot.lane.b32.xlu1 %v9040_v12, %s16926_s25  ;;  %11451 = vrot.lane.b32.xlu0 %v11345_v39, %s16926_s25  ;;  %v10880_v57 = vshrl.u32 %v15814_v26, 16  ;;  %v10883_v3 = vshll.u32 %v15814_v26, 16  ;;  %v18801_v44 = vld.sshfl [vmem:[#allocation2 + $0x110] sm:$0x12 pattern:$0x76325410]  ;;  %v5511_v35 = vrot.slane %v5503_v25, %v17100_v16  ;;  %v8445_v21 = vcombine.high %v15686_v31, %v15686_v31 }
 0x2a7   : > { %5646 = vst.msk [vmem:[#allocation4 + $0x148] sm:$0xff] %vm2550_vm9, %v5502_v8  ;;  %2560 = vst.msk [vmem:[#allocation4 + $0x168] sm:$0xff] %vm2550_vm9, %v2431_v23  ;;  %v10889_v19 = vshll.u32 %v10110_v42, 16  ;;  %v10894_v2 = vshrl.u32 %v15815_v38, 16  ;;  %v10897_v41 = vshll.u32 %v15815_v38, 16  ;;  %v10903_v63 = vshll.u32 %v10118_v54, 16 }
 0x2a8   : > { %v18806_v33 = vld.sshfl [vmem:[#allocation2 + $0x114] sm:$0x12 pattern:$0x76325410]  ;;  %6110 = vst.msk [vmem:[#allocation4 + $0x148] sm:$0xff] %vm4430_vm10, %v6071_v29  ;;  %4440 = vst.msk [vmem:[#allocation4 + $0x168] sm:$0xff] %vm4430_vm10, %v4401_v15  ;;  %v5519_v20 = vcombine.low %v5511_v35, %v5518_v40  ;;  %v8453_v4 = vcombine.high %v18801_v44, %v18801_v44 }
 0x2a9   : > { %v18808_v61 = vld.sshfl [vmem:[#allocation2 + $0x118] sm:$0x12 pattern:$0x76325410]  ;;  %v10882_v30 = vrot.slane %v10880_v57, 6  ;;  %v10885_v43 = vrot.slane %v10883_v3, 7  ;;  %v8461_v6 = vcombine.high %v18806_v33, %v18806_v33 }
 0x2aa   : > { %v10908_v18 = vshrl.u32 %v15816_v36, 16  ;;  %v10891_v45 = vrot.slane %v10889_v19, 7  ;;  %v10896_v24 = vrot.slane %v10894_v2, 6  ;;  %v10899_v7 = vrot.slane %v10897_v41, 7  ;;  %5647 = vst.msk [vmem:[#allocation4 + $0x170] sm:$0xff] %vm2550_vm9, %v5519_v20  ;;  %v16753_v23 = vld [vmem:[%s20793_s1 + $0x110] sm:$0xff]  }
 0x2ab   : > { %v10886_v14 = vor.u32 %v10885_v43, %v10882_v30  ;;  %v10905_v58 = vrot.slane %v10903_v63, 7  ;;  %v10911_v60 = vshll.u32 %v15816_v36, 16  ;;  %v10917_v1 = vshll.u32 %v10126_v53, 16  ;;  %6111 = vst.msk [vmem:[#allocation4 + $0x170] sm:$0xff] %vm4430_vm10, %v6073_v48  ;;  %v12735_v3 = vld [vmem:[#allocation4 + $0x140] sm:$0xff]  ;;  %16564 = vmatprep.subr.bf16.mxu0 %v16753_v23 }
 0x2ac   : > { %v10910_v5 = vrot.slane %v10908_v18, 6  ;;  %v10900_v49 = vor.u32 %v10899_v7, %v10896_v24  ;;  %v15817_v28 = vld.sshfl [vmem:[#allocation2 + $0x11c] sm:$0x13 pattern:$0x76325410]  ;;  %v8469_v51 = vcombine.high %v18808_v61, %v18808_v61  ;;  %v15750_v12 = vrot.slane %v15686_v31, 9  ;;  %16565 = vmatpush3.bf16.msra.mxu0 %v16753_v23 }
 0x2ad   : > { %v10887_v55 = vrot.slane %v10886_v14, 2  ;;  %v10913_v22 = vrot.slane %v10911_v60, 7  ;;  %v10134_v50 = vcombine.high %v15817_v28, %v15817_v28  ;;  %v10919_v32 = vrot.slane %v10917_v1, 7 }
 0x2ae   : > { %v10901_v62 = vrot.slane %v10900_v49, 2  ;;  %v10922_v34 = vshrl.u32 %v15817_v28, 16  ;;  %v10925_v26 = vshll.u32 %v15817_v28, 16  ;;  %v8776_v52 = vrot.slane %v8445_v21, 7  ;;  %v502_v28 = vld [vmem:[#allocation2 + $0x134] sm:$0x1] }
 0x2af   : > { %v10892_v47 = vsel %vm17115_vm15, %v10887_v55, %v10891_v45  ;;  %v10914_v59 = vor.u32 %v10913_v22, %v10910_v5  ;;  %v15490_v56 = vld.sshfl [vmem:[#allocation2 + $0xf0] sm:$0x12 pattern:$0x76325410]  ;;  %v10931_v39 = vshll.u32 %v10134_v50, 16  ;;  %v12736_v27 = vld [vmem:[#allocation4 + $0x148] sm:$0xff]  ;;  %v5521_v14 = vcombine.low %v18759_v46, %v18764_v17 }
 0x2b0   : > { %v10906_v13 = vsel %vm17115_vm15, %v10901_v62, %v10905_v58  ;;  %v10924_v38 = vrot.slane %v10922_v34, 6  ;;  %v16872_v40 = vld.sshfl [vmem:[#allocation2 + $0xf0] sm:$0xf pattern:$0x76325410]  ;;  %v10927_v8 = vrot.slane %v10925_v26, 7  ;;  %13214 = vmatprep.mubr.bf16.mxu0 %v12736_v27  ;;  %v18830_v54 = vsel %vm18007_vm8, %v15750_v12, %v8776_v52 }
 0x2b1   : > { %v10915_v36 = vrot.slane %v10914_v59, 2  ;;  %v11346_v29 = vcombine.low %v10892_v47, %v10906_v13  ;;  %v15751_v25 = vrot.slane %v18801_v44, 9  ;;  %v10933_v42 = vrot.slane %v10931_v39, 7  ;;  %13215 = vmatmul.mubr.bf16.gmra.mrb[32].mxu0 %v12735_v3  ;;  %v793_v55 = vld [vmem:[#allocation2 + $0x134] sm:$0x4] }
 0x2b2   : > { %v8780_v53 = vrot.slane %v8453_v4, 7  ;;  %v15752_v57 = vrot.slane %v18806_v33, 9  ;;  %v10928_v35 = vor.u32 %v10927_v8, %v10924_v38  ;;  %v8784_v15 = vrot.slane %v8461_v6, 7  ;;  %v4403_v6 = vpop.permute.xlu1 %4402  ;;  %v12741_v39 = vld [vmem:[#allocation4 + $0x170] sm:$0xff] }
 0x2b3   : > { %v10920_v31 = vsel %vm17115_vm15, %v10915_v36, %v10919_v32  ;;  %v11354_v44 = vrot.slane %v11346_v29, %v17100_v16  ;;  %v16873_v19 = vld.sshfl [vmem:[#allocation2 + $0xf8] sm:$0xf pattern:$0x76325410]  ;;  %v15753_v41 = vrot.slane %v18808_v61, 9  ;;  %v8788_v30 = vrot.slane %v8469_v51, 7  ;;  %13222 = vmatprep.mubr.bf16.mxu0 %v12741_v39 }
 0x2b4   : > { %v8781_v2 = vsel %vm18007_vm8, %v15751_v25, %v8780_v53  ;;  %v4902_v43 = vcombine.high %v15490_v56, %v15490_v56  ;;  %v15494_v63 = vld.sshfl [vmem:[#allocation2 + $0x108] sm:$0x12 pattern:$0x76325410]  ;;  %v10929_v33 = vrot.slane %v10928_v35, 2  ;;  %v8785_v18 = vsel %vm18007_vm8, %v15752_v57, %v8784_v15 }
 0x2b5   : > { %v9041_v20 = vcombine.low %v18830_v54, %v8781_v2  ;;  %v15554_v45 = vrot.slane %v15490_v56, 9  ;;  %v8789_v24 = vsel %vm18007_vm8, %v15753_v41, %v8788_v30  ;;  %v16874_v58 = vld.sshfl [vmem:[#allocation2 + $0x108] sm:$0xf pattern:$0x76325410]  ;;  %v5535_v21 = vrot.slane %v5521_v14, %v17100_v16 }
 0x2b6   : > { %v5256_v7 = vrot.slane %v4902_v43, 7  ;;  %v10934_v61 = vsel %vm17115_vm15, %v10929_v33, %v10933_v42  ;;  %v9042_v5 = vcombine.low %v8785_v18, %v8789_v24  ;;  %v16875_v48 = vld.sshfl [vmem:[#allocation2 + $0x110] sm:$0xf pattern:$0x76325410]  ;;  %v4934_v4 = vcombine.high %v15494_v63, %v15494_v63  ;;  %v12740_v41 = vld [vmem:[#allocation4 + $0x168] sm:$0xff] }
 0x2b7   : > { %v9049_v60 = vrot.slane %v9041_v20, %v17100_v16  ;;  %v11347_v49 = vcombine.low %v10920_v31, %v10934_v61  ;;  %v2448_v17 = vcombine.low %v16872_v40, %v16873_v19  ;;  %v15558_v51 = vrot.slane %v15494_v63, 9  ;;  %v15818_v50 = vld.sshfl [vmem:[#allocation2 + $0x128] sm:$0x13 pattern:$0x76325410]  ;;  %v6075_v40 = vpop.permute.xlu0 %6074 }
 0x2b8   : > { %v5257_v1 = vsel %vm18007_vm8, %v15554_v45, %v5256_v7  ;;  %v9056_v22 = vrot.slane %v9042_v5, %v17100_v16  ;;  %v5272_v32 = vrot.slane %v4934_v4, 7  ;;  %v5538_v34 = vcombine.low %v8781_v2, %v8785_v18  ;;  %v15819_v47 = vld.sshfl [vmem:[#allocation2 + $0x12c] sm:$0x13 pattern:$0x76325410] }
 0x2b9   : > { %v5520_v46 = vcombine.low %v5257_v1, %v18746_v37  ;;  %v11361_v62 = vrot.slane %v11347_v49, %v17100_v16  ;;  %2561 = vst.msk [vmem:[#allocation4 + $0x190] sm:$0xff] %vm2550_vm9, %v2448_v17  ;;  %v503_v12 = vsel %vm16965_vm2, 0, %v502_v28  ;;  %v794_v38 = vsel %vm16979_vm6, 0, %v793_v55  ;;  %13223 = vmatmul.mubr.bf16.gmra.mrb[36].mxu0 %v12740_v41 }
 0x2ba   : > { %v9057_v59 = vcombine.low %v9049_v60, %v9056_v22  ;;  %4441 = vst.msk [vmem:[#allocation4 + $0x190] sm:$0xff] %vm4430_vm10, %v4403_v6  ;;  %v5273_v37 = vsel %vm18007_vm8, %v15558_v51, %v5272_v32  ;;  %v5552_v13 = vrot.slane %v5538_v34, %v17100_v16  ;;  %504 = vst [vmem:[#allocation2 + $0x134] sm:$0x1] %v503_v12  ;;  %v10936_v42 = vshrl.u32 %v15818_v50, 16 }
 0x2bb   : > { %v5528_v26 = vrot.slane %v5520_v46, %v17100_v16  ;;  %v11362_v56 = vcombine.low %v11354_v44, %v11361_v62  ;;  %v5537_v27 = vcombine.low %v5273_v37, %v18830_v54  ;;  %v2465_v36 = vcombine.low %v16874_v58, %v16875_v48  ;;  %795 = vst [vmem:[#allocation2 + $0x134] sm:$0x4] %v794_v38  ;;  %v15820_v8 = vld.sshfl [vmem:[#allocation2 + $0x130] sm:$0x13 pattern:$0x76325410]  ;;  %v4405_v54 = vpop.permute.xlu1 %4404  ;;  %v6077_v5 = vpop.permute.xlu0 %6076 }
 0x2bc   : > { %9148 = vrot.lane.b32.xlu1 %v9057_v59, %s16926_s25  ;;  %v10142_v29 = vcombine.high %v15818_v50, %v15818_v50  ;;  %v10150_v25 = vcombine.high %v15819_v47, %v15819_v47  ;;  %v10158_v23 = vcombine.high %v15820_v8, %v15820_v8  ;;  %v10939_v53 = vshll.u32 %v15818_v50, 16  ;;  %v15690_v57 = vld.sshfl [vmem:[#allocation2 + $0x124] sm:$0x12 pattern:$0x76325410] }
 0x2bd   : > { %v5536_v52 = vcombine.low %v5528_v26, %v5535_v21  ;;  %11453 = vrot.lane.b32.xlu0 %v11362_v56, %s16926_s25  ;;  %v18868_v3 = vld.sshfl [vmem:[#allocation2 + $0x128] sm:$0x12 pattern:$0x76325410]  ;;  %v5545_v31 = vrot.slane %v5537_v27, %v17100_v16  ;;  %2562 = vst.msk [vmem:[#allocation4 + $0x1b8] sm:$0xff] %vm2550_vm9, %v2465_v36  ;;  %v10950_v44 = vshrl.u32 %v15819_v47, 16  ;;  %v8477_v49 = vcombine.high %v15690_v57, %v15690_v57 }
 0x2be   : > { %v10945_v35 = vshll.u32 %v10142_v29, 16  ;;  %v10953_v15 = vshll.u32 %v15819_v47, 16  ;;  %v18873_v19 = vld.sshfl [vmem:[#allocation2 + $0x12c] sm:$0x12 pattern:$0x76325410]  ;;  %v8485_v1 = vcombine.high %v18868_v3, %v18868_v3 }
 0x2bf   : > { %5648 = vst.msk [vmem:[#allocation4 + $0x198] sm:$0xff] %vm2550_vm9, %v5536_v52  ;;  %v18875_v2 = vld.sshfl [vmem:[#allocation2 + $0x130] sm:$0x12 pattern:$0x76325410]  ;;  %v10938_v30 = vrot.slane %v10936_v42, 6  ;;  %v5553_v18 = vcombine.low %v5545_v31, %v5552_v13  ;;  %v8493_v55 = vcombine.high %v18873_v19, %v18873_v19 }
 0x2c0   : > { %6112 = vst.msk [vmem:[#allocation4 + $0x198] sm:$0xff] %vm4430_vm10, %v6075_v40  ;;  %4442 = vst.msk [vmem:[#allocation4 + $0x1b8] sm:$0xff] %vm4430_vm10, %v4405_v54  ;;  %v10941_v43 = vrot.slane %v10939_v53, 7  ;;  %v10959_v63 = vshll.u32 %v10150_v25, 16  ;;  %v10964_v33 = vshrl.u32 %v15820_v8, 16  ;;  %v10947_v20 = vrot.slane %v10945_v35, 7 }
 0x2c1   : > { %v10952_v45 = vrot.slane %v10950_v44, 6  ;;  %v10955_v24 = vrot.slane %v10953_v15, 7  ;;  %v10967_v61 = vshll.u32 %v15820_v8, 16  ;;  %5649 = vst.msk [vmem:[#allocation4 + $0x1c0] sm:$0xff] %vm2550_vm9, %v5553_v18  ;;  %v10973_v48 = vshll.u32 %v10158_v23, 16  ;;  %v12745_v23 = vld [vmem:[#allocation4 + $0x190] sm:$0xff] }
 0x2c2   : > { %v10942_v7 = vor.u32 %v10941_v43, %v10938_v30  ;;  %v10961_v14 = vrot.slane %v10959_v63, 7  ;;  %v10966_v58 = vrot.slane %v10964_v33, 6  ;;  %6113 = vst.msk [vmem:[#allocation4 + $0x1c0] sm:$0xff] %vm4430_vm10, %v6077_v5  ;;  %v8501_v22 = vcombine.high %v18875_v2, %v18875_v2 }
 0x2c3   : > { %v10956_v60 = vor.u32 %v10955_v24, %v10952_v45  ;;  %v15821_v21 = vld.sshfl [vmem:[#allocation2 + $0x134] sm:$0x13 pattern:$0x76325410]  ;;  %v10969_v28 = vrot.slane %v10967_v61, 7  ;;  %v10975_v6 = vrot.slane %v10973_v48, 7 }
 0x2c4   : > { %v10943_v4 = vrot.slane %v10942_v7, 2  ;;  %v10166_v46 = vcombine.high %v15821_v21, %v15821_v21  ;;  %v10978_v51 = vshrl.u32 %v15821_v21, 16  ;;  %v10981_v32 = vshll.u32 %v15821_v21, 16 }
 0x2c5   : > { %v10957_v17 = vrot.slane %v10956_v60, 2  ;;  %v10970_v62 = vor.u32 %v10969_v28, %v10966_v58  ;;  %v15754_v34 = vrot.slane %v15690_v57, 9  ;;  %v15498_v47 = vld.sshfl [vmem:[#allocation2 + $0x120] sm:$0x12 pattern:$0x76325410] }
 0x2c6   : > { %v10948_v50 = vsel %vm17115_vm15, %v10943_v4, %v10947_v20  ;;  %v10980_v26 = vrot.slane %v10978_v51, 6  ;;  %v10987_v12 = vshll.u32 %v10166_v46, 16  ;;  %v8792_v56 = vrot.slane %v8477_v49, 7 }
 0x2c7   : > { %v10962_v59 = vsel %vm17115_vm15, %v10957_v17, %v10961_v14  ;;  %v10971_v37 = vrot.slane %v10970_v62, 2  ;;  %v10983_v13 = vrot.slane %v10981_v32, 7  ;;  %v15755_v39 = vrot.slane %v18868_v3, 9  ;;  %v12746_v40 = vld [vmem:[#allocation4 + $0x198] sm:$0xff] }
 0x2c8   : > { %v11363_v38 = vcombine.low %v10948_v50, %v10962_v59  ;;  %v16876_v52 = vld.sshfl [vmem:[#allocation2 + $0x120] sm:$0xf pattern:$0x76325410]  ;;  %v10989_v27 = vrot.slane %v10987_v12, 7  ;;  %v8793_v36 = vsel %vm18007_vm8, %v15754_v34, %v8792_v56  ;;  %v8796_v8 = vrot.slane %v8485_v1, 7  ;;  %13230 = vmatprep.mubr.bf16.mxu0 %v12746_v40  ;;  %v4407_v50 = vpop.permute.xlu1 %4406 }
 0x2c9   : > { %v15756_v29 = vrot.slane %v18873_v19, 9  ;;  %v16877_v25 = vld.sshfl [vmem:[#allocation2 + $0x128] sm:$0xf pattern:$0x76325410]  ;;  %v10976_v42 = vsel %vm17115_vm15, %v10971_v37, %v10975_v6  ;;  %v10984_v53 = vor.u32 %v10983_v13, %v10980_v26  ;;  %v8800_v31 = vrot.slane %v8493_v55, 7  ;;  %13231 = vmatmul.mubr.bf16.gmra.mrb[40].mxu0 %v12745_v23 }
 0x2ca   : > { %v11371_v57 = vrot.slane %v11363_v38, %v17100_v16  ;;  %v15502_v3 = vld.sshfl [vmem:[#allocation2 + $0x138] sm:$0x12 pattern:$0x76325410]  ;;  %v8797_v54 = vsel %vm18007_vm8, %v15755_v39, %v8796_v8  ;;  %v15757_v35 = vrot.slane %v18875_v2, 9  ;;  %v8804_v44 = vrot.slane %v8501_v22, 7  ;;  %v6079_v8 = vpop.permute.xlu0 %6078 }
 0x2cb   : > { %v4966_v15 = vcombine.high %v15498_v47, %v15498_v47  ;;  %v15503_v19 = vld.sshfl [vmem:[#allocation2 + $0x13c] sm:$0x12 pattern:$0x76325410]  ;;  %v10985_v41 = vrot.slane %v10984_v53, 2  ;;  %v8801_v30 = vsel %vm18007_vm8, %v15756_v29, %v8800_v31  ;;  %v9058_v43 = vcombine.low %v8793_v36, %v8797_v54 }
 0x2cc   : > { %v15562_v63 = vrot.slane %v15498_v47, 9  ;;  %v15504_v33 = vld.sshfl [vmem:[#allocation2 + $0x140] sm:$0x12 pattern:$0x76325410]  ;;  %v8805_v18 = vsel %vm18007_vm8, %v15757_v35, %v8804_v44  ;;  %v5555_v45 = vcombine.low %v8797_v54, %v8801_v30  ;;  %v4998_v60 = vcombine.high %v15502_v3, %v15502_v3 }
 0x2cd   : > { %v5288_v20 = vrot.slane %v4966_v15, 7  ;;  %v15505_v24 = vld.sshfl [vmem:[#allocation2 + $0x144] sm:$0x12 pattern:$0x76325410]  ;;  %v10990_v7 = vsel %vm17115_vm15, %v10985_v41, %v10989_v27  ;;  %v9059_v2 = vcombine.low %v8801_v30, %v8805_v18  ;;  %v9066_v14 = vrot.slane %v9058_v43, %v17100_v16  ;;  %v4409_v43 = vpop.permute.xlu1 %4408 }
 0x2ce   : > { %v11364_v58 = vcombine.low %v10976_v42, %v10990_v7  ;;  %v5569_v5 = vrot.slane %v5555_v45, %v17100_v16  ;;  %v2482_v1 = vcombine.low %v16876_v52, %v16877_v25  ;;  %v5006_v21 = vcombine.high %v15503_v19, %v15503_v19  ;;  %v16878_v46 = vld.sshfl [vmem:[#allocation2 + $0x138] sm:$0xf pattern:$0x76325410]  ;;  %v520_v34 = vld [vmem:[#allocation2 + $0x14c] sm:$0x1] }
 0x2cf   : > { %v5289_v61 = vsel %vm18007_vm8, %v15562_v63, %v5288_v20  ;;  %v9073_v48 = vrot.slane %v9059_v2, %v17100_v16  ;;  %v5014_v28 = vcombine.high %v15504_v33, %v15504_v33  ;;  %v5022_v55 = vcombine.high %v15505_v24, %v15505_v24  ;;  %v16879_v17 = vld.sshfl [vmem:[#allocation2 + $0x140] sm:$0xf pattern:$0x76325410]  ;;  %v811_v47 = vld [vmem:[#allocation2 + $0x14c] sm:$0x4] }
 0x2d0   : > { %v5554_v49 = vcombine.low %v5289_v61, %v8793_v36  ;;  %v11378_v4 = vrot.slane %v11364_v58, %v17100_v16  ;;  %v15566_v22 = vrot.slane %v15502_v3, 9  ;;  %2563 = vst.msk [vmem:[#allocation4 + $0x1e0] sm:$0xff] %vm2550_vm9, %v2482_v1  ;;  %v5304_v62 = vrot.slane %v4998_v60, 7  ;;  %v12751_v45 = vld [vmem:[#allocation4 + $0x1c0] sm:$0xff] }
 0x2d1   : > { %v9074_v6 = vcombine.low %v9066_v14, %v9073_v48  ;;  %v15567_v32 = vrot.slane %v15503_v19, 9  ;;  %4443 = vst.msk [vmem:[#allocation4 + $0x1e0] sm:$0xff] %vm4430_vm10, %v4407_v50  ;;  %v5308_v26 = vrot.slane %v5006_v21, 7  ;;  %v15568_v12 = vrot.slane %v15504_v33, 9  ;;  %13238 = vmatprep.mubr.bf16.mxu0 %v12751_v45  ;;  %v12750_v48 = vld [vmem:[#allocation4 + $0x1b8] sm:$0xff] }
 0x2d2   : > { %v5562_v51 = vrot.slane %v5554_v49, %v17100_v16  ;;  %v11379_v59 = vcombine.low %v11371_v57, %v11378_v4  ;;  %v5312_v56 = vrot.slane %v5014_v28, 7  ;;  %v5305_v13 = vsel %vm18007_vm8, %v15566_v22, %v5304_v62  ;;  %v15822_v52 = vld.sshfl [vmem:[#allocation2 + $0x140] sm:$0x13 pattern:$0x76325410]  ;;  %13239 = vmatmul.mubr.bf16.gmra.mrb[44].mxu0 %v12750_v48  ;;  %v6081_v28 = vpop.permute.xlu0 %6080 }
 0x2d3   : > { %9150 = vrot.lane.b32.xlu1 %v9074_v6, %s16926_s25  ;;  %v15569_v38 = vrot.slane %v15505_v24, 9  ;;  %v5316_v39 = vrot.slane %v5022_v55, 7  ;;  %v18922_v40 = vsel %vm18007_vm8, %v15567_v32, %v5308_v26  ;;  %v15823_v36 = vld.sshfl [vmem:[#allocation2 + $0x144] sm:$0x13 pattern:$0x76325410]  ;;  %v2499_v57 = vcombine.low %v16878_v46, %v16879_v17 }
 0x2d4   : > { %v5570_v37 = vcombine.low %v5562_v51, %v5569_v5  ;;  %11455 = vrot.lane.b32.xlu0 %v11379_v59, %s16926_s25  ;;  %v18926_v27 = vsel %vm18007_vm8, %v15568_v12, %v5312_v56  ;;  %v5571_v25 = vcombine.low %v5305_v13, %v18922_v40  ;;  %v521_v23 = vsel %vm16965_vm2, 0, %v520_v34  ;;  %v15824_v31 = vld.sshfl [vmem:[#allocation2 + $0x148] sm:$0x13 pattern:$0x76325410] }
 0x2d5   : > { %v18931_v29 = vsel %vm18007_vm8, %v15569_v38, %v5316_v39  ;;  %v812_v42 = vsel %vm16979_vm6, 0, %v811_v47  ;;  %522 = vst [vmem:[#allocation2 + $0x14c] sm:$0x1] %v521_v23  ;;  %v10174_v3 = vcombine.high %v15822_v52, %v15822_v52  ;;  %v10182_v54 = vcombine.high %v15823_v36, %v15823_v36  ;;  %2564 = vst.msk [vmem:[#allocation4 + $0x208] sm:$0xff] %vm2550_vm9, %v2499_v57 }
 0x2d6   : > { %5650 = vst.msk [vmem:[#allocation4 + $0x1e8] sm:$0xff] %vm2550_vm9, %v5570_v37  ;;  %v5572_v53 = vcombine.low %v18926_v27, %v18931_v29  ;;  %813 = vst [vmem:[#allocation2 + $0x14c] sm:$0x4] %v812_v42  ;;  %v5579_v35 = vrot.slane %v5571_v25, %v17100_v16  ;;  %v10190_v44 = vcombine.high %v15824_v31, %v15824_v31  ;;  %v10992_v15 = vshrl.u32 %v15822_v52, 16 }
 0x2d7   : > { %6114 = vst.msk [vmem:[#allocation4 + $0x1e8] sm:$0xff] %vm4430_vm10, %v6079_v8  ;;  %v10995_v19 = vshll.u32 %v15822_v52, 16  ;;  %v15697_v41 = vld.sshfl [vmem:[#allocation2 + $0x148] sm:$0x12 pattern:$0x76325410]  ;;  %v9075_v62 = vcombine.low %v18922_v40, %v18926_v27 }
 0x2d8   : > { %v5586_v30 = vrot.slane %v5572_v53, %v17100_v16  ;;  %v11001_v63 = vshll.u32 %v10174_v3, 16  ;;  %v11006_v33 = vshrl.u32 %v15823_v36, 16  ;;  %v11009_v18 = vshll.u32 %v15823_v36, 16  ;;  %4444 = vst.msk [vmem:[#allocation4 + $0x208] sm:$0xff] %vm4430_vm10, %v4409_v43 }
 0x2d9   : > { %v18944_v20 = vld.sshfl [vmem:[#allocation2 + $0x150] sm:$0x12 pattern:$0x76325410]  ;;  %v10994_v24 = vrot.slane %v10992_v15, 6  ;;  %v10997_v7 = vrot.slane %v10995_v19, 7  ;;  %v8533_v46 = vcombine.high %v15697_v41, %v15697_v41  ;;  %v9083_v27 = vrot.slane %v9075_v62, %v17100_v16 }
 0x2da   : > { %v11015_v2 = vshll.u32 %v10182_v54, 16  ;;  %v11020_v14 = vshrl.u32 %v15824_v31, 16  ;;  %v5587_v58 = vcombine.low %v5579_v35, %v5586_v30  ;;  %v11003_v61 = vrot.slane %v11001_v63, 7 }
 0x2db   : > { %v11008_v5 = vrot.slane %v11006_v33, 6  ;;  %v11011_v60 = vrot.slane %v11009_v18, 7  ;;  %v10998_v49 = vor.u32 %v10997_v7, %v10994_v24  ;;  %v11023_v4 = vshll.u32 %v15824_v31, 16  ;;  %v16762_v7 = vld [vmem:[%s20793_s1 + $0x118] sm:$0xff]  }
 0x2dc   : > { %v11017_v1 = vrot.slane %v11015_v2, 7  ;;  %v11022_v21 = vrot.slane %v11020_v14, 6  ;;  %5651 = vst.msk [vmem:[#allocation4 + $0x210] sm:$0xff] %vm2550_vm9, %v5587_v58  ;;  %v11029_v22 = vshll.u32 %v10190_v44, 16  ;;  %v15761_v17 = vrot.slane %v15697_v41, 9  ;;  %16566 = vmatprep.subr.bf16.mxu0 %v16762_v7 }
 0x2dd   : > { %v11012_v55 = vor.u32 %v11011_v60, %v11008_v5  ;;  %6115 = vst.msk [vmem:[#allocation4 + $0x210] sm:$0xff] %vm4430_vm10, %v6081_v28  ;;  %v15825_v6 = vld.sshfl [vmem:[#allocation2 + $0x14c] sm:$0x13 pattern:$0x76325410]  ;;  %v10999_v51 = vrot.slane %v10998_v49, 2  ;;  %v5030_v34 = vcombine.high %v18944_v20, %v18944_v20  ;;  %16567 = vmatpush3.bf16.msra.mxu0 %v16762_v7 }
 0x2de   : > { %v11025_v50 = vrot.slane %v11023_v4, 7  ;;  %v15507_v32 = vld.sshfl [vmem:[#allocation2 + $0x154] sm:$0x12 pattern:$0x76325410]  ;;  %v10198_v47 = vcombine.high %v15825_v6, %v15825_v6  ;;  %v11031_v26 = vrot.slane %v11029_v22, 7 }
 0x2df   : > { %v11013_v59 = vrot.slane %v11012_v55, 2  ;;  %v11034_v12 = vshrl.u32 %v15825_v6, 16  ;;  %v11004_v56 = vsel %vm17115_vm15, %v10999_v51, %v11003_v61  ;;  %v11037_v13 = vshll.u32 %v15825_v6, 16  ;;  %v12756_v35 = vld [vmem:[#allocation4 + $0x1e8] sm:$0xff] }
 0x2e0   : > { %v11026_v37 = vor.u32 %v11025_v50, %v11022_v21  ;;  %v8820_v38 = vrot.slane %v8533_v46, 7  ;;  %v15508_v39 = vld.sshfl [vmem:[#allocation2 + $0x158] sm:$0x12 pattern:$0x76325410]  ;;  %v11043_v40 = vshll.u32 %v10198_v47, 16  ;;  %v5038_v3 = vcombine.high %v15507_v32, %v15507_v32  ;;  %13246 = vmatprep.mubr.bf16.mxu0 %v12756_v35 }
 0x2e1   : > { %v11018_v52 = vsel %vm17115_vm15, %v11013_v59, %v11017_v1  ;;  %v11036_v36 = vrot.slane %v11034_v12, 6  ;;  %v15509_v8 = vld.sshfl [vmem:[#allocation2 + $0x15c] sm:$0x12 pattern:$0x76325410]  ;;  %v11039_v23 = vrot.slane %v11037_v13, 7  ;;  %v5046_v54 = vcombine.high %v15508_v39, %v15508_v39 }
 0x2e2   : > { %v11027_v25 = vrot.slane %v11026_v37, 2  ;;  %v11380_v42 = vcombine.low %v11004_v56, %v11018_v52  ;;  %v8821_v53 = vsel %vm18007_vm8, %v15761_v17, %v8820_v38  ;;  %v11045_v57 = vrot.slane %v11043_v40, 7  ;;  %v16880_v30 = vld.sshfl [vmem:[#allocation2 + $0x150] sm:$0xf pattern:$0x76325410]  ;;  %v4411_v40 = vpop.permute.xlu1 %4410 }
 0x2e3   : > { %v9076_v31 = vcombine.low %v18931_v29, %v8821_v53  ;;  %v11040_v15 = vor.u32 %v11039_v23, %v11036_v36  ;;  %v5054_v41 = vcombine.high %v15509_v8, %v15509_v8  ;;  %v16881_v43 = vld.sshfl [vmem:[#allocation2 + $0x158] sm:$0xf pattern:$0x76325410]  ;;  %v15570_v33 = vrot.slane %v18944_v20, 9  ;;  %v12755_v52 = vld [vmem:[#allocation4 + $0x1e0] sm:$0xff] }
 0x2e4   : > { %v11032_v44 = vsel %vm17115_vm15, %v11027_v25, %v11031_v26  ;;  %v18964_v19 = vrot.slane %v11380_v42, %v17100_v16  ;;  %v5320_v18 = vrot.slane %v5030_v34, 7  ;;  %v15571_v29 = vrot.slane %v15507_v32, 9  ;;  %v15510_v45 = vld.sshfl [vmem:[#allocation2 + $0x168] sm:$0x12 pattern:$0x76325410]  ;;  %13247 = vmatmul.mubr.bf16.gmra.mrb[48].mxu0 %v12755_v52 }
 0x2e5   : > { %v9090_v63 = vrot.slane %v9076_v31, %v17100_v16  ;;  %v15511_v24 = vld.sshfl [vmem:[#allocation2 + $0x16c] sm:$0x12 pattern:$0x76325410]  ;;  %v11041_v2 = vrot.slane %v11040_v15, 2  ;;  %v5324_v14 = vrot.slane %v5038_v3, 7  ;;  %v5062_v6 = vcombine.high %v15510_v45, %v15510_v45  ;;  %v6083_v15 = vpop.permute.xlu0 %6082 }
 0x2e6   : > { %v15572_v58 = vrot.slane %v15508_v39, 9  ;;  %v5328_v61 = vrot.slane %v5046_v54, 7  ;;  %v5321_v60 = vsel %vm18007_vm8, %v15570_v33, %v5320_v18  ;;  %v15573_v48 = vrot.slane %v15509_v8, 9  ;;  %v538_v12 = vld [vmem:[#allocation2 + $0x164] sm:$0x1]  ;;  %v12761_v23 = vld [vmem:[#allocation4 + $0x210] sm:$0xff] }
 0x2e7   : > { %v9091_v5 = vcombine.low %v9083_v27, %v9090_v63  ;;  %v5332_v49 = vrot.slane %v5054_v41, 7  ;;  %v15512_v1 = vld.sshfl [vmem:[#allocation2 + $0x170] sm:$0x12 pattern:$0x76325410]  ;;  %v11046_v20 = vsel %vm17115_vm15, %v11041_v2, %v11045_v57  ;;  %v18977_v21 = vsel %vm18007_vm8, %v15571_v29, %v5324_v14  ;;  %13254 = vmatprep.mubr.bf16.mxu0 %v12761_v23 }
 0x2e8   : > { %v18981_v4 = vsel %vm18007_vm8, %v15572_v58, %v5328_v61  ;;  %v15513_v28 = vld.sshfl [vmem:[#allocation2 + $0x174] sm:$0x12 pattern:$0x76325410]  ;;  %v11381_v55 = vcombine.low %v11032_v44, %v11046_v20  ;;  %v5588_v46 = vcombine.low %v5321_v60, %v18977_v21  ;;  %v5070_v51 = vcombine.high %v15511_v24, %v15511_v24  ;;  %v829_v56 = vld [vmem:[#allocation2 + $0x164] sm:$0x4]  ;;  %v4413_v60 = vpop.permute.xlu1 %4412 }
 0x2e9   : > { %9152 = vrot.lane.b32.xlu1 %v9091_v5, %s16926_s25  ;;  %v18986_v22 = vsel %vm18007_vm8, %v15573_v48, %v5332_v49  ;;  %v5078_v50 = vcombine.high %v15512_v1, %v15512_v1  ;;  %v16882_v62 = vld.sshfl [vmem:[#allocation2 + $0x168] sm:$0xf pattern:$0x76325410]  ;;  %v2516_v59 = vcombine.low %v16880_v30, %v16881_v43  ;;  %v5086_v26 = vcombine.high %v15513_v28, %v15513_v28 }
 0x2ea   : > { %v5589_v17 = vcombine.low %v18981_v4, %v18986_v22  ;;  %v16883_v32 = vld.sshfl [vmem:[#allocation2 + $0x170] sm:$0xf pattern:$0x76325410]  ;;  %v11395_v34 = vrot.slane %v11381_v55, %v17100_v16  ;;  %v5596_v47 = vrot.slane %v5588_v46, %v17100_v16  ;;  %v15574_v13 = vrot.slane %v15510_v45, 9  ;;  %v12760_v20 = vld [vmem:[#allocation4 + $0x208] sm:$0xff] }
 0x2eb   : > { %v5336_v38 = vrot.slane %v5062_v6, 7  ;;  %v15575_v39 = vrot.slane %v15511_v24, 9  ;;  %2565 = vst.msk [vmem:[#allocation4 + $0x230] sm:$0xff] %vm2550_vm9, %v2516_v59  ;;  %v5340_v27 = vrot.slane %v5070_v51, 7  ;;  %v15576_v8 = vrot.slane %v15512_v1, 9 }
 0x2ec   : > { %v5603_v37 = vrot.slane %v5589_v17, %v17100_v16  ;;  %v11396_v36 = vcombine.low %v18964_v19, %v11395_v34  ;;  %v5344_v25 = vrot.slane %v5078_v50, 7  ;;  %4445 = vst.msk [vmem:[#allocation4 + $0x230] sm:$0xff] %vm4430_vm10, %v4411_v40  ;;  %v15577_v57 = vrot.slane %v15513_v28, 9  ;;  %13255 = vmatmul.mubr.bf16.gmra.mrb[52].mxu0 %v12760_v20 }
 0x2ed   : > { %v5337_v53 = vsel %vm18007_vm8, %v15574_v13, %v5336_v38  ;;  %v5348_v31 = vrot.slane %v5086_v26, 7  ;;  %v15826_v3 = vld.sshfl [vmem:[#allocation2 + $0x158] sm:$0x13 pattern:$0x76325410]  ;;  %v19002_v54 = vsel %vm18007_vm8, %v15575_v39, %v5340_v27  ;;  %v539_v30 = vsel %vm16965_vm2, 0, %v538_v12  ;;  %v6085_v26 = vpop.permute.xlu0 %6084 }
 0x2ee   : > { %v5604_v42 = vcombine.low %v5596_v47, %v5603_v37  ;;  %11457 = vrot.lane.b32.xlu0 %v11396_v36, %s16926_s25  ;;  %v19006_v35 = vsel %vm18007_vm8, %v15576_v8, %v5344_v25  ;;  %v15827_v44 = vld.sshfl [vmem:[#allocation2 + $0x15c] sm:$0x13 pattern:$0x76325410]  ;;  %v5605_v41 = vcombine.low %v5337_v53, %v19002_v54  ;;  %v830_v43 = vsel %vm16979_vm6, 0, %v829_v56 }
 0x2ef   : > { %v19011_v19 = vsel %vm18007_vm8, %v15577_v57, %v5348_v31  ;;  %v2533_v33 = vcombine.low %v16882_v62, %v16883_v32  ;;  %540 = vst [vmem:[#allocation2 + $0x164] sm:$0x1] %v539_v30  ;;  %831 = vst [vmem:[#allocation2 + $0x164] sm:$0x4] %v830_v43  ;;  %v10206_v29 = vcombine.high %v15826_v3, %v15826_v3  ;;  %v11048_v2 = vshrl.u32 %v15826_v3, 16 }
 0x2f0   : > { %5652 = vst.msk [vmem:[#allocation4 + $0x238] sm:$0xff] %vm2550_vm9, %v5604_v42  ;;  %v5606_v63 = vcombine.low %v19006_v35, %v19011_v19  ;;  %v15828_v18 = vld.sshfl [vmem:[#allocation2 + $0x160] sm:$0x13 pattern:$0x76325410]  ;;  %v10214_v45 = vcombine.high %v15827_v44, %v15827_v44  ;;  %v5613_v24 = vrot.slane %v5605_v41, %v17100_v16  ;;  %v11051_v14 = vshll.u32 %v15826_v3, 16 }
 0x2f1   : > { %6116 = vst.msk [vmem:[#allocation4 + $0x238] sm:$0xff] %vm4430_vm10, %v6083_v15  ;;  %v10222_v7 = vcombine.high %v15828_v18, %v15828_v18  ;;  %v15701_v58 = vld.sshfl [vmem:[#allocation2 + $0x160] sm:$0x12 pattern:$0x76325410]  ;;  %v11057_v48 = vshll.u32 %v10206_v29, 16  ;;  %v9092_v40 = vcombine.low %v18977_v21, %v18981_v4 }
 0x2f2   : > { %v19022_v61 = vld.sshfl [vmem:[#allocation2 + $0x8] sm:$0xf pattern:$0x76325410]  ;;  %v5620_v5 = vrot.slane %v5606_v63, %v17100_v16  ;;  %2566 = vst.msk [vmem:[#allocation4 + $0x258] sm:$0xff] %vm2550_vm9, %v2533_v33  ;;  %v11062_v49 = vshrl.u32 %v15827_v44, 16  ;;  %v8565_v37 = vcombine.high %v15701_v58, %v15701_v58 }
 0x2f3   : > { %v11065_v1 = vshll.u32 %v15827_v44, 16  ;;  %4446 = vst.msk [vmem:[#allocation4 + $0x258] sm:$0xff] %vm4430_vm10, %v4413_v60  ;;  %v11050_v28 = vrot.slane %v11048_v2, 6  ;;  %v11053_v55 = vrot.slane %v11051_v14, 7  ;;  %v11071_v46 = vshll.u32 %v10214_v45, 16 }
 0x2f4   : > { %v11076_v17 = vshrl.u32 %v15828_v18, 16  ;;  %v5621_v6 = vcombine.low %v5613_v24, %v5620_v5  ;;  %v11059_v51 = vrot.slane %v11057_v48, 7  ;;  %v11064_v50 = vrot.slane %v11062_v49, 6 }
 0x2f5   : > { %v11067_v62 = vrot.slane %v11065_v1, 7  ;;  %v11054_v32 = vor.u32 %v11053_v55, %v11050_v28  ;;  %v11073_v34 = vrot.slane %v11071_v46, 7  ;;  %v11079_v59 = vshll.u32 %v15828_v18, 16  ;;  %v11432_v1 = vpop.permute.xlu0 %11431 }
 0x2f6   : > { %v11078_v47 = vrot.slane %v11076_v17, 6  ;;  %5653 = vst.msk [vmem:[#allocation4 + $0x260] sm:$0xff] %vm2550_vm9, %v5621_v6  ;;  %v11085_v56 = vshll.u32 %v10222_v7, 16  ;;  %v15765_v13 = vrot.slane %v15701_v58, 9  ;;  %v8836_v3 = vrot.slane %v8565_v37, 7  ;;  %v12765_v7 = vld [vmem:[#allocation4 + $0x230] sm:$0xff] }
 0x2f7   : > { %v11068_v12 = vor.u32 %v11067_v62, %v11064_v50  ;;  %v16885_v38 = vld.sshfl [vmem:[#allocation2 + $0x10] sm:$0xf pattern:$0x76325410]  ;;  %6117 = vst.msk [vmem:[#allocation4 + $0x260] sm:$0xff] %vm4430_vm10, %v6085_v26  ;;  %v11055_v52 = vrot.slane %v11054_v32, 2  ;;  %v9100_v30 = vrot.slane %v9092_v40, %v17100_v16 }
 0x2f8   : > { %v15829_v39 = vld.sshfl [vmem:[#allocation2 + $0x164] sm:$0x13 pattern:$0x76325410]  ;;  %v11081_v36 = vrot.slane %v11079_v59, 7  ;;  %v11087_v25 = vrot.slane %v11085_v56, 7  ;;  %v8837_v63 = vsel %vm18007_vm8, %v15765_v13, %v8836_v3  ;;  %v9335_v49 = vcombine.low %v19022_v61, %v16885_v38 }
 0x2f9   : > { %v10230_v27 = vcombine.high %v15829_v39, %v15829_v39  ;;  %v11069_v8 = vrot.slane %v11068_v12, 2  ;;  %v11090_v23 = vshrl.u32 %v15829_v39, 16  ;;  %v12766_v42 = vld [vmem:[#allocation4 + $0x238] sm:$0xff]  ;;  %v11060_v53 = vsel %vm17115_vm15, %v11055_v52, %v11059_v51 }
 0x2fa   : > { %v11082_v57 = vor.u32 %v11081_v36, %v11078_v47  ;;  %v11093_v31 = vshll.u32 %v15829_v39, 16  ;;  %13262 = vmatprep.mubr.bf16.mxu0 %v12766_v42  ;;  %v15579_v33 = vld.sshfl [vmem:[#allocation2 + $0x8] sm:$0x13 pattern:$0x76325410]  ;;  %v9093_v29 = vcombine.low %v18986_v22, %v8837_v63  ;;  %9607 = vst.msk [vmem:[#allocation4 + $0x18] sm:$0xff] %vm2550_vm9, %v9335_v49 }
 0x2fb   : > { %v11074_v44 = vsel %vm17115_vm15, %v11069_v8, %v11073_v34  ;;  %v11092_v15 = vrot.slane %v11090_v23, 6  ;;  %v11099_v41 = vshll.u32 %v10230_v27, 16  ;;  %v15580_v45 = vld.sshfl [vmem:[#allocation2 + $0xc] sm:$0x13 pattern:$0x76325410]  ;;  %v6261_v24 = vcombine.high %v15579_v33, %v15579_v33  ;;  %13263 = vmatmul.mubr.bf16.gmra.mrb[56].mxu0 %v12765_v7 }
 0x2fc   : > { %v11083_v21 = vrot.slane %v11082_v57, 2  ;;  %v11095_v4 = vrot.slane %v11093_v31, 7  ;;  %v11397_v43 = vcombine.low %v11060_v53, %v11074_v44  ;;  %v15581_v5 = vld.sshfl [vmem:[#allocation2 + $0x10] sm:$0x13 pattern:$0x76325410]  ;;  %v6269_v60 = vcombine.high %v15580_v45, %v15580_v45 }
 0x2fd   : > { %v11101_v18 = vrot.slane %v11099_v41, 7  ;;  %v9107_v48 = vrot.slane %v9093_v29, %v17100_v16  ;;  %v6277_v20 = vcombine.high %v15581_v5, %v15581_v5  ;;  %v6773_v28 = vshrl.u32 %v15579_v33, 16  ;;  %v15578_v6 = vld.sshfl [vmem:[#allocation2 + $0x4] sm:$0x13 pattern:$0x76325410] }
 0x2fe   : > { %v11088_v2 = vsel %vm17115_vm15, %v11083_v21, %v11087_v25  ;;  %v11096_v14 = vor.u32 %v11095_v4, %v11092_v15  ;;  %v11405_v58 = vrot.slane %v11397_v43, %v17100_v16  ;;  %v6776_v55 = vshll.u32 %v15579_v33, 16  ;;  %11479 = vst.msk [vmem:[#allocation4 + $0x18] sm:$0xff] %vm4430_vm10, %v11432_v1  ;;  %v556_v25 = vld [vmem:[#allocation2 + $0x17c] sm:$0x1]  ;;  %v847_v23 = vld [vmem:[#allocation2 + $0x17c] sm:$0x4] }
 0x2ff   : > { %v6782_v46 = vshll.u32 %v6261_v24, 16  ;;  %v6787_v17 = vshrl.u32 %v15580_v45, 16  ;;  %v9108_v51 = vcombine.low %v9100_v30, %v9107_v48  ;;  %v6775_v50 = vrot.slane %v6773_v28, 6  ;;  %v12771_v4 = vld [vmem:[#allocation4 + $0x260] sm:$0xff] }
 0x300   : > { %v11097_v22 = vrot.slane %v11096_v14, 2  ;;  %v6790_v62 = vshll.u32 %v15580_v45, 16  ;;  %v6796_v32 = vshll.u32 %v6269_v60, 16  ;;  %v6778_v61 = vrot.slane %v6776_v55, 7  ;;  %13270 = vmatprep.mubr.bf16.mxu0 %v12771_v4 }
 0x301   : > { %v6784_v47 = vrot.slane %v6782_v46, 7  ;;  %v6789_v59 = vrot.slane %v6787_v17, 6  ;;  %9154 = vrot.lane.b32.xlu1 %v9108_v51, %s16926_s25  ;;  %v6801_v37 = vshrl.u32 %v15581_v5, 16  ;;  %v6804_v38 = vshll.u32 %v15581_v5, 16 }
 0x302   : > { %v11102_v34 = vsel %vm17115_vm15, %v11097_v22, %v11101_v18  ;;  %v6792_v12 = vrot.slane %v6790_v62, 7  ;;  %v6798_v56 = vrot.slane %v6796_v32, 7  ;;  %v6779_v13 = vor.u32 %v6778_v61, %v6775_v50  ;;  %v15830_v3 = vld.sshfl [vmem:[#allocation2 + $0x170] sm:$0x13 pattern:$0x76325410] }
 0x303   : > { %v11398_v26 = vcombine.low %v11088_v2, %v11102_v34  ;;  %v6810_v39 = vshll.u32 %v6277_v20, 16  ;;  %v6253_v52 = vcombine.high %v15578_v6, %v15578_v6  ;;  %v6803_v27 = vrot.slane %v6801_v37, 6  ;;  %v15831_v44 = vld.sshfl [vmem:[#allocation2 + $0x174] sm:$0x13 pattern:$0x76325410] }
 0x304   : > { %v6793_v40 = vor.u32 %v6792_v12, %v6789_v59  ;;  %v6759_v8 = vshrl.u32 %v15578_v6, 16  ;;  %v6780_v42 = vrot.slane %v6779_v13, 2  ;;  %v6806_v53 = vrot.slane %v6804_v38, 7 }
 0x305   : > { %v11412_v36 = vrot.slane %v11398_v26, %v17100_v16  ;;  %v6812_v57 = vrot.slane %v6810_v39, 7  ;;  %v6762_v31 = vshll.u32 %v15578_v6, 16  ;;  %v6768_v21 = vshll.u32 %v6253_v52, 16  ;;  %v12698_v14 = vld [vmem:[#allocation4 + $0x18] sm:$0xff] }
 0x306   : > { %v6794_v41 = vrot.slane %v6793_v40, 2  ;;  %v6761_v30 = vrot.slane %v6759_v8, 6  ;;  %v6785_v43 = vsel %vm17115_vm15, %v6780_v42, %v6784_v47  ;;  %v6807_v63 = vor.u32 %v6806_v53, %v6803_v27  ;;  %v15832_v29 = vld.sshfl [vmem:[#allocation2 + $0x178] sm:$0x13 pattern:$0x76325410]  ;;  %13311 = vmatprep.mubr.bf16.mxu1 %v12698_v14 }
 0x307   : > { %v11413_v15 = vcombine.low %v11405_v58, %v11412_v36  ;;  %v6764_v33 = vrot.slane %v6762_v31, 7  ;;  %v557_v18 = vsel %vm16965_vm2, 0, %v556_v25  ;;  %v6770_v24 = vrot.slane %v6768_v21, 7  ;;  %v12770_v58 = vld [vmem:[#allocation4 + $0x258] sm:$0xff]  ;;  %v9127_v31 = vpop.permute.xlu1 %9126 }
 0x308   : > { %v6799_v45 = vsel %vm17115_vm15, %v6794_v41, %v6798_v56  ;;  %558 = vst [vmem:[#allocation2 + $0x17c] sm:$0x1] %v557_v18  ;;  %v848_v7 = vsel %vm16979_vm6, 0, %v847_v23  ;;  %v10238_v2 = vcombine.high %v15830_v3, %v15830_v3  ;;  %v6808_v5 = vrot.slane %v6807_v63, 2  ;;  %13271 = vmatmul.mubr.bf16.gmra.mrb[60].mxu0 %v12770_v58 }
 0x309   : > { %11459 = vrot.lane.b32.xlu0 %v11413_v15, %s16926_s25  ;;  %v6765_v60 = vor.u32 %v6764_v33, %v6761_v30  ;;  %849 = vst [vmem:[#allocation2 + $0x17c] sm:$0x4] %v848_v7  ;;  %v10246_v0 = vcombine.high %v15831_v44, %v15831_v44  ;;  %v10254_v48 = vcombine.high %v15832_v29, %v15832_v29  ;;  %v11104_v49 = vshrl.u32 %v15830_v3, 16 }
 0x30a   : > { %v11107_v1 = vshll.u32 %v15830_v3, 16  ;;  %v11113_v20 = vshll.u32 %v10238_v2, 16  ;;  %v11118_v28 = vshrl.u32 %v15831_v44, 16  ;;  %v6813_v55 = vsel %vm17115_vm15, %v6808_v5, %v6812_v57 }
 0x30b   : > { %v15705_v22 = vld.sshfl [vmem:[#allocation2 + $0x178] sm:$0x12 pattern:$0x76325410]  ;;  %v6766_v9 = vrot.slane %v6765_v60, 2  ;;  %v11121_v46 = vshll.u32 %v15831_v44, 16  ;;  %v7655_v6 = vcombine.low %v6799_v45, %v6813_v55  ;;  %v9109_v25 = vcombine.low %v19002_v54, %v19006_v35  ;;  %v11434_v55 = vpop.permute.xlu0 %11433 }
 0x30c   : > { %v11127_v17 = vshll.u32 %v10246_v0, 16  ;;  %v11106_v51 = vrot.slane %v11104_v49, 6  ;;  %v11109_v50 = vrot.slane %v11107_v1, 7  ;;  %v11115_v62 = vrot.slane %v11113_v20, 7 }
 0x30d   : > { %v6771_v32 = vsel %vm17115_vm15, %v6766_v9, %v6770_v24  ;;  %v11120_v34 = vrot.slane %v11118_v28, 6  ;;  %v11123_v61 = vrot.slane %v11121_v46, 7  ;;  %v7669_v59 = vrot.slane %v7655_v6, %v17100_v16  ;;  %v16886_v52 = vld.sshfl [vmem:[#allocation2 + $0x20] sm:$0xf pattern:$0x76325410] }
 0x30e   : > { %v11129_v47 = vrot.slane %v11127_v17, 7  ;;  %v7654_v26 = vcombine.low %v6771_v32, %v6785_v43  ;;  %v11110_v12 = vor.u32 %v11109_v50, %v11106_v51  ;;  %v11132_v56 = vshrl.u32 %v15832_v29, 16  ;;  %v16887_v30 = vld.sshfl [vmem:[#allocation2 + $0x28] sm:$0xf pattern:$0x76325410] }
 0x30f   : > { %v11124_v37 = vor.u32 %v11123_v61, %v11120_v34  ;;  %v11135_v13 = vshll.u32 %v15832_v29, 16  ;;  %v11141_v38 = vshll.u32 %v10254_v48, 16  ;;  %v8597_v39 = vcombine.high %v15705_v22, %v15705_v22  ;;  %v15582_v29 = vld.sshfl [vmem:[#allocation2 + $0x1c] sm:$0x13 pattern:$0x76325410] }
 0x310   : > { %v7662_v36 = vrot.slane %v7654_v26, %v17100_v16  ;;  %v15833_v40 = vld.sshfl [vmem:[#allocation2 + $0x17c] sm:$0x13 pattern:$0x76325410]  ;;  %v11111_v27 = vrot.slane %v11110_v12, 2  ;;  %v11134_v8 = vrot.slane %v11132_v56, 6  ;;  %v9117_v2 = vrot.slane %v9109_v25, %v17100_v16 }
 0x311   : > { %v10262_v23 = vcombine.high %v15833_v40, %v15833_v40  ;;  %v11125_v42 = vrot.slane %v11124_v37, 2  ;;  %v11137_v53 = vrot.slane %v11135_v13, 7  ;;  %v11143_v57 = vrot.slane %v11141_v38, 7 }
 0x312   : > { %v7670_v3 = vcombine.low %v7662_v36, %v7669_v59  ;;  %v11116_v44 = vsel %vm17115_vm15, %v11111_v27, %v11115_v62  ;;  %v11146_v15 = vshrl.u32 %v15833_v40, 16  ;;  %v11149_v41 = vshll.u32 %v15833_v40, 16  ;;  %v15583_v45 = vld.sshfl [vmem:[#allocation2 + $0x20] sm:$0x13 pattern:$0x76325410] }
 0x313   : > { %v11130_v21 = vsel %vm17115_vm15, %v11125_v42, %v11129_v47  ;;  %v11138_v4 = vor.u32 %v11137_v53, %v11134_v8  ;;  %v11155_v43 = vshll.u32 %v10262_v23, 16  ;;  %v15769_v63 = vrot.slane %v15705_v22, 9  ;;  %v15584_v60 = vld.sshfl [vmem:[#allocation2 + $0x24] sm:$0x13 pattern:$0x76325410] }
 0x314   : > { %7942 = vst.msk [vmem:[#allocation4 + $0x10] sm:$0xff] %vm2550_vm9, %v7670_v3  ;;  %v11148_v54 = vrot.slane %v11146_v15, 6  ;;  %v11151_v35 = vrot.slane %v11149_v41, 7  ;;  %v11414_v33 = vcombine.low %v11116_v44, %v11130_v21  ;;  %v8852_v18 = vrot.slane %v8597_v39, 7 }
 0x315   : > { %9174 = vst.msk [vmem:[#allocation4 + $0x10] sm:$0xff] %vm4430_vm10, %v9127_v31  ;;  %v11139_v24 = vrot.slane %v11138_v4, 2  ;;  %v11157_v7 = vrot.slane %v11155_v43, 7  ;;  %v6285_v1 = vcombine.high %v15582_v29, %v15582_v29  ;;  %v6293_v20 = vcombine.high %v15583_v45, %v15583_v45 }
 0x316   : > { %v11152_v14 = vor.u32 %v11151_v35, %v11148_v54  ;;  %v11422_v58 = vrot.slane %v11414_v33, %v17100_v16  ;;  %v8853_v5 = vsel %vm18007_vm8, %v15769_v63, %v8852_v18  ;;  %v15585_v49 = vld.sshfl [vmem:[#allocation2 + $0x28] sm:$0x13 pattern:$0x76325410]  ;;  %v9352_v22 = vcombine.low %v16886_v52, %v16887_v30 }
 0x317   : > { %v11144_v0 = vsel %vm17115_vm15, %v11139_v24, %v11143_v57  ;;  %v9110_v48 = vcombine.low %v19011_v19, %v8853_v5  ;;  %v6301_v9 = vcombine.high %v15584_v60, %v15584_v60  ;;  %v6309_v46 = vcombine.high %v15585_v49, %v15585_v49  ;;  %v16888_v27 = vld.sshfl [vmem:[#allocation2 + $0x38] sm:$0xf pattern:$0x76325410] }
 0x318   : > { %v11153_v28 = vrot.slane %v11152_v14, 2  ;;  %v6815_v6 = vshrl.u32 %v15582_v29, 16  ;;  %v6818_v51 = vshll.u32 %v15582_v29, 16  ;;  %v6824_v50 = vshll.u32 %v6285_v1, 16  ;;  %9608 = vst.msk [vmem:[#allocation4 + $0x40] sm:$0xff] %vm2550_vm9, %v9352_v22 }
 0x319   : > { %v9124_v17 = vrot.slane %v9110_v48, %v17100_v16  ;;  %v6829_v32 = vshrl.u32 %v15583_v45, 16  ;;  %v6832_v19 = vshll.u32 %v15583_v45, 16  ;;  %v6838_v34 = vshll.u32 %v6293_v20, 16  ;;  %11480 = vst.msk [vmem:[#allocation4 + $0x40] sm:$0xff] %vm4430_vm10, %v11434_v55  ;;  %v11436_v48 = vpop.permute.xlu0 %11435 }
 0x31a   : > { %v11158_v62 = vsel %vm17115_vm15, %v11153_v28, %v11157_v7  ;;  %v6817_v59 = vrot.slane %v6815_v6, 6  ;;  %v6820_v26 = vrot.slane %v6818_v51, 7  ;;  %v6826_v12 = vrot.slane %v6824_v50, 7 }
 0x31b   : > { %v11415_v61 = vcombine.low %v11144_v0, %v11158_v62  ;;  %v9125_v47 = vcombine.low %v9117_v2, %v9124_v17  ;;  %v6831_v56 = vrot.slane %v6829_v32, 6  ;;  %v6834_v37 = vrot.slane %v6832_v19, 7  ;;  %v16889_v53 = vld.sshfl [vmem:[#allocation2 + $0x40] sm:$0xf pattern:$0x76325410] }
 0x31c   : > { %v6840_v13 = vrot.slane %v6838_v34, 7  ;;  %v12697_v38 = vld [vmem:[#allocation4 + $0x10] sm:$0xff]  ;;  %v6821_v52 = vor.u32 %v6820_v26, %v6817_v59  ;;  %v6843_v36 = vshrl.u32 %v15584_v60, 16  ;;  %v6846_v40 = vshll.u32 %v15584_v60, 16 }
 0x31d   : > { %v11429_v39 = vrot.slane %v11415_v61, %v17100_v16  ;;  %9156 = vrot.lane.b32.xlu1 %v9125_v47, %s16926_s25  ;;  %13312 = vmatmul.mubr.bf16.vlgmr.msra.gmra.mrb[0].mxu1 %v12697_v38  ;;  %v6835_v8 = vor.u32 %v6834_v37, %v6831_v56  ;;  %v6852_v25 = vshll.u32 %v6301_v9, 16  ;;  %v6857_v23 = vshrl.u32 %v15585_v49, 16  ;;  %v15586_v15 = vld.sshfl [vmem:[#allocation2 + $0x34] sm:$0x13 pattern:$0x76325410] }
 0x31e   : > { %v6860_v42 = vshll.u32 %v15585_v49, 16  ;;  %v6822_v31 = vrot.slane %v6821_v52, 2  ;;  %v6845_v3 = vrot.slane %v6843_v36, 6  ;;  %v6848_v44 = vrot.slane %v6846_v40, 7 }
 0x31f   : > { %v11430_v57 = vcombine.low %v11422_v58, %v11429_v39  ;;  %v6836_v41 = vrot.slane %v6835_v8, 2  ;;  %v6854_v30 = vrot.slane %v6852_v25, 7  ;;  %v6859_v21 = vrot.slane %v6857_v23, 6 }
 0x320   : > { %v6862_v4 = vrot.slane %v6860_v42, 7  ;;  %v6827_v43 = vsel %vm17115_vm15, %v6822_v31, %v6826_v12  ;;  %v6849_v63 = vor.u32 %v6848_v44, %v6845_v3  ;;  %v6866_v54 = vshll.u32 %v6309_v46, 16  ;;  %v15587_v35 = vld.sshfl [vmem:[#allocation2 + $0x38] sm:$0x13 pattern:$0x76325410] }
 0x321   : > { %11461 = vrot.lane.b32.xlu0 %v11430_v57, %s16926_s25  ;;  %v6841_v33 = vsel %vm17115_vm15, %v6836_v41, %v6840_v13  ;;  %v15588_v29 = vld.sshfl [vmem:[#allocation2 + $0x3c] sm:$0x13 pattern:$0x76325410]  ;;  %v6317_v45 = vcombine.high %v15586_v15, %v15586_v15  ;;  %v12703_v24 = vld [vmem:[#allocation4 + $0x40] sm:$0xff]  ;;  %v6325_v5 = vcombine.high %v15587_v35, %v15587_v35  ;;  %v9369_v0 = vcombine.low %v16888_v27, %v16889_v53  ;;  %v9129_v27 = vpop.permute.xlu1 %9128 }
 0x322   : > { %v6863_v18 = vor.u32 %v6862_v4, %v6859_v21  ;;  %v6850_v7 = vrot.slane %v6849_v63, 2  ;;  %v6868_v2 = vrot.slane %v6866_v54, 7  ;;  %v7671_v14 = vcombine.low %v6827_v43, %v6841_v33  ;;  %v15589_v58 = vld.sshfl [vmem:[#allocation2 + $0x40] sm:$0x13 pattern:$0x76325410]  ;;  %13319 = vmatprep.mubr.bf16.mxu1 %v12703_v24  ;;  %v11438_v24 = vpop.permute.xlu0 %11437 }
 0x323   : > { %v6333_v49 = vcombine.high %v15588_v29, %v15588_v29  ;;  %v6341_v1 = vcombine.high %v15589_v58, %v15589_v58  ;;  %v6871_v22 = vshrl.u32 %v15586_v15, 16  ;;  %v6874_v55 = vshll.u32 %v15586_v15, 16  ;;  %9609 = vst.msk [vmem:[#allocation4 + $0x68] sm:$0xff] %vm2550_vm9, %v9369_v0 }
 0x324   : > { %v6864_v60 = vrot.slane %v6863_v18, 2  ;;  %v6855_v20 = vsel %vm17115_vm15, %v6850_v7, %v6854_v30  ;;  %v7679_v28 = vrot.slane %v7671_v14, %v17100_v16  ;;  %v6880_v46 = vshll.u32 %v6317_v45, 16  ;;  %11481 = vst.msk [vmem:[#allocation4 + $0x68] sm:$0xff] %vm4430_vm10, %v11436_v48 }
 0x325   : > { %v6885_v17 = vshrl.u32 %v15587_v35, 16  ;;  %v6888_v6 = vshll.u32 %v15587_v35, 16  ;;  %v6873_v50 = vrot.slane %v6871_v22, 6  ;;  %v6876_v62 = vrot.slane %v6874_v55, 7 }
 0x326   : > { %v6869_v9 = vsel %vm17115_vm15, %v6864_v60, %v6868_v2  ;;  %v6894_v32 = vshll.u32 %v6325_v5, 16  ;;  %v6882_v19 = vrot.slane %v6880_v46, 7  ;;  %v6899_v47 = vshrl.u32 %v15588_v29, 16 }
 0x327   : > { %v7672_v51 = vcombine.low %v6855_v20, %v6869_v9  ;;  %v6887_v34 = vrot.slane %v6885_v17, 6  ;;  %v6890_v61 = vrot.slane %v6888_v6, 7  ;;  %v6877_v26 = vor.u32 %v6876_v62, %v6873_v50  ;;  %v16890_v37 = vld.sshfl [vmem:[#allocation2 + $0x50] sm:$0xf pattern:$0x76325410] }
 0x328   : > { %v6896_v12 = vrot.slane %v6894_v32, 7  ;;  %v6902_v56 = vshll.u32 %v15588_v29, 16  ;;  %v6901_v38 = vrot.slane %v6899_v47, 6  ;;  %v6908_v39 = vshll.u32 %v6333_v49, 16 }
 0x329   : > { %v7686_v59 = vrot.slane %v7672_v51, %v17100_v16  ;;  %v6891_v13 = vor.u32 %v6890_v61, %v6887_v34  ;;  %v6913_v52 = vshrl.u32 %v15589_v58, 16  ;;  %v16891_v36 = vld.sshfl [vmem:[#allocation2 + $0x58] sm:$0xf pattern:$0x76325410]  ;;  %v6878_v8 = vrot.slane %v6877_v26, 2 }
 0x32a   : > { %v6904_v25 = vrot.slane %v6902_v56, 7  ;;  %v6916_v23 = vshll.u32 %v15589_v58, 16  ;;  %v15590_v42 = vld.sshfl [vmem:[#allocation2 + $0x4c] sm:$0x13 pattern:$0x76325410]  ;;  %v9386_v45 = vcombine.low %v16890_v37, %v16891_v36 }
 0x32b   : > { %v7687_v40 = vcombine.low %v7679_v28, %v7686_v59  ;;  %v6892_v53 = vrot.slane %v6891_v13, 2  ;;  %v6910_v57 = vrot.slane %v6908_v39, 7  ;;  %v6915_v31 = vrot.slane %v6913_v52, 6  ;;  %v12708_v50 = vld [vmem:[#allocation4 + $0x68] sm:$0xff] }
 0x32c   : > { %v6922_v3 = vshll.u32 %v6341_v1, 16  ;;  %v6883_v44 = vsel %vm17115_vm15, %v6878_v8, %v6882_v19  ;;  %v6905_v15 = vor.u32 %v6904_v25, %v6901_v38  ;;  %v6918_v41 = vrot.slane %v6916_v23, 7  ;;  %v15591_v30 = vld.sshfl [vmem:[#allocation2 + $0x50] sm:$0x13 pattern:$0x76325410] }
 0x32d   : > { %7943 = vst.msk [vmem:[#allocation4 + $0x38] sm:$0xff] %vm2550_vm9, %v7687_v40  ;;  %v6897_v21 = vsel %vm17115_vm15, %v6892_v53, %v6896_v12  ;;  %v15592_v43 = vld.sshfl [vmem:[#allocation2 + $0x54] sm:$0x13 pattern:$0x76325410]  ;;  %v6349_v63 = vcombine.high %v15590_v42, %v15590_v42  ;;  %v6357_v29 = vcombine.high %v15591_v30, %v15591_v30  ;;  %v6927_v14 = vshrl.u32 %v15590_v42, 16 }
 0x32e   : > { %9175 = vst.msk [vmem:[#allocation4 + $0x38] sm:$0xff] %vm4430_vm10, %v9129_v27  ;;  %v6924_v4 = vrot.slane %v6922_v3, 7  ;;  %v6906_v54 = vrot.slane %v6905_v15, 2  ;;  %v6919_v35 = vor.u32 %v6918_v41, %v6915_v31  ;;  %v7688_v33 = vcombine.low %v6883_v44, %v6897_v21  ;;  %v9131_v27 = vpop.permute.xlu1 %9130 }
 0x32f   : > { %v15593_v18 = vld.sshfl [vmem:[#allocation2 + $0x58] sm:$0x13 pattern:$0x76325410]  ;;  %v6365_v7 = vcombine.high %v15592_v43, %v15592_v43  ;;  %v6930_v0 = vshll.u32 %v15590_v42, 16  ;;  %9610 = vst.msk [vmem:[#allocation4 + $0x90] sm:$0xff] %vm2550_vm9, %v9386_v45 }
 0x330   : > { %v6373_v2 = vcombine.high %v15593_v18, %v15593_v18  ;;  %v6911_v58 = vsel %vm17115_vm15, %v6906_v54, %v6910_v57  ;;  %v6920_v5 = vrot.slane %v6919_v35, 2  ;;  %v7696_v60 = vrot.slane %v7688_v33, %v17100_v16  ;;  %11482 = vst.msk [vmem:[#allocation4 + $0x90] sm:$0xff] %vm4430_vm10, %v11438_v24  ;;  %v16892_v56 = vld.sshfl [vmem:[#allocation2 + $0x68] sm:$0xf pattern:$0x76325410]  ;;  %v11440_v35 = vpop.permute.xlu0 %11439 }
 0x331   : > { %v6929_v48 = vrot.slane %v6927_v14, 6  ;;  %v6936_v49 = vshll.u32 %v6349_v63, 16  ;;  %v6941_v1 = vshrl.u32 %v15591_v30, 16  ;;  %v6944_v20 = vshll.u32 %v15591_v30, 16 }
 0x332   : > { %v6925_v28 = vsel %vm17115_vm15, %v6920_v5, %v6924_v4  ;;  %v6932_v22 = vrot.slane %v6930_v0, 7  ;;  %v6950_v55 = vshll.u32 %v6357_v29, 16  ;;  %v6955_v9 = vshrl.u32 %v15592_v43, 16 }
 0x333   : > { %v7689_v46 = vcombine.low %v6911_v58, %v6925_v28  ;;  %v6938_v17 = vrot.slane %v6936_v49, 7  ;;  %v6943_v6 = vrot.slane %v6941_v1, 6  ;;  %v6946_v51 = vrot.slane %v6944_v20, 7 }
 0x334   : > { %v6933_v32 = vor.u32 %v6932_v22, %v6929_v48  ;;  %v6952_v19 = vrot.slane %v6950_v55, 7  ;;  %v6957_v34 = vrot.slane %v6955_v9, 6  ;;  %v6958_v61 = vshll.u32 %v15592_v43, 16 }
 0x335   : > { %v12702_v62 = vld [vmem:[#allocation4 + $0x38] sm:$0xff]  ;;  %v7703_v47 = vrot.slane %v7689_v46, %v17100_v16  ;;  %v6947_v59 = vor.u32 %v6946_v51, %v6943_v6  ;;  %v6964_v26 = vshll.u32 %v6365_v7, 16  ;;  %v6969_v12 = vshrl.u32 %v15593_v18, 16 }
 0x336   : > { %13320 = vmatmul.mubr.bf16.gmra.mrb[4].mxu1 %v12702_v62  ;;  %v16893_v37 = vld.sshfl [vmem:[#allocation2 + $0x70] sm:$0xf pattern:$0x76325410]  ;;  %v6934_v13 = vrot.slane %v6933_v32, 2  ;;  %v6960_v38 = vrot.slane %v6958_v61, 7 }
 0x337   : > { %v6972_v39 = vshll.u32 %v15593_v18, 16  ;;  %v6978_v52 = vshll.u32 %v6373_v2, 16  ;;  %13327 = vmatprep.mubr.bf16.mxu1 %v12708_v50  ;;  %v15594_v36 = vld.sshfl [vmem:[#allocation2 + $0x64] sm:$0x13 pattern:$0x76325410]  ;;  %v7704_v40 = vcombine.low %v7696_v60, %v7703_v47  ;;  %v9403_v54 = vcombine.low %v16892_v56, %v16893_v37 }
 0x338   : > { %v6948_v8 = vrot.slane %v6947_v59, 2  ;;  %v6966_v25 = vrot.slane %v6964_v26, 7  ;;  %v6971_v23 = vrot.slane %v6969_v12, 6  ;;  %v6939_v42 = vsel %vm17115_vm15, %v6934_v13, %v6938_v17  ;;  %v12713_v62 = vld [vmem:[#allocation4 + $0x90] sm:$0xff] }
 0x339   : > { %v6961_v53 = vor.u32 %v6960_v38, %v6957_v34  ;;  %v6974_v57 = vrot.slane %v6972_v39, 7  ;;  %v6980_v31 = vrot.slane %v6978_v52, 7  ;;  %v15595_v3 = vld.sshfl [vmem:[#allocation2 + $0x68] sm:$0x13 pattern:$0x76325410]  ;;  %v6381_v41 = vcombine.high %v15594_v36, %v15594_v36  ;;  %v9133_v38 = vpop.permute.xlu1 %9132 }
 0x33a   : > { %7944 = vst.msk [vmem:[#allocation4 + $0x60] sm:$0xff] %vm2550_vm9, %v7704_v40  ;;  %v6953_v44 = vsel %vm17115_vm15, %v6948_v8, %v6952_v19  ;;  %v15596_v15 = vld.sshfl [vmem:[#allocation2 + $0x6c] sm:$0x13 pattern:$0x76325410]  ;;  %v6389_v63 = vcombine.high %v15595_v3, %v15595_v3  ;;  %v6983_v29 = vshrl.u32 %v15594_v36, 16 }
 0x33b   : > { %9176 = vst.msk [vmem:[#allocation4 + $0x60] sm:$0xff] %vm4430_vm10, %v9131_v27  ;;  %v6962_v30 = vrot.slane %v6961_v53, 2  ;;  %v6975_v21 = vor.u32 %v6974_v57, %v6971_v23  ;;  %v7705_v4 = vcombine.low %v6939_v42, %v6953_v44  ;;  %v15597_v43 = vld.sshfl [vmem:[#allocation2 + $0x70] sm:$0x13 pattern:$0x76325410]  ;;  %v6397_v33 = vcombine.high %v15596_v15, %v15596_v15 }
 0x33c   : > { %v6405_v18 = vcombine.high %v15597_v43, %v15597_v43  ;;  %v6986_v2 = vshll.u32 %v15594_v36, 16  ;;  %9611 = vst.msk [vmem:[#allocation4 + $0xb8] sm:$0xff] %vm2550_vm9, %v9403_v54  ;;  %v6985_v14 = vrot.slane %v6983_v29, 6  ;;  %v6992_v58 = vshll.u32 %v6381_v41, 16 }
 0x33d   : > { %v6967_v45 = vsel %vm17115_vm15, %v6962_v30, %v6966_v25  ;;  %v6976_v24 = vrot.slane %v6975_v21, 2  ;;  %v7713_v7 = vrot.slane %v7705_v4, %v17100_v16  ;;  %v6997_v5 = vshrl.u32 %v15595_v3, 16  ;;  %11483 = vst.msk [vmem:[#allocation4 + $0xb8] sm:$0xff] %vm4430_vm10, %v11440_v35  ;;  %v11442_v21 = vpop.permute.xlu0 %11441 }
 0x33e   : > { %v7000_v60 = vshll.u32 %v15595_v3, 16  ;;  %v6988_v48 = vrot.slane %v6986_v2, 7  ;;  %v7006_v49 = vshll.u32 %v6389_v63, 16  ;;  %v7011_v1 = vshrl.u32 %v15596_v15, 16 }
 0x33f   : > { %v6981_v0 = vsel %vm17115_vm15, %v6976_v24, %v6980_v31  ;;  %v6994_v28 = vrot.slane %v6992_v58, 7  ;;  %v6999_v22 = vrot.slane %v6997_v5, 6  ;;  %v16894_v9 = vld.sshfl [vmem:[#allocation2 + $0x80] sm:$0xf pattern:$0x76325410] }
 0x340   : > { %v7706_v20 = vcombine.low %v6967_v45, %v6981_v0  ;;  %v7002_v55 = vrot.slane %v7000_v60, 7  ;;  %v16895_v46 = vld.sshfl [vmem:[#allocation2 + $0x88] sm:$0xf pattern:$0x76325410]  ;;  %v6989_v17 = vor.u32 %v6988_v48, %v6985_v14  ;;  %v7008_v6 = vrot.slane %v7006_v49, 7 }
 0x341   : > { %v7013_v51 = vrot.slane %v7011_v1, 6  ;;  %v7014_v50 = vshll.u32 %v15596_v15, 16  ;;  %v7020_v61 = vshll.u32 %v6397_v33, 16  ;;  %v7025_v47 = vshrl.u32 %v15597_v43, 16 }
 0x342   : > { %v7720_v32 = vrot.slane %v7706_v20, %v17100_v16  ;;  %v12707_v19 = vld [vmem:[#allocation4 + $0x60] sm:$0xff]  ;;  %v7003_v34 = vor.u32 %v7002_v55, %v6999_v22  ;;  %v6990_v59 = vrot.slane %v6989_v17, 2  ;;  %v7028_v12 = vshll.u32 %v15597_v43, 16 }
 0x343   : > { %13328 = vmatmul.mubr.bf16.gmra.mrb[8].mxu1 %v12707_v19  ;;  %v7016_v26 = vrot.slane %v7014_v50, 7  ;;  %v7034_v56 = vshll.u32 %v6405_v18, 16  ;;  %v15598_v37 = vld.sshfl [vmem:[#allocation2 + $0x7c] sm:$0x13 pattern:$0x76325410]  ;;  %v9420_v30 = vcombine.low %v16894_v9, %v16895_v46 }
 0x344   : > { %v7721_v13 = vcombine.low %v7713_v7, %v7720_v32  ;;  %v7004_v39 = vrot.slane %v7003_v34, 2  ;;  %v7022_v52 = vrot.slane %v7020_v61, 7  ;;  %v7027_v36 = vrot.slane %v7025_v47, 6  ;;  %13335 = vmatprep.mubr.bf16.mxu1 %v12713_v62  ;;  %v12718_v46 = vld [vmem:[#allocation4 + $0xb8] sm:$0xff] }
 0x345   : > { %v6995_v40 = vsel %vm17115_vm15, %v6990_v59, %v6994_v28  ;;  %v7017_v27 = vor.u32 %v7016_v26, %v7013_v51  ;;  %v7030_v8 = vrot.slane %v7028_v12, 7  ;;  %v7036_v25 = vrot.slane %v7034_v56, 7  ;;  %v15599_v23 = vld.sshfl [vmem:[#allocation2 + $0x80] sm:$0x13 pattern:$0x76325410]  ;;  %v9135_v26 = vpop.permute.xlu1 %9134 }
 0x346   : > { %7945 = vst.msk [vmem:[#allocation4 + $0x88] sm:$0xff] %vm2550_vm9, %v7721_v13  ;;  %v7009_v42 = vsel %vm17115_vm15, %v7004_v39, %v7008_v6  ;;  %v15600_v53 = vld.sshfl [vmem:[#allocation2 + $0x84] sm:$0x13 pattern:$0x76325410]  ;;  %v6413_v57 = vcombine.high %v15598_v37, %v15598_v37  ;;  %v6421_v41 = vcombine.high %v15599_v23, %v15599_v23  ;;  %v7039_v63 = vshrl.u32 %v15598_v37, 16 }
 0x347   : > { %9177 = vst.msk [vmem:[#allocation4 + $0x88] sm:$0xff] %vm4430_vm10, %v9133_v38  ;;  %v7018_v31 = vrot.slane %v7017_v27, 2  ;;  %v7031_v3 = vor.u32 %v7030_v8, %v7027_v36  ;;  %v7722_v44 = vcombine.low %v6995_v40, %v7009_v42  ;;  %v15601_v15 = vld.sshfl [vmem:[#allocation2 + $0x88] sm:$0x13 pattern:$0x76325410]  ;;  %v6429_v4 = vcombine.high %v15600_v53, %v15600_v53 }
 0x348   : > { %v6437_v43 = vcombine.high %v15601_v15, %v15601_v15  ;;  %v7042_v18 = vshll.u32 %v15598_v37, 16  ;;  %9612 = vst.msk [vmem:[#allocation4 + $0xe0] sm:$0xff] %vm2550_vm9, %v9420_v30  ;;  %v7041_v29 = vrot.slane %v7039_v63, 6  ;;  %v7048_v45 = vshll.u32 %v6413_v57, 16 }
 0x349   : > { %v7023_v54 = vsel %vm17115_vm15, %v7018_v31, %v7022_v52  ;;  %v7032_v35 = vrot.slane %v7031_v3, 2  ;;  %v7730_v33 = vrot.slane %v7722_v44, %v17100_v16  ;;  %v7053_v24 = vshrl.u32 %v15599_v23, 16  ;;  %11484 = vst.msk [vmem:[#allocation4 + $0xe0] sm:$0xff] %vm4430_vm10, %v11442_v21  ;;  %v11444_v3 = vpop.permute.xlu0 %11443 }
 0x34a   : > { %v7056_v7 = vshll.u32 %v15599_v23, 16  ;;  %v7044_v14 = vrot.slane %v7042_v18, 7  ;;  %v7062_v58 = vshll.u32 %v6421_v41, 16  ;;  %v7067_v5 = vshrl.u32 %v15600_v53, 16 }
 0x34b   : > { %v7037_v2 = vsel %vm17115_vm15, %v7032_v35, %v7036_v25  ;;  %v7050_v0 = vrot.slane %v7048_v45, 7  ;;  %v7055_v48 = vrot.slane %v7053_v24, 6  ;;  %v16896_v1 = vld.sshfl [vmem:[#allocation2 + $0x98] sm:$0xf pattern:$0x76325410] }
 0x34c   : > { %v7723_v60 = vcombine.low %v7023_v54, %v7037_v2  ;;  %v7058_v49 = vrot.slane %v7056_v7, 7  ;;  %v16897_v20 = vld.sshfl [vmem:[#allocation2 + $0xa0] sm:$0xf pattern:$0x76325410]  ;;  %v7045_v28 = vor.u32 %v7044_v14, %v7041_v29  ;;  %v7064_v22 = vrot.slane %v7062_v58, 7 }
 0x34d   : > { %v7069_v55 = vrot.slane %v7067_v5, 6  ;;  %v7070_v9 = vshll.u32 %v15600_v53, 16  ;;  %v7076_v50 = vshll.u32 %v6429_v4, 16  ;;  %v7081_v62 = vshrl.u32 %v15601_v15, 16 }
 0x34e   : > { %v7737_v17 = vrot.slane %v7723_v60, %v17100_v16  ;;  %v12712_v6 = vld [vmem:[#allocation4 + $0x88] sm:$0xff]  ;;  %v7059_v51 = vor.u32 %v7058_v49, %v7055_v48  ;;  %v7046_v32 = vrot.slane %v7045_v28, 2  ;;  %v7084_v34 = vshll.u32 %v15601_v15, 16 }
 0x34f   : > { %13336 = vmatmul.mubr.bf16.gmra.mrb[12].mxu1 %v12712_v6  ;;  %v7072_v19 = vrot.slane %v7070_v9, 7  ;;  %v7090_v61 = vshll.u32 %v6437_v43, 16  ;;  %v15602_v47 = vld.sshfl [vmem:[#allocation2 + $0x94] sm:$0x13 pattern:$0x76325410]  ;;  %v9437_v31 = vcombine.low %v16896_v1, %v16897_v20 }
 0x350   : > { %v7738_v59 = vcombine.low %v7730_v33, %v7737_v17  ;;  %v7060_v12 = vrot.slane %v7059_v51, 2  ;;  %v7078_v56 = vrot.slane %v7076_v50, 7  ;;  %v7083_v37 = vrot.slane %v7081_v62, 6  ;;  %13343 = vmatprep.mubr.bf16.mxu1 %v12718_v46  ;;  %v12723_v20 = vld [vmem:[#allocation4 + $0xe0] sm:$0xff] }
 0x351   : > { %v7051_v13 = vsel %vm17115_vm15, %v7046_v32, %v7050_v0  ;;  %v7073_v38 = vor.u32 %v7072_v19, %v7069_v55  ;;  %v7086_v39 = vrot.slane %v7084_v34, 7  ;;  %v7092_v52 = vrot.slane %v7090_v61, 7  ;;  %v15603_v36 = vld.sshfl [vmem:[#allocation2 + $0x98] sm:$0x13 pattern:$0x76325410]  ;;  %v9137_v19 = vpop.permute.xlu1 %9136 }
 0x352   : > { %7946 = vst.msk [vmem:[#allocation4 + $0xb0] sm:$0xff] %vm2550_vm9, %v7738_v59  ;;  %v7065_v40 = vsel %vm17115_vm15, %v7060_v12, %v7064_v22  ;;  %v15604_v27 = vld.sshfl [vmem:[#allocation2 + $0x9c] sm:$0x13 pattern:$0x76325410]  ;;  %v6445_v8 = vcombine.high %v15602_v47, %v15602_v47  ;;  %v6453_v57 = vcombine.high %v15603_v36, %v15603_v36  ;;  %v7095_v41 = vshrl.u32 %v15602_v47, 16 }
 0x353   : > { %9178 = vst.msk [vmem:[#allocation4 + $0xb0] sm:$0xff] %vm4430_vm10, %v9135_v26  ;;  %v7074_v25 = vrot.slane %v7073_v38, 2  ;;  %v7087_v23 = vor.u32 %v7086_v39, %v7083_v37  ;;  %v7739_v42 = vcombine.low %v7051_v13, %v7065_v40  ;;  %v15605_v53 = vld.sshfl [vmem:[#allocation2 + $0xa0] sm:$0x13 pattern:$0x76325410]  ;;  %v6461_v44 = vcombine.high %v15604_v27, %v15604_v27 }
 0x354   : > { %v6469_v15 = vcombine.high %v15605_v53, %v15605_v53  ;;  %v7098_v43 = vshll.u32 %v15602_v47, 16  ;;  %9613 = vst.msk [vmem:[#allocation4 + $0x108] sm:$0xff] %vm2550_vm9, %v9437_v31  ;;  %v7097_v63 = vrot.slane %v7095_v41, 6  ;;  %v7104_v54 = vshll.u32 %v6445_v8, 16 }
 0x355   : > { %v7079_v30 = vsel %vm17115_vm15, %v7074_v25, %v7078_v56  ;;  %v7088_v21 = vrot.slane %v7087_v23, 2  ;;  %v7747_v4 = vrot.slane %v7739_v42, %v17100_v16  ;;  %v7109_v35 = vshrl.u32 %v15603_v36, 16  ;;  %11485 = vst.msk [vmem:[#allocation4 + $0x108] sm:$0xff] %vm4430_vm10, %v11444_v3  ;;  %v11446_v23 = vpop.permute.xlu0 %11445 }
 0x356   : > { %v7112_v33 = vshll.u32 %v15603_v36, 16  ;;  %v7100_v29 = vrot.slane %v7098_v43, 7  ;;  %v7118_v45 = vshll.u32 %v6453_v57, 16  ;;  %v7123_v24 = vshrl.u32 %v15604_v27, 16 }
 0x357   : > { %v7093_v18 = vsel %vm17115_vm15, %v7088_v21, %v7092_v52  ;;  %v7106_v2 = vrot.slane %v7104_v54, 7  ;;  %v7111_v14 = vrot.slane %v7109_v35, 6  ;;  %v16898_v5 = vld.sshfl [vmem:[#allocation2 + $0xb0] sm:$0xf pattern:$0x76325410] }
 0x358   : > { %v7740_v7 = vcombine.low %v7079_v30, %v7093_v18  ;;  %v7114_v58 = vrot.slane %v7112_v33, 7  ;;  %v16899_v60 = vld.sshfl [vmem:[#allocation2 + $0xb8] sm:$0xf pattern:$0x76325410]  ;;  %v7101_v0 = vor.u32 %v7100_v29, %v7097_v63  ;;  %v7120_v48 = vrot.slane %v7118_v45, 7 }
 0x359   : > { %v7125_v49 = vrot.slane %v7123_v24, 6  ;;  %v7126_v1 = vshll.u32 %v15604_v27, 16  ;;  %v7132_v9 = vshll.u32 %v6461_v44, 16  ;;  %v7137_v46 = vshrl.u32 %v15605_v53, 16 }
 0x35a   : > { %v7754_v28 = vrot.slane %v7740_v7, %v17100_v16  ;;  %v12717_v22 = vld [vmem:[#allocation4 + $0xb0] sm:$0xff]  ;;  %v7115_v55 = vor.u32 %v7114_v58, %v7111_v14  ;;  %v7102_v17 = vrot.slane %v7101_v0, 2  ;;  %v7140_v51 = vshll.u32 %v15605_v53, 16 }
 0x35b   : > { %13344 = vmatmul.mubr.bf16.gmra.mrb[16].mxu1 %v12717_v22  ;;  %v7128_v6 = vrot.slane %v7126_v1, 7  ;;  %v7146_v50 = vshll.u32 %v6469_v15, 16  ;;  %v15606_v62 = vld.sshfl [vmem:[#allocation2 + $0xac] sm:$0x13 pattern:$0x76325410]  ;;  %v9454_v25 = vcombine.low %v16898_v5, %v16899_v60 }
 0x35c   : > { %v7755_v32 = vcombine.low %v7747_v4, %v7754_v28  ;;  %v7116_v34 = vrot.slane %v7115_v55, 2  ;;  %v7134_v61 = vrot.slane %v7132_v9, 7  ;;  %v7139_v47 = vrot.slane %v7137_v46, 6  ;;  %13351 = vmatprep.mubr.bf16.mxu1 %v12723_v20  ;;  %v12728_v60 = vld [vmem:[#allocation4 + $0x108] sm:$0xff] }
 0x35d   : > { %v7107_v59 = vsel %vm17115_vm15, %v7102_v17, %v7106_v2  ;;  %v7129_v26 = vor.u32 %v7128_v6, %v7125_v49  ;;  %v7142_v12 = vrot.slane %v7140_v51, 7  ;;  %v7148_v56 = vrot.slane %v7146_v50, 7  ;;  %v15607_v37 = vld.sshfl [vmem:[#allocation2 + $0xb0] sm:$0x13 pattern:$0x76325410]  ;;  %v9139_v6 = vpop.permute.xlu1 %9138 }
 0x35e   : > { %7947 = vst.msk [vmem:[#allocation4 + $0xd8] sm:$0xff] %vm2550_vm9, %v7755_v32  ;;  %v7121_v13 = vsel %vm17115_vm15, %v7116_v34, %v7120_v48  ;;  %v15608_v38 = vld.sshfl [vmem:[#allocation2 + $0xb4] sm:$0x13 pattern:$0x76325410]  ;;  %v6477_v39 = vcombine.high %v15606_v62, %v15606_v62  ;;  %v6485_v8 = vcombine.high %v15607_v37, %v15607_v37  ;;  %v7151_v57 = vshrl.u32 %v15606_v62, 16 }
 0x35f   : > { %9179 = vst.msk [vmem:[#allocation4 + $0xd8] sm:$0xff] %vm4430_vm10, %v9137_v19  ;;  %v7130_v52 = vrot.slane %v7129_v26, 2  ;;  %v7143_v36 = vor.u32 %v7142_v12, %v7139_v47  ;;  %v7756_v40 = vcombine.low %v7107_v59, %v7121_v13  ;;  %v15609_v27 = vld.sshfl [vmem:[#allocation2 + $0xb8] sm:$0x13 pattern:$0x76325410]  ;;  %v6493_v42 = vcombine.high %v15608_v38, %v15608_v38 }
 0x360   : > { %v6501_v53 = vcombine.high %v15609_v27, %v15609_v27  ;;  %v7154_v15 = vshll.u32 %v15606_v62, 16  ;;  %9614 = vst.msk [vmem:[#allocation4 + $0x130] sm:$0xff] %vm2550_vm9, %v9454_v25  ;;  %v7153_v41 = vrot.slane %v7151_v57, 6  ;;  %v7160_v30 = vshll.u32 %v6477_v39, 16 }
 0x361   : > { %v7135_v31 = vsel %vm17115_vm15, %v7130_v52, %v7134_v61  ;;  %v7144_v3 = vrot.slane %v7143_v36, 2  ;;  %v7764_v44 = vrot.slane %v7756_v40, %v17100_v16  ;;  %v7165_v21 = vshrl.u32 %v15607_v37, 16  ;;  %11486 = vst.msk [vmem:[#allocation4 + $0x130] sm:$0xff] %vm4430_vm10, %v11446_v23  ;;  %v11448_v36 = vpop.permute.xlu0 %11447 }
 0x362   : > { %v7168_v4 = vshll.u32 %v15607_v37, 16  ;;  %v7156_v63 = vrot.slane %v7154_v15, 7  ;;  %v7174_v54 = vshll.u32 %v6485_v8, 16  ;;  %v7179_v35 = vshrl.u32 %v15608_v38, 16 }
 0x363   : > { %v7149_v43 = vsel %vm17115_vm15, %v7144_v3, %v7148_v56  ;;  %v7162_v18 = vrot.slane %v7160_v30, 7  ;;  %v7167_v29 = vrot.slane %v7165_v21, 6  ;;  %v16900_v24 = vld.sshfl [vmem:[#allocation2 + $0xc8] sm:$0xf pattern:$0x76325410] }
 0x364   : > { %v7757_v33 = vcombine.low %v7135_v31, %v7149_v43  ;;  %v7170_v45 = vrot.slane %v7168_v4, 7  ;;  %v16901_v7 = vld.sshfl [vmem:[#allocation2 + $0xd0] sm:$0xf pattern:$0x76325410]  ;;  %v7157_v2 = vor.u32 %v7156_v63, %v7153_v41  ;;  %v7176_v14 = vrot.slane %v7174_v54, 7 }
 0x365   : > { %v7181_v58 = vrot.slane %v7179_v35, 6  ;;  %v7182_v5 = vshll.u32 %v15608_v38, 16  ;;  %v7188_v1 = vshll.u32 %v6493_v42, 16  ;;  %v7193_v20 = vshrl.u32 %v15609_v27, 16 }
 0x366   : > { %v7771_v0 = vrot.slane %v7757_v33, %v17100_v16  ;;  %v12722_v48 = vld [vmem:[#allocation4 + $0xd8] sm:$0xff]  ;;  %v7171_v49 = vor.u32 %v7170_v45, %v7167_v29  ;;  %v7158_v28 = vrot.slane %v7157_v2, 2  ;;  %v7196_v55 = vshll.u32 %v15609_v27, 16 }
 0x367   : > { %13352 = vmatmul.mubr.bf16.gmra.mrb[20].mxu1 %v12722_v48  ;;  %v7184_v22 = vrot.slane %v7182_v5, 7  ;;  %v7202_v9 = vshll.u32 %v6501_v53, 16  ;;  %v15610_v46 = vld.sshfl [vmem:[#allocation2 + $0xc4] sm:$0x13 pattern:$0x76325410]  ;;  %v9471_v52 = vcombine.low %v16900_v24, %v16901_v7 }
 0x368   : > { %v7772_v17 = vcombine.low %v7764_v44, %v7771_v0  ;;  %v7172_v51 = vrot.slane %v7171_v49, 2  ;;  %v7190_v50 = vrot.slane %v7188_v1, 7  ;;  %v7195_v62 = vrot.slane %v7193_v20, 6  ;;  %13359 = vmatprep.mubr.bf16.mxu1 %v12728_v60  ;;  %v12733_v7 = vld [vmem:[#allocation4 + $0x130] sm:$0xff] }
 0x369   : > { %v7163_v32 = vsel %vm17115_vm15, %v7158_v28, %v7162_v18  ;;  %v7185_v19 = vor.u32 %v7184_v22, %v7181_v58  ;;  %v7198_v34 = vrot.slane %v7196_v55, 7  ;;  %v7204_v61 = vrot.slane %v7202_v9, 7  ;;  %v15611_v47 = vld.sshfl [vmem:[#allocation2 + $0xc8] sm:$0x13 pattern:$0x76325410]  ;;  %v9141_v22 = vpop.permute.xlu1 %9140 }
 0x36a   : > { %7948 = vst.msk [vmem:[#allocation4 + $0x100] sm:$0xff] %vm2550_vm9, %v7772_v17  ;;  %v7177_v59 = vsel %vm17115_vm15, %v7172_v51, %v7176_v14  ;;  %v15612_v26 = vld.sshfl [vmem:[#allocation2 + $0xcc] sm:$0x13 pattern:$0x76325410]  ;;  %v6509_v12 = vcombine.high %v15610_v46, %v15610_v46  ;;  %v6517_v39 = vcombine.high %v15611_v47, %v15611_v47  ;;  %v7207_v8 = vshrl.u32 %v15610_v46, 16 }
 0x36b   : > { %9180 = vst.msk [vmem:[#allocation4 + $0x100] sm:$0xff] %vm4430_vm10, %v9139_v6  ;;  %v7186_v56 = vrot.slane %v7185_v19, 2  ;;  %v7199_v37 = vor.u32 %v7198_v34, %v7195_v62  ;;  %v7773_v13 = vcombine.low %v7163_v32, %v7177_v59  ;;  %v15613_v38 = vld.sshfl [vmem:[#allocation2 + $0xd0] sm:$0x13 pattern:$0x76325410]  ;;  %v6525_v40 = vcombine.high %v15612_v26, %v15612_v26 }
 0x36c   : > { %v6533_v27 = vcombine.high %v15613_v38, %v15613_v38  ;;  %v7210_v53 = vshll.u32 %v15610_v46, 16  ;;  %9615 = vst.msk [vmem:[#allocation4 + $0x158] sm:$0xff] %vm2550_vm9, %v9471_v52  ;;  %v7209_v57 = vrot.slane %v7207_v8, 6  ;;  %v7216_v31 = vshll.u32 %v6509_v12, 16 }
 0x36d   : > { %v7191_v25 = vsel %vm17115_vm15, %v7186_v56, %v7190_v50  ;;  %v7200_v23 = vrot.slane %v7199_v37, 2  ;;  %v7781_v42 = vrot.slane %v7773_v13, %v17100_v16  ;;  %v7221_v3 = vshrl.u32 %v15611_v47, 16  ;;  %11487 = vst.msk [vmem:[#allocation4 + $0x158] sm:$0xff] %vm4430_vm10, %v11448_v36  ;;  %v11450_v37 = vpop.permute.xlu0 %11449 }
 0x36e   : > { %v7224_v44 = vshll.u32 %v15611_v47, 16  ;;  %v7212_v41 = vrot.slane %v7210_v53, 7  ;;  %v7230_v30 = vshll.u32 %v6517_v39, 16  ;;  %v7235_v21 = vshrl.u32 %v15612_v26, 16 }
 0x36f   : > { %v7205_v15 = vsel %vm17115_vm15, %v7200_v23, %v7204_v61  ;;  %v7218_v43 = vrot.slane %v7216_v31, 7  ;;  %v7223_v63 = vrot.slane %v7221_v3, 6  ;;  %v16902_v35 = vld.sshfl [vmem:[#allocation2 + $0xe0] sm:$0xf pattern:$0x76325410] }
 0x370   : > { %v7774_v4 = vcombine.low %v7191_v25, %v7205_v15  ;;  %v7226_v54 = vrot.slane %v7224_v44, 7  ;;  %v16903_v33 = vld.sshfl [vmem:[#allocation2 + $0xe8] sm:$0xf pattern:$0x76325410]  ;;  %v7213_v18 = vor.u32 %v7212_v41, %v7209_v57  ;;  %v7232_v29 = vrot.slane %v7230_v30, 7 }
 0x371   : > { %v7237_v45 = vrot.slane %v7235_v21, 6  ;;  %v7238_v24 = vshll.u32 %v15612_v26, 16  ;;  %v7244_v5 = vshll.u32 %v6525_v40, 16  ;;  %v7249_v60 = vshrl.u32 %v15613_v38, 16 }
 0x372   : > { %v7788_v2 = vrot.slane %v7774_v4, %v17100_v16  ;;  %v12727_v14 = vld [vmem:[#allocation4 + $0x100] sm:$0xff]  ;;  %v7227_v58 = vor.u32 %v7226_v54, %v7223_v63  ;;  %v7214_v0 = vrot.slane %v7213_v18, 2  ;;  %v7252_v49 = vshll.u32 %v15613_v38, 16 }
 0x373   : > { %13360 = vmatmul.mubr.bf16.gmra.mrb[24].mxu1 %v12727_v14  ;;  %v7240_v48 = vrot.slane %v7238_v24, 7  ;;  %v7258_v1 = vshll.u32 %v6533_v27, 16  ;;  %v15614_v20 = vld.sshfl [vmem:[#allocation2 + $0xdc] sm:$0x13 pattern:$0x76325410]  ;;  %v9488_v56 = vcombine.low %v16902_v35, %v16903_v33 }
 0x374   : > { %v7789_v28 = vcombine.low %v7781_v42, %v7788_v2  ;;  %v7228_v55 = vrot.slane %v7227_v58, 2  ;;  %v7246_v9 = vrot.slane %v7244_v5, 7  ;;  %v7251_v46 = vrot.slane %v7249_v60, 6  ;;  %13367 = vmatprep.mubr.bf16.mxu1 %v12733_v7  ;;  %v12738_v54 = vld [vmem:[#allocation4 + $0x158] sm:$0xff] }
 0x375   : > { %v7219_v17 = vsel %vm17115_vm15, %v7214_v0, %v7218_v43  ;;  %v7241_v6 = vor.u32 %v7240_v48, %v7237_v45  ;;  %v7254_v51 = vrot.slane %v7252_v49, 7  ;;  %v7260_v50 = vrot.slane %v7258_v1, 7  ;;  %v15615_v62 = vld.sshfl [vmem:[#allocation2 + $0xe0] sm:$0x13 pattern:$0x76325410]  ;;  %v9143_v49 = vpop.permute.xlu1 %9142 }
 0x376   : > { %7949 = vst.msk [vmem:[#allocation4 + $0x128] sm:$0xff] %vm2550_vm9, %v7789_v28  ;;  %v7233_v32 = vsel %vm17115_vm15, %v7228_v55, %v7232_v29  ;;  %v15616_v19 = vld.sshfl [vmem:[#allocation2 + $0xe4] sm:$0x13 pattern:$0x76325410]  ;;  %v6541_v34 = vcombine.high %v15614_v20, %v15614_v20  ;;  %v6549_v12 = vcombine.high %v15615_v62, %v15615_v62  ;;  %v7263_v39 = vshrl.u32 %v15614_v20, 16 }
 0x377   : > { %9181 = vst.msk [vmem:[#allocation4 + $0x128] sm:$0xff] %vm4430_vm10, %v9141_v22  ;;  %v7242_v61 = vrot.slane %v7241_v6, 2  ;;  %v7255_v47 = vor.u32 %v7254_v51, %v7251_v46  ;;  %v7790_v59 = vcombine.low %v7219_v17, %v7233_v32  ;;  %v15617_v26 = vld.sshfl [vmem:[#allocation2 + $0xe8] sm:$0x13 pattern:$0x76325410]  ;;  %v6557_v13 = vcombine.high %v15616_v19, %v15616_v19 }
 0x378   : > { %v6565_v38 = vcombine.high %v15617_v26, %v15617_v26  ;;  %v7266_v27 = vshll.u32 %v15614_v20, 16  ;;  %9616 = vst.msk [vmem:[#allocation4 + $0x180] sm:$0xff] %vm2550_vm9, %v9488_v56  ;;  %v7265_v8 = vrot.slane %v7263_v39, 6  ;;  %v7272_v25 = vshll.u32 %v6541_v34, 16 }
 0x379   : > { %v7247_v52 = vsel %vm17115_vm15, %v7242_v61, %v7246_v9  ;;  %v7256_v36 = vrot.slane %v7255_v47, 2  ;;  %v7798_v40 = vrot.slane %v7790_v59, %v17100_v16  ;;  %v7277_v23 = vshrl.u32 %v15615_v62, 16  ;;  %11488 = vst.msk [vmem:[#allocation4 + $0x180] sm:$0xff] %vm4430_vm10, %v11450_v37 }
 0x37a   : > { %v7280_v42 = vshll.u32 %v15615_v62, 16  ;;  %v7268_v57 = vrot.slane %v7266_v27, 7  ;;  %v7286_v31 = vshll.u32 %v6549_v12, 16  ;;  %v7291_v3 = vshrl.u32 %v15616_v19, 16 }
 0x37b   : > { %v7261_v53 = vsel %vm17115_vm15, %v7256_v36, %v7260_v50  ;;  %v7274_v15 = vrot.slane %v7272_v25, 7  ;;  %v7279_v41 = vrot.slane %v7277_v23, 6  ;;  %v7294_v63 = vshll.u32 %v15616_v19, 16 }
 0x37c   : > { %v7791_v44 = vcombine.low %v7247_v52, %v7261_v53  ;;  %v7282_v30 = vrot.slane %v7280_v42, 7  ;;  %v7269_v21 = vor.u32 %v7268_v57, %v7265_v8  ;;  %v7288_v4 = vrot.slane %v7286_v31, 7  ;;  %v15834_v35 = vld.sshfl [vmem:[#allocation2 + $0x8] sm:$0x12 pattern:$0x76325410] }
 0x37d   : > { %v7293_v43 = vrot.slane %v7291_v3, 6  ;;  %v15835_v33 = vld.sshfl [vmem:[#allocation2 + $0xc] sm:$0x12 pattern:$0x76325410]  ;;  %v7300_v7 = vshll.u32 %v6557_v13, 16  ;;  %v11630_v6 = vcombine.high %v15834_v35, %v15834_v35 }
 0x37e   : > { %v15836_v18 = vld.sshfl [vmem:[#allocation2 + $0x10] sm:$0x12 pattern:$0x76325410]  ;;  %v7805_v29 = vrot.slane %v7791_v44, %v17100_v16  ;;  %v12732_v45 = vld [vmem:[#allocation4 + $0x128] sm:$0xff]  ;;  %v7283_v24 = vor.u32 %v7282_v30, %v7279_v41  ;;  %v7305_v2 = vshrl.u32 %v15617_v26, 16  ;;  %v11638_v51 = vcombine.high %v15835_v33, %v15835_v33 }
 0x37f   : > { %v15837_v14 = vld.sshfl [vmem:[#allocation2 + $0x14] sm:$0x12 pattern:$0x76325410]  ;;  %13368 = vmatmul.mubr.bf16.gmra.mrb[28].mxu1 %v12732_v45  ;;  %v7270_v58 = vrot.slane %v7269_v21, 2  ;;  %v7296_v5 = vrot.slane %v7294_v63, 7  ;;  %v11646_v50 = vcombine.high %v15836_v18, %v15836_v18 }
 0x380   : > { %v7308_v60 = vshll.u32 %v15617_v26, 16  ;;  %v7314_v0 = vshll.u32 %v6565_v38, 16  ;;  %v7806_v48 = vcombine.low %v7798_v40, %v7805_v29  ;;  %v7284_v1 = vrot.slane %v7283_v24, 2  ;;  %13375 = vmatprep.mubr.bf16.mxu1 %v12738_v54  ;;  %v12743_v54 = vld [vmem:[#allocation4 + $0x180] sm:$0xff] }
 0x381   : > { %v7302_v20 = vrot.slane %v7300_v7, 7  ;;  %v7307_v28 = vrot.slane %v7305_v2, 6  ;;  %v7275_v22 = vsel %vm17115_vm15, %v7270_v58, %v7274_v15  ;;  %v7297_v55 = vor.u32 %v7296_v5, %v7293_v43  ;;  %v15838_v62 = vld.sshfl [vmem:[#allocation2 + $0x20] sm:$0x12 pattern:$0x76325410]  ;;  %v9145_v5 = vpop.permute.xlu1 %9144 }
 0x382   : > { %v7310_v9 = vrot.slane %v7308_v60, 7  ;;  %v7316_v46 = vrot.slane %v7314_v0, 7  ;;  %7950 = vst.msk [vmem:[#allocation4 + $0x150] sm:$0xff] %vm2550_vm9, %v7806_v48  ;;  %v7289_v17 = vsel %vm17115_vm15, %v7284_v1, %v7288_v4  ;;  %v11654_v61 = vcombine.high %v15837_v14, %v15837_v14 }
 0x383   : > { %9182 = vst.msk [vmem:[#allocation4 + $0x150] sm:$0xff] %vm4430_vm10, %v9143_v49  ;;  %v7298_v32 = vrot.slane %v7297_v55, 2  ;;  %v7807_v34 = vcombine.low %v7275_v22, %v7289_v17  ;;  %v15839_v47 = vld.sshfl [vmem:[#allocation2 + $0x24] sm:$0x12 pattern:$0x76325410]  ;;  %v11662_v57 = vcombine.high %v15838_v62, %v15838_v62 }
 0x384   : > { %v7311_v19 = vor.u32 %v7310_v9, %v7307_v28  ;;  %v15898_v59 = vrot.slane %v15834_v35, 9  ;;  %v12137_v26 = vrot.slane %v11630_v6, 7  ;;  %v15899_v12 = vrot.slane %v15835_v33, 9 }
 0x385   : > { %v12141_v56 = vrot.slane %v11638_v51, 7  ;;  %v7303_v37 = vsel %vm17115_vm15, %v7298_v32, %v7302_v20  ;;  %v7815_v38 = vrot.slane %v7807_v34, %v17100_v16  ;;  %v15900_v39 = vrot.slane %v15836_v18, 9  ;;  %v15840_v52 = vld.sshfl [vmem:[#allocation2 + $0x28] sm:$0x12 pattern:$0x76325410] }
 0x386   : > { %v7312_v13 = vrot.slane %v7311_v19, 2  ;;  %v12138_v36 = vsel %vm18007_vm8, %v15898_v59, %v12137_v26  ;;  %v12145_v27 = vrot.slane %v11646_v50, 7  ;;  %v15901_v8 = vrot.slane %v15837_v14, 9  ;;  %v11452_v50 = vpop.permute.xlu0 %11451 }
 0x387   : > { %v12142_v40 = vsel %vm18007_vm8, %v15899_v12, %v12141_v56  ;;  %v15841_v25 = vld.sshfl [vmem:[#allocation2 + $0x2c] sm:$0x12 pattern:$0x76325410]  ;;  %v12149_v42 = vrot.slane %v11654_v61, 7  ;;  %v11670_v44 = vcombine.high %v15839_v47, %v15839_v47  ;;  %v11678_v15 = vcombine.high %v15840_v52, %v15840_v52 }
 0x388   : > { %v7317_v23 = vsel %vm17115_vm15, %v7312_v13, %v7316_v46  ;;  %v12391_v53 = vcombine.low %v12138_v36, %v12142_v40  ;;  %v12146_v3 = vsel %vm18007_vm8, %v15900_v39, %v12145_v27  ;;  %v11686_v21 = vcombine.high %v15841_v25, %v15841_v25  ;;  %v16904_v43 = vld.sshfl [vmem:[#allocation2 + $0xf8] sm:$0xf pattern:$0x76325410] }
 0x389   : > { %v7808_v31 = vcombine.low %v7303_v37, %v7317_v23  ;;  %v12150_v41 = vsel %vm18007_vm8, %v15901_v8, %v12149_v42  ;;  %v15902_v4 = vrot.slane %v15838_v62, 9  ;;  %v16905_v63 = vld.sshfl [vmem:[#allocation2 + $0x100] sm:$0xf pattern:$0x76325410]  ;;  %v12153_v29 = vrot.slane %v11662_v57, 7 }
 0x38a   : > { %v12399_v30 = vrot.slane %v12391_v53, %v17100_v16  ;;  %v12737_v33 = vld [vmem:[#allocation4 + $0x150] sm:$0xff]  ;;  %v12392_v18 = vcombine.low %v12146_v3, %v12150_v41  ;;  %v15903_v45 = vrot.slane %v15839_v47, 9  ;;  %v12157_v24 = vrot.slane %v11670_v44, 7 }
 0x38b   : > { %v7822_v35 = vrot.slane %v7808_v31, %v17100_v16  ;;  %13376 = vmatmul.mubr.bf16.gmra.mrb[32].mxu1 %v12737_v33  ;;  %v15904_v7 = vrot.slane %v15840_v52, 9  ;;  %v12161_v2 = vrot.slane %v11678_v15, 7  ;;  %v15905_v14 = vrot.slane %v15841_v25, 9 }
 0x38c   : > { %v12406_v60 = vrot.slane %v12392_v18, %v17100_v16  ;;  %v12154_v0 = vsel %vm18007_vm8, %v15902_v4, %v12153_v29  ;;  %v12165_v48 = vrot.slane %v11686_v21, 7  ;;  %v15618_v49 = vld.sshfl [vmem:[#allocation2 + $0xf4] sm:$0x13 pattern:$0x76325410]  ;;  %13383 = vmatprep.mubr.bf16.mxu1 %v12743_v54  ;;  %v12158_v1 = vsel %vm18007_vm8, %v15903_v45, %v12157_v24 }
 0x38d   : > { %v7823_v58 = vcombine.low %v7815_v38, %v7822_v35  ;;  %v12162_v20 = vsel %vm18007_vm8, %v15904_v7, %v12161_v2  ;;  %v15619_v28 = vld.sshfl [vmem:[#allocation2 + $0xf8] sm:$0x13 pattern:$0x76325410]  ;;  %v12408_v9 = vcombine.low %v12154_v0, %v12158_v1  ;;  %v6573_v17 = vcombine.high %v15618_v49, %v15618_v49 }
 0x38e   : > { %v12407_v22 = vcombine.low %v12399_v30, %v12406_v60  ;;  %v12166_v55 = vsel %vm18007_vm8, %v15905_v14, %v12165_v48  ;;  %v15620_v46 = vld.sshfl [vmem:[#allocation2 + $0xfc] sm:$0x13 pattern:$0x76325410]  ;;  %v9505_v51 = vcombine.low %v16904_v43, %v16905_v63  ;;  %v6581_v32 = vcombine.high %v15619_v28, %v15619_v28 }
 0x38f   : > { %7951 = vst.msk [vmem:[#allocation4 + $0x178] sm:$0xff] %vm2550_vm9, %v7823_v58  ;;  %v12409_v6 = vcombine.low %v12162_v20, %v12166_v55  ;;  %v15621_v62 = vld.sshfl [vmem:[#allocation2 + $0x100] sm:$0x13 pattern:$0x76325410]  ;;  %v6589_v19 = vcombine.high %v15620_v46, %v15620_v46  ;;  %v12416_v34 = vrot.slane %v12408_v9, %v17100_v16  ;;  %v7319_v47 = vshrl.u32 %v15618_v49, 16 }
 0x390   : > { %9183 = vst.msk [vmem:[#allocation4 + $0x178] sm:$0xff] %vm4430_vm10, %v9145_v5  ;;  %v6597_v61 = vcombine.high %v15621_v62, %v15621_v62  ;;  %v7322_v59 = vshll.u32 %v15618_v49, 16  ;;  %v7328_v12 = vshll.u32 %v6573_v17, 16  ;;  %v7333_v56 = vshrl.u32 %v15619_v28, 16  ;;  %v14252_v20 = vld [vmem:[#allocation3 + $0x58] sm:$0xff] }
 0x391   : > { %12679 = vst.msk [vmem:[#allocation4 + $0x20] sm:$0xff] %vm2550_vm9, %v12407_v22  ;;  %v12423_v26 = vrot.slane %v12409_v6, %v17100_v16  ;;  %9617 = vst.msk [vmem:[#allocation4 + $0x1a8] sm:$0xff] %vm2550_vm9, %v9505_v51  ;;  %v7336_v37 = vshll.u32 %v15619_v28, 16  ;;  %v7321_v38 = vrot.slane %v7319_v47, 6  ;;  %v7342_v52 = vshll.u32 %v6581_v32, 16 }
 0x392   : > { %v15842_v13 = vld.sshfl [vmem:[#allocation2 + $0x38] sm:$0x12 pattern:$0x76325410]  ;;  %11489 = vst.msk [vmem:[#allocation4 + $0x1a8] sm:$0xff] %vm4430_vm10, %v11452_v50  ;;  %v7324_v39 = vrot.slane %v7322_v59, 7 }
 0x393   : > { %v7347_v36 = vshrl.u32 %v15620_v46, 16  ;;  %v12424_v40 = vcombine.low %v12416_v34, %v12423_v26  ;;  %v7330_v27 = vrot.slane %v7328_v12, 7  ;;  %v7335_v8 = vrot.slane %v7333_v56, 6 }
 0x394   : > { %v7338_v25 = vrot.slane %v7336_v37, 7  ;;  %v15843_v23 = vld.sshfl [vmem:[#allocation2 + $0x3c] sm:$0x12 pattern:$0x76325410]  ;;  %v7325_v42 = vor.u32 %v7324_v39, %v7321_v38  ;;  %v7344_v53 = vrot.slane %v7342_v52, 7  ;;  %v11694_v35 = vcombine.high %v15842_v13, %v15842_v13 }
 0x395   : > { %v7349_v57 = vrot.slane %v7347_v36, 6  ;;  %v7350_v31 = vshll.u32 %v15620_v46, 16  ;;  %v15844_v3 = vld.sshfl [vmem:[#allocation2 + $0x40] sm:$0x12 pattern:$0x76325410]  ;;  %v11702_v58 = vcombine.high %v15843_v23, %v15843_v23 }
 0x396   : > { %v15845_v44 = vld.sshfl [vmem:[#allocation2 + $0x44] sm:$0x12 pattern:$0x76325410]  ;;  %12680 = vst.msk [vmem:[#allocation4 + $0x48] sm:$0xff] %vm2550_vm9, %v12424_v40  ;;  %v7339_v15 = vor.u32 %v7338_v25, %v7335_v8  ;;  %v7356_v41 = vshll.u32 %v6589_v19, 16  ;;  %v11710_v0 = vcombine.high %v15844_v3, %v15844_v3 }
 0x397   : > { %v7361_v30 = vshrl.u32 %v15621_v62, 16  ;;  %v7364_v21 = vshll.u32 %v15621_v62, 16  ;;  %v7326_v4 = vrot.slane %v7325_v42, 2  ;;  %v7352_v43 = vrot.slane %v7350_v31, 7  ;;  %v12742_v54 = vld [vmem:[#allocation4 + $0x178] sm:$0xff] }
 0x398   : > { %v7370_v63 = vshll.u32 %v6597_v61, 16  ;;  %v12699_v33 = vld [vmem:[#allocation4 + $0x20] sm:$0xff]  ;;  %v7340_v18 = vrot.slane %v7339_v15, 2  ;;  %v7358_v29 = vrot.slane %v7356_v41, 7  ;;  %13384 = vmatmul.mubr.bf16.gmra.mrb[36].mxu1 %v12742_v54  ;;  %v11718_v48 = vcombine.high %v15845_v44, %v15845_v44 }
 0x399   : > { %v7363_v45 = vrot.slane %v7361_v30, 6  ;;  %v7366_v24 = vrot.slane %v7364_v21, 7  ;;  %16568 = vmatprep.mubr.msk.bf16.mxu0 %vm2550_vm9, %v12699_v33  ;;  %v7331_v7 = vsel %vm17115_vm15, %v7326_v4, %v7330_v27  ;;  %v7353_v2 = vor.u32 %v7352_v43, %v7349_v57  ;;  %v15846_v49 = vld.sshfl [vmem:[#allocation2 + $0x50] sm:$0x12 pattern:$0x76325410]  ;;  %v9147_v21 = vpop.permute.xlu1 %9146 }
 0x39a   : > { %v7372_v14 = vrot.slane %v7370_v63, 7  ;;  %v7345_v5 = vsel %vm17115_vm15, %v7340_v18, %v7344_v53  ;;  %v12748_v1 = vld [vmem:[#allocation4 + $0x1a8] sm:$0xff]  ;;  %v15906_v55 = vrot.slane %v15842_v13, 9  ;;  %v12169_v9 = vrot.slane %v11694_v35, 7 }
 0x39b   : > { %v7367_v60 = vor.u32 %v7366_v24, %v7363_v45  ;;  %v7354_v28 = vrot.slane %v7353_v2, 2  ;;  %v7824_v22 = vcombine.low %v7331_v7, %v7345_v5  ;;  %v15847_v46 = vld.sshfl [vmem:[#allocation2 + $0x54] sm:$0x12 pattern:$0x76325410]  ;;  %13391 = vmatprep.mubr.bf16.mxu1 %v12748_v1  ;;  %v15907_v51 = vrot.slane %v15843_v23, 9 }
 0x39c   : > { %v15848_v17 = vld.sshfl [vmem:[#allocation2 + $0x58] sm:$0x12 pattern:$0x76325410]  ;;  %v12173_v50 = vrot.slane %v11702_v58, 7  ;;  %v15908_v62 = vrot.slane %v15844_v3, 9  ;;  %v12170_v61 = vsel %vm18007_vm8, %v15906_v55, %v12169_v9  ;;  %v11726_v52 = vcombine.high %v15846_v49, %v15846_v49 }
 0x39d   : > { %v7368_v6 = vrot.slane %v7367_v60, 2  ;;  %v12704_v32 = vld [vmem:[#allocation4 + $0x48] sm:$0xff]  ;;  %v7359_v19 = vsel %vm17115_vm15, %v7354_v28, %v7358_v29  ;;  %v7832_v34 = vrot.slane %v7824_v22, %v17100_v16  ;;  %v12177_v47 = vrot.slane %v11710_v0, 7 }
 0x39e   : > { %v15849_v59 = vld.sshfl [vmem:[#allocation2 + $0x5c] sm:$0x12 pattern:$0x76325410]  ;;  %16569 = vmatmul.mubr.msk.bf16.vlgmr.msra.gmra.mrb[64].mxu0 %vm2550_vm9, %v12704_v32  ;;  %14268 = vst.msk [vmem:[#allocation4 + $0x48] sm:$0xff] %vm2550_vm9, %v14252_v20  ;;  %v12174_v12 = vsel %vm18007_vm8, %v15907_v51, %v12173_v50  ;;  %v15909_v56 = vrot.slane %v15845_v44, 9  ;;  %v11734_v40 = vcombine.high %v15847_v46, %v15847_v46  ;;  %v11742_v27 = vcombine.high %v15848_v17, %v15848_v17  ;;  %v11454_v20 = vpop.permute.xlu0 %11453 }
 0x39f   : > { %v7373_v26 = vsel %vm17115_vm15, %v7368_v6, %v7372_v14  ;;  %v12181_v37 = vrot.slane %v11718_v48, 7  ;;  %v12178_v38 = vsel %vm18007_vm8, %v15908_v62, %v12177_v47  ;;  %v12425_v39 = vcombine.low %v12170_v61, %v12174_v12  ;;  %v16906_v25 = vld.sshfl [vmem:[#allocation2 + $0x110] sm:$0xf pattern:$0x76325410] }
 0x3a0   : > { %v7825_v13 = vcombine.low %v7359_v19, %v7373_v26  ;;  %v11750_v8 = vcombine.high %v15849_v59, %v15849_v59  ;;  %v15910_v57 = vrot.slane %v15846_v49, 9  ;;  %v16907_v31 = vld.sshfl [vmem:[#allocation2 + $0x118] sm:$0xf pattern:$0x76325410]  ;;  %v12185_v3 = vrot.slane %v11726_v52, 7 }
 0x3a1   : > { %v12182_v36 = vsel %vm18007_vm8, %v15909_v56, %v12181_v37  ;;  %v12433_v53 = vrot.slane %v12425_v39, %v17100_v16  ;;  %v15911_v44 = vrot.slane %v15847_v46, 9  ;;  %v12189_v15 = vrot.slane %v11734_v40, 7  ;;  %v15622_v54 = vld.sshfl [vmem:[#allocation2 + $0x10c] sm:$0x13 pattern:$0x76325410] }
 0x3a2   : > { %v7839_v23 = vrot.slane %v7825_v13, %v17100_v16  ;;  %v12426_v42 = vcombine.low %v12178_v38, %v12182_v36  ;;  %v15912_v41 = vrot.slane %v15848_v17, 9  ;;  %v12193_v43 = vrot.slane %v11742_v27, 7  ;;  %v15623_v29 = vld.sshfl [vmem:[#allocation2 + $0x110] sm:$0x13 pattern:$0x76325410] }
 0x3a3   : > { %v15913_v63 = vrot.slane %v15849_v59, 9  ;;  %v12186_v35 = vsel %vm18007_vm8, %v15910_v57, %v12185_v3  ;;  %v12190_v33 = vsel %vm18007_vm8, %v15911_v44, %v12189_v15  ;;  %v12197_v18 = vrot.slane %v11750_v8, 7  ;;  %v15624_v2 = vld.sshfl [vmem:[#allocation2 + $0x114] sm:$0x13 pattern:$0x76325410] }
 0x3a4   : > { %v7840_v30 = vcombine.low %v7832_v34, %v7839_v23  ;;  %v12440_v4 = vrot.slane %v12426_v42, %v17100_v16  ;;  %v12194_v24 = vsel %vm18007_vm8, %v15912_v41, %v12193_v43  ;;  %v12442_v7 = vcombine.low %v12186_v35, %v12190_v33  ;;  %v15625_v58 = vld.sshfl [vmem:[#allocation2 + $0x118] sm:$0x13 pattern:$0x76325410]  ;;  %v14253_v38 = vld [vmem:[#allocation3 + $0x70] sm:$0xff]  ;;  %v19287_v35 = vpop.f32.mrb[0].mxu0 }
 0x3a5   : > { %v12198_v14 = vsel %vm18007_vm8, %v15913_v63, %v12197_v18  ;;  %v6605_v5 = vcombine.high %v15622_v54, %v15622_v54  ;;  %v6613_v60 = vcombine.high %v15623_v29, %v15623_v29  ;;  %v6621_v0 = vcombine.high %v15624_v2, %v15624_v2  ;;  %v19271_v17 = vld.sshfl [vmem:[#allocation2 + $0x68] sm:$0x12 pattern:$0x76325410]  ;;  %v14254_v33 = vld [vmem:[#allocation3 + $0x78] sm:$0xff] }
 0x3a6   : > { %7952 = vst.msk [vmem:[#allocation4 + $0x1a0] sm:$0xff] %vm2550_vm9, %v7840_v30  ;;  %v12441_v45 = vcombine.low %v12433_v53, %v12440_v4  ;;  %v12443_v48 = vcombine.low %v12194_v24, %v12198_v14  ;;  %v12450_v49 = vrot.slane %v12442_v7, %v17100_v16  ;;  %v9522_v1 = vcombine.low %v16906_v25, %v16907_v31  ;;  %v15851_v47 = vld.sshfl [vmem:[#allocation2 + $0x6c] sm:$0x12 pattern:$0x76325410] }
 0x3a7   : > { %9184 = vst.msk [vmem:[#allocation4 + $0x1a0] sm:$0xff] %vm4430_vm10, %v9147_v21  ;;  %v6629_v28 = vcombine.high %v15625_v58, %v15625_v58  ;;  %v7375_v22 = vshrl.u32 %v15622_v54, 16  ;;  %v7378_v55 = vshll.u32 %v15622_v54, 16  ;;  %v7384_v9 = vshll.u32 %v6605_v5, 16  ;;  %v19292_v5 = vpop.f32.mrb[1].mxu0 }
 0x3a8   : > { %12681 = vst.msk [vmem:[#allocation4 + $0x70] sm:$0xff] %vm2550_vm9, %v12441_v45  ;;  %v7389_v46 = vshrl.u32 %v15623_v29, 16  ;;  %v12457_v6 = vrot.slane %v12443_v48, %v17100_v16  ;;  %9618 = vst.msk [vmem:[#allocation4 + $0x1d0] sm:$0xff] %vm2550_vm9, %v9522_v1  ;;  %v7392_v51 = vshll.u32 %v15623_v29, 16  ;;  %v7398_v50 = vshll.u32 %v6613_v60, 16  ;;  %v19294_v1 = vpop.f32.mrb[2].mxu0 }
 0x3a9   : > { %v7403_v62 = vshrl.u32 %v15624_v2, 16  ;;  %11490 = vst.msk [vmem:[#allocation4 + $0x1d0] sm:$0xff] %vm4430_vm10, %v11454_v20  ;;  %v7377_v32 = vrot.slane %v7375_v22, 6  ;;  %v7380_v19 = vrot.slane %v7378_v55, 7  ;;  %v7386_v34 = vrot.slane %v7384_v9, 7  ;;  %v19298_v9 = vpop.f32.mrb[3].mxu0 }
 0x3aa   : > { %v7391_v61 = vrot.slane %v7389_v46, 6  ;;  %v12458_v59 = vcombine.low %v12450_v49, %v12457_v6  ;;  %v7394_v26 = vrot.slane %v7392_v51, 7  ;;  %v7400_v12 = vrot.slane %v7398_v50, 7 }
 0x3ab   : > { %v7405_v56 = vrot.slane %v7403_v62, 6  ;;  %v15852_v37 = vld.sshfl [vmem:[#allocation2 + $0x70] sm:$0x12 pattern:$0x76325410]  ;;  %v7381_v39 = vor.u32 %v7380_v19, %v7377_v32  ;;  %v7406_v52 = vshll.u32 %v15624_v2, 16  ;;  %v11758_v42 = vcombine.high %v19271_v17, %v19271_v17 }
 0x3ac   : > { %v19276_v13 = vld.sshfl [vmem:[#allocation2 + $0x74] sm:$0x12 pattern:$0x76325410]  ;;  %v7412_v36 = vshll.u32 %v6621_v0, 16  ;;  %v7417_v40 = vshrl.u32 %v15625_v58, 16  ;;  %v7395_v27 = vor.u32 %v7394_v26, %v7391_v61  ;;  %v11766_v21 = vcombine.high %v15851_v47, %v15851_v47 }
 0x3ad   : > { %12682 = vst.msk [vmem:[#allocation4 + $0x98] sm:$0xff] %vm2550_vm9, %v12458_v59  ;;  %v7420_v8 = vshll.u32 %v15625_v58, 16  ;;  %v7426_v25 = vshll.u32 %v6629_v28, 16  ;;  %v7382_v57 = vrot.slane %v7381_v39, 2  ;;  %v7408_v31 = vrot.slane %v7406_v52, 7 }
 0x3ae   : > { %v12747_v23 = vld [vmem:[#allocation4 + $0x1a0] sm:$0xff]  ;;  %v7414_v3 = vrot.slane %v7412_v36, 7  ;;  %v7419_v44 = vrot.slane %v7417_v40, 6  ;;  %v7396_v15 = vrot.slane %v7395_v27, 2  ;;  %v11774_v63 = vcombine.high %v15852_v37, %v15852_v37 }
 0x3af   : > { %v12709_v53 = vld [vmem:[#allocation4 + $0x70] sm:$0xff]  ;;  %13392 = vmatmul.mubr.bf16.gmra.mrb[40].mxu1 %v12747_v23  ;;  %v7422_v41 = vrot.slane %v7420_v8, 7  ;;  %v7428_v30 = vrot.slane %v7426_v25, 7  ;;  %v7387_v4 = vsel %vm17115_vm15, %v7382_v57, %v7386_v34  ;;  %v7409_v43 = vor.u32 %v7408_v31, %v7405_v56 }
 0x3b0   : > { %16572 = vmatprep.mubr.msk.bf16.mxu0 %vm2550_vm9, %v12709_v53  ;;  %14269 = vst.msk [vmem:[#allocation4 + $0x70] sm:$0xff] %vm2550_vm9, %v14253_v38  ;;  %v11782_v54 = vcombine.high %v19276_v13, %v19276_v13  ;;  %v7401_v18 = vsel %vm17115_vm15, %v7396_v15, %v7400_v12  ;;  %v15914_v45 = vrot.slane %v19271_v17, 9  ;;  %v12201_v24 = vrot.slane %v11758_v42, 7  ;;  %v12753_v58 = vld [vmem:[#allocation4 + $0x1d0] sm:$0xff] }
 0x3b1   : > { %v7423_v29 = vor.u32 %v7422_v41, %v7419_v44  ;;  %v15854_v7 = vld.sshfl [vmem:[#allocation2 + $0x80] sm:$0x12 pattern:$0x76325410]  ;;  %v7410_v60 = vrot.slane %v7409_v43, 2  ;;  %v7841_v0 = vcombine.low %v7387_v4, %v7401_v18  ;;  %v15915_v48 = vrot.slane %v15851_v47, 9  ;;  %13399 = vmatprep.mubr.bf16.mxu1 %v12753_v58  ;;  %v9149_v41 = vpop.permute.xlu1 %9148 }
 0x3b2   : > { %v15855_v2 = vld.sshfl [vmem:[#allocation2 + $0x84] sm:$0x12 pattern:$0x76325410]  ;;  %v12205_v49 = vrot.slane %v11766_v21, 7  ;;  %v12202_v28 = vsel %vm18007_vm8, %v15914_v45, %v12201_v24  ;;  %v15916_v22 = vrot.slane %v15852_v37, 9  ;;  %v11790_v26 = vcombine.high %v15854_v7, %v15854_v7 }
 0x3b3   : > { %v15856_v14 = vld.sshfl [vmem:[#allocation2 + $0x88] sm:$0x12 pattern:$0x76325410]  ;;  %v7424_v20 = vrot.slane %v7423_v29, 2  ;;  %v12209_v55 = vrot.slane %v11774_v63, 7  ;;  %v7415_v17 = vsel %vm17115_vm15, %v7410_v60, %v7414_v3  ;;  %v7849_v6 = vrot.slane %v7841_v0, %v17100_v16 }
 0x3b4   : > { %v12714_v46 = vld [vmem:[#allocation4 + $0x98] sm:$0xff]  ;;  %v12206_v51 = vsel %vm18007_vm8, %v15915_v48, %v12205_v49  ;;  %v15917_v50 = vrot.slane %v19276_v13, 9  ;;  %v15857_v62 = vld.sshfl [vmem:[#allocation2 + $0x8c] sm:$0x12 pattern:$0x76325410]  ;;  %v11798_v12 = vcombine.high %v15855_v2, %v15855_v2  ;;  %v11806_v56 = vcombine.high %v15856_v14, %v15856_v14  ;;  %v11456_v48 = vpop.permute.xlu0 %11455 }
 0x3b5   : > { %16573 = vmatmul.mubr.msk.bf16.gmra.mrb[68].mxu0 %vm2550_vm9, %v12714_v46  ;;  %14270 = vst.msk [vmem:[#allocation4 + $0x98] sm:$0xff] %vm2550_vm9, %v14254_v33  ;;  %v7429_v32 = vsel %vm17115_vm15, %v7424_v20, %v7428_v30  ;;  %v12210_v19 = vsel %vm18007_vm8, %v15916_v22, %v12209_v55  ;;  %v12213_v34 = vrot.slane %v11782_v54, 7  ;;  %v12459_v61 = vcombine.low %v12202_v28, %v12206_v51  ;;  %v19312_v47 = vpop.f32.mrb[4].mxu0 }
 0x3b6   : > { %v7842_v59 = vcombine.low %v7415_v17, %v7429_v32  ;;  %v19314_v37 = vpop.f32.mrb[5].mxu0  ;;  %v11814_v39 = vcombine.high %v15857_v62, %v15857_v62  ;;  %v15918_v52 = vrot.slane %v15854_v7, 9  ;;  %v16908_v36 = vld.sshfl [vmem:[#allocation2 + $0x128] sm:$0xf pattern:$0x76325410] }
 0x3b7   : > { %v12214_v13 = vsel %vm18007_vm8, %v15917_v50, %v12213_v34  ;;  %v12467_v38 = vrot.slane %v12459_v61, %v17100_v16  ;;  %v16909_v40 = vld.sshfl [vmem:[#allocation2 + $0x130] sm:$0xf pattern:$0x76325410]  ;;  %v19319_v27 = vpop.f32.mrb[6].mxu0  ;;  %v12217_v23 = vrot.slane %v11790_v26, 7 }
 0x3b8   : > { %v7856_v8 = vrot.slane %v7842_v59, %v17100_v16  ;;  %v12460_v25 = vcombine.low %v12210_v19, %v12214_v13  ;;  %v15919_v42 = vrot.slane %v15855_v2, 9  ;;  %v12221_v53 = vrot.slane %v11798_v12, 7  ;;  %v19322_v44 = vpop.f32.mrb[7].mxu0 }
 0x3b9   : > { %v15920_v57 = vrot.slane %v15856_v14, 9  ;;  %v12225_v31 = vrot.slane %v11806_v56, 7  ;;  %v15921_v3 = vrot.slane %v15857_v62, 9  ;;  %v12218_v21 = vsel %vm18007_vm8, %v15918_v52, %v12217_v23  ;;  %v19327_v63 = vpop.f32.mrb[8].mxu0 }
 0x3ba   : > { %v7857_v15 = vcombine.low %v7849_v6, %v7856_v8  ;;  %v12474_v30 = vrot.slane %v12460_v25, %v17100_v16  ;;  %v12229_v4 = vrot.slane %v11814_v39, 7  ;;  %v15626_v43 = vld.sshfl [vmem:[#allocation2 + $0x124] sm:$0x13 pattern:$0x76325410]  ;;  %v12222_v54 = vsel %vm18007_vm8, %v15919_v42, %v12221_v53  ;;  %v19333_v29 = vpop.f32.mrb[9].mxu0 }
 0x3bb   : > { %v12226_v33 = vsel %vm18007_vm8, %v15920_v57, %v12225_v31  ;;  %v15627_v18 = vld.sshfl [vmem:[#allocation2 + $0x128] sm:$0x13 pattern:$0x76325410]  ;;  %v12476_v7 = vcombine.low %v12218_v21, %v12222_v54  ;;  %v6637_v14 = vcombine.high %v15626_v43, %v15626_v43  ;;  %v19338_v58 = vpop.f32.mrb[10].mxu0  ;;  %v9539_v0 = vcombine.low %v16908_v36, %v16909_v40 }
 0x3bc   : > { %7953 = vst.msk [vmem:[#allocation4 + $0x1c8] sm:$0xff] %vm2550_vm9, %v7857_v15  ;;  %v12475_v45 = vcombine.low %v12467_v38, %v12474_v30  ;;  %v12230_v24 = vsel %vm18007_vm8, %v15921_v3, %v12229_v4  ;;  %v15628_v2 = vld.sshfl [vmem:[#allocation2 + $0x12c] sm:$0x13 pattern:$0x76325410]  ;;  %v6645_v20 = vcombine.high %v15627_v18, %v15627_v18  ;;  %v19341_v22 = vpop.f32.mrb[11].mxu0 }
 0x3bd   : > { %9185 = vst.msk [vmem:[#allocation4 + $0x1c8] sm:$0xff] %vm4430_vm10, %v9149_v41  ;;  %v12477_v60 = vcombine.low %v12226_v33, %v12230_v24  ;;  %v15629_v49 = vld.sshfl [vmem:[#allocation2 + $0x130] sm:$0x13 pattern:$0x76325410]  ;;  %v6653_v28 = vcombine.high %v15628_v2, %v15628_v2  ;;  %v12484_v55 = vrot.slane %v12476_v7, %v17100_v16  ;;  %v7431_v17 = vshrl.u32 %v15626_v43, 16 }
 0x3be   : > { %12683 = vst.msk [vmem:[#allocation4 + $0xc0] sm:$0xff] %vm2550_vm9, %v12475_v45  ;;  %v6661_v46 = vcombine.high %v15629_v49, %v15629_v49  ;;  %v7434_v6 = vshll.u32 %v15626_v43, 16  ;;  %9619 = vst.msk [vmem:[#allocation4 + $0x1f8] sm:$0xff] %vm2550_vm9, %v9539_v0  ;;  %v7440_v50 = vshll.u32 %v6637_v14, 16  ;;  %v7445_v62 = vshrl.u32 %v15627_v18, 16  ;;  %v19349_v34 = vpop.f32.mrb[12].mxu0 }
 0x3bf   : > { %v12491_v51 = vrot.slane %v12477_v60, %v17100_v16  ;;  %v7448_v32 = vshll.u32 %v15627_v18, 16  ;;  %v19347_v19 = vld.sshfl [vmem:[#allocation2 + $0x98] sm:$0x12 pattern:$0x76325410]  ;;  %11491 = vst.msk [vmem:[#allocation4 + $0x1f8] sm:$0xff] %vm4430_vm10, %v11456_v48  ;;  %v16105_v11 = vadd.f32 %v19341_v22, %v19338_v58 }
 0x3c0   : > { %v7433_v61 = vrot.slane %v7431_v17, 6  ;;  %v7436_v59 = vrot.slane %v7434_v6, 7  ;;  %v7454_v26 = vshll.u32 %v6645_v20, 16  ;;  %v7459_v12 = vshrl.u32 %v15628_v2, 16  ;;  %v19352_v56 = vpop.f32.mrb[13].mxu0  ;;  %v14256_v48 = vld [vmem:[#allocation3 + $0xd8] sm:$0xff] }
 0x3c1   : > { %v12492_v13 = vcombine.low %v12484_v55, %v12491_v51  ;;  %v7442_v38 = vrot.slane %v7440_v50, 7  ;;  %v7447_v39 = vrot.slane %v7445_v62, 6  ;;  %v7450_v52 = vrot.slane %v7448_v32, 7  ;;  %v19356_v40 = vpop.f32.mrb[14].mxu0 }
 0x3c2   : > { %v19354_v36 = vld.sshfl [vmem:[#allocation2 + $0x9c] sm:$0x12 pattern:$0x76325410]  ;;  %v7437_v8 = vor.u32 %v7436_v59, %v7433_v61  ;;  %v7456_v25 = vrot.slane %v7454_v26, 7  ;;  %v7461_v23 = vrot.slane %v7459_v12, 6  ;;  %v11822_v18 = vcombine.high %v19347_v19, %v19347_v19 }
 0x3c3   : > { %v7462_v42 = vshll.u32 %v15628_v2, 16  ;;  %v19358_v53 = vld.sshfl [vmem:[#allocation2 + $0xa0] sm:$0x12 pattern:$0x76325410]  ;;  %v19362_v31 = vpop.f32.mrb[15].mxu0  ;;  %v7451_v3 = vor.u32 %v7450_v52, %v7447_v39  ;;  %v11830_v55 = vcombine.high %v19354_v36, %v19354_v36 }
 0x3c4   : > { %v19360_v57 = vld.sshfl [vmem:[#allocation2 + $0xa4] sm:$0x12 pattern:$0x76325410]  ;;  %12684 = vst.msk [vmem:[#allocation4 + $0xe8] sm:$0xff] %vm2550_vm9, %v12492_v13  ;;  %v7468_v15 = vshll.u32 %v6653_v28, 16  ;;  %v11838_v51 = vcombine.high %v19358_v53, %v19358_v53 }
 0x3c5   : > { %v7473_v41 = vshrl.u32 %v15629_v49, 16  ;;  %v7476_v30 = vshll.u32 %v15629_v49, 16  ;;  %v19365_v21 = vpop.f32.mrb[16].mxu0  ;;  %v7438_v4 = vrot.slane %v7437_v8, 2  ;;  %v7464_v43 = vrot.slane %v7462_v42, 7  ;;  %v12752_v33 = vld [vmem:[#allocation4 + $0x1c8] sm:$0xff] }
 0x3c6   : > { %v7482_v54 = vshll.u32 %v6661_v46, 16  ;;  %v19369_v45 = vpop.f32.mrb[17].mxu0  ;;  %v12719_v24 = vld [vmem:[#allocation4 + $0xc0] sm:$0xff]  ;;  %v7452_v7 = vrot.slane %v7451_v3, 2  ;;  %v7470_v2 = vrot.slane %v7468_v15, 7  ;;  %13400 = vmatmul.mubr.bf16.gmra.mrb[44].mxu1 %v12752_v33  ;;  %v11846_v50 = vcombine.high %v19360_v57, %v19360_v57  ;;  %v12758_v32 = vld [vmem:[#allocation4 + $0x1f8] sm:$0xff] }
 0x3c7   : > { %v7475_v14 = vrot.slane %v7473_v41, 6  ;;  %v7478_v60 = vrot.slane %v7476_v30, 7  ;;  %v19371_v0 = vpop.f32.mrb[18].mxu0  ;;  %16576 = vmatprep.mubr.msk.bf16.mxu0 %vm2550_vm9, %v12719_v24  ;;  %v7443_v49 = vsel %vm17115_vm15, %v7438_v4, %v7442_v38  ;;  %v7465_v20 = vor.u32 %v7464_v43, %v7461_v23  ;;  %13407 = vmatprep.mubr.bf16.mxu1 %v12758_v32 }
 0x3c8   : > { %v7484_v28 = vrot.slane %v7482_v54, 7  ;;  %v19378_v46 = vpop.f32.mrb[19].mxu0  ;;  %v7457_v17 = vsel %vm17115_vm15, %v7452_v7, %v7456_v25  ;;  %v15862_v62 = vld.sshfl [vmem:[#allocation2 + $0xb0] sm:$0x12 pattern:$0x76325410] }
 0x3c9   : > { %v7479_v6 = vor.u32 %v7478_v60, %v7475_v14  ;;  %v19386_v61 = vpop.f32.mrb[20].mxu0  ;;  %v7466_v59 = vrot.slane %v7465_v20, 2  ;;  %v7858_v26 = vcombine.low %v7443_v49, %v7457_v17  ;;  %v15922_v12 = vrot.slane %v19347_v19, 9 }
 0x3ca   : > { %v12233_v13 = vrot.slane %v11822_v18, 7  ;;  %v15863_v38 = vld.sshfl [vmem:[#allocation2 + $0xb4] sm:$0x12 pattern:$0x76325410]  ;;  %v19389_v52 = vpop.f32.mrb[21].mxu0 }
 0x3cb   : > { %v15864_v39 = vld.sshfl [vmem:[#allocation2 + $0xb8] sm:$0x12 pattern:$0x76325410]  ;;  %v7480_v8 = vrot.slane %v7479_v6, 2  ;;  %v15923_v25 = vrot.slane %v19354_v36, 9  ;;  %v7471_v41 = vsel %vm17115_vm15, %v7466_v59, %v7470_v2  ;;  %v7866_v19 = vrot.slane %v7858_v26, %v17100_v16 }
 0x3cc   : > { %v12237_v23 = vrot.slane %v11830_v55, 7  ;;  %v15924_v42 = vrot.slane %v19358_v53, 9  ;;  %v19393_v3 = vpop.f32.mrb[22].mxu0  ;;  %v12724_v15 = vld [vmem:[#allocation4 + $0xe8] sm:$0xff]  ;;  %v12234_v30 = vsel %vm18007_vm8, %v15922_v12, %v12233_v13  ;;  %v12241_v4 = vrot.slane %v11838_v51, 7 }
 0x3cd   : > { %v15865_v43 = vld.sshfl [vmem:[#allocation2 + $0xbc] sm:$0x12 pattern:$0x76325410]  ;;  %16577 = vmatmul.mubr.msk.bf16.gmra.mrb[72].mxu0 %vm2550_vm9, %v12724_v15  ;;  %14272 = vst.msk [vmem:[#allocation4 + $0xe8] sm:$0xff] %vm2550_vm9, %v14256_v48  ;;  %v7485_v36 = vsel %vm17115_vm15, %v7480_v8, %v7484_v28  ;;  %v15925_v54 = vrot.slane %v19360_v57, 9  ;;  %v11854_v2 = vcombine.high %v15862_v62, %v15862_v62  ;;  %v11862_v48 = vcombine.high %v15863_v38, %v15863_v38 }
 0x3ce   : > { %v12238_v53 = vsel %vm18007_vm8, %v15923_v25, %v12237_v23  ;;  %v12245_v33 = vrot.slane %v11846_v50, 7  ;;  %v7859_v18 = vcombine.low %v7471_v41, %v7485_v36  ;;  %v12242_v24 = vsel %vm18007_vm8, %v15924_v42, %v12241_v4  ;;  %v19409_v14 = vpop.f32.mrb[23].mxu0  ;;  %v16910_v28 = vld.sshfl [vmem:[#allocation2 + $0x140] sm:$0xf pattern:$0x76325410]  ;;  %v9151_v23 = vpop.permute.xlu1 %9150 }
 0x3cf   : > { %v12493_v7 = vcombine.low %v12234_v30, %v12238_v53  ;;  %v11870_v49 = vcombine.high %v15864_v39, %v15864_v39  ;;  %v11878_v20 = vcombine.high %v15865_v43, %v15865_v43  ;;  %v19413_v55 = vpop.f32.mrb[24].mxu0  ;;  %v15926_v51 = vrot.slane %v15862_v62, 9  ;;  %v16911_v50 = vld.sshfl [vmem:[#allocation2 + $0x148] sm:$0xf pattern:$0x76325410] }
 0x3d0   : > { %v12246_v60 = vsel %vm18007_vm8, %v15925_v54, %v12245_v33  ;;  %v7873_v57 = vrot.slane %v7859_v18, %v17100_v16  ;;  %v19417_v32 = vpop.f32.mrb[25].mxu0  ;;  %v12249_v59 = vrot.slane %v11854_v2, 7  ;;  %v15927_v26 = vrot.slane %v15863_v38, 9 }
 0x3d1   : > { %v12494_v17 = vcombine.low %v12242_v24, %v12246_v60  ;;  %v12501_v6 = vrot.slane %v12493_v7, %v17100_v16  ;;  %v12253_v12 = vrot.slane %v11862_v48, 7  ;;  %v15928_v13 = vrot.slane %v15864_v39, 9  ;;  %v19419_v8 = vpop.f32.mrb[26].mxu0 }
 0x3d2   : > { %v7874_v25 = vcombine.low %v7866_v19, %v7873_v57  ;;  %v12257_v15 = vrot.slane %v11870_v49, 7  ;;  %v15929_v41 = vrot.slane %v15865_v43, 9  ;;  %v15630_v30 = vld.sshfl [vmem:[#allocation2 + $0x13c] sm:$0x13 pattern:$0x76325410]  ;;  %v12250_v4 = vsel %vm18007_vm8, %v15926_v51, %v12249_v59 }
 0x3d3   : > { %v12508_v42 = vrot.slane %v12494_v17, %v17100_v16  ;;  %v12254_v62 = vsel %vm18007_vm8, %v15927_v26, %v12253_v12  ;;  %v12261_v36 = vrot.slane %v11878_v20, 7  ;;  %v15631_v53 = vld.sshfl [vmem:[#allocation2 + $0x140] sm:$0x13 pattern:$0x76325410]  ;;  %v19426_v38 = vpop.f32.mrb[27].mxu0  ;;  %v6669_v7 = vcombine.high %v15630_v30, %v15630_v30  ;;  %v11458_v17 = vpop.permute.xlu0 %11457 }
 0x3d4   : > { %7954 = vst.msk [vmem:[#allocation4 + $0x1f0] sm:$0xff] %vm2550_vm9, %v7874_v25  ;;  %v12258_v19 = vsel %vm18007_vm8, %v15928_v13, %v12257_v15  ;;  %v12510_v54 = vcombine.low %v12250_v4, %v12254_v62  ;;  %v15632_v33 = vld.sshfl [vmem:[#allocation2 + $0x144] sm:$0x13 pattern:$0x76325410]  ;;  %v19431_v43 = vpop.f32.mrb[28].mxu0  ;;  %v6677_v2 = vcombine.high %v15631_v53, %v15631_v53  ;;  %v9556_v57 = vcombine.low %v16910_v28, %v16911_v50 }
 0x3d5   : > { %v12509_v39 = vcombine.low %v12501_v6, %v12508_v42  ;;  %9186 = vst.msk [vmem:[#allocation4 + $0x1f0] sm:$0xff] %vm4430_vm10, %v9151_v23  ;;  %v12262_v18 = vsel %vm18007_vm8, %v15929_v41, %v12261_v36  ;;  %v15633_v24 = vld.sshfl [vmem:[#allocation2 + $0x148] sm:$0x13 pattern:$0x76325410]  ;;  %v6685_v60 = vcombine.high %v15632_v33, %v15632_v33  ;;  %v19436_v48 = vpop.f32.mrb[29].mxu0  ;;  %v19802_v22 = vadd.f32 %v19389_v52, %v19386_v61 }
 0x3d6   : > { %20808 = vst [vmem:[#allocation5_spill] sm:$0xff] %v19436_v48  ;;  %v12511_v49 = vcombine.low %v12258_v19, %v12262_v18  ;;  %v12518_v20 = vrot.slane %v12510_v54, %v17100_v16  ;;  %v6693_v6 = vcombine.high %v15633_v24, %v15633_v24  ;;  %v19440_v51 = vpop.f32.mrb[30].mxu0  ;;  %v7487_v59 = vshrl.u32 %v15630_v30, 16  ;;  %9620 = vst.msk [vmem:[#allocation4 + $0x220] sm:$0xff] %vm2550_vm9, %v9556_v57  ;;  %v14257_v50 = vld [vmem:[#allocation3 + $0xf0] sm:$0xff] }
 0x3d7   : > { %12685 = vst.msk [vmem:[#allocation4 + $0x110] sm:$0xff] %vm2550_vm9, %v12509_v39  ;;  %20809 = vst [vmem:[#allocation6_spill] sm:$0xff] %v19440_v51  ;;  %v7490_v26 = vshll.u32 %v15630_v30, 16  ;;  %v7496_v12 = vshll.u32 %v6669_v7, 16  ;;  %v7501_v13 = vshrl.u32 %v15631_v53, 16  ;;  %v19444_v23 = vpop.f32.mrb[31].mxu0  ;;  %v19818_v61 = vadd.f32 %v19409_v14, %v19393_v3 }
 0x3d8   : > { %v19442_v25 = vld.sshfl [vmem:[#allocation2 + $0xc8] sm:$0x12 pattern:$0x76325410]  ;;  %20810 = vst [vmem:[#allocation7_spill] sm:$0xff] %v19444_v23  ;;  %v12525_v42 = vrot.slane %v12511_v49, %v17100_v16  ;;  %v7504_v15 = vshll.u32 %v15631_v53, 16  ;;  %v16126_v52 = vadd.f32 %v19417_v32, %v19413_v55 }
 0x3d9   : > { %v7510_v41 = vshll.u32 %v6677_v2, 16  ;;  %v7515_v4 = vshrl.u32 %v15632_v33, 16  ;;  %v19448_v28 = vpop.f32.mrb[32].mxu0  ;;  %11492 = vst.msk [vmem:[#allocation4 + $0x220] sm:$0xff] %vm4430_vm10, %v11458_v17  ;;  %v7489_v62 = vrot.slane %v7487_v59, 6  ;;  %v7492_v30 = vrot.slane %v7490_v26, 7 }
 0x3da   : > { %20811 = vst [vmem:[#allocation8_spill] sm:$0xff] %v19448_v28  ;;  %v7498_v36 = vrot.slane %v7496_v12, 7  ;;  %v7503_v39 = vrot.slane %v7501_v13, 6  ;;  %v19453_v54 = vpop.f32.mrb[33].mxu0  ;;  %v12526_v18 = vcombine.low %v12518_v20, %v12525_v42  ;;  %v7506_v7 = vrot.slane %v7504_v15, 7  ;;  %v16785_v55 = vld [vmem:[%s20795_s3 + $0x48] sm:$0xff]  }
 0x3db   : > { %v19451_v19 = vld.sshfl [vmem:[#allocation2 + $0xcc] sm:$0x12 pattern:$0x76325410]  ;;  %20812 = vst [vmem:[#allocation9_spill] sm:$0xff] %v19453_v54  ;;  %v7512_v49 = vrot.slane %v7510_v41, 7  ;;  %v7493_v23 = vor.u32 %v7492_v30, %v7489_v62  ;;  %v11886_v15 = vcombine.high %v19442_v25, %v19442_v25 }
 0x3dc   : > { %v7517_v57 = vrot.slane %v7515_v4, 6  ;;  %v19455_v53 = vld.sshfl [vmem:[#allocation2 + $0xd0] sm:$0x12 pattern:$0x76325410]  ;;  %v19459_v28 = vpop.f32.mrb[34].mxu0  ;;  %v7507_v13 = vor.u32 %v7506_v7, %v7503_v39  ;;  %v11894_v39 = vcombine.high %v19451_v19, %v19451_v19 }
 0x3dd   : > { %v19457_v2 = vld.sshfl [vmem:[#allocation2 + $0xd4] sm:$0x12 pattern:$0x76325410]  ;;  %20813 = vst [vmem:[#allocation10_spill] sm:$0xff] %v19459_v28  ;;  %v7518_v17 = vshll.u32 %v15632_v33, 16 }
 0x3de   : > { %v7524_v59 = vshll.u32 %v6685_v60, 16  ;;  %v7529_v26 = vshrl.u32 %v15633_v24, 16  ;;  %v19461_v12 = vpop.f32.mrb[35].mxu0  ;;  %12686 = vst.msk [vmem:[#allocation4 + $0x138] sm:$0xff] %vm2550_vm9, %v12526_v18  ;;  %v7532_v54 = vshll.u32 %v15633_v24, 16  ;;  %v7538_v20 = vshll.u32 %v6693_v6, 16 }
 0x3df   : > { %20814 = vst [vmem:[#allocation11_spill] sm:$0xff] %v19461_v12  ;;  %v12757_v42 = vld [vmem:[#allocation4 + $0x1f0] sm:$0xff]  ;;  %v19466_v41 = vpop.f32.mrb[36].mxu0  ;;  %v7494_v51 = vrot.slane %v7493_v23, 2  ;;  %v7520_v28 = vrot.slane %v7518_v17, 7  ;;  %v7508_v24 = vrot.slane %v7507_v13, 2 }
 0x3e0   : > { %20815 = vst [vmem:[#allocation12_spill] sm:$0xff] %v19466_v41  ;;  %v12729_v4 = vld [vmem:[#allocation4 + $0x110] sm:$0xff]  ;;  %v7526_v62 = vrot.slane %v7524_v59, 7  ;;  %v7531_v33 = vrot.slane %v7529_v26, 6  ;;  %13408 = vmatmul.mubr.bf16.gmra.mrb[48].mxu1 %v12757_v42  ;;  %v19468_v60 = vpop.f32.mrb[37].mxu0  ;;  %v7534_v6 = vrot.slane %v7532_v54, 7  ;;  %v11902_v59 = vcombine.high %v19455_v53, %v19455_v53 }
 0x3e1   : > { %20816 = vst [vmem:[#allocation13_spill] sm:$0xff] %v19468_v60  ;;  %16580 = vmatprep.mubr.msk.bf16.mxu0 %vm2550_vm9, %v12729_v4  ;;  %14273 = vst.msk [vmem:[#allocation4 + $0x110] sm:$0xff] %vm2550_vm9, %v14257_v50  ;;  %v7540_v30 = vrot.slane %v7538_v20, 7  ;;  %v19474_v18 = vpop.f32.mrb[38].mxu0  ;;  %v14258_v7 = vld [vmem:[#allocation3 + $0xf8] sm:$0xff]  ;;  %v7499_v23 = vsel %vm17115_vm15, %v7494_v51, %v7498_v36  ;;  %v7521_v17 = vor.u32 %v7520_v28, %v7517_v57  ;;  %v15930_v20 = vrot.slane %v19442_v25, 9 }
 0x3e2   : > { %20817 = vst [vmem:[#allocation14_spill] sm:$0xff] %v19474_v18  ;;  %v11910_v26 = vcombine.high %v19457_v2, %v19457_v2  ;;  %v19482_v50 = vpop.f32.mrb[39].mxu0  ;;  %v7513_v54 = vsel %vm17115_vm15, %v7508_v24, %v7512_v49  ;;  %v7535_v13 = vor.u32 %v7534_v6, %v7531_v33  ;;  %v12265_v42 = vrot.slane %v11886_v15, 7  ;;  %v12763_v51 = vld [vmem:[#allocation4 + $0x220] sm:$0xff]  ;;  %v16786_v32 = vld [vmem:[%s20795_s3 + $0x8] sm:$0xff]  }
 0x3e3   : > { %20818 = vst [vmem:[#allocation15_spill] sm:$0xff] %v19482_v50  ;;  %v15870_v4 = vld.sshfl [vmem:[#allocation2 + $0xe0] sm:$0x12 pattern:$0x76325410]  ;;  %v19487_v28 = vpop.f32.mrb[40].mxu0  ;;  %v7875_v57 = vcombine.low %v7499_v23, %v7513_v54  ;;  %13415 = vmatprep.mubr.bf16.mxu1 %v12763_v51 }
 0x3e4   : > { %v15871_v18 = vld.sshfl [vmem:[#allocation2 + $0xe4] sm:$0x12 pattern:$0x76325410]  ;;  %20819 = vst [vmem:[#allocation16_spill] sm:$0xff] %v19487_v28  ;;  %v7522_v36 = vrot.slane %v7521_v17, 2  ;;  %v12266_v49 = vsel %vm18007_vm8, %v15930_v20, %v12265_v42 }
 0x3e5   : > { %v15872_v60 = vld.sshfl [vmem:[#allocation2 + $0xe8] sm:$0x12 pattern:$0x76325410]  ;;  %v15931_v41 = vrot.slane %v19451_v19, 9  ;;  %v12269_v12 = vrot.slane %v11894_v39, 7  ;;  %v7883_v23 = vrot.slane %v7875_v57, %v17100_v16 }
 0x3e6   : > { %v19490_v50 = vpop.f32.mrb[41].mxu0  ;;  %v7536_v48 = vrot.slane %v7535_v13, 2  ;;  %v15932_v25 = vrot.slane %v19455_v53, 9  ;;  %v12273_v15 = vrot.slane %v11902_v59, 7  ;;  %v12734_v24 = vld [vmem:[#allocation4 + $0x138] sm:$0xff]  ;;  %v7527_v6 = vsel %vm17115_vm15, %v7522_v36, %v7526_v62 }
 0x3e7   : > { %20820 = vst [vmem:[#allocation17_spill] sm:$0xff] %v19490_v50  ;;  %v19495_v33 = vpop.f32.mrb[42].mxu0  ;;  %v12270_v19 = vsel %vm18007_vm8, %v15931_v41, %v12269_v12  ;;  %v15933_v39 = vrot.slane %v19457_v2, 9  ;;  %16581 = vmatmul.mubr.msk.bf16.gmra.mrb[76].mxu0 %vm2550_vm9, %v12734_v24  ;;  %14274 = vst.msk [vmem:[#allocation4 + $0x138] sm:$0xff] %vm2550_vm9, %v14258_v7  ;;  %v12277_v54 = vrot.slane %v11910_v26, 7  ;;  %v11918_v41 = vcombine.high %v15870_v4, %v15870_v4 }
 0x3e8   : > { %20821 = vst [vmem:[#allocation18_spill] sm:$0xff] %v19495_v33  ;;  %v15873_v17 = vld.sshfl [vmem:[#allocation2 + $0xec] sm:$0x12 pattern:$0x76325410]  ;;  %v7541_v53 = vsel %vm17115_vm15, %v7536_v48, %v7540_v30  ;;  %v12274_v59 = vsel %vm18007_vm8, %v15932_v25, %v12273_v15  ;;  %v12527_v62 = vcombine.low %v12266_v49, %v12270_v19  ;;  %v19509_v42 = vpop.f32.mrb[43].mxu0  ;;  %v11926_v2 = vcombine.high %v15871_v18, %v15871_v18 }
 0x3e9   : > { %v16912_v13 = vld.sshfl [vmem:[#allocation2 + $0x158] sm:$0xf pattern:$0x76325410]  ;;  %20822 = vst [vmem:[#allocation19_spill] sm:$0xff] %v19509_v42  ;;  %v7876_v12 = vcombine.low %v7527_v6, %v7541_v53  ;;  %v11934_v51 = vcombine.high %v15872_v60, %v15872_v60  ;;  %v19511_v36 = vpop.f32.mrb[44].mxu0  ;;  %v12278_v7 = vsel %vm18007_vm8, %v15933_v39, %v12277_v54  ;;  %v11942_v30 = vcombine.high %v15873_v17, %v15873_v17  ;;  %v9153_v54 = vpop.permute.xlu1 %9152 }
 0x3ea   : > { %v16913_v20 = vld.sshfl [vmem:[#allocation2 + $0x160] sm:$0xf pattern:$0x76325410]  ;;  %20823 = vst [vmem:[#allocation20_spill] sm:$0xff] %v19511_v36  ;;  %v12535_v48 = vrot.slane %v12527_v62, %v17100_v16  ;;  %v15934_v57 = vrot.slane %v15870_v4, 9  ;;  %v12528_v49 = vcombine.low %v12274_v59, %v12278_v7 }
 0x3eb   : > { %v19516_v25 = vpop.f32.mrb[45].mxu0  ;;  %v7890_v26 = vrot.slane %v7876_v12, %v17100_v16  ;;  %v12281_v15 = vrot.slane %v11918_v41, 7  ;;  %v15935_v24 = vrot.slane %v15871_v18, 9  ;;  %v12285_v19 = vrot.slane %v11926_v2, 7 }
 0x3ec   : > { %20824 = vst [vmem:[#allocation21_spill] sm:$0xff] %v19516_v25  ;;  %v19519_v6 = vpop.f32.mrb[46].mxu0  ;;  %v15936_v53 = vrot.slane %v15872_v60, 9  ;;  %v12289_v42 = vrot.slane %v11934_v51, 7  ;;  %v15937_v36 = vrot.slane %v15873_v17, 9  ;;  %v12542_v4 = vrot.slane %v12528_v49, %v17100_v16 }
 0x3ed   : > { %20825 = vst [vmem:[#allocation22_spill] sm:$0xff] %v19519_v6  ;;  %v15634_v33 = vld.sshfl [vmem:[#allocation2 + $0x154] sm:$0x13 pattern:$0x76325410]  ;;  %v19521_v50 = vpop.f32.mrb[47].mxu0  ;;  %v7891_v39 = vcombine.low %v7883_v23, %v7890_v26  ;;  %v12282_v62 = vsel %vm18007_vm8, %v15934_v57, %v12281_v15  ;;  %v12286_v60 = vsel %vm18007_vm8, %v15935_v24, %v12285_v19  ;;  %v9573_v15 = vcombine.low %v16912_v13, %v16913_v20  ;;  %v11460_v24 = vpop.permute.xlu0 %11459 }
 0x3ee   : > { %20826 = vst [vmem:[#allocation23_spill] sm:$0xff] %v19521_v50  ;;  %v12293_v12 = vrot.slane %v11942_v30, 7  ;;  %v15635_v59 = vld.sshfl [vmem:[#allocation2 + $0x158] sm:$0x13 pattern:$0x76325410]  ;;  %v12290_v17 = vsel %vm18007_vm8, %v15936_v53, %v12289_v42  ;;  %v12543_v51 = vcombine.low %v12535_v48, %v12542_v4  ;;  %v12544_v30 = vcombine.low %v12282_v62, %v12286_v60 }
 0x3ef   : > { %v15636_v41 = vld.sshfl [vmem:[#allocation2 + $0x15c] sm:$0x13 pattern:$0x76325410]  ;;  %v19526_v18 = vpop.f32.mrb[48].mxu0  ;;  %7955 = vst.msk [vmem:[#allocation4 + $0x218] sm:$0xff] %vm2550_vm9, %v7891_v39  ;;  %v6701_v57 = vcombine.high %v15634_v33, %v15634_v33  ;;  %v6709_v42 = vcombine.high %v15635_v59, %v15635_v59 }
 0x3f0   : > { %20827 = vst [vmem:[#allocation24_spill] sm:$0xff] %v19526_v18  ;;  %v19532_v2 = vld.sshfl [vmem:[#allocation2 + $0x160] sm:$0x13 pattern:$0x76325410]  ;;  %v19534_v23 = vpop.f32.mrb[49].mxu0  ;;  %v12294_v7 = vsel %vm18007_vm8, %v15937_v36, %v12293_v12  ;;  %v6717_v19 = vcombine.high %v15636_v41, %v15636_v41  ;;  %v12552_v48 = vrot.slane %v12544_v30, %v17100_v16 }
 0x3f1   : > { %20828 = vst [vmem:[#allocation25_spill] sm:$0xff] %v19534_v23  ;;  %v19539_v26 = vpop.f32.mrb[50].mxu0  ;;  %9187 = vst.msk [vmem:[#allocation4 + $0x218] sm:$0xff] %vm4430_vm10, %v9153_v54  ;;  %v12545_v49 = vcombine.low %v12290_v17, %v12294_v7  ;;  %v6725_v36 = vcombine.high %v19532_v2, %v19532_v2  ;;  %v7543_v39 = vshrl.u32 %v15634_v33, 16  ;;  %v7546_v4 = vshll.u32 %v15634_v33, 16 }
 0x3f2   : > { %20829 = vst [vmem:[#allocation26_spill] sm:$0xff] %v19539_v26  ;;  %v19542_v53 = vpop.f32.mrb[51].mxu0  ;;  %12687 = vst.msk [vmem:[#allocation4 + $0x160] sm:$0xff] %vm2550_vm9, %v12543_v51  ;;  %v7552_v13 = vshll.u32 %v6701_v57, 16  ;;  %v7557_v20 = vshrl.u32 %v15635_v59, 16  ;;  %v7560_v12 = vshll.u32 %v15635_v59, 16 }
 0x3f3   : > { %20830 = vst [vmem:[#allocation27_spill] sm:$0xff] %v19542_v53  ;;  %v19548_v62 = vpop.f32.mrb[52].mxu0  ;;  %v12559_v54 = vrot.slane %v12545_v49, %v17100_v16  ;;  %9621 = vst.msk [vmem:[#allocation4 + $0x248] sm:$0xff] %vm2550_vm9, %v9573_v15  ;;  %v7545_v51 = vrot.slane %v7543_v39, 6  ;;  %v7548_v7 = vrot.slane %v7546_v4, 7  ;;  %v7566_v30 = vshll.u32 %v6709_v42, 16 }
 0x3f4   : > { %20831 = vst [vmem:[#allocation28_spill] sm:$0xff] %v19548_v62  ;;  %v19552_v60 = vld.sshfl [vmem:[#allocation2 + $0xf8] sm:$0x12 pattern:$0x76325410]  ;;  %v19554_v17 = vpop.f32.mrb[53].mxu0 }
 0x3f5   : > { %20832 = vst [vmem:[#allocation29_spill] sm:$0xff] %v19554_v17  ;;  %11493 = vst.msk [vmem:[#allocation4 + $0x248] sm:$0xff] %vm4430_vm10, %v11460_v24  ;;  %v7571_v53 = vshrl.u32 %v15636_v41, 16  ;;  %v19557_v33 = vpop.f32.mrb[54].mxu0  ;;  %v12560_v62 = vcombine.low %v12552_v48, %v12559_v54  ;;  %v7554_v26 = vrot.slane %v7552_v13, 7  ;;  %v7559_v49 = vrot.slane %v7557_v20, 6 }
 0x3f6   : > { %20833 = vst [vmem:[#allocation30_spill] sm:$0xff] %v19557_v33  ;;  %v7562_v23 = vrot.slane %v7560_v12, 7  ;;  %v19559_v15 = vld.sshfl [vmem:[#allocation2 + $0xfc] sm:$0x12 pattern:$0x76325410]  ;;  %v7549_v59 = vor.u32 %v7548_v7, %v7545_v51  ;;  %v11950_v51 = vcombine.high %v19552_v60, %v19552_v60 }
 0x3f7   : > { %v19561_v57 = vpop.f32.mrb[55].mxu0  ;;  %v7568_v18 = vrot.slane %v7566_v30, 7  ;;  %v7573_v50 = vrot.slane %v7571_v53, 6  ;;  %v7574_v17 = vshll.u32 %v15636_v41, 16  ;;  %12688 = vst.msk [vmem:[#allocation4 + $0x188] sm:$0xff] %vm2550_vm9, %v12560_v62  ;;  %v7580_v39 = vshll.u32 %v6717_v19, 16 }
 0x3f8   : > { %20834 = vst [vmem:[#allocation31_spill] sm:$0xff] %v19561_v57  ;;  %v19563_v6 = vld.sshfl [vmem:[#allocation2 + $0x100] sm:$0x12 pattern:$0x76325410]  ;;  %v19567_v42 = vpop.f32.mrb[56].mxu0  ;;  %v7563_v48 = vor.u32 %v7562_v23, %v7559_v49 }
 0x3f9   : > { %v19565_v24 = vld.sshfl [vmem:[#allocation2 + $0x104] sm:$0x12 pattern:$0x76325410]  ;;  %20835 = vst [vmem:[#allocation32_spill] sm:$0xff] %v19567_v42  ;;  %v7585_v4 = vshrl.u32 %v19532_v2, 16 }
 0x3fa   : > { %v7588_v54 = vshll.u32 %v19532_v2, 16  ;;  %v19572_v13 = vpop.f32.mrb[57].mxu0  ;;  %v7550_v20 = vrot.slane %v7549_v59, 2  ;;  %v7576_v12 = vrot.slane %v7574_v17, 7  ;;  %v7594_v53 = vshll.u32 %v6725_v36, 16  ;;  %v12762_v41 = vld [vmem:[#allocation4 + $0x218] sm:$0xff] }
 0x3fb   : > { %20836 = vst [vmem:[#allocation33_spill] sm:$0xff] %v19572_v13  ;;  %v19576_v7 = vpop.f32.mrb[0].mxu1  ;;  %v19578_v30 = vpop.f32.mrb[58].mxu0  ;;  %v12739_v62 = vld [vmem:[#allocation4 + $0x160] sm:$0xff]  ;;  %v7564_v23 = vrot.slane %v7563_v48, 2  ;;  %v7582_v19 = vrot.slane %v7580_v39, 7  ;;  %13416 = vmatmul.mubr.bf16.gmra.mrb[52].mxu1 %v12762_v41  ;;  %v11958_v13 = vcombine.high %v19559_v15, %v19559_v15 }
 0x3fc   : > { %20837 = vst [vmem:[#allocation34_spill] sm:$0xff] %v19576_v7  ;;  %20838 = vst [vmem:[#allocation35_spill] sm:$0xff] %v19578_v30  ;;  %v7587_v49 = vrot.slane %v7585_v4, 6  ;;  %v7590_v42 = vrot.slane %v7588_v54, 7  ;;  %v19580_v2 = vpop.f32.mrb[1].mxu1  ;;  %16584 = vmatprep.mubr.msk.bf16.mxu0 %vm2550_vm9, %v12739_v62  ;;  %v7555_v36 = vsel %vm17115_vm15, %v7550_v20, %v7554_v26  ;;  %v7577_v17 = vor.u32 %v7576_v12, %v7573_v50  ;;  %v19589_v30 = vpop.f32.mrb[59].mxu0 }
 0x3fd   : > { %20839 = vst [vmem:[#allocation36_spill] sm:$0xff] %v19580_v2  ;;  %v7596_v59 = vrot.slane %v7594_v53, 7  ;;  %v19587_v57 = vpop.f32.mrb[2].mxu1  ;;  %20841 = vst [vmem:[#allocation38_spill] sm:$0xff] %v19589_v30  ;;  %v7569_v48 = vsel %vm17115_vm15, %v7564_v23, %v7568_v18  ;;  %v11966_v4 = vcombine.high %v19563_v6, %v19563_v6  ;;  %v11974_v54 = vcombine.high %v19565_v24, %v19565_v24  ;;  %v12768_v50 = vld [vmem:[#allocation4 + $0x248] sm:$0xff]  ;;  %v19601_v12 = vpop.f32.mrb[60].mxu0 }
 0x3fe   : > { %20840 = vst [vmem:[#allocation37_spill] sm:$0xff] %v19587_v57  ;;  %v7591_v39 = vor.u32 %v7590_v42, %v7587_v49  ;;  %v19597_v26 = vld.sshfl [vmem:[#allocation2 + $0x110] sm:$0x12 pattern:$0x76325410]  ;;  %v19599_v20 = vpop.f32.mrb[3].mxu1  ;;  %v7892_v62 = vcombine.low %v7555_v36, %v7569_v48  ;;  %13423 = vmatprep.mubr.bf16.mxu1 %v12768_v50 }
 0x3ff   : > { %20842 = vst [vmem:[#allocation39_spill] sm:$0xff] %v19599_v20  ;;  %20843 = vst [vmem:[#allocation40_spill] sm:$0xff] %v19601_v12  ;;  %v14260_v53 = vld [vmem:[#allocation3 + $0x158] sm:$0xff]  ;;  %v7578_v41 = vrot.slane %v7577_v17, 2  ;;  %v15938_v30 = vrot.slane %v19552_v60, 9  ;;  %v12297_v18 = vrot.slane %v11950_v51, 7 }
 0x400   : > { %v15879_v42 = vld.sshfl [vmem:[#allocation2 + $0x114] sm:$0x12 pattern:$0x76325410]  ;;  %v19608_v33 = vpop.f32.mrb[61].mxu0  ;;  %v7592_v25 = vrot.slane %v7591_v39, 2  ;;  %v7900_v51 = vrot.slane %v7892_v62, %v17100_v16 }
 0x401   : > { %v19604_v23 = vld.sshfl [vmem:[#allocation2 + $0x118] sm:$0x12 pattern:$0x76325410]  ;;  %20844 = vst [vmem:[#allocation41_spill] sm:$0xff] %v19608_v33  ;;  %v15939_v28 = vrot.slane %v19559_v15, 9  ;;  %v7583_v60 = vsel %vm17115_vm15, %v7578_v41, %v7582_v19  ;;  %v12298_v17 = vsel %vm18007_vm8, %v15938_v30, %v12297_v18  ;;  %v11982_v41 = vcombine.high %v19597_v26, %v19597_v26 }
 0x402   : > { %v19606_v49 = vld.sshfl [vmem:[#allocation2 + $0x11c] sm:$0x12 pattern:$0x76325410]  ;;  %v12301_v20 = vrot.slane %v11958_v13, 7  ;;  %v15940_v12 = vrot.slane %v19563_v6, 9  ;;  %v7597_v6 = vsel %vm17115_vm15, %v7592_v25, %v7596_v59  ;;  %v11990_v62 = vcombine.high %v15879_v42, %v15879_v42 }
 0x403   : > { %v19612_v57 = vpop.f32.mrb[62].mxu0  ;;  %v12744_v36 = vld [vmem:[#allocation4 + $0x188] sm:$0xff]  ;;  %v12305_v48 = vrot.slane %v11966_v4, 7  ;;  %v15941_v13 = vrot.slane %v19565_v24, 9  ;;  %v12309_v19 = vrot.slane %v11974_v54, 7  ;;  %v7893_v39 = vcombine.low %v7583_v60, %v7597_v6  ;;  %v16784_v60 = vld [vmem:[%s20795_s3] sm:$0xff]  }
 0x404   : > { %20845 = vst [vmem:[#allocation42_spill] sm:$0xff] %v19612_v57  ;;  %v19619_v50 = vpop.f32.mrb[63].mxu0  ;;  %16585 = vmatmul.mubr.msk.bf16.gmra.mrb[80].mxu0 %vm2550_vm9, %v12744_v36  ;;  %14276 = vst.msk [vmem:[#allocation4 + $0x188] sm:$0xff] %vm2550_vm9, %v14260_v53  ;;  %v12302_v15 = vsel %vm18007_vm8, %v15939_v28, %v12301_v20  ;;  %v11998_v25 = vcombine.high %v19604_v23, %v19604_v23  ;;  %v12006_v28 = vcombine.high %v19606_v49, %v19606_v49  ;;  %v16783_v36 = vld [vmem:[%s20795_s3 + $0x40] sm:$0xff]  }
 0x405   : > { %20846 = vst [vmem:[#allocation43_spill] sm:$0xff] %v19619_v50  ;;  %v12306_v30 = vsel %vm18007_vm8, %v15940_v12, %v12305_v48  ;;  %v12561_v4 = vcombine.low %v12298_v17, %v12302_v15  ;;  %v12310_v53 = vsel %vm18007_vm8, %v15941_v13, %v12309_v19  ;;  %v16914_v24 = vld.sshfl [vmem:[#allocation2 + $0x170] sm:$0xf pattern:$0x76325410]  ;;  %v7907_v54 = vrot.slane %v7893_v39, %v17100_v16  ;;  %v13895_v17 = vld [vmem:[#allocation3 + $0x20] sm:$0xff]  ;;  %v9155_v39 = vpop.permute.xlu1 %9154 }
 0x406   : > { %v16915_v59 = vld.sshfl [vmem:[#allocation2 + $0x178] sm:$0xf pattern:$0x76325410]  ;;  %v12562_v20 = vcombine.low %v12306_v30, %v12310_v53  ;;  %v15942_v18 = vrot.slane %v19597_v26, 9  ;;  %v12313_v48 = vrot.slane %v11982_v41, 7  ;;  %13927 = vrot.lane.b32.xlu0 %v13895_v17, %s16926_s25  ;;  %16316 = vmatprep.subr.bf16.mxu1 %v16783_v36 }
 0x407   : > { %v12569_v12 = vrot.slane %v12561_v4, %v17100_v16  ;;  %v15943_v6 = vrot.slane %v15879_v42, 9  ;;  %v12317_v15 = vrot.slane %v11990_v62, 7  ;;  %v15944_v13 = vrot.slane %v19604_v23, 9  ;;  %v13765_v19 = vld [vmem:[#allocation3 + $0x8] sm:$0xff]  ;;  %13750 = vst.msk [vmem:[#allocation4 + $0x50] sm:$0xff] %vm2550_vm9, %v13895_v17  ;;  %16317 = vmatpush3.bf16.msra.mxu1 %v16784_v60  ;;  %v20855_v3 = vld [vmem:[#allocation39_spill] sm:$0xff] }
 0x408   : > { %v7908_v26 = vcombine.low %v7900_v51, %v7907_v54  ;;  %v12576_v30 = vrot.slane %v12562_v20, %v17100_v16  ;;  %v12321_v4 = vrot.slane %v11998_v25, 7  ;;  %v15945_v53 = vrot.slane %v19606_v49, 9  ;;  %v15638_v50 = vld.sshfl [vmem:[#allocation2 + $0x16c] sm:$0x13 pattern:$0x76325410]  ;;  %13797 = vrot.lane.b32.xlu1 %v13765_v19, %s16926_s25  ;;  %16318 = vmatprep.subr.bf16.mxu1 %v16785_v55 }
 0x409   : > { %13749 = vst.msk [vmem:[#allocation4 + $0x28] sm:$0xff] %vm2550_vm9, %v13765_v19  ;;  %v12314_v42 = vsel %vm18007_vm8, %v15942_v18, %v12313_v48  ;;  %v12318_v23 = vsel %vm18007_vm8, %v15943_v6, %v12317_v15  ;;  %v12325_v41 = vrot.slane %v12006_v28, 7  ;;  %v15639_v51 = vld.sshfl [vmem:[#allocation2 + $0x170] sm:$0x13 pattern:$0x76325410]  ;;  %v6733_v36 = vcombine.high %v15638_v50, %v15638_v50  ;;  %v11462_v6 = vpop.permute.xlu0 %11461 }
 0x40a   : > { %7956 = vst.msk [vmem:[#allocation4 + $0x240] sm:$0xff] %vm2550_vm9, %v7908_v26  ;;  %v12577_v62 = vcombine.low %v12569_v12, %v12576_v30  ;;  %v12322_v49 = vsel %vm18007_vm8, %v15944_v13, %v12321_v4  ;;  %v12578_v25 = vcombine.low %v12314_v42, %v12318_v23  ;;  %v15640_v54 = vld.sshfl [vmem:[#allocation2 + $0x174] sm:$0x13 pattern:$0x76325410]  ;;  %v6741_v17 = vcombine.high %v15639_v51, %v15639_v51 }
 0x40b   : > { %9188 = vst.msk [vmem:[#allocation4 + $0x240] sm:$0xff] %vm4430_vm10, %v9155_v39  ;;  %v12326_v20 = vsel %vm18007_vm8, %v15945_v53, %v12325_v41  ;;  %v15641_v18 = vld.sshfl [vmem:[#allocation2 + $0x178] sm:$0x13 pattern:$0x76325410]  ;;  %v6749_v48 = vcombine.high %v15640_v54, %v15640_v54  ;;  %v9590_v12 = vcombine.low %v16914_v24, %v16915_v59  ;;  %v7599_v13 = vshrl.u32 %v15638_v50, 16  ;;  %16319 = vmatpush3.bf16.msra.mxu1 %v16786_v32 }
 0x40c   : > { %12689 = vst.msk [vmem:[#allocation4 + $0x1b0] sm:$0xff] %vm2550_vm9, %v12577_v62  ;;  %v12579_v28 = vcombine.low %v12322_v49, %v12326_v20  ;;  %v12586_v60 = vrot.slane %v12578_v25, %v17100_v16  ;;  %v6757_v15 = vcombine.high %v15641_v18, %v15641_v18  ;;  %v7602_v19 = vshll.u32 %v15638_v50, 16  ;;  %v19666_v39 = vld.sshfl [vmem:[#allocation2 + $0x128] sm:$0x12 pattern:$0x76325410] }
 0x40d   : > { %v7608_v26 = vshll.u32 %v6733_v36, 16  ;;  %v7613_v30 = vshrl.u32 %v15639_v51, 16  ;;  %9622 = vst.msk [vmem:[#allocation4 + $0x270] sm:$0xff] %vm2550_vm9, %v9590_v12  ;;  %v7616_v53 = vshll.u32 %v15639_v51, 16  ;;  %v7622_v42 = vshll.u32 %v6741_v17, 16 }
 0x40e   : > { %v12593_v4 = vrot.slane %v12579_v28, %v17100_v16  ;;  %v7627_v23 = vshrl.u32 %v15640_v54, 16  ;;  %11494 = vst.msk [vmem:[#allocation4 + $0x270] sm:$0xff] %vm4430_vm10, %v11462_v6  ;;  %v7601_v41 = vrot.slane %v7599_v13, 6  ;;  %v7604_v62 = vrot.slane %v7602_v19, 7  ;;  %v14261_v28 = vld [vmem:[#allocation3 + $0x170] sm:$0xff] }
 0x40f   : > { %v7610_v24 = vrot.slane %v7608_v26, 7  ;;  %v7615_v59 = vrot.slane %v7613_v30, 6  ;;  %v15883_v49 = vld.sshfl [vmem:[#allocation2 + $0x12c] sm:$0x12 pattern:$0x76325410] }
 0x410   : > { %v12594_v25 = vcombine.low %v12586_v60, %v12593_v4  ;;  %v7618_v50 = vrot.slane %v7616_v53, 7  ;;  %v7624_v20 = vrot.slane %v7622_v42, 7  ;;  %v7629_v36 = vrot.slane %v7627_v23, 6 }
 0x411   : > { %v15884_v57 = vld.sshfl [vmem:[#allocation2 + $0x130] sm:$0x12 pattern:$0x76325410]  ;;  %v7605_v2 = vor.u32 %v7604_v62, %v7601_v41  ;;  %v7630_v12 = vshll.u32 %v15640_v54, 16  ;;  %v7636_v51 = vshll.u32 %v6749_v48, 16  ;;  %v12014_v60 = vcombine.high %v19666_v39, %v19666_v39 }
 0x412   : > { %v19671_v33 = vld.sshfl [vmem:[#allocation2 + $0x134] sm:$0x12 pattern:$0x76325410]  ;;  %v7641_v17 = vshrl.u32 %v15641_v18, 16  ;;  %12690 = vst.msk [vmem:[#allocation4 + $0x1d8] sm:$0xff] %vm2550_vm9, %v12594_v25  ;;  %v7619_v6 = vor.u32 %v7618_v50, %v7615_v59  ;;  %v12022_v62 = vcombine.high %v15883_v49, %v15883_v49  ;;  %v12030_v59 = vcombine.high %v15884_v57, %v15884_v57 }
 0x413   : > { %v7644_v13 = vshll.u32 %v15641_v18, 16  ;;  %v7650_v19 = vshll.u32 %v6757_v15, 16  ;;  %v12767_v26 = vld [vmem:[#allocation4 + $0x240] sm:$0xff]  ;;  %v12749_v30 = vld [vmem:[#allocation4 + $0x1b0] sm:$0xff]  ;;  %v7606_v4 = vrot.slane %v7605_v2, 2  ;;  %v7632_v53 = vrot.slane %v7630_v12, 7 }
 0x414   : > { %v7638_v42 = vrot.slane %v7636_v51, 7  ;;  %v7643_v23 = vrot.slane %v7641_v17, 6  ;;  %13424 = vmatmul.mubr.bf16.gmra.mrb[56].mxu1 %v12767_v26  ;;  %16588 = vmatprep.mubr.msk.bf16.mxu0 %vm2550_vm9, %v12749_v30  ;;  %14277 = vst.msk [vmem:[#allocation4 + $0x1b0] sm:$0xff] %vm2550_vm9, %v14261_v28  ;;  %v7620_v54 = vrot.slane %v7619_v6, 2  ;;  %v12038_v2 = vcombine.high %v19671_v33, %v19671_v33  ;;  %v19682_v25 = vpop.f32.mrb[4].mxu1 }
 0x415   : > { %v7646_v48 = vrot.slane %v7644_v13, 7  ;;  %v7652_v41 = vrot.slane %v7650_v19, 7  ;;  %v7611_v18 = vsel %vm17115_vm15, %v7606_v4, %v7610_v24  ;;  %v7633_v15 = vor.u32 %v7632_v53, %v7629_v36  ;;  %20847 = vst [vmem:[#allocation44_spill] sm:$0xff] %v19682_v25  ;;  %v12773_v19 = vld [vmem:[#allocation4 + $0x270] sm:$0xff]  ;;  %v19687_v26 = vpop.f32.mrb[5].mxu1  ;;  %v14262_v24 = vld [vmem:[#allocation3 + $0x178] sm:$0xff] }
 0x416   : > { %v7625_v50 = vsel %vm17115_vm15, %v7620_v54, %v7624_v20  ;;  %v15946_v28 = vrot.slane %v19666_v39, 9  ;;  %v12329_v51 = vrot.slane %v12014_v60, 7  ;;  %v15886_v17 = vld.sshfl [vmem:[#allocation2 + $0x140] sm:$0x12 pattern:$0x76325410]  ;;  %13431 = vmatprep.mubr.bf16.mxu1 %v12773_v19 }
 0x417   : > { %v7647_v12 = vor.u32 %v7646_v48, %v7643_v23  ;;  %v15887_v6 = vld.sshfl [vmem:[#allocation2 + $0x144] sm:$0x12 pattern:$0x76325410]  ;;  %v7634_v36 = vrot.slane %v7633_v15, 2  ;;  %v7909_v30 = vcombine.low %v7611_v18, %v7625_v50  ;;  %v15947_v4 = vrot.slane %v15883_v49, 9 }
 0x418   : > { %v15888_v13 = vld.sshfl [vmem:[#allocation2 + $0x148] sm:$0x12 pattern:$0x76325410]  ;;  %v12333_v53 = vrot.slane %v12022_v62, 7  ;;  %v19689_v25 = vpop.f32.mrb[6].mxu1  ;;  %v12330_v20 = vsel %vm18007_vm8, %v15946_v28, %v12329_v51  ;;  %v12046_v28 = vcombine.high %v15886_v17, %v15886_v17  ;;  %v12054_v51 = vcombine.high %v15887_v6, %v15887_v6 }
 0x419   : > { %v7648_v7 = vrot.slane %v7647_v12, 2  ;;  %v15948_v39 = vrot.slane %v15884_v57, 9  ;;  %v12337_v60 = vrot.slane %v12030_v59, 7  ;;  %v19693_v23 = vpop.f32.mrb[7].mxu1  ;;  %v12754_v54 = vld [vmem:[#allocation4 + $0x1d8] sm:$0xff]  ;;  %v7639_v48 = vsel %vm17115_vm15, %v7634_v36, %v7638_v42 }
 0x41a   : > { %20848 = vst [vmem:[#allocation45_spill] sm:$0xff] %v19693_v23  ;;  %v7917_v15 = vrot.slane %v7909_v30, %v17100_v16  ;;  %v12334_v49 = vsel %vm18007_vm8, %v15947_v4, %v12333_v53  ;;  %v15949_v62 = vrot.slane %v19671_v33, 9  ;;  %v15889_v18 = vld.sshfl [vmem:[#allocation2 + $0x14c] sm:$0x12 pattern:$0x76325410]  ;;  %16589 = vmatmul.mubr.msk.bf16.gmra.mrb[84].mxu0 %vm2550_vm9, %v12754_v54  ;;  %v12062_v19 = vcombine.high %v15888_v13, %v15888_v13 }
 0x41b   : > { %14278 = vst.msk [vmem:[#allocation4 + $0x1d8] sm:$0xff] %vm2550_vm9, %v14262_v24  ;;  %v7653_v57 = vsel %vm17115_vm15, %v7648_v7, %v7652_v41  ;;  %v12338_v59 = vsel %vm18007_vm8, %v15948_v39, %v12337_v60  ;;  %v12341_v50 = vrot.slane %v12038_v2, 7  ;;  %v12595_v42 = vcombine.low %v12330_v20, %v12334_v49  ;;  %v15890_v36 = vld.sshfl [vmem:[#allocation2 + $0x158] sm:$0x12 pattern:$0x76325410] }
 0x41c   : > { %v7910_v12 = vcombine.low %v7639_v48, %v7653_v57  ;;  %v12070_v4 = vcombine.high %v15889_v18, %v15889_v18  ;;  %v15950_v24 = vrot.slane %v15886_v17, 9  ;;  %v15891_v53 = vld.sshfl [vmem:[#allocation2 + $0x15c] sm:$0x12 pattern:$0x76325410]  ;;  %v12345_v41 = vrot.slane %v12046_v28, 7  ;;  %v9157_v57 = vpop.permute.xlu1 %9156 }
 0x41d   : > { %v12342_v33 = vsel %vm18007_vm8, %v15949_v62, %v12341_v50  ;;  %v12603_v30 = vrot.slane %v12595_v42, %v17100_v16  ;;  %v15951_v39 = vrot.slane %v15887_v6, 9  ;;  %v15892_v2 = vld.sshfl [vmem:[#allocation2 + $0x160] sm:$0x12 pattern:$0x76325410]  ;;  %v12349_v20 = vrot.slane %v12054_v51, 7 }
 0x41e   : > { %v7924_v10 = vrot.slane %v7910_v12, %v17100_v16  ;;  %v12596_v7 = vcombine.low %v12338_v59, %v12342_v33  ;;  %v15952_v60 = vrot.slane %v15888_v13, 9  ;;  %v12353_v54 = vrot.slane %v12062_v19, 7  ;;  %v15893_v17 = vld.sshfl [vmem:[#allocation2 + $0x164] sm:$0x12 pattern:$0x76325410] }
 0x41f   : > { %v15953_v48 = vrot.slane %v15889_v18, 9  ;;  %v12346_v62 = vsel %vm18007_vm8, %v15950_v24, %v12345_v41  ;;  %v12357_v50 = vrot.slane %v12070_v4, 7  ;;  %v12350_v42 = vsel %vm18007_vm8, %v15951_v39, %v12349_v20  ;;  %v15894_v13 = vld.sshfl [vmem:[#allocation2 + $0x170] sm:$0x12 pattern:$0x76325410] }
 0x420   : > { %v7925_v49 = vcombine.low %v7917_v15, %v7924_v10  ;;  %v12610_v23 = vrot.slane %v12596_v7, %v17100_v16  ;;  %v12354_v6 = vsel %vm18007_vm8, %v15952_v60, %v12353_v54  ;;  %v12078_v59 = vcombine.high %v15890_v36, %v15890_v36  ;;  %v15895_v28 = vld.sshfl [vmem:[#allocation2 + $0x174] sm:$0x12 pattern:$0x76325410]  ;;  %v19722_v39 = vpop.f32.mrb[8].mxu1 }
 0x421   : > { %v12086_v12 = vcombine.high %v15891_v53, %v15891_v53  ;;  %v12358_v18 = vsel %vm18007_vm8, %v15953_v48, %v12357_v50  ;;  %v12612_v51 = vcombine.low %v12346_v62, %v12350_v42  ;;  %v12094_v19 = vcombine.high %v15892_v2, %v15892_v2  ;;  %v15896_v33 = vld.sshfl [vmem:[#allocation2 + $0x178] sm:$0x12 pattern:$0x76325410]  ;;  %v19726_v54 = vpop.f32.mrb[9].mxu1  ;;  %v13766_v50 = vld [vmem:[#allocation3 + $0x10] sm:$0xff] }
 0x422   : > { %7957 = vst.msk [vmem:[#allocation4 + $0x268] sm:$0xff] %vm2550_vm9, %v7925_v49  ;;  %v12611_v15 = vcombine.low %v12603_v30, %v12610_v23  ;;  %v12613_v4 = vcombine.low %v12354_v6, %v12358_v18  ;;  %v12102_v24 = vcombine.high %v15893_v17, %v15893_v17  ;;  %v15954_v10 = vrot.slane %v15890_v36, 9  ;;  %v15897_v41 = vld.sshfl [vmem:[#allocation2 + $0x17c] sm:$0x12 pattern:$0x76325410]  ;;  %13799 = vrot.lane.b32.xlu1 %v13766_v50, %s16926_s25 }
 0x423   : > { %9189 = vst.msk [vmem:[#allocation4 + $0x268] sm:$0xff] %vm4430_vm10, %v9157_v57  ;;  %v12361_v7 = vrot.slane %v12078_v59, 7  ;;  %v12620_v20 = vrot.slane %v12612_v51, %v17100_v16  ;;  %v15955_v23 = vrot.slane %v15891_v53, 9  ;;  %v12365_v30 = vrot.slane %v12086_v12, 7  ;;  %v19731_v62 = vpop.f32.mrb[10].mxu1 }
 0x424   : > { %12691 = vst.msk [vmem:[#allocation4 + $0x200] sm:$0xff] %vm2550_vm9, %v12611_v15  ;;  %v15956_v60 = vrot.slane %v15892_v2, 9  ;;  %v12627_v48 = vrot.slane %v12613_v4, %v17100_v16  ;;  %v12369_v57 = vrot.slane %v12094_v19, 7  ;;  %v15957_v36 = vrot.slane %v15893_v17, 9  ;;  %v19735_v12 = vpop.f32.mrb[11].mxu1  ;;  %13878 = vst.msk [vmem:[#allocation4 + $0x8] sm:$0xff] %vm2550_vm9, %v13766_v50 }
 0x425   : > { %v12362_v49 = vsel %vm18007_vm8, %v15954_v10, %v12361_v7  ;;  %v12366_v42 = vsel %vm18007_vm8, %v15955_v23, %v12365_v30  ;;  %v12373_v6 = vrot.slane %v12102_v24, 7  ;;  %v12110_v59 = vcombine.high %v15894_v13, %v15894_v13 }
 0x426   : > { %v12118_v53 = vcombine.high %v15895_v28, %v15895_v28  ;;  %v12628_v2 = vcombine.low %v12620_v20, %v12627_v48  ;;  %v12370_v15 = vsel %vm18007_vm8, %v15956_v60, %v12369_v57  ;;  %v12629_v17 = vcombine.low %v12362_v49, %v12366_v42 }
 0x427   : > { %v12126_v18 = vcombine.high %v15896_v33, %v15896_v33  ;;  %v12374_v51 = vsel %vm18007_vm8, %v15957_v36, %v12373_v6  ;;  %v12134_v19 = vcombine.high %v15897_v41, %v15897_v41  ;;  %v15958_v4 = vrot.slane %v15894_v13, 9 }
 0x428   : > { %v12377_v24 = vrot.slane %v12110_v59, 7  ;;  %12692 = vst.msk [vmem:[#allocation4 + $0x228] sm:$0xff] %vm2550_vm9, %v12628_v2  ;;  %v12630_v10 = vcombine.low %v12370_v15, %v12374_v51  ;;  %v12637_v7 = vrot.slane %v12629_v17, %v17100_v16  ;;  %v15959_v23 = vrot.slane %v15895_v28, 9  ;;  %v19753_v28 = vld [vmem:[%s20794_s2] ss:$0 sm:$0xff] }
 0x429   : > { %v12381_v30 = vrot.slane %v12118_v53, 7  ;;  %v15960_v60 = vrot.slane %v15896_v33, 9  ;;  %v12385_v48 = vrot.slane %v12126_v18, 7  ;;  %v15961_v49 = vrot.slane %v15897_v41, 9 }
 0x42a   : > { %v12772_v50 = vld [vmem:[#allocation4 + $0x268] sm:$0xff]  ;;  %v12378_v20 = vsel %vm18007_vm8, %v15958_v4, %v12377_v24  ;;  %v12644_v36 = vrot.slane %v12630_v10, %v17100_v16  ;;  %v12389_v42 = vrot.slane %v12134_v19, 7  ;;  %v16090_v6 = vadd.f32 %v19292_v5, %v19287_v35  ;;  %v14264_v35 = vld [vmem:[#allocation3 + $0x1d8] sm:$0xff] }
 0x42b   : > { %v12759_v57 = vld [vmem:[#allocation4 + $0x200] sm:$0xff]  ;;  %13432 = vmatmul.mubr.bf16.gmra.mrb[60].mxu1 %v12772_v50  ;;  %v12382_v13 = vsel %vm18007_vm8, %v15959_v23, %v12381_v30  ;;  %v12386_v33 = vsel %vm18007_vm8, %v15960_v60, %v12385_v48  ;;  %v16093_v59 = vadd.f32 %v19298_v9, %v19294_v1  ;;  %v16096_v53 = vadd.f32 %v19314_v37, %v19312_v47  ;;  %v16218_v37 = vpop.f32.mrb[12].mxu1  ;;  %v20850_v30 = vld [vmem:[#allocation6_spill] sm:$0xff]  ;;  %v20851_v50 = vld [vmem:[#allocation7_spill] sm:$0xff] }
 0x42c   : > { %16592 = vmatprep.mubr.msk.bf16.mxu0 %vm2550_vm9, %v12759_v57  ;;  %v12646_v41 = vcombine.low %v12378_v20, %v12382_v13  ;;  %v12645_v2 = vcombine.low %v12637_v7, %v12644_v36  ;;  %v12390_v15 = vsel %vm18007_vm8, %v15961_v49, %v12389_v42  ;;  %v16099_v17 = vadd.f32 %v19322_v44, %v19319_v27  ;;  %v20849_v7 = vld [vmem:[#allocation5_spill] sm:$0xff]  ;;  %v20852_v60 = vld [vmem:[#allocation34_spill] sm:$0xff]  ;;  %v20853_v48 = vld [vmem:[#allocation36_spill] sm:$0xff] }
 0x42d   : > { %v12647_v5 = vcombine.low %v12386_v33, %v12390_v15  ;;  %v19770_v51 = vadd.f32 %v16090_v6, %v19753_v28  ;;  %v19774_v1 = vadd.f32 %v16093_v59, %v19753_v28  ;;  %v16102_v9 = vadd.f32 %v19333_v29, %v19327_v63  ;;  %v16219_v63 = vpop.f32.mrb[13].mxu1  ;;  %v20854_v57 = vld [vmem:[#allocation37_spill] sm:$0xff]  ;;  %v20856_v13 = vld [vmem:[#allocation8_spill] sm:$0xff] }
 0x42e   : > { %v12654_v18 = vrot.slane %v12646_v41, %v17100_v16  ;;  %12693 = vst.msk [vmem:[#allocation4 + $0x250] sm:$0xff] %vm2550_vm9, %v12645_v2  ;;  %v16108_v47 = vadd.f32 %v19352_v56, %v19349_v34  ;;  %v16111_v19 = vadd.f32 %v19362_v31, %v19356_v40  ;;  %v16114_v4 = vadd.f32 %v19369_v45, %v19365_v21  ;;  %v16221_v34 = vpop.f32.mrb[14].mxu1  ;;  %v20857_v42 = vld [vmem:[#allocation9_spill] sm:$0xff]  ;;  %v20859_v2 = vld [vmem:[#allocation11_spill] sm:$0xff] }
 0x42f   : > { %v12764_v27 = vld [vmem:[#allocation4 + $0x228] sm:$0xff]  ;;  %v12661_v44 = vrot.slane %v12647_v5, %v17100_v16  ;;  %v16117_v24 = vadd.f32 %v19378_v46, %v19371_v0  ;;  %v19792_v29 = vadd.f32 %v16096_v53, %v19753_v28  ;;  %v19795_v58 = vadd.f32 %v16099_v17, %v19753_v28  ;;  %v16222_v45 = vpop.f32.mrb[15].mxu1  ;;  %v14265_v0 = vld [vmem:[#allocation3 + $0x1f0] sm:$0xff]  ;;  %v20860_v17 = vld [vmem:[#allocation44_spill] sm:$0xff] }
 0x430   : > { %16593 = vmatmul.mubr.msk.bf16.gmra.mrb[88].mxu0 %vm2550_vm9, %v12764_v27  ;;  %14280 = vst.msk [vmem:[#allocation4 + $0x228] sm:$0xff] %vm2550_vm9, %v14264_v35  ;;  %v19798_v16 = vadd.f32 %v16102_v9, %v19753_v28  ;;  %v19805_v40 = vadd.f32 %v16105_v11, %v19753_v28  ;;  %v19808_v31 = vadd.f32 %v16108_v47, %v19753_v28  ;;  %v20858_v53 = vld [vmem:[#allocation10_spill] sm:$0xff]  ;;  %v20862_v11 = vld [vmem:[#allocation12_spill] sm:$0xff]  ;;  %v20863_v47 = vld [vmem:[#allocation13_spill] sm:$0xff] }
 0x431   : > { %v12662_v56 = vcombine.low %v12654_v18, %v12661_v44  ;;  %v19811_v21 = vadd.f32 %v16111_v19, %v19753_v28  ;;  %v19814_v46 = vadd.f32 %v16114_v4, %v19753_v28  ;;  %v16129_v10 = vadd.f32 %v19426_v38, %v19419_v8  ;;  %v19841_v8 = vld [vmem:[#allocation3 + $0x40] sm:$0xff]  ;;  %v20864_v44 = vld [vmem:[#allocation14_spill] sm:$0xff]  ;;  %v20865_v19 = vld [vmem:[#allocation15_spill] sm:$0xff] }
 0x432   : > { %v16132_v23 = vadd.f32 %v20849_v7, %v19431_v43  ;;  %v16135_v20 = vadd.f32 %v20851_v50, %v20850_v30  ;;  %v16202_v49 = vadd.f32 %v20853_v48, %v20852_v60  ;;  %v19833_v14 = vadd.f32 %v20855_v3, %v20854_v57  ;;  %14137 = vst.msk [vmem:[#allocation4 + $0x18] sm:$0xff] %vm2550_vm9, %v19841_v8  ;;  %v20861_v18 = vld [vmem:[#allocation45_spill] sm:$0xff]  ;;  %v20868_v30 = vld [vmem:[#allocation18_spill] sm:$0xff]  ;;  %v20869_v50 = vld [vmem:[#allocation19_spill] sm:$0xff] }
 0x433   : > { %12694 = vst.msk [vmem:[#allocation4 + $0x278] sm:$0xff] %vm2550_vm9, %v12662_v56  ;;  %v19844_v38 = vadd.f32 %v16117_v24, %v19753_v28  ;;  %v19847_v43 = vadd.f32 %v16126_v52, %v19753_v28  ;;  %v19850_v36 = vadd.f32 %v16129_v10, %v19753_v28  ;;  %v16138_v6 = vadd.f32 %v20857_v42, %v20856_v13  ;;  %v20867_v52 = vld [vmem:[#allocation17_spill] sm:$0xff]  ;;  %v20872_v57 = vld [vmem:[#allocation22_spill] sm:$0xff]  ;;  %v20873_v3 = vld [vmem:[#allocation23_spill] sm:$0xff]  ;;  %v16224_v42 = vpop.f32.mrb[16].mxu1 }
 0x434   : > { %v19857_v41 = vadd.f32 %v16132_v23, %v19753_v28  ;;  %v19860_v59 = vadd.f32 %v16135_v20, %v19753_v28  ;;  %v16141_v15 = vadd.f32 %v20859_v2, %v20858_v53  ;;  %v16208_v35 = vadd.f32 %v19687_v26, %v20860_v17  ;;  %v20876_v2 = vld [vmem:[#allocation26_spill] sm:$0xff]  ;;  %v20879_v17 = vld [vmem:[#allocation29_spill] sm:$0xff] }
 0x435   : > { %v12769_v33 = vld [vmem:[#allocation4 + $0x250] sm:$0xff]  ;;  %v19869_v5 = vadd.f32 %v16138_v6, %v19753_v28  ;;  %v16211_v9 = vadd.f32 %v20861_v18, %v19689_v25  ;;  %v16144_v27 = vadd.f32 %v20863_v47, %v20862_v11  ;;  %v16147_v4 = vadd.f32 %v20865_v19, %v20864_v44  ;;  %v14266_v25 = vld [vmem:[#allocation3 + $0x1f8] sm:$0xff]  ;;  %v16225_v11 = vpop.f32.mrb[17].mxu1  ;;  %v20880_v47 = vld [vmem:[#allocation30_spill] sm:$0xff] }
 0x436   : > { %16596 = vmatprep.mubr.msk.bf16.mxu0 %vm2550_vm9, %v12769_v33  ;;  %14281 = vst.msk [vmem:[#allocation4 + $0x250] sm:$0xff] %vm2550_vm9, %v14265_v0  ;;  %v19878_v24 = vadd.f32 %v16141_v15, %v19753_v28  ;;  %v16214_v26 = vadd.f32 %v19726_v54, %v19722_v39  ;;  %v16217_v56 = vadd.f32 %v19735_v12, %v19731_v62  ;;  %v20866_v0 = vld [vmem:[#allocation16_spill] sm:$0xff]  ;;  %v20871_v12 = vld [vmem:[#allocation21_spill] sm:$0xff] }
 0x437   : > { %v16150_v10 = vadd.f32 %v20867_v52, %v20866_v0  ;;  %v19887_v7 = vadd.f32 %v16144_v27, %v19753_v28  ;;  %v19890_v23 = vadd.f32 %v16147_v4, %v19753_v28  ;;  %v16153_v20 = vadd.f32 %v20869_v50, %v20868_v30  ;;  %v20870_v62 = vld [vmem:[#allocation20_spill] sm:$0xff]  ;;  %v20875_v33 = vld [vmem:[#allocation25_spill] sm:$0xff]  ;;  %v20881_v27 = vld [vmem:[#allocation31_spill] sm:$0xff] }
 0x438   : > { %v16220_v60 = vadd.f32 %v16219_v63, %v16218_v37  ;;  %v16223_v54 = vadd.f32 %v16222_v45, %v16221_v34  ;;  %v16156_v48 = vadd.f32 %v20871_v12, %v20870_v62  ;;  %v16159_v55 = vadd.f32 %v20873_v3, %v20872_v57  ;;  %v20874_v6 = vld [vmem:[#allocation24_spill] sm:$0xff]  ;;  %v20877_v37 = vld [vmem:[#allocation27_spill] sm:$0xff]  ;;  %v20883_v4 = vld [vmem:[#allocation33_spill] sm:$0xff] }
 0x439   : > { %v19895_v39 = vadd.f32 %v16150_v10, %v19753_v28  ;;  %v19902_v13 = vadd.f32 %v16153_v20, %v19753_v28  ;;  %v16162_v53 = vadd.f32 %v20875_v33, %v20874_v6  ;;  %v16165_v63 = vadd.f32 %v20877_v37, %v20876_v2  ;;  %v20878_v15 = vld [vmem:[#allocation28_spill] sm:$0xff]  ;;  %v16227_v10 = vpop.f32.mrb[18].mxu1  ;;  %v20885_v57 = vld [vmem:[#allocation38_spill] sm:$0xff] }
 0x43a   : > { %v12774_v32 = vld [vmem:[#allocation4 + $0x278] sm:$0xff]  ;;  %v16168_v34 = vadd.f32 %v20879_v17, %v20878_v15  ;;  %v19913_v45 = vadd.f32 %v16156_v48, %v19753_v28  ;;  %v19916_v18 = vadd.f32 %v16159_v55, %v19753_v28  ;;  %v16171_v44 = vadd.f32 %v20881_v27, %v20880_v47  ;;  %v16228_v20 = vpop.f32.mrb[19].mxu1  ;;  %v20884_v48 = vld [vmem:[#allocation35_spill] sm:$0xff]  ;;  %v20888_v33 = vld [vmem:[#allocation42_spill] sm:$0xff] }
 0x43b   : > { %16597 = vmatmul.mubr.msk.bf16.gmra.mrb[92].mxu0 %vm2550_vm9, %v12774_v32  ;;  %14282 = vst.msk [vmem:[#allocation4 + $0x278] sm:$0xff] %vm2550_vm9, %v14266_v25  ;;  %v20882_v19 = vld [vmem:[#allocation32_spill] sm:$0xff]  ;;  %v16226_v52 = vadd.f32 %v16225_v11, %v16224_v42  ;;  %v19923_v30 = vadd.f32 %v16162_v53, %v19753_v28  ;;  %v19926_v25 = vadd.f32 %v16165_v63, %v19753_v28  ;;  %v20887_v32 = vld [vmem:[#allocation41_spill] sm:$0xff]  ;;  %v20889_v53 = vld [vmem:[#allocation43_spill] sm:$0xff] }
 0x43c   : > { %v16174_v0 = vadd.f32 %v20883_v4, %v20882_v19  ;;  %v19929_v50 = vadd.f32 %v16168_v34, %v19753_v28  ;;  %v19932_v62 = vadd.f32 %v16171_v44, %v19753_v28  ;;  %v16177_v3 = vadd.f32 %v20885_v57, %v20884_v48  ;;  %v20886_v55 = vld [vmem:[#allocation40_spill] sm:$0xff]  ;;  %v19995_v27 = vld [vmem:[#allocation3 + $0x90] sm:$0xff] }
 0x43d   : > { %v16180_v42 = vadd.f32 %v20887_v32, %v20886_v55  ;;  %v16229_v6 = vadd.f32 %v16228_v20, %v16227_v10  ;;  %v16183_v2 = vadd.f32 %v20889_v53, %v20888_v33  ;;  %v19944_v37 = vadd.f32 %v16208_v35, %v19792_v29  ;;  %13882 = vst.msk [vmem:[#allocation4 + $0xa8] sm:$0xff] %vm2550_vm9, %v19995_v27  ;;  %v16788_v55 = vld [vmem:[%s20795_s3 + $0x10] sm:$0xff]   ;;  %v20015_v32 = vld [vmem:[#allocation3 + $0xc0] sm:$0xff] }
 0x43e   : > { %v19935_v12 = vadd.f32 %v16174_v0, %v19753_v28  ;;  %v19947_v63 = vadd.f32 %v16202_v49, %v19770_v51  ;;  %v19950_v15 = vadd.f32 %v16177_v3, %v19753_v28  ;;  %v19956_v34 = vadd.f32 %v16211_v9, %v19795_v58  ;;  %v16787_v3 = vld [vmem:[%s20795_s3 + $0x50] sm:$0xff]   ;;  %14141 = vst.msk [vmem:[#allocation4 + $0xb8] sm:$0xff] %vm2550_vm9, %v20015_v32 }
 0x43f   : > { %v19953_v17 = vadd.f32 %v16180_v42, %v19753_v28  ;;  %v19960_v11 = vadd.f32 %v19833_v14, %v19774_v1  ;;  %v19963_v47 = vadd.f32 %v16183_v2, %v19753_v28  ;;  %v19966_v29 = vadd.f32 %v16220_v60, %v19808_v31  ;;  %v16230_v14 = vpop.f32.mrb[20].mxu1  ;;  %16320 = vmatprep.subr.bf16.mxu1 %v16787_v3 }
 0x440   : > { %v19969_v51 = vadd.f32 %v16214_v26, %v19798_v16  ;;  %v19972_v49 = vadd.f32 %v16223_v54, %v19811_v21  ;;  %v19975_v35 = vadd.f32 %v16217_v56, %v19805_v40  ;;  %v19978_v58 = vadd.f32 %v16226_v52, %v19814_v46  ;;  %v16231_v9 = vpop.f32.mrb[21].mxu1  ;;  %v19991_v46 = vld [vmem:[#allocation3 + $0x88] sm:$0xff]  ;;  %16321 = vmatpush3.bf16.msra.mxu1 %v16788_v55 }
 0x441   : > { %v19981_v1 = vadd.f32 %v16229_v6, %v19844_v38  ;;  %v13193_v31 = vadd.f32 %v19802_v22, %v19753_v28  ;;  %v16232_v60 = vadd.f32 %v16231_v9, %v16230_v14  ;;  %v16233_v16 = vpop.f32.mrb[22].mxu1  ;;  %v13196_v21 = vadd.f32 %v19818_v61, %v19753_v28  ;;  %v19993_v38 = vld [vmem:[#allocation3 + $0xa0] sm:$0xff]  ;;  %13753 = vst.msk [vmem:[#allocation4 + $0xc8] sm:$0xff] %vm2550_vm9, %v19991_v46 }
 0x442   : > { %v16234_v26 = vpop.f32.mrb[23].mxu1  ;;  %13754 = vst.msk [vmem:[#allocation4 + $0xf0] sm:$0xff] %vm2550_vm9, %v19993_v38 }
 0x443   : > { %v16235_v54 = vadd.f32 %v16234_v26, %v16233_v16  ;;  %v19987_v40 = vadd.f32 %v16232_v60, %v13193_v31 }
 0x445   : > { %v19989_v56 = vadd.f32 %v16235_v54, %v13196_v21 }
 0x446   : > { %v16236_v44 = vpop.f32.mrb[24].mxu1 }
 0x447   : > { %v16237_v28 = vpop.f32.mrb[25].mxu1 }
 0x448   : > { %v16238_v22 = vadd.f32 %v16237_v28, %v16236_v44  ;;  %v16239_v61 = vpop.f32.mrb[26].mxu1 }
 0x449   : > { %v16240_v19 = vpop.f32.mrb[27].mxu1 }
 0x44a   : > { %v16241_v4 = vadd.f32 %v16240_v19, %v16239_v61  ;;  %v20004_v0 = vadd.f32 %v16238_v22, %v19847_v43 }
 0x44c   : > { %v20007_v52 = vadd.f32 %v16241_v4, %v19850_v36 }
 0x452   : > { %v16242_v10 = vpop.f32.mrb[28].mxu1 }
 0x453   : > { %v16243_v20 = vpop.f32.mrb[29].mxu1 }
 0x454   : > { %v16244_v48 = vadd.f32 %v16243_v20, %v16242_v10  ;;  %v16245_v57 = vpop.f32.mrb[30].mxu1  ;;  %v20039_v10 = vld [vmem:[#allocation3 + $0x108] sm:$0xff] }
 0x455   : > { %v16246_v42 = vpop.f32.mrb[31].mxu1  ;;  %13757 = vst.msk [vmem:[#allocation4 + $0x168] sm:$0xff] %vm2550_vm9, %v20039_v10 }
 0x456   : > { %v16247_v43 = vadd.f32 %v16246_v42, %v16245_v57  ;;  %v20020_v36 = vadd.f32 %v16244_v48, %v19857_v41 }
 0x458   : > { %v20023_v6 = vadd.f32 %v16247_v43, %v19860_v59  ;;  %v20049_v43 = vld [vmem:[#allocation3 + $0x38] sm:$0xff] }
 0x459   : > { %13881 = vst.msk [vmem:[#allocation4 + $0x80] sm:$0xff] %vm2550_vm9, %v20049_v43 }
 0x45e   : > { %v16248_v33 = vpop.f32.mrb[32].mxu1 }
 0x45f   : > { %v16249_v53 = vpop.f32.mrb[33].mxu1 }
 0x460   : > { %v16250_v2 = vadd.f32 %v16249_v53, %v16248_v33  ;;  %v16251_v14 = vpop.f32.mrb[34].mxu1 }
 0x461   : > { %v16252_v9 = vpop.f32.mrb[35].mxu1 }
 0x462   : > { %v16253_v31 = vadd.f32 %v16252_v9, %v16251_v14  ;;  %v20026_v60 = vadd.f32 %v16250_v2, %v19869_v5  ;;  %v16789_v14 = vld [vmem:[%s20795_s3 + $0x58] sm:$0xff]  }
 0x463   : > { %v16790_v9 = vld [vmem:[%s20795_s3 + $0x18] sm:$0xff]   ;;  %16322 = vmatprep.subr.bf16.mxu1 %v16789_v14 }
 0x464   : > { %v20029_v16 = vadd.f32 %v16253_v31, %v19878_v24  ;;  %16323 = vmatpush3.bf16.msra.mxu1 %v16790_v9  ;;  %v16795_v9 = vld [vmem:[%s20795_s3 + $0x70] sm:$0xff]  }
 0x46b   : > { %v16254_v26 = vpop.f32.mrb[36].mxu1 }
 0x46c   : > { %v16255_v41 = vpop.f32.mrb[37].mxu1 }
 0x46d   : > { %v16256_v21 = vadd.f32 %v16255_v41, %v16254_v26  ;;  %v16257_v54 = vpop.f32.mrb[38].mxu1 }
 0x46e   : > { %v16258_v44 = vpop.f32.mrb[39].mxu1 }
 0x46f   : > { %v16259_v28 = vadd.f32 %v16258_v44, %v16257_v54  ;;  %v20032_v59 = vadd.f32 %v16256_v21, %v19887_v7 }
 0x471   : > { %v16570_v22 = vpop.f32.mrb[64].mxu0  ;;  %v20035_v61 = vadd.f32 %v16259_v28, %v19890_v23 }
 0x472   : > { %v13483_v19 = vadd.f32 %v16570_v22, %v19944_v37  ;;  %v13474_v5 = vpop.f32.mrb[65].mxu0  ;;  %v20085_v22 = vld [vmem:[#allocation3 + $0x68] sm:$0xff] }
 0x473   : > { %v13475_v4 = vadd.f32 %v13474_v5, %v19947_v63  ;;  %v16571_v24 = vpop.f32.mrb[66].mxu0  ;;  %v20047_v63 = vld [vmem:[#allocation3 + $0x120] sm:$0xff]  ;;  %14140 = vst.msk [vmem:[#allocation4 + $0x90] sm:$0xff] %vm2550_vm9, %v20085_v22 }
 0x474   : > { %v13486_v20 = vadd.f32 %v16571_v24, %v19956_v34  ;;  %v13477_v48 = vpop.f32.mrb[67].mxu0  ;;  %v13603_v57 = vmax.f32 %v13483_v19, 0.0  ;;  %13758 = vst.msk [vmem:[#allocation4 + $0x190] sm:$0xff] %vm2550_vm9, %v20047_v63  ;;  %v20055_v34 = vld [vmem:[#allocation3 + $0x110] sm:$0xff] }
 0x475   : > { %v13478_v7 = vadd.f32 %v13477_v48, %v19960_v11  ;;  %v13601_v23 = vmax.f32 %v13475_v4, 0.0  ;;  %13886 = vst.msk [vmem:[#allocation4 + $0x148] sm:$0xff] %vm2550_vm9, %v20055_v34 }
 0x476   : > { %v13604_v3 = vmax.f32 %v13486_v20, 0.0  ;;  %v20095_v20 = vld [vmem:[#allocation3 + $0x140] sm:$0xff] }
 0x477   : > { %v13602_v55 = vmax.f32 %v13478_v7, 0.0  ;;  %14145 = vst.msk [vmem:[#allocation4 + $0x158] sm:$0xff] %vm2550_vm9, %v20095_v20 }
 0x478   : > { %v13700_v42 = vpack.c.bf16 %v13604_v3, %v13603_v57 }
 0x479   : > { %v13699_v37 = vpack.c.bf16 %v13602_v55, %v13601_v23  ;;  %v20111_v23 = vld [vmem:[#allocation3 + $0x1a0] sm:$0xff]  ;;  %v20113_v55 = vld [vmem:[#allocation3 + $0xb8] sm:$0xff] }
 0x47a   : > { %13717 = vst.msk [vmem:[#allocation3 + $0x30] sm:$0xff] %vm2550_vm9, %v13700_v42  ;;  %v20120_v42 = vld [vmem:[#allocation3 + $0x190] sm:$0xff]  ;;  %13885 = vst.msk [vmem:[#allocation4 + $0x120] sm:$0xff] %vm2550_vm9, %v20113_v55 }
 0x47b   : > { %13716 = vst.msk [vmem:[#allocation3 + $0x28] sm:$0xff] %vm2550_vm9, %v13699_v37  ;;  %v20122_v37 = vld [vmem:[#allocation3 + $0xe8] sm:$0xff]  ;;  %13762 = vst.msk [vmem:[#allocation4 + $0x230] sm:$0xff] %vm2550_vm9, %v20111_v23 }
 0x47c   : > { %13890 = vst.msk [vmem:[#allocation4 + $0x1e8] sm:$0xff] %vm2550_vm9, %v20120_v42  ;;  %14144 = vst.msk [vmem:[#allocation4 + $0x130] sm:$0xff] %vm2550_vm9, %v20122_v37 }
 0x481   : > { %v20057_v33 = vld [vmem:[#allocation3 + $0x30] sm:$0xff] }
 0x482   : > { %v16260_v11 = vpop.f32.mrb[40].mxu1  ;;  %v13896_v2 = vld [vmem:[#allocation3 + $0x28] sm:$0xff]  ;;  %13880 = vst.msk [vmem:[#allocation4 + $0x58] sm:$0xff] %vm2550_vm9, %v20057_v33  ;;  %14008 = vst.msk [vmem:[#allocation4 + $0x38] sm:$0xff] %vm2550_vm9, %v20057_v33 }
 0x483   : > { %v16261_v53 = vpop.f32.mrb[41].mxu1  ;;  %13929 = vrot.lane.b32.xlu0 %v13896_v2, %s16926_s25  ;;  %13801 = vrot.lane.b32.xlu1 %v13896_v2, %s16926_s25  ;;  %13751 = vst.msk [vmem:[#allocation4 + $0x78] sm:$0xff] %vm2550_vm9, %v13896_v2  ;;  %14007 = vst.msk [vmem:[#allocation4 + $0x10] sm:$0xff] %vm2550_vm9, %v13896_v2 }
 0x484   : > { %v16262_v31 = vadd.f32 %v16261_v53, %v16260_v11  ;;  %v16263_v26 = vpop.f32.mrb[42].mxu1  ;;  %v16794_v11 = vld [vmem:[%s20795_s3 + $0x28] sm:$0xff]   ;;  %v20131_v53 = vld [vmem:[#allocation3 + $0x1c0] sm:$0xff] }
 0x485   : > { %v16264_v41 = vpop.f32.mrb[43].mxu1  ;;  %14149 = vst.msk [vmem:[#allocation4 + $0x1f8] sm:$0xff] %vm2550_vm9, %v20131_v53 }
 0x486   : > { %v16265_v21 = vadd.f32 %v16264_v41, %v16263_v26  ;;  %v20076_v54 = vadd.f32 %v16262_v31, %v19895_v39 }
 0x487   : > { %13931 = vrot.lane.b32.xlu0 %v19841_v8, %s16926_s25  ;;  %13803 = vrot.lane.b32.xlu1 %v20057_v33, %s16926_s25 }
 0x488   : > { %v20083_v44 = vadd.f32 %v16265_v21, %v19902_v13  ;;  %v16574_v28 = vpop.f32.mrb[68].mxu0 }
 0x489   : > { %v13499_v19 = vadd.f32 %v16574_v28, %v19966_v29  ;;  %v13490_v5 = vpop.f32.mrb[69].mxu0 }
 0x48a   : > { %v13491_v39 = vadd.f32 %v13490_v5, %v19969_v51  ;;  %v16575_v4 = vpop.f32.mrb[70].mxu0  ;;  %v16796_v5 = vld [vmem:[%s20795_s3 + $0x30] sm:$0xff]  }
 0x48b   : > { %v13502_v8 = vadd.f32 %v16575_v4, %v19972_v49  ;;  %v13493_v24 = vpop.f32.mrb[71].mxu0  ;;  %13805 = vrot.lane.b32.xlu1 %v19991_v46, %s16926_s25  ;;  %v13607_v48 = vmax.f32 %v13499_v19, 0.0  ;;  %v16791_v49 = vld [vmem:[%s20795_s3 + $0x60] sm:$0xff]   ;;  %v20109_v46 = vld [vmem:[#allocation3 + $0x188] sm:$0xff] }
 0x48c   : > { %v13494_v13 = vadd.f32 %v13493_v24, %v19975_v35  ;;  %v13605_v29 = vmax.f32 %v13491_v39, 0.0  ;;  %v16792_v35 = vld [vmem:[%s20795_s3 + $0x20] sm:$0xff]   ;;  %13761 = vst.msk [vmem:[#allocation4 + $0x208] sm:$0xff] %vm2550_vm9, %v20109_v46  ;;  %16324 = vmatprep.subr.bf16.mxu1 %v16791_v49 }
 0x48d   : > { %v13608_v7 = vmax.f32 %v13502_v8, 0.0  ;;  %16325 = vmatpush3.bf16.msra.mxu1 %v16792_v35 }
 0x48e   : > { %v13606_v57 = vmax.f32 %v13494_v13, 0.0  ;;  %v20166_v13 = vld [vmem:[#allocation3 + $0x138] sm:$0xff] }
 0x48f   : > { %v13702_v3 = vpack.c.bf16 %v13608_v7, %v13607_v48  ;;  %13807 = vrot.lane.b32.xlu1 %v19995_v27, %s16926_s25  ;;  %v16793_v27 = vld [vmem:[%s20795_s3 + $0x68] sm:$0xff]   ;;  %13889 = vst.msk [vmem:[#allocation4 + $0x1c0] sm:$0xff] %vm2550_vm9, %v20166_v13 }
 0x490   : > { %v13701_v51 = vpack.c.bf16 %v13606_v57, %v13605_v29  ;;  %16326 = vmatprep.subr.bf16.mxu1 %v16793_v27 }
 0x491   : > { %13719 = vst.msk [vmem:[#allocation3 + $0x50] sm:$0xff] %vm2550_vm9, %v13702_v3  ;;  %16327 = vmatpush3.bf16.msra.mxu1 %v16794_v11  ;;  %v13928_v11 = vpop.permute.xlu0 %13927 }
 0x492   : > { %13718 = vst.msk [vmem:[#allocation3 + $0x48] sm:$0xff] %vm2550_vm9, %v13701_v51  ;;  %16328 = vmatprep.subr.bf16.mxu1 %v16795_v9  ;;  %v20180_v51 = vld [vmem:[#allocation3 + $0x168] sm:$0xff]  ;;  %v13798_v9 = vpop.permute.xlu1 %13797 }
 0x493   : > { %14148 = vst.msk [vmem:[#allocation4 + $0x1d0] sm:$0xff] %vm2550_vm9, %v20180_v51 }
 0x494   : > { %13975 = vst.msk [vmem:[#allocation4 + $0x8] sm:$0xff] %vm4430_vm10, %v13928_v11 }
 0x495   : > { %16329 = vmatpush3.bf16.msra.mxu1 %v16796_v5 }
 0x498   : > { %v20137_v2 = vld [vmem:[#allocation3 + $0x50] sm:$0xff] }
 0x499   : > { %v16266_v14 = vpop.f32.mrb[44].mxu1  ;;  %14267 = vst.msk [vmem:[#allocation4 + $0x20] sm:$0xff] %vm2550_vm9, %v20137_v2  ;;  %v20146_v26 = vld [vmem:[#allocation3 + $0x48] sm:$0xff]  ;;  %v13994_v41 = vld [vmem:[#allocation3 + $0x50] sm:$0xff] }
 0x49a   : > { %v16267_v31 = vpop.f32.mrb[45].mxu1  ;;  %13933 = vrot.lane.b32.xlu0 %v20146_v26, %s16926_s25  ;;  %14138 = vst.msk [vmem:[#allocation4 + $0x40] sm:$0xff] %vm2550_vm9, %v20146_v26  ;;  %14009 = vst.msk [vmem:[#allocation4 + $0x60] sm:$0xff] %vm2550_vm9, %v20146_v26 }
 0x49b   : > { %v16268_v21 = vadd.f32 %v16267_v31, %v16266_v14  ;;  %v16269_v28 = vpop.f32.mrb[46].mxu1  ;;  %14010 = vst.msk [vmem:[#allocation4 + $0x88] sm:$0xff] %vm2550_vm9, %v13994_v41  ;;  %v13732_v14 = vld [vmem:[#allocation3] sm:$0xff] }
 0x49c   : > { %v16270_v19 = vpop.f32.mrb[47].mxu1  ;;  %13748 = vst.msk [vmem:[#allocation4] sm:$0xff] %vm2550_vm9, %v13732_v14 }
 0x49d   : > { %v16271_v39 = vadd.f32 %v16270_v19, %v16269_v28  ;;  %v20159_v4 = vadd.f32 %v16268_v21, %v19913_v45  ;;  %13845 = vst.msk [vmem:[#allocation4] sm:$0xff] %vm4430_vm10, %v13798_v9  ;;  %v20191_v21 = vld [vmem:[#allocation3 + $0x1b8] sm:$0xff]  ;;  %v13800_v28 = vpop.permute.xlu1 %13799  ;;  %v16799_v19 = vld [vmem:[%s20795_s3 + $0xc0] sm:$0xff]  }
 0x49e   : > { %13935 = vrot.lane.b32.xlu0 %v19993_v38, %s16926_s25  ;;  %13846 = vst.msk [vmem:[#allocation4 + $0x28] sm:$0xff] %vm4430_vm10, %v13800_v28  ;;  %16428 = vmatprep.subr.bf16.mxu0 %v16799_v19 }
 0x49f   : > { %v20164_v24 = vadd.f32 %v16271_v39, %v19916_v18  ;;  %v16797_v18 = vld [vmem:[%s20795_s3 + $0x78] sm:$0xff]   ;;  %13893 = vst.msk [vmem:[#allocation4 + $0x260] sm:$0xff] %vm2550_vm9, %v20191_v21 }
 0x4a0   : > { %v16578_v8 = vpop.f32.mrb[72].mxu0  ;;  %16330 = vmatprep.subr.bf16.mxu1 %v16797_v18  ;;  %v13863_v18 = vld [vmem:[#allocation3 + $0x18] sm:$0xff] }
 0x4a1   : > { %v13515_v48 = vadd.f32 %v16578_v8, %v19987_v40  ;;  %v13506_v7 = vpop.f32.mrb[73].mxu0  ;;  %v16798_v40 = vld [vmem:[%s20795_s3 + $0x38] sm:$0xff]   ;;  %v14284_v8 = vld [vmem:[#allocation4 + $0x8] sm:$0xff]  ;;  %13879 = vst.msk [vmem:[#allocation4 + $0x30] sm:$0xff] %vm2550_vm9, %v13863_v18  ;;  %v16812_v18 = vld [vmem:[%s20795_s3 + $0xf0] sm:$0xff]  }
 0x4a2   : > { %v13507_v45 = vadd.f32 %v13506_v7, %v19978_v58  ;;  %v16579_v29 = vpop.f32.mrb[74].mxu0  ;;  %16331 = vmatpush3.bf16.msra.mxu1 %v16798_v40  ;;  %14738 = vmatprep.mubr.bf16.mxu1 %v14284_v8  ;;  %v16801_v40 = vld [vmem:[%s20795_s3 + $0x100] sm:$0xff]   ;;  %v20250_v8 = vld [vmem:[#allocation3 + $0x1e8] sm:$0xff] }
 0x4a3   : > { %v13518_v57 = vadd.f32 %v16579_v29, %v19989_v56  ;;  %v13509_v3 = vpop.f32.mrb[75].mxu0  ;;  %v13611_v49 = vmax.f32 %v13515_v48, 0.0  ;;  %v16800_v48 = vld [vmem:[%s20795_s3 + $0x80] sm:$0xff]   ;;  %16600 = vmatprep.subr.bf16.mxu1 %v16801_v40  ;;  %14152 = vst.msk [vmem:[#allocation4 + $0x270] sm:$0xff] %vm2550_vm9, %v20250_v8 }
 0x4a4   : > { %v13510_v38 = vadd.f32 %v13509_v3, %v19981_v1  ;;  %v13609_v58 = vmax.f32 %v13507_v45, 0.0  ;;  %16429 = vmatpush3.bf16.msra.mxu0 %v16800_v48 }
 0x4a5   : > { %v13612_v35 = vmax.f32 %v13518_v57, 0.0 }
 0x4a6   : > { %v13610_v56 = vmax.f32 %v13510_v38, 0.0  ;;  %v14283_v38 = vld [vmem:[#allocation4] sm:$0xff] }
 0x4a7   : > { %v13704_v27 = vpack.c.bf16 %v13612_v35, %v13611_v49  ;;  %14739 = vmatmul.mubr.bf16.vlgmr.msra.gmra.mrb[64].mxu1 %v14283_v38  ;;  %v16802_v49 = vld [vmem:[%s20795_s3 + $0xc8] sm:$0xff]  }
 0x4a8   : > { %v13703_v1 = vpack.c.bf16 %v13610_v56, %v13609_v58  ;;  %v16803_v35 = vld [vmem:[%s20795_s3 + $0x88] sm:$0xff]   ;;  %v16804_v56 = vld [vmem:[%s20795_s3 + $0xd0] sm:$0xff]   ;;  %16430 = vmatprep.subr.bf16.mxu0 %v16802_v49  ;;  %16601 = vmatpush3.bf16.msra.mxu1 %v16801_v40 }
 0x4a9   : > { %13721 = vst.msk [vmem:[#allocation3 + $0xb0] sm:$0xff] %vm2550_vm9, %v13704_v27  ;;  %v13867_v27 = vld [vmem:[#allocation3 + $0x98] sm:$0xff]  ;;  %16431 = vmatpush3.bf16.msra.mxu0 %v16803_v35  ;;  %v16814_v38 = vld [vmem:[%s20795_s3 + $0x108] sm:$0xff]  }
 0x4aa   : > { %13720 = vst.msk [vmem:[#allocation3 + $0xa8] sm:$0xff] %vm2550_vm9, %v13703_v1  ;;  %13883 = vst.msk [vmem:[#allocation4 + $0xd0] sm:$0xff] %vm2550_vm9, %v13867_v27  ;;  %16432 = vmatprep.subr.bf16.mxu0 %v16804_v56  ;;  %16602 = vmatprep.subr.bf16.mxu1 %v16814_v38  ;;  %v16813_v56 = vld [vmem:[%s20795_s3 + $0xb0] sm:$0xff]  }
 0x4ac   : > { %16603 = vmatpush3.bf16.msra.mxu1 %v16814_v38 }
 0x4b0   : > { %v20189_v41 = vld [vmem:[#allocation3 + $0xb0] sm:$0xff] }
 0x4b1   : > { %v13900_v39 = vld [vmem:[#allocation3 + $0xa8] sm:$0xff]  ;;  %13884 = vst.msk [vmem:[#allocation4 + $0xf8] sm:$0xff] %vm2550_vm9, %v20189_v41  ;;  %14012 = vst.msk [vmem:[#allocation4 + $0xd8] sm:$0xff] %vm2550_vm9, %v20189_v41 }
 0x4b2   : > { %13937 = vrot.lane.b32.xlu0 %v13900_v39, %s16926_s25  ;;  %13809 = vrot.lane.b32.xlu1 %v13900_v39, %s16926_s25  ;;  %13755 = vst.msk [vmem:[#allocation4 + $0x118] sm:$0xff] %vm2550_vm9, %v13900_v39  ;;  %14011 = vst.msk [vmem:[#allocation4 + $0xb0] sm:$0xff] %vm2550_vm9, %v13900_v39 }
 0x4b3   : > { %v16272_v31 = vpop.f32.mrb[48].mxu1 }
 0x4b4   : > { %v16273_v5 = vpop.f32.mrb[49].mxu1 }
 0x4b5   : > { %v16274_v7 = vadd.f32 %v16273_v5, %v16272_v31  ;;  %v16275_v45 = vpop.f32.mrb[50].mxu1  ;;  %v16806_v31 = vld [vmem:[%s20795_s3 + $0xd8] sm:$0xff]  }
 0x4b6   : > { %v16276_v29 = vpop.f32.mrb[51].mxu1  ;;  %13939 = vrot.lane.b32.xlu0 %v20015_v32, %s16926_s25  ;;  %13811 = vrot.lane.b32.xlu1 %v20189_v41, %s16926_s25 }
 0x4b7   : > { %v16277_v57 = vadd.f32 %v16276_v29, %v16275_v45  ;;  %v20211_v3 = vadd.f32 %v16274_v7, %v19923_v30  ;;  %v13736_v30 = vld [vmem:[#allocation3 + $0x80] sm:$0xff] }
 0x4b8   : > { %13752 = vst.msk [vmem:[#allocation4 + $0xa0] sm:$0xff] %vm2550_vm9, %v13736_v30  ;;  %v16809_v45 = vld [vmem:[%s20795_s3 + $0xa0] sm:$0xff]  }
 0x4b9   : > { %v20228_v58 = vadd.f32 %v16277_v57, %v19926_v25  ;;  %v16805_v25 = vld [vmem:[%s20795_s3 + $0x90] sm:$0xff]   ;;  %v13740_v29 = vld [vmem:[#allocation3 + $0x100] sm:$0xff]  ;;  %v16810_v57 = vld [vmem:[%s20795_s3 + $0xe8] sm:$0xff]  }
 0x4ba   : > { %v16582_v1 = vpop.f32.mrb[76].mxu0  ;;  %14056 = vrot.lane.b32.xlu1 %v20057_v33, %s16926_s25  ;;  %16433 = vmatpush3.bf16.msra.mxu0 %v16805_v25  ;;  %13756 = vst.msk [vmem:[#allocation4 + $0x140] sm:$0xff] %vm2550_vm9, %v13740_v29 }
 0x4bb   : > { %v13531_v32 = vadd.f32 %v16582_v1, %v20020_v36  ;;  %v13522_v11 = vpop.f32.mrb[77].mxu0  ;;  %16434 = vmatprep.subr.bf16.mxu0 %v16806_v31  ;;  %v16815_v1 = vld [vmem:[%s20795_s3 + $0xf8] sm:$0xff]  }
 0x4bc   : > { %v13523_v14 = vadd.f32 %v13522_v11, %v20004_v0  ;;  %v16583_v9 = vpop.f32.mrb[78].mxu0  ;;  %v16807_v0 = vld [vmem:[%s20795_s3 + $0x98] sm:$0xff]  }
 0x4bd   : > { %v13534_v28 = vadd.f32 %v16583_v9, %v20023_v6  ;;  %v13525_v19 = vpop.f32.mrb[79].mxu0  ;;  %v13615_v5 = vmax.f32 %v13531_v32, 0.0  ;;  %v16808_v6 = vld [vmem:[%s20795_s3 + $0xe0] sm:$0xff]   ;;  %v13871_v32 = vld [vmem:[#allocation3 + $0x118] sm:$0xff] }
 0x4be   : > { %v13526_v36 = vadd.f32 %v13525_v19, %v20007_v52  ;;  %v13613_v48 = vmax.f32 %v13523_v14, 0.0  ;;  %13813 = vrot.lane.b32.xlu1 %v20039_v10, %s16926_s25  ;;  %16435 = vmatpush3.bf16.msra.mxu0 %v16807_v0  ;;  %v16811_v10 = vld [vmem:[%s20795_s3 + $0xa8] sm:$0xff]   ;;  %13887 = vst.msk [vmem:[#allocation4 + $0x170] sm:$0xff] %vm2550_vm9, %v13871_v32  ;;  %v16816_v9 = vld [vmem:[%s20795_s3 + $0xb8] sm:$0xff]  }
 0x4bf   : > { %v13616_v39 = vmax.f32 %v13534_v28, 0.0  ;;  %16436 = vmatprep.subr.bf16.mxu0 %v16808_v6 }
 0x4c0   : > { %v13614_v7 = vmax.f32 %v13526_v36, 0.0 }
 0x4c1   : > { %v13706_v52 = vpack.c.bf16 %v13616_v39, %v13615_v5 }
 0x4c2   : > { %v13705_v33 = vpack.c.bf16 %v13614_v7, %v13613_v48  ;;  %14058 = vrot.lane.b32.xlu1 %v20049_v43, %s16926_s25  ;;  %16437 = vmatpush3.bf16.msra.mxu0 %v16809_v45 }
 0x4c3   : > { %13723 = vst.msk [vmem:[#allocation3 + $0xd0] sm:$0xff] %vm2550_vm9, %v13706_v52  ;;  %16438 = vmatprep.subr.bf16.mxu0 %v16810_v57  ;;  %v14027_v57 = vld [vmem:[#allocation3 + $0x58] sm:$0xff] }
 0x4c4   : > { %13722 = vst.msk [vmem:[#allocation3 + $0xc8] sm:$0xff] %vm2550_vm9, %v13705_v33 }
 0x4c6   : > { %13815 = vrot.lane.b32.xlu1 %v20055_v34, %s16926_s25  ;;  %16439 = vmatpush3.bf16.msra.mxu0 %v16811_v10 }
 0x4c7   : > { %16440 = vmatprep.subr.bf16.mxu0 %v16812_v18 }
 0x4ca   : > { %v20281_v40 = vld [vmem:[#allocation3 + $0xd0] sm:$0xff]  ;;  %14060 = vrot.lane.b32.xlu1 %v20137_v2, %s16926_s25  ;;  %16441 = vmatpush3.bf16.msra.mxu0 %v16813_v56 }
 0x4cb   : > { %v13998_v49 = vld [vmem:[#allocation3 + $0xd0] sm:$0xff]  ;;  %14271 = vst.msk [vmem:[#allocation4 + $0xc0] sm:$0xff] %vm2550_vm9, %v20281_v40  ;;  %v20285_v30 = vld [vmem:[#allocation3 + $0xc8] sm:$0xff]  ;;  %16442 = vmatprep.subr.bf16.mxu0 %v16815_v1 }
 0x4cc   : > { %14014 = vst.msk [vmem:[#allocation4 + $0x128] sm:$0xff] %vm2550_vm9, %v13998_v49  ;;  %13941 = vrot.lane.b32.xlu0 %v20285_v30, %s16926_s25  ;;  %14142 = vst.msk [vmem:[#allocation4 + $0xe0] sm:$0xff] %vm2550_vm9, %v20285_v30 }
 0x4cd   : > { %14013 = vst.msk [vmem:[#allocation4 + $0x100] sm:$0xff] %vm2550_vm9, %v20285_v30 }
 0x4ce   : > { %v16278_v43 = vpop.f32.mrb[52].mxu1  ;;  %16443 = vmatpush3.bf16.msra.mxu0 %v16816_v9 }
 0x4cf   : > { %v16279_v35 = vpop.f32.mrb[53].mxu1 }
 0x4d0   : > { %v16280_v34 = vadd.f32 %v16279_v35, %v16278_v43  ;;  %v16281_v27 = vpop.f32.mrb[54].mxu1  ;;  %14186 = vrot.lane.b32.xlu0 %v20146_v26, %s16926_s25 }
 0x4d1   : > { %v16282_v11 = vpop.f32.mrb[55].mxu1 }
 0x4d2   : > { %v16283_v25 = vadd.f32 %v16282_v11, %v16281_v27  ;;  %v20304_v14 = vadd.f32 %v16280_v34, %v19929_v50 }
 0x4d4   : > { %v20312_v28 = vadd.f32 %v16283_v25, %v19932_v62  ;;  %13943 = vrot.lane.b32.xlu0 %v20047_v63, %s16926_s25  ;;  %v14123_v62 = vld [vmem:[#allocation3 + $0x60] sm:$0xff] }
 0x4d5   : > { %14139 = vst.msk [vmem:[#allocation4 + $0x68] sm:$0xff] %vm2550_vm9, %v14123_v62 }
 0x4d7   : > { %v16586_v31 = vpop.f32.mrb[80].mxu0 }
 0x4d8   : > { %v13547_v19 = vadd.f32 %v16586_v31, %v20032_v59  ;;  %v13538_v36 = vpop.f32.mrb[81].mxu0  ;;  %14188 = vrot.lane.b32.xlu0 %v20137_v2, %s16926_s25 }
 0x4d9   : > { %v13539_v5 = vadd.f32 %v13538_v36, %v20026_v60  ;;  %v16587_v50 = vpop.f32.mrb[82].mxu0 }
 0x4da   : > { %v13550_v39 = vadd.f32 %v16587_v50, %v20035_v61  ;;  %v13541_v0 = vpop.f32.mrb[83].mxu0  ;;  %v13619_v26 = vmax.f32 %v13547_v19, 0.0 }
 0x4db   : > { %v13542_v48 = vadd.f32 %v13541_v0, %v20029_v16  ;;  %v13617_v6 = vmax.f32 %v13539_v5, 0.0 }
 0x4dc   : > { %v13620_v7 = vmax.f32 %v13550_v39, 0.0 }
 0x4dd   : > { %v13618_v52 = vmax.f32 %v13542_v48, 0.0 }
 0x4de   : > { %v13708_v59 = vpack.c.bf16 %v13620_v7, %v13619_v26 }
 0x4df   : > { %v13707_v33 = vpack.c.bf16 %v13618_v52, %v13617_v6 }
 0x4e0   : > { %13725 = vst.msk [vmem:[#allocation3 + $0x130] sm:$0xff] %vm2550_vm9, %v13708_v59 }
 0x4e1   : > { %13724 = vst.msk [vmem:[#allocation3 + $0x128] sm:$0xff] %vm2550_vm9, %v13707_v33 }
 0x4e7   : > { %v16284_v60 = vpop.f32.mrb[56].mxu1  ;;  %v20325_v16 = vld [vmem:[#allocation3 + $0x130] sm:$0xff] }
 0x4e8   : > { %v16285_v61 = vpop.f32.mrb[57].mxu1  ;;  %v13904_v63 = vld [vmem:[#allocation3 + $0x128] sm:$0xff]  ;;  %13888 = vst.msk [vmem:[#allocation4 + $0x198] sm:$0xff] %vm2550_vm9, %v20325_v16  ;;  %14016 = vst.msk [vmem:[#allocation4 + $0x178] sm:$0xff] %vm2550_vm9, %v20325_v16 }
 0x4e9   : > { %v16286_v45 = vadd.f32 %v16285_v61, %v16284_v60  ;;  %v16287_v29 = vpop.f32.mrb[58].mxu1  ;;  %13945 = vrot.lane.b32.xlu0 %v13904_v63, %s16926_s25  ;;  %13817 = vrot.lane.b32.xlu1 %v13904_v63, %s16926_s25  ;;  %13759 = vst.msk [vmem:[#allocation4 + $0x1b8] sm:$0xff] %vm2550_vm9, %v13904_v63  ;;  %14015 = vst.msk [vmem:[#allocation4 + $0x150] sm:$0xff] %vm2550_vm9, %v13904_v63 }
 0x4ea   : > { %v16288_v2 = vpop.f32.mrb[59].mxu1 }
 0x4eb   : > { %v16289_v10 = vadd.f32 %v16288_v2, %v16287_v29  ;;  %v20336_v38 = vadd.f32 %v16286_v45, %v19935_v12  ;;  %v14127_v45 = vld [vmem:[#allocation3 + $0xe0] sm:$0xff] }
 0x4ec   : > { %14143 = vst.msk [vmem:[#allocation4 + $0x108] sm:$0xff] %vm2550_vm9, %v14127_v45 }
 0x4ed   : > { %v20339_v18 = vadd.f32 %v16289_v10, %v19950_v15  ;;  %14190 = vrot.lane.b32.xlu0 %v20085_v22, %s16926_s25  ;;  %14062 = vrot.lane.b32.xlu1 %v14027_v57, %s16926_s25  ;;  %v16590_v43 = vpop.f32.mrb[84].mxu0  ;;  %v14157_v15 = vld [vmem:[#allocation3 + $0x70] sm:$0xff] }
 0x4ee   : > { %v13563_v49 = vadd.f32 %v16590_v43, %v20159_v4  ;;  %v13554_v35 = vpop.f32.mrb[85].mxu0 }
 0x4ef   : > { %v13555_v56 = vadd.f32 %v13554_v35, %v20076_v54  ;;  %v16591_v34 = vpop.f32.mrb[86].mxu0 }
 0x4f0   : > { %v13566_v27 = vadd.f32 %v16591_v34, %v20164_v24  ;;  %v13557_v1 = vpop.f32.mrb[87].mxu0  ;;  %v13623_v22 = vmax.f32 %v13563_v49, 0.0 }
 0x4f1   : > { %13947 = vrot.lane.b32.xlu0 %v20095_v20, %s16926_s25  ;;  %13819 = vrot.lane.b32.xlu1 %v20325_v16, %s16926_s25  ;;  %v13558_v12 = vadd.f32 %v13557_v1, %v20083_v44  ;;  %v13621_v11 = vmax.f32 %v13555_v56, 0.0  ;;  %v13744_v20 = vld [vmem:[#allocation3 + $0x180] sm:$0xff]  ;;  %v16817_v44 = vld [vmem:[%s20795_s3 + $0x110] sm:$0xff]  }
 0x4f2   : > { %v13624_v32 = vmax.f32 %v13566_v27, 0.0  ;;  %13760 = vst.msk [vmem:[#allocation4 + $0x1e0] sm:$0xff] %vm2550_vm9, %v13744_v20  ;;  %16604 = vmatprep.subr.bf16.mxu1 %v16817_v44 }
 0x4f3   : > { %v13622_v4 = vmax.f32 %v13558_v12, 0.0  ;;  %16605 = vmatpush3.bf16.msra.mxu1 %v16817_v44 }
 0x4f4   : > { %v13710_v25 = vpack.c.bf16 %v13624_v32, %v13623_v22 }
 0x4f5   : > { %14192 = vrot.lane.b32.xlu0 %v14157_v15, %s16926_s25  ;;  %14064 = vrot.lane.b32.xlu1 %v20189_v41, %s16926_s25  ;;  %v13709_v54 = vpack.c.bf16 %v13622_v4, %v13621_v11  ;;  %v13930_v50 = vpop.permute.xlu0 %13929  ;;  %v13802_v48 = vpop.permute.xlu1 %13801 }
 0x4f6   : > { %13727 = vst.msk [vmem:[#allocation3 + $0x150] sm:$0xff] %vm2550_vm9, %v13710_v25 }
 0x4f7   : > { %13726 = vst.msk [vmem:[#allocation3 + $0x148] sm:$0xff] %vm2550_vm9, %v13709_v54 }
 0x4f8   : > { %13976 = vst.msk [vmem:[#allocation4 + $0x30] sm:$0xff] %vm4430_vm10, %v13930_v50  ;;  %13847 = vst.msk [vmem:[#allocation4 + $0x50] sm:$0xff] %vm4430_vm10, %v13802_v48 }
 0x4f9   : > { %13821 = vrot.lane.b32.xlu1 %v20109_v46, %s16926_s25  ;;  %v13932_v6 = vpop.permute.xlu0 %13931  ;;  %v13804_v59 = vpop.permute.xlu1 %13803 }
 0x4fa   : > { %13977 = vst.msk [vmem:[#allocation4 + $0x58] sm:$0xff] %vm4430_vm10, %v13932_v6  ;;  %13848 = vst.msk [vmem:[#allocation4 + $0x78] sm:$0xff] %vm4430_vm10, %v13804_v59 }
 0x4fd   : > { %14066 = vrot.lane.b32.xlu1 %v20113_v55, %s16926_s25  ;;  %v20365_v24 = vld [vmem:[#allocation3 + $0x150] sm:$0xff]  ;;  %v13875_v55 = vld [vmem:[#allocation3 + $0x198] sm:$0xff]  ;;  %v13806_v2 = vpop.permute.xlu1 %13805 }
 0x4fe   : > { %v16290_v41 = vpop.f32.mrb[60].mxu1  ;;  %v14002_v9 = vld [vmem:[#allocation3 + $0x150] sm:$0xff]  ;;  %14275 = vst.msk [vmem:[#allocation4 + $0x160] sm:$0xff] %vm2550_vm9, %v20365_v24  ;;  %v20369_v19 = vld [vmem:[#allocation3 + $0x148] sm:$0xff]  ;;  %13891 = vst.msk [vmem:[#allocation4 + $0x210] sm:$0xff] %vm2550_vm9, %v13875_v55 }
 0x4ff   : > { %v16291_v31 = vpop.f32.mrb[61].mxu1  ;;  %14018 = vst.msk [vmem:[#allocation4 + $0x1c8] sm:$0xff] %vm2550_vm9, %v14002_v9  ;;  %13949 = vrot.lane.b32.xlu0 %v20369_v19, %s16926_s25  ;;  %14146 = vst.msk [vmem:[#allocation4 + $0x180] sm:$0xff] %vm2550_vm9, %v20369_v19  ;;  %v14289_v63 = vld [vmem:[#allocation4 + $0x30] sm:$0xff] }
 0x500   : > { %v16292_v46 = vadd.f32 %v16291_v31, %v16290_v41  ;;  %v16293_v36 = vpop.f32.mrb[62].mxu1  ;;  %14017 = vst.msk [vmem:[#allocation4 + $0x1a0] sm:$0xff] %vm2550_vm9, %v20369_v19  ;;  %14746 = vmatprep.mubr.bf16.mxu1 %v14289_v63  ;;  %v14293_v1 = vld [vmem:[#allocation4 + $0x50] sm:$0xff] }
 0x501   : > { %v16294_v5 = vpop.f32.mrb[63].mxu1  ;;  %13823 = vrot.lane.b32.xlu1 %v20120_v42, %s16926_s25  ;;  %13849 = vst.msk [vmem:[#allocation4 + $0xa0] sm:$0xff] %vm4430_vm10, %v13806_v2  ;;  %v14161_v41 = vld [vmem:[#allocation3 + $0xf0] sm:$0xff] }
 0x502   : > { %v16295_v39 = vadd.f32 %v16294_v5, %v16293_v36  ;;  %v13434_v0 = vadd.f32 %v16292_v46, %v19953_v17  ;;  %v14131_v36 = vld [vmem:[#allocation3 + $0x160] sm:$0xff] }
 0x503   : > { %v16594_v26 = vpop.f32.mrb[88].mxu0  ;;  %14194 = vrot.lane.b32.xlu0 %v20285_v30, %s16926_s25  ;;  %v14288_v30 = vld [vmem:[#allocation4 + $0x28] sm:$0xff]  ;;  %14147 = vst.msk [vmem:[#allocation4 + $0x1a8] sm:$0xff] %vm2550_vm9, %v14131_v36 }
 0x504   : > { %v13437_v7 = vadd.f32 %v16295_v39, %v19963_v47  ;;  %v13579_v62 = vadd.f32 %v16594_v26, %v20304_v14  ;;  %v13570_v42 = vpop.f32.mrb[89].mxu0  ;;  %14747 = vmatmul.mubr.bf16.gmra.mrb[68].mxu1 %v14288_v30 }
 0x505   : > { %14068 = vrot.lane.b32.xlu1 %v20281_v40, %s16926_s25  ;;  %v13571_v17 = vadd.f32 %v13570_v42, %v20211_v3  ;;  %v16595_v52 = vpop.f32.mrb[90].mxu0 }
 0x506   : > { %v13582_v33 = vadd.f32 %v16595_v52, %v20312_v28  ;;  %v13573_v60 = vpop.f32.mrb[91].mxu0  ;;  %v13627_v14 = vmax.f32 %v13579_v62, 0.0  ;;  %v14039_v62 = vld [vmem:[#allocation3 + $0x1d8] sm:$0xff] }
 0x507   : > { %v13574_v47 = vadd.f32 %v13573_v60, %v20228_v58  ;;  %13951 = vrot.lane.b32.xlu0 %v20111_v23, %s16926_s25  ;;  %v13625_v3 = vmax.f32 %v13571_v17, 0.0  ;;  %v14294_v23 = vld [vmem:[#allocation4 + $0x58] sm:$0xff]  ;;  %v13808_v58 = vpop.permute.xlu1 %13807  ;;  %v14169_v17 = vld [vmem:[#allocation3 + $0x1f0] sm:$0xff] }
 0x508   : > { %v13628_v61 = vmax.f32 %v13582_v33, 0.0  ;;  %14754 = vmatprep.mubr.bf16.mxu1 %v14294_v23  ;;  %13850 = vst.msk [vmem:[#allocation4 + $0xc8] sm:$0xff] %vm4430_vm10, %v13808_v58  ;;  %v14303_v5 = vld [vmem:[#allocation4 + $0xa0] sm:$0xff] }
 0x509   : > { %v13626_v29 = vmax.f32 %v13574_v47, 0.0  ;;  %v14135_v33 = vld [vmem:[#allocation3 + $0x1e0] sm:$0xff] }
 0x50a   : > { %v13712_v28 = vpack.c.bf16 %v13628_v61, %v13627_v14  ;;  %14151 = vst.msk [vmem:[#allocation4 + $0x248] sm:$0xff] %vm2550_vm9, %v14135_v33 }
 0x50b   : > { %v13711_v57 = vpack.c.bf16 %v13626_v29, %v13625_v3  ;;  %14196 = vrot.lane.b32.xlu0 %v20281_v40, %s16926_s25 }
 0x50c   : > { %13729 = vst.msk [vmem:[#allocation3 + $0x1b0] sm:$0xff] %vm2550_vm9, %v13712_v28  ;;  %14755 = vmatmul.mubr.bf16.gmra.mrb[72].mxu1 %v14293_v1  ;;  %v13934_v54 = vpop.permute.xlu0 %13933 }
 0x50d   : > { %13728 = vst.msk [vmem:[#allocation3 + $0x1a8] sm:$0xff] %vm2550_vm9, %v13711_v57 }
 0x50e   : > { %v16598_v10 = vpop.f32.mrb[92].mxu0  ;;  %13978 = vst.msk [vmem:[#allocation4 + $0x80] sm:$0xff] %vm4430_vm10, %v13934_v54 }
 0x50f   : > { %v13595_v43 = vadd.f32 %v16598_v10, %v13434_v0  ;;  %v13586_v49 = vpop.f32.mrb[93].mxu0  ;;  %v14165_v0 = vld [vmem:[#allocation3 + $0x170] sm:$0xff] }
 0x510   : > { %v13587_v35 = vadd.f32 %v13586_v49, %v20336_v38  ;;  %v16599_v56 = vpop.f32.mrb[94].mxu0  ;;  %v13936_v20 = vpop.permute.xlu0 %13935 }
 0x511   : > { %v13598_v34 = vadd.f32 %v16599_v56, %v13437_v7  ;;  %v13589_v27 = vpop.f32.mrb[95].mxu0  ;;  %v13631_v12 = vmax.f32 %v13595_v43, 0.0  ;;  %13979 = vst.msk [vmem:[#allocation4 + $0xa8] sm:$0xff] %vm4430_vm10, %v13936_v20 }
 0x512   : > { %v13590_v40 = vadd.f32 %v13589_v27, %v20339_v18  ;;  %v13629_v32 = vmax.f32 %v13587_v35, 0.0  ;;  %v14031_v18 = vld [vmem:[#allocation3 + $0xd8] sm:$0xff] }
 0x513   : > { %v13632_v15 = vmax.f32 %v13598_v34, 0.0  ;;  %v13780_v22 = vld [vmem:[#allocation3 + $0x1b0] sm:$0xff] }
 0x514   : > { %v13630_v11 = vmax.f32 %v13590_v40, 0.0  ;;  %v13908_v4 = vld [vmem:[#allocation3 + $0x1a8] sm:$0xff]  ;;  %13892 = vst.msk [vmem:[#allocation4 + $0x238] sm:$0xff] %vm2550_vm9, %v13780_v22  ;;  %14020 = vst.msk [vmem:[#allocation4 + $0x218] sm:$0xff] %vm2550_vm9, %v13780_v22 }
 0x515   : > { %v13714_v25 = vpack.c.bf16 %v13632_v15, %v13631_v12  ;;  %13953 = vrot.lane.b32.xlu0 %v13908_v4, %s16926_s25  ;;  %13825 = vrot.lane.b32.xlu1 %v13908_v4, %s16926_s25  ;;  %13763 = vst.msk [vmem:[#allocation4 + $0x258] sm:$0xff] %vm2550_vm9, %v13908_v4  ;;  %14019 = vst.msk [vmem:[#allocation4 + $0x1f0] sm:$0xff] %vm2550_vm9, %v13908_v4  ;;  %v14299_v46 = vld [vmem:[#allocation4 + $0x80] sm:$0xff] }
 0x516   : > { %v13713_v38 = vpack.c.bf16 %v13630_v11, %v13629_v32  ;;  %14762 = vmatprep.mubr.bf16.mxu1 %v14299_v46 }
 0x517   : > { %13731 = vst.msk [vmem:[#allocation3 + $0x1d0] sm:$0xff] %vm2550_vm9, %v13714_v25 }
 0x518   : > { %13730 = vst.msk [vmem:[#allocation3 + $0x1c8] sm:$0xff] %vm2550_vm9, %v13713_v38  ;;  %v14304_v55 = vld [vmem:[#allocation4 + $0xa8] sm:$0xff] }
 0x519   : > { %14198 = vrot.lane.b32.xlu0 %v20122_v37, %s16926_s25  ;;  %14070 = vrot.lane.b32.xlu1 %v14031_v18, %s16926_s25  ;;  %v16818_v37 = vld [vmem:[%s20795_s3 + $0x118] sm:$0xff]  }
 0x51a   : > { %16606 = vmatprep.subr.bf16.mxu1 %v16818_v37 }
 0x51b   : > { %16607 = vmatpush3.bf16.msra.mxu1 %v16818_v37 }
 0x51d   : > { %13955 = vrot.lane.b32.xlu0 %v20131_v53, %s16926_s25  ;;  %13827 = vrot.lane.b32.xlu1 %v13780_v22, %s16926_s25  ;;  %v14298_v53 = vld [vmem:[#allocation4 + $0x78] sm:$0xff] }
 0x51e   : > { %v14263_v44 = vld [vmem:[#allocation3 + $0x1d0] sm:$0xff]  ;;  %14763 = vmatmul.mubr.bf16.gmra.mrb[76].mxu1 %v14298_v53 }
 0x51f   : > { %v14006_v9 = vld [vmem:[#allocation3 + $0x1d0] sm:$0xff]  ;;  %14279 = vst.msk [vmem:[#allocation4 + $0x200] sm:$0xff] %vm2550_vm9, %v14263_v44  ;;  %v13910_v31 = vld [vmem:[#allocation3 + $0x1c8] sm:$0xff]  ;;  %14770 = vmatprep.mubr.bf16.mxu1 %v14304_v55 }
 0x520   : > { %14022 = vst.msk [vmem:[#allocation4 + $0x268] sm:$0xff] %vm2550_vm9, %v14006_v9  ;;  %14150 = vst.msk [vmem:[#allocation4 + $0x220] sm:$0xff] %vm2550_vm9, %v13910_v31 }
 0x521   : > { %14021 = vst.msk [vmem:[#allocation4 + $0x240] sm:$0xff] %vm2550_vm9, %v13910_v31  ;;  %14200 = vrot.lane.b32.xlu0 %v14161_v41, %s16926_s25  ;;  %14072 = vrot.lane.b32.xlu1 %v20325_v16, %s16926_s25  ;;  %v14035_v16 = vld [vmem:[#allocation3 + $0x158] sm:$0xff] }
 0x524   : > { %v13938_v50 = vpop.permute.xlu0 %13937  ;;  %v13810_v39 = vpop.permute.xlu1 %13809 }
 0x525   : > { %13957 = vrot.lane.b32.xlu0 %v13910_v31, %s16926_s25  ;;  %14074 = vrot.lane.b32.xlu1 %v20166_v13, %s16926_s25  ;;  %13980 = vst.msk [vmem:[#allocation4 + $0xd0] sm:$0xff] %vm4430_vm10, %v13938_v50  ;;  %13851 = vst.msk [vmem:[#allocation4 + $0xf0] sm:$0xff] %vm4430_vm10, %v13810_v39 }
 0x526   : > { %14771 = vmatmul.mubr.bf16.gmra.mrb[80].mxu1 %v14303_v5 }
 0x528   : > { %v13940_v13 = vpop.permute.xlu0 %13939 }
 0x529   : > { %14202 = vrot.lane.b32.xlu0 %v20369_v19, %s16926_s25  ;;  %14076 = vrot.lane.b32.xlu1 %v20365_v24, %s16926_s25  ;;  %v13812_v19 = vpop.permute.xlu1 %13811  ;;  %13981 = vst.msk [vmem:[#allocation4 + $0xf8] sm:$0xff] %vm4430_vm10, %v13940_v13 }
 0x52a   : > { %13852 = vst.msk [vmem:[#allocation4 + $0x118] sm:$0xff] %vm4430_vm10, %v13812_v19 }
 0x52c   : > { %v14309_v26 = vld [vmem:[#allocation4 + $0xd0] sm:$0xff] }
 0x52d   : > { %14204 = vrot.lane.b32.xlu0 %v20365_v24, %s16926_s25  ;;  %14078 = vrot.lane.b32.xlu1 %v14035_v16, %s16926_s25  ;;  %v14308_v24 = vld [vmem:[#allocation4 + $0xc8] sm:$0xff]  ;;  %v14057_v48 = vpop.permute.xlu1 %14056 }
 0x52e   : > { %14104 = vst.msk [vmem:[#allocation4 + $0x10] sm:$0xff] %vm4430_vm10, %v14057_v48  ;;  %14778 = vmatprep.mubr.bf16.mxu1 %v14309_v26 }
 0x52f   : > { %14779 = vmatmul.mubr.bf16.gmra.mrb[84].mxu1 %v14308_v24 }
 0x530   : > { %v14314_v7 = vld [vmem:[#allocation4 + $0xf8] sm:$0xff] }
 0x531   : > { %14206 = vrot.lane.b32.xlu0 %v20180_v51, %s16926_s25  ;;  %14080 = vrot.lane.b32.xlu1 %v13780_v22, %s16926_s25  ;;  %v13814_v51 = vpop.permute.xlu1 %13813  ;;  %v14318_v30 = vld [vmem:[#allocation4 + $0x118] sm:$0xff] }
 0x532   : > { %13853 = vst.msk [vmem:[#allocation4 + $0x140] sm:$0xff] %vm4430_vm10, %v13814_v51  ;;  %14786 = vmatprep.mubr.bf16.mxu1 %v14314_v7 }
 0x535   : > { %14208 = vrot.lane.b32.xlu0 %v14165_v0, %s16926_s25  ;;  %14082 = vrot.lane.b32.xlu1 %v20191_v21, %s16926_s25  ;;  %v14059_v42 = vpop.permute.xlu1 %14058  ;;  %v14313_v21 = vld [vmem:[#allocation4 + $0xf0] sm:$0xff] }
 0x536   : > { %14105 = vst.msk [vmem:[#allocation4 + $0x38] sm:$0xff] %vm4430_vm10, %v14059_v42  ;;  %v14285_v63 = vld [vmem:[#allocation4 + $0x10] sm:$0xff] }
 0x537   : > { %14787 = vmatmul.mubr.bf16.gmra.mrb[88].mxu1 %v14313_v21 }
 0x539   : > { %14210 = vrot.lane.b32.xlu0 %v13910_v31, %s16926_s25  ;;  %14084 = vrot.lane.b32.xlu1 %v14263_v44, %s16926_s25  ;;  %v13816_v6 = vpop.permute.xlu1 %13815  ;;  %v14323_v45 = vld [vmem:[#allocation4 + $0x140] sm:$0xff] }
 0x53a   : > { %13854 = vst.msk [vmem:[#allocation4 + $0x168] sm:$0xff] %vm4430_vm10, %v13816_v6 }
 0x53d   : > { %14212 = vrot.lane.b32.xlu0 %v14263_v44, %s16926_s25  ;;  %14086 = vrot.lane.b32.xlu1 %v14039_v62, %s16926_s25  ;;  %v14061_v59 = vpop.permute.xlu1 %14060  ;;  %v14290_v29 = vld [vmem:[#allocation4 + $0x38] sm:$0xff] }
 0x53e   : > { %v13942_v52 = vpop.permute.xlu0 %13941  ;;  %14106 = vst.msk [vmem:[#allocation4 + $0x60] sm:$0xff] %vm4430_vm10, %v14061_v59 }
 0x53f   : > { %13982 = vst.msk [vmem:[#allocation4 + $0x120] sm:$0xff] %vm4430_vm10, %v13942_v52 }
 0x541   : > { %14214 = vrot.lane.b32.xlu0 %v20250_v8, %s16926_s25  ;;  %v14328_v10 = vld [vmem:[#allocation4 + $0x168] sm:$0xff] }
 0x542   : > { %v14187_v60 = vpop.permute.xlu0 %14186 }
 0x543   : > { %14234 = vst.msk [vmem:[#allocation4 + $0x18] sm:$0xff] %vm4430_vm10, %v14187_v60 }
 0x545   : > { %14216 = vrot.lane.b32.xlu0 %v14169_v17, %s16926_s25  ;;  %v14295_v1 = vld [vmem:[#allocation4 + $0x60] sm:$0xff] }
 0x546   : > { %v13944_v47 = vpop.permute.xlu0 %13943  ;;  %v14319_v8 = vld [vmem:[#allocation4 + $0x120] sm:$0xff] }
 0x547   : > { %13983 = vst.msk [vmem:[#allocation4 + $0x148] sm:$0xff] %vm4430_vm10, %v13944_v47  ;;  %14794 = vmatprep.mubr.bf16.mxu1 %v14319_v8 }
 0x548   : > { %14795 = vmatmul.mubr.bf16.gmra.mrb[92].mxu1 %v14318_v30 }
 0x54a   : > { %v14189_v14 = vpop.permute.xlu0 %14188  ;;  %v14286_v61 = vld [vmem:[#allocation4 + $0x18] sm:$0xff] }
 0x54b   : > { %14235 = vst.msk [vmem:[#allocation4 + $0x40] sm:$0xff] %vm4430_vm10, %v14189_v14  ;;  %14899 = vmatprep.mubr.bf16.mxu0 %v14286_v61 }
 0x54c   : > { %14900 = vmatmul.mubr.bf16.vlgmr.msra.gmra.mrb[96].mxu0 %v14285_v63 }
 0x54e   : > { %v14324_v3 = vld [vmem:[#allocation4 + $0x148] sm:$0xff] }
 0x54f   : > { %14802 = vmatprep.mubr.bf16.mxu1 %v14324_v3 }
 0x550   : > { %14803 = vmatmul.mubr.bf16.gmra.mrb[96].mxu1 %v14323_v45 }
 0x552   : > { %v14291_v2 = vld [vmem:[#allocation4 + $0x40] sm:$0xff] }
 0x553   : > { %14907 = vmatprep.mubr.bf16.mxu0 %v14291_v2 }
 0x554   : > { %14908 = vmatmul.mubr.bf16.gmra.mrb[100].mxu0 %v14290_v29  ;;  %v14287_v29 = vld [vmem:[#allocation4 + $0x20] sm:$0xff] }
 0x55b   : > { %v13946_v28 = vpop.permute.xlu0 %13945  ;;  %v13818_v57 = vpop.permute.xlu1 %13817 }
 0x55c   : > { %13984 = vst.msk [vmem:[#allocation4 + $0x170] sm:$0xff] %vm4430_vm10, %v13946_v28  ;;  %13855 = vst.msk [vmem:[#allocation4 + $0x190] sm:$0xff] %vm4430_vm10, %v13818_v57 }
 0x55f   : > { %v14191_v23 = vpop.permute.xlu0 %14190  ;;  %v14063_v58 = vpop.permute.xlu1 %14062 }
 0x560   : > { %14236 = vst.msk [vmem:[#allocation4 + $0x68] sm:$0xff] %vm4430_vm10, %v14191_v23  ;;  %14107 = vst.msk [vmem:[#allocation4 + $0x88] sm:$0xff] %vm4430_vm10, %v14063_v58  ;;  %v14292_v58 = vld [vmem:[#allocation4 + $0x48] sm:$0xff] }
 0x563   : > { %v13948_v43 = vpop.permute.xlu0 %13947  ;;  %v13820_v49 = vpop.permute.xlu1 %13819  ;;  %v14329_v35 = vld [vmem:[#allocation4 + $0x170] sm:$0xff] }
 0x564   : > { %13985 = vst.msk [vmem:[#allocation4 + $0x198] sm:$0xff] %vm4430_vm10, %v13948_v43  ;;  %13856 = vst.msk [vmem:[#allocation4 + $0x1b8] sm:$0xff] %vm4430_vm10, %v13820_v49  ;;  %14810 = vmatprep.mubr.bf16.mxu1 %v14329_v35  ;;  %v14333_v15 = vld [vmem:[#allocation4 + $0x190] sm:$0xff] }
 0x565   : > { %14811 = vmatmul.mubr.bf16.gmra.mrb[100].mxu1 %v14328_v10  ;;  %v14297_v35 = vld [vmem:[#allocation4 + $0x70] sm:$0xff] }
 0x567   : > { %v14193_v56 = vpop.permute.xlu0 %14192  ;;  %v14296_v34 = vld [vmem:[#allocation4 + $0x68] sm:$0xff]  ;;  %v14065_v27 = vpop.permute.xlu1 %14064 }
 0x568   : > { %14237 = vst.msk [vmem:[#allocation4 + $0x90] sm:$0xff] %vm4430_vm10, %v14193_v56  ;;  %14915 = vmatprep.mubr.bf16.mxu0 %v14296_v34  ;;  %14108 = vst.msk [vmem:[#allocation4 + $0xb0] sm:$0xff] %vm4430_vm10, %v14065_v27  ;;  %v14300_v22 = vld [vmem:[#allocation4 + $0x88] sm:$0xff] }
 0x569   : > { %14916 = vmatmul.mubr.bf16.gmra.mrb[104].mxu0 %v14295_v1 }
 0x56b   : > { %v13822_v40 = vpop.permute.xlu1 %13821  ;;  %v14334_v12 = vld [vmem:[#allocation4 + $0x198] sm:$0xff] }
 0x56c   : > { %13857 = vst.msk [vmem:[#allocation4 + $0x1e0] sm:$0xff] %vm4430_vm10, %v13822_v40  ;;  %14818 = vmatprep.mubr.bf16.mxu1 %v14334_v12  ;;  %v14338_v44 = vld [vmem:[#allocation4 + $0x1b8] sm:$0xff] }
 0x56d   : > { %14819 = vmatmul.mubr.bf16.gmra.mrb[104].mxu1 %v14333_v15  ;;  %v14302_v40 = vld [vmem:[#allocation4 + $0x98] sm:$0xff] }
 0x56f   : > { %v14301_v32 = vld [vmem:[#allocation4 + $0x90] sm:$0xff]  ;;  %v14067_v11 = vpop.permute.xlu1 %14066 }
 0x570   : > { %14923 = vmatprep.mubr.bf16.mxu0 %v14301_v32  ;;  %14109 = vst.msk [vmem:[#allocation4 + $0xd8] sm:$0xff] %vm4430_vm10, %v14067_v11  ;;  %v14305_v31 = vld [vmem:[#allocation4 + $0xb0] sm:$0xff] }
 0x571   : > { %14924 = vmatmul.mubr.bf16.gmra.mrb[108].mxu0 %v14300_v22  ;;  %v13950_v4 = vpop.permute.xlu0 %13949  ;;  %v14307_v22 = vld [vmem:[#allocation4 + $0xc0] sm:$0xff] }
 0x572   : > { %13986 = vst.msk [vmem:[#allocation4 + $0x1c0] sm:$0xff] %vm4430_vm10, %v13950_v4 }
 0x573   : > { %v13824_v25 = vpop.permute.xlu1 %13823  ;;  %v14343_v46 = vld [vmem:[#allocation4 + $0x1e0] sm:$0xff] }
 0x574   : > { %13858 = vst.msk [vmem:[#allocation4 + $0x208] sm:$0xff] %vm4430_vm10, %v13824_v25  ;;  %v14312_v25 = vld [vmem:[#allocation4 + $0xe8] sm:$0xff] }
 0x575   : > { %v14195_v38 = vpop.permute.xlu0 %14194 }
 0x576   : > { %14238 = vst.msk [vmem:[#allocation4 + $0xb8] sm:$0xff] %vm4430_vm10, %v14195_v38 }
 0x577   : > { %v14069_v18 = vpop.permute.xlu1 %14068  ;;  %v14310_v36 = vld [vmem:[#allocation4 + $0xd8] sm:$0xff] }
 0x578   : > { %14110 = vst.msk [vmem:[#allocation4 + $0x100] sm:$0xff] %vm4430_vm10, %v14069_v18  ;;  %v14317_v18 = vld [vmem:[#allocation4 + $0x110] sm:$0xff] }
 0x579   : > { %v13952_v54 = vpop.permute.xlu0 %13951  ;;  %v14339_v20 = vld [vmem:[#allocation4 + $0x1c0] sm:$0xff] }
 0x57a   : > { %13987 = vst.msk [vmem:[#allocation4 + $0x1e8] sm:$0xff] %vm4430_vm10, %v13952_v54  ;;  %14826 = vmatprep.mubr.bf16.mxu1 %v14339_v20  ;;  %v16332_v24 = vpop.f32.mrb[64].mxu1 }
 0x57b   : > { %14827 = vmatmul.mubr.bf16.gmra.mrb[108].mxu1 %v14338_v44  ;;  %v14348_v39 = vld [vmem:[#allocation4 + $0x208] sm:$0xff]  ;;  %v16333_v48 = vpop.f32.mrb[65].mxu1  ;;  %v14322_v44 = vld [vmem:[#allocation4 + $0x138] sm:$0xff] }
 0x57c   : > { %v20492_v62 = vadd.f32 %v16333_v48, %v16332_v24  ;;  %v16335_v21 = vpop.f32.mrb[66].mxu1  ;;  %v14362_v24 = vld [vmem:[#allocation4 + $0x278] sm:$0xff] }
 0x57d   : > { %v14197_v41 = vpop.permute.xlu0 %14196  ;;  %v14306_v9 = vld [vmem:[#allocation4 + $0xb8] sm:$0xff]  ;;  %v16336_v6 = vpop.f32.mrb[67].mxu1 }
 0x57e   : > { %14239 = vst.msk [vmem:[#allocation4 + $0xe0] sm:$0xff] %vm4430_vm10, %v14197_v41  ;;  %14931 = vmatprep.mubr.bf16.mxu0 %v14306_v9  ;;  %v20496_v17 = vadd.f32 %v16336_v6, %v16335_v21  ;;  %v14327_v41 = vld [vmem:[#allocation4 + $0x160] sm:$0xff] }
 0x57f   : > { %14932 = vmatmul.mubr.bf16.gmra.mrb[112].mxu0 %v14305_v31  ;;  %v14315_v42 = vld [vmem:[#allocation4 + $0x100] sm:$0xff] }
 0x581   : > { %v14344_v37 = vld [vmem:[#allocation4 + $0x1e8] sm:$0xff] }
 0x582   : > { %14834 = vmatprep.mubr.bf16.mxu1 %v14344_v37  ;;  %v14337_v37 = vld [vmem:[#allocation4 + $0x1b0] sm:$0xff] }
 0x583   : > { %14835 = vmatmul.mubr.bf16.gmra.mrb[112].mxu1 %v14343_v46  ;;  %v14332_v46 = vld [vmem:[#allocation4 + $0x188] sm:$0xff] }
 0x585   : > { %v14311_v53 = vld [vmem:[#allocation4 + $0xe0] sm:$0xff] }
 0x586   : > { %14939 = vmatprep.mubr.bf16.mxu0 %v14311_v53 }
 0x587   : > { %v13954_v55 = vpop.permute.xlu0 %13953  ;;  %v13826_v5 = vpop.permute.xlu1 %13825  ;;  %14940 = vmatmul.mubr.bf16.gmra.mrb[116].mxu0 %v14310_v36 }
 0x588   : > { %13988 = vst.msk [vmem:[#allocation4 + $0x210] sm:$0xff] %vm4430_vm10, %v13954_v55  ;;  %13859 = vst.msk [vmem:[#allocation4 + $0x230] sm:$0xff] %vm4430_vm10, %v13826_v5  ;;  %v14342_v55 = vld [vmem:[#allocation4 + $0x1d8] sm:$0xff]  ;;  %v14347_v5 = vld [vmem:[#allocation4 + $0x200] sm:$0xff] }
 0x58b   : > { %v14199_v16 = vpop.permute.xlu0 %14198  ;;  %v14071_v50 = vpop.permute.xlu1 %14070 }
 0x58c   : > { %14240 = vst.msk [vmem:[#allocation4 + $0x108] sm:$0xff] %vm4430_vm10, %v14199_v16  ;;  %14111 = vst.msk [vmem:[#allocation4 + $0x128] sm:$0xff] %vm4430_vm10, %v14071_v50 }
 0x58f   : > { %v13956_v13 = vpop.permute.xlu0 %13955  ;;  %v13828_v19 = vpop.permute.xlu1 %13827  ;;  %v14349_v0 = vld [vmem:[#allocation4 + $0x210] sm:$0xff] }
 0x590   : > { %13989 = vst.msk [vmem:[#allocation4 + $0x238] sm:$0xff] %vm4430_vm10, %v13956_v13  ;;  %13860 = vst.msk [vmem:[#allocation4 + $0x258] sm:$0xff] %vm4430_vm10, %v13828_v19  ;;  %14842 = vmatprep.mubr.bf16.mxu1 %v14349_v0  ;;  %v14353_v60 = vld [vmem:[#allocation4 + $0x230] sm:$0xff] }
 0x591   : > { %14843 = vmatmul.mubr.bf16.gmra.mrb[116].mxu1 %v14348_v39  ;;  %v14352_v39 = vld [vmem:[#allocation4 + $0x228] sm:$0xff]  ;;  %v14357_v13 = vld [vmem:[#allocation4 + $0x250] sm:$0xff] }
 0x593   : > { %v14201_v26 = vpop.permute.xlu0 %14200  ;;  %v14316_v51 = vld [vmem:[#allocation4 + $0x108] sm:$0xff]  ;;  %v14073_v7 = vpop.permute.xlu1 %14072 }
 0x594   : > { %14241 = vst.msk [vmem:[#allocation4 + $0x130] sm:$0xff] %vm4430_vm10, %v14201_v26  ;;  %14947 = vmatprep.mubr.bf16.mxu0 %v14316_v51  ;;  %14112 = vst.msk [vmem:[#allocation4 + $0x150] sm:$0xff] %vm4430_vm10, %v14073_v7  ;;  %v14320_v47 = vld [vmem:[#allocation4 + $0x128] sm:$0xff] }
 0x595   : > { %14948 = vmatmul.mubr.bf16.gmra.mrb[120].mxu0 %v14315_v42 }
 0x597   : > { %v13958_v52 = vpop.permute.xlu0 %13957  ;;  %v14075_v59 = vpop.permute.xlu1 %14074  ;;  %v14354_v33 = vld [vmem:[#allocation4 + $0x238] sm:$0xff] }
 0x598   : > { %13990 = vst.msk [vmem:[#allocation4 + $0x260] sm:$0xff] %vm4430_vm10, %v13958_v52  ;;  %14113 = vst.msk [vmem:[#allocation4 + $0x178] sm:$0xff] %vm4430_vm10, %v14075_v59  ;;  %14850 = vmatprep.mubr.bf16.mxu1 %v14354_v33  ;;  %v14358_v3 = vld [vmem:[#allocation4 + $0x258] sm:$0xff] }
 0x599   : > { %14851 = vmatmul.mubr.bf16.gmra.mrb[120].mxu1 %v14353_v60 }
 0x59b   : > { %v14203_v8 = vpop.permute.xlu0 %14202  ;;  %v14321_v30 = vld [vmem:[#allocation4 + $0x130] sm:$0xff]  ;;  %v14077_v14 = vpop.permute.xlu1 %14076 }
 0x59c   : > { %14242 = vst.msk [vmem:[#allocation4 + $0x158] sm:$0xff] %vm4430_vm10, %v14203_v8  ;;  %14955 = vmatprep.mubr.bf16.mxu0 %v14321_v30  ;;  %14114 = vst.msk [vmem:[#allocation4 + $0x1a0] sm:$0xff] %vm4430_vm10, %v14077_v14  ;;  %v14325_v23 = vld [vmem:[#allocation4 + $0x150] sm:$0xff] }
 0x59d   : > { %14956 = vmatmul.mubr.bf16.gmra.mrb[124].mxu0 %v14320_v47 }
 0x59f   : > { %v14205_v61 = vpop.permute.xlu0 %14204  ;;  %v14079_v63 = vpop.permute.xlu1 %14078  ;;  %v14359_v45 = vld [vmem:[#allocation4 + $0x260] sm:$0xff]  ;;  %v14330_v56 = vld [vmem:[#allocation4 + $0x178] sm:$0xff] }
 0x5a0   : > { %14243 = vst.msk [vmem:[#allocation4 + $0x180] sm:$0xff] %vm4430_vm10, %v14205_v61  ;;  %14115 = vst.msk [vmem:[#allocation4 + $0x1c8] sm:$0xff] %vm4430_vm10, %v14079_v63  ;;  %14858 = vmatprep.mubr.bf16.mxu1 %v14359_v45 }
 0x5a1   : > { %14859 = vmatmul.mubr.bf16.gmra.mrb[124].mxu1 %v14358_v3 }
 0x5a2   : > { %16608 = vmatprep.mubr.msk.bf16.mxu1 %vm2550_vm9, %v14287_v29 }
 0x5a3   : > { %v14207_v2 = vpop.permute.xlu0 %14206  ;;  %v14326_v28 = vld [vmem:[#allocation4 + $0x158] sm:$0xff]  ;;  %v14081_v57 = vpop.permute.xlu1 %14080  ;;  %v14335_v4 = vld [vmem:[#allocation4 + $0x1a0] sm:$0xff] }
 0x5a4   : > { %14244 = vst.msk [vmem:[#allocation4 + $0x1a8] sm:$0xff] %vm4430_vm10, %v14207_v2  ;;  %14963 = vmatprep.mubr.bf16.mxu0 %v14326_v28  ;;  %14116 = vst.msk [vmem:[#allocation4 + $0x1f0] sm:$0xff] %vm4430_vm10, %v14081_v57 }
 0x5a5   : > { %14964 = vmatmul.mubr.bf16.gmra.mrb[128].mxu0 %v14325_v23 }
 0x5a7   : > { %v14209_v10 = vpop.permute.xlu0 %14208  ;;  %v14331_v43 = vld [vmem:[#allocation4 + $0x180] sm:$0xff]  ;;  %v14083_v49 = vpop.permute.xlu1 %14082  ;;  %v14340_v54 = vld [vmem:[#allocation4 + $0x1c8] sm:$0xff] }
 0x5a8   : > { %14245 = vst.msk [vmem:[#allocation4 + $0x1d0] sm:$0xff] %vm4430_vm10, %v14209_v10  ;;  %14971 = vmatprep.mubr.bf16.mxu0 %v14331_v43  ;;  %14117 = vst.msk [vmem:[#allocation4 + $0x218] sm:$0xff] %vm4430_vm10, %v14083_v49 }
 0x5a9   : > { %16609 = vmatmul.mubr.msk.bf16.vlgmr.msra.gmra.mrb[128].mxu1 %vm2550_vm9, %v14292_v58 }
 0x5aa   : > { %16612 = vmatprep.mubr.msk.bf16.mxu1 %vm2550_vm9, %v14297_v35 }
 0x5ab   : > { %v14211_v34 = vpop.permute.xlu0 %14210  ;;  %v14085_v27 = vpop.permute.xlu1 %14084  ;;  %v14336_v1 = vld [vmem:[#allocation4 + $0x1a8] sm:$0xff]  ;;  %v14345_v9 = vld [vmem:[#allocation4 + $0x1f0] sm:$0xff] }
 0x5ac   : > { %14246 = vst.msk [vmem:[#allocation4 + $0x1f8] sm:$0xff] %vm4430_vm10, %v14211_v34  ;;  %14118 = vst.msk [vmem:[#allocation4 + $0x240] sm:$0xff] %vm4430_vm10, %v14085_v27 }
 0x5ad   : > { %14972 = vmatmul.mubr.bf16.gmra.mrb[132].mxu0 %v14330_v56 }
 0x5ae   : > { %14979 = vmatprep.mubr.bf16.mxu0 %v14336_v1 }
 0x5af   : > { %v14213_v12 = vpop.permute.xlu0 %14212  ;;  %v14087_v15 = vpop.permute.xlu1 %14086  ;;  %v14341_v32 = vld [vmem:[#allocation4 + $0x1d0] sm:$0xff]  ;;  %v14350_v36 = vld [vmem:[#allocation4 + $0x218] sm:$0xff] }
 0x5b0   : > { %14247 = vst.msk [vmem:[#allocation4 + $0x220] sm:$0xff] %vm4430_vm10, %v14213_v12  ;;  %14119 = vst.msk [vmem:[#allocation4 + $0x268] sm:$0xff] %vm4430_vm10, %v14087_v15 }
 0x5b1   : > { %16613 = vmatmul.mubr.msk.bf16.gmra.mrb[132].mxu1 %vm2550_vm9, %v14302_v40 }
 0x5b2   : > { %16616 = vmatprep.mubr.msk.bf16.mxu1 %vm2550_vm9, %v14307_v22 }
 0x5b3   : > { %v14215_v11 = vpop.permute.xlu0 %14214  ;;  %v14346_v20 = vld [vmem:[#allocation4 + $0x1f8] sm:$0xff]  ;;  %v14355_v50 = vld [vmem:[#allocation4 + $0x240] sm:$0xff] }
 0x5b4   : > { %14248 = vst.msk [vmem:[#allocation4 + $0x248] sm:$0xff] %vm4430_vm10, %v14215_v11 }
 0x5b5   : > { %14980 = vmatmul.mubr.bf16.gmra.mrb[136].mxu0 %v14335_v4  ;;  %v20555_v4 = vld [vmem:[%s20796_s4] ss:$0 sm:$0xff] }
 0x5b6   : > { %14987 = vmatprep.mubr.bf16.mxu0 %v14341_v32 }
 0x5b7   : > { %v14217_v38 = vpop.permute.xlu0 %14216  ;;  %v14351_v31 = vld [vmem:[#allocation4 + $0x220] sm:$0xff]  ;;  %v14360_v19 = vld [vmem:[#allocation4 + $0x268] sm:$0xff] }
 0x5b8   : > { %14249 = vst.msk [vmem:[#allocation4 + $0x270] sm:$0xff] %vm4430_vm10, %v14217_v38 }
 0x5b9   : > { %16617 = vmatmul.mubr.msk.bf16.gmra.mrb[136].mxu1 %vm2550_vm9, %v14312_v25 }
 0x5ba   : > { %16620 = vmatprep.mubr.msk.bf16.mxu1 %vm2550_vm9, %v14317_v18 }
 0x5bb   : > { %v14356_v53 = vld [vmem:[#allocation4 + $0x248] sm:$0xff] }
 0x5bd   : > { %14988 = vmatmul.mubr.bf16.gmra.mrb[140].mxu0 %v14340_v54 }
 0x5be   : > { %14995 = vmatprep.mubr.bf16.mxu0 %v14346_v20  ;;  %v14741_v20 = vadd.f32 %v20492_v62, %v20555_v4 }
 0x5bf   : > { %v14361_v16 = vld [vmem:[#allocation4 + $0x270] sm:$0xff] }
 0x5c1   : > { %16621 = vmatmul.mubr.msk.bf16.gmra.mrb[140].mxu1 %vm2550_vm9, %v14322_v44 }
 0x5c2   : > { %16624 = vmatprep.mubr.msk.bf16.mxu1 %vm2550_vm9, %v14327_v41 }
 0x5c5   : > { %14996 = vmatmul.mubr.bf16.gmra.mrb[144].mxu0 %v14345_v9 }
 0x5c6   : > { %15003 = vmatprep.mubr.bf16.mxu0 %v14351_v31  ;;  %v14744_v31 = vadd.f32 %v20496_v17, %v20555_v4 }
 0x5c9   : > { %16625 = vmatmul.mubr.msk.bf16.gmra.mrb[144].mxu1 %vm2550_vm9, %v14332_v46 }
 0x5ca   : > { %16628 = vmatprep.mubr.msk.bf16.mxu1 %vm2550_vm9, %v14337_v37 }
 0x5cd   : > { %15004 = vmatmul.mubr.bf16.gmra.mrb[148].mxu0 %v14350_v36 }
 0x5ce   : > { %15011 = vmatprep.mubr.bf16.mxu0 %v14356_v53 }
 0x5d1   : > { %16629 = vmatmul.mubr.msk.bf16.gmra.mrb[148].mxu1 %vm2550_vm9, %v14342_v55 }
 0x5d2   : > { %16632 = vmatprep.mubr.msk.bf16.mxu1 %vm2550_vm9, %v14347_v5 }
 0x5d5   : > { %15012 = vmatmul.mubr.bf16.gmra.mrb[152].mxu0 %v14355_v50 }
 0x5d6   : > { %15019 = vmatprep.mubr.bf16.mxu0 %v14361_v16 }
 0x5d7   : > { %v16338_v0 = vpop.f32.mrb[68].mxu1 }
 0x5d8   : > { %v16339_v48 = vpop.f32.mrb[69].mxu1 }
 0x5d9   : > { %16633 = vmatmul.mubr.msk.bf16.gmra.mrb[152].mxu1 %vm2550_vm9, %v14352_v39  ;;  %v16340_v26 = vadd.f32 %v16339_v48, %v16338_v0  ;;  %v16341_v51 = vpop.f32.mrb[70].mxu1 }
 0x5da   : > { %16636 = vmatprep.mubr.msk.bf16.mxu1 %vm2550_vm9, %v14357_v13  ;;  %v16342_v7 = vpop.f32.mrb[71].mxu1 }
 0x5db   : > { %v16343_v42 = vadd.f32 %v16342_v7, %v16341_v51 }
 0x5dd   : > { %15020 = vmatmul.mubr.bf16.gmra.mrb[156].mxu0 %v14360_v19  ;;  %v14749_v19 = vadd.f32 %v16340_v26, %v20555_v4  ;;  %v14752_v48 = vadd.f32 %v16343_v42, %v20555_v4 }
 0x5df   : > { %v16344_v21 = vpop.f32.mrb[72].mxu1 }
 0x5e0   : > { %v16345_v6 = vpop.f32.mrb[73].mxu1 }
 0x5e1   : > { %16637 = vmatmul.mubr.msk.bf16.gmra.mrb[156].mxu1 %vm2550_vm9, %v14362_v24  ;;  %v20530_v52 = vadd.f32 %v16345_v6, %v16344_v21  ;;  %v16347_v59 = vpop.f32.mrb[74].mxu1 }
 0x5e2   : > { %v16348_v33 = vpop.f32.mrb[75].mxu1 }
 0x5e3   : > { %v20532_v60 = vadd.f32 %v16348_v33, %v16347_v59 }
 0x5f1   : > { %v16350_v47 = vpop.f32.mrb[76].mxu1 }
 0x5f2   : > { %v16351_v8 = vpop.f32.mrb[77].mxu1 }
 0x5f3   : > { %v20534_v30 = vadd.f32 %v16351_v8, %v16350_v47  ;;  %v16353_v14 = vpop.f32.mrb[78].mxu1 }
 0x5f4   : > { %v16354_v61 = vpop.f32.mrb[79].mxu1 }
 0x5f5   : > { %v20536_v63 = vadd.f32 %v16354_v61, %v16353_v14 }
 0x5f9   : > { %v16356_v45 = vpop.f32.mrb[80].mxu1 }
 0x5fa   : > { %v16357_v3 = vpop.f32.mrb[81].mxu1 }
 0x5fb   : > { %v20538_v29 = vadd.f32 %v16357_v3, %v16356_v45  ;;  %v16359_v2 = vpop.f32.mrb[82].mxu1  ;;  %v14757_v45 = vadd.f32 %v20530_v52, %v20555_v4 }
 0x5fc   : > { %v16360_v28 = vpop.f32.mrb[83].mxu1 }
 0x5fd   : > { %v20540_v57 = vadd.f32 %v16360_v28, %v16359_v2  ;;  %v14760_v28 = vadd.f32 %v20532_v60, %v20555_v4 }
 0x602   : > { %v16362_v23 = vpop.f32.mrb[84].mxu1 }
 0x603   : > { %v16363_v58 = vpop.f32.mrb[85].mxu1 }
 0x604   : > { %v20542_v10 = vadd.f32 %v16363_v58, %v16362_v23  ;;  %v16365_v43 = vpop.f32.mrb[86].mxu1 }
 0x605   : > { %v16366_v49 = vpop.f32.mrb[87].mxu1 }
 0x606   : > { %v20544_v35 = vadd.f32 %v16366_v49, %v16365_v43 }
 0x60a   : > { %v16368_v56 = vpop.f32.mrb[88].mxu1 }
 0x60b   : > { %v16369_v34 = vpop.f32.mrb[89].mxu1 }
 0x60c   : > { %v20546_v27 = vadd.f32 %v16369_v34, %v16368_v56  ;;  %v16371_v1 = vpop.f32.mrb[90].mxu1 }
 0x60d   : > { %v16372_v40 = vpop.f32.mrb[91].mxu1 }
 0x60e   : > { %v20548_v12 = vadd.f32 %v16372_v40, %v16371_v1 }
 0x61b   : > { %v16374_v15 = vpop.f32.mrb[92].mxu1 }
 0x61c   : > { %v16375_v22 = vpop.f32.mrb[93].mxu1 }
 0x61d   : > { %v20550_v32 = vadd.f32 %v16375_v22, %v16374_v15  ;;  %v16377_v11 = vpop.f32.mrb[94].mxu1 }
 0x61e   : > { %v16378_v25 = vpop.f32.mrb[95].mxu1 }
 0x61f   : > { %v16444_v38 = vpop.f32.mrb[96].mxu0  ;;  %v20557_v18 = vadd.f32 %v16378_v25, %v16377_v11  ;;  %v14765_v11 = vadd.f32 %v20534_v30, %v20555_v4 }
 0x620   : > { %v16445_v54 = vpop.f32.mrb[97].mxu0 }
 0x621   : > { %v16446_v44 = vadd.f32 %v16445_v54, %v16444_v38  ;;  %v16447_v41 = vpop.f32.mrb[98].mxu0  ;;  %v14768_v54 = vadd.f32 %v20536_v63, %v20555_v4 }
 0x622   : > { %v16448_v9 = vpop.f32.mrb[99].mxu0 }
 0x623   : > { %v16449_v46 = vadd.f32 %v16448_v9, %v16447_v41  ;;  %v16380_v37 = vpop.f32.mrb[96].mxu1  ;;  %v20563_v36 = vadd.f32 %v16446_v44, %v14741_v20 }
 0x624   : > { %v16381_v53 = vpop.f32.mrb[97].mxu1 }
 0x625   : > { %v20565_v55 = vadd.f32 %v16381_v53, %v16380_v37  ;;  %v16383_v5 = vpop.f32.mrb[98].mxu1  ;;  %v20567_v16 = vadd.f32 %v16449_v46, %v14744_v31 }
 0x626   : > { %v16384_v50 = vpop.f32.mrb[99].mxu1 }
 0x627   : > { %v16450_v39 = vpop.f32.mrb[100].mxu0  ;;  %v20569_v13 = vadd.f32 %v16384_v50, %v16383_v5 }
 0x628   : > { %v16451_v62 = vpop.f32.mrb[101].mxu0 }
 0x629   : > { %v16452_v0 = vadd.f32 %v16451_v62, %v16450_v39  ;;  %v16453_v24 = vpop.f32.mrb[102].mxu0  ;;  %v14773_v39 = vadd.f32 %v20538_v29, %v20555_v4 }
 0x62a   : > { %v16454_v17 = vpop.f32.mrb[103].mxu0 }
 0x62b   : > { %v16455_v51 = vadd.f32 %v16454_v17, %v16453_v24  ;;  %v20573_v7 = vadd.f32 %v16452_v0, %v14749_v19  ;;  %v14776_v0 = vadd.f32 %v20540_v57, %v20555_v4 }
 0x62d   : > { %v20575_v21 = vadd.f32 %v16455_v51, %v14752_v48 }
 0x638   : > { %v16386_v6 = vpop.f32.mrb[100].mxu1 }
 0x639   : > { %v16387_v59 = vpop.f32.mrb[101].mxu1 }
 0x63a   : > { %v20577_v33 = vadd.f32 %v16387_v59, %v16386_v6  ;;  %v16389_v47 = vpop.f32.mrb[102].mxu1 }
 0x63b   : > { %v16390_v8 = vpop.f32.mrb[103].mxu1 }
 0x63c   : > { %v16456_v14 = vpop.f32.mrb[104].mxu0  ;;  %v20579_v61 = vadd.f32 %v16390_v8, %v16389_v47 }
 0x63d   : > { %v16457_v26 = vpop.f32.mrb[105].mxu0 }
 0x63e   : > { %v16458_v3 = vadd.f32 %v16457_v26, %v16456_v14  ;;  %v16459_v42 = vpop.f32.mrb[106].mxu0 }
 0x63f   : > { %v16460_v2 = vpop.f32.mrb[107].mxu0 }
 0x640   : > { %v16461_v23 = vadd.f32 %v16460_v2, %v16459_v42  ;;  %v16392_v58 = vpop.f32.mrb[104].mxu1  ;;  %v20585_v43 = vadd.f32 %v16458_v3, %v14757_v45  ;;  %v14781_v45 = vadd.f32 %v20542_v10, %v20555_v4  ;;  %v14784_v2 = vadd.f32 %v20544_v35, %v20555_v4 }
 0x641   : > { %v16393_v49 = vpop.f32.mrb[105].mxu1 }
 0x642   : > { %v20587_v56 = vadd.f32 %v16393_v49, %v16392_v58  ;;  %v16395_v34 = vpop.f32.mrb[106].mxu1  ;;  %v20589_v1 = vadd.f32 %v16461_v23, %v14760_v28 }
 0x643   : > { %v16396_v40 = vpop.f32.mrb[107].mxu1 }
 0x644   : > { %v16462_v15 = vpop.f32.mrb[108].mxu0  ;;  %v20591_v22 = vadd.f32 %v16396_v40, %v16395_v34 }
 0x645   : > { %v16463_v52 = vpop.f32.mrb[109].mxu0 }
 0x646   : > { %v16464_v25 = vadd.f32 %v16463_v52, %v16462_v15  ;;  %v16465_v60 = vpop.f32.mrb[110].mxu0 }
 0x647   : > { %v16466_v38 = vpop.f32.mrb[111].mxu0 }
 0x648   : > { %v16467_v20 = vadd.f32 %v16466_v38, %v16465_v60  ;;  %v20597_v44 = vadd.f32 %v16464_v25, %v14765_v11  ;;  %v14789_v60 = vadd.f32 %v20546_v27, %v20555_v4 }
 0x64a   : > { %v20599_v41 = vadd.f32 %v16467_v20, %v14768_v54  ;;  %v14792_v20 = vadd.f32 %v20548_v12, %v20555_v4 }
 0x64e   : > { %v16398_v9 = vpop.f32.mrb[108].mxu1 }
 0x64f   : > { %v16399_v31 = vpop.f32.mrb[109].mxu1 }
 0x650   : > { %v20601_v46 = vadd.f32 %v16399_v31, %v16398_v9  ;;  %v16401_v37 = vpop.f32.mrb[110].mxu1 }
 0x651   : > { %v16402_v53 = vpop.f32.mrb[111].mxu1 }
 0x652   : > { %v16468_v5 = vpop.f32.mrb[112].mxu0  ;;  %v20603_v50 = vadd.f32 %v16402_v53, %v16401_v37 }
 0x653   : > { %v16469_v30 = vpop.f32.mrb[113].mxu0 }
 0x654   : > { %v16470_v62 = vadd.f32 %v16469_v30, %v16468_v5  ;;  %v16471_v63 = vpop.f32.mrb[114].mxu0 }
 0x655   : > { %v16472_v19 = vpop.f32.mrb[115].mxu0 }
 0x656   : > { %v16473_v24 = vadd.f32 %v16472_v19, %v16471_v63  ;;  %v16404_v17 = vpop.f32.mrb[112].mxu1  ;;  %v20609_v48 = vadd.f32 %v16470_v62, %v14773_v39 }
 0x657   : > { %v16405_v51 = vpop.f32.mrb[113].mxu1 }
 0x658   : > { %v20611_v6 = vadd.f32 %v16405_v51, %v16404_v17  ;;  %v16407_v59 = vpop.f32.mrb[114].mxu1  ;;  %v20613_v47 = vadd.f32 %v16473_v24, %v14776_v0  ;;  %v14797_v0 = vadd.f32 %v20550_v32, %v20555_v4  ;;  %v14800_v51 = vadd.f32 %v20557_v18, %v20555_v4 }
 0x659   : > { %v16408_v8 = vpop.f32.mrb[115].mxu1 }
 0x65a   : > { %v16474_v14 = vpop.f32.mrb[116].mxu0  ;;  %v20615_v26 = vadd.f32 %v16408_v8, %v16407_v59 }
 0x65b   : > { %v16475_v29 = vpop.f32.mrb[117].mxu0 }
 0x65c   : > { %v16476_v3 = vadd.f32 %v16475_v29, %v16474_v14  ;;  %v16477_v57 = vpop.f32.mrb[118].mxu0 }
 0x65d   : > { %v16478_v42 = vpop.f32.mrb[119].mxu0 }
 0x65e   : > { %v16479_v28 = vadd.f32 %v16478_v42, %v16477_v57  ;;  %v20621_v23 = vadd.f32 %v16476_v3, %v14781_v45 }
 0x660   : > { %v20623_v58 = vadd.f32 %v16479_v28, %v14784_v2 }
 0x664   : > { %v16410_v49 = vpop.f32.mrb[116].mxu1 }
 0x665   : > { %v16411_v34 = vpop.f32.mrb[117].mxu1 }
 0x666   : > { %v20625_v40 = vadd.f32 %v16411_v34, %v16410_v49  ;;  %v16413_v15 = vpop.f32.mrb[118].mxu1  ;;  %v14805_v49 = vadd.f32 %v20565_v55, %v20555_v4 }
 0x667   : > { %v16414_v52 = vpop.f32.mrb[119].mxu1 }
 0x668   : > { %v16480_v11 = vpop.f32.mrb[120].mxu0  ;;  %v20627_v25 = vadd.f32 %v16414_v52, %v16413_v15  ;;  %v14808_v52 = vadd.f32 %v20569_v13, %v20555_v4 }
 0x669   : > { %v16481_v10 = vpop.f32.mrb[121].mxu0 }
 0x66a   : > { %v16482_v38 = vadd.f32 %v16481_v10, %v16480_v11  ;;  %v16483_v35 = vpop.f32.mrb[122].mxu0 }
 0x66b   : > { %v16484_v54 = vpop.f32.mrb[123].mxu0 }
 0x66c   : > { %v16485_v9 = vadd.f32 %v16484_v54, %v16483_v35  ;;  %v16416_v31 = vpop.f32.mrb[120].mxu1  ;;  %v20633_v37 = vadd.f32 %v16482_v38, %v14789_v60 }
 0x66d   : > { %v16417_v53 = vpop.f32.mrb[121].mxu1 }
 0x66e   : > { %v20635_v5 = vadd.f32 %v16417_v53, %v16416_v31  ;;  %v16419_v30 = vpop.f32.mrb[122].mxu1  ;;  %v20637_v39 = vadd.f32 %v16485_v9, %v14792_v20 }
 0x66f   : > { %v16420_v62 = vpop.f32.mrb[123].mxu1 }
 0x670   : > { %v16486_v63 = vpop.f32.mrb[124].mxu0  ;;  %v20639_v19 = vadd.f32 %v16420_v62, %v16419_v30 }
 0x671   : > { %v16487_v27 = vpop.f32.mrb[125].mxu0 }
 0x672   : > { %v16488_v24 = vadd.f32 %v16487_v27, %v16486_v63  ;;  %v16489_v12 = vpop.f32.mrb[126].mxu0 }
 0x673   : > { %v16490_v17 = vpop.f32.mrb[127].mxu0 }
 0x674   : > { %v16491_v59 = vadd.f32 %v16490_v17, %v16489_v12  ;;  %v16422_v8 = vpop.f32.mrb[124].mxu1  ;;  %v20645_v14 = vadd.f32 %v16488_v24, %v14797_v0 }
 0x675   : > { %v16423_v29 = vpop.f32.mrb[125].mxu1 }
 0x676   : > { %v20647_v45 = vadd.f32 %v16423_v29, %v16422_v8  ;;  %v16425_v3 = vpop.f32.mrb[126].mxu1  ;;  %v20649_v57 = vadd.f32 %v16491_v59, %v14800_v51 }
 0x677   : > { %v16426_v42 = vpop.f32.mrb[127].mxu1 }
 0x678   : > { %v16492_v2 = vpop.f32.mrb[128].mxu0  ;;  %v20651_v32 = vadd.f32 %v16426_v42, %v16425_v3 }
 0x679   : > { %v16493_v28 = vpop.f32.mrb[129].mxu0 }
 0x67a   : > { %v16494_v18 = vadd.f32 %v16493_v28, %v16492_v2  ;;  %v16495_v34 = vpop.f32.mrb[130].mxu0 }
 0x67b   : > { %v16496_v15 = vpop.f32.mrb[131].mxu0 }
 0x67c   : > { %v16497_v11 = vadd.f32 %v16496_v15, %v16495_v34  ;;  %v16610_v10 = vpop.f32.mrb[128].mxu1  ;;  %v20658_v60 = vadd.f32 %v16494_v18, %v14805_v49 }
 0x67d   : > { %v15071_v38 = vadd.f32 %v16610_v10, %v20573_v7  ;;  %v15062_v35 = vpop.f32.mrb[129].mxu1 }
 0x67e   : > { %v15063_v55 = vadd.f32 %v15062_v35, %v20563_v36  ;;  %v16611_v54 = vpop.f32.mrb[130].mxu1  ;;  %v20667_v20 = vadd.f32 %v16497_v11, %v14808_v52  ;;  %v14813_v36 = vadd.f32 %v20577_v33, %v20555_v4 }
 0x67f   : > { %v15191_v13 = vmax.f32 %v15071_v38, 0.0  ;;  %v15074_v9 = vadd.f32 %v16611_v54, %v20575_v21  ;;  %v15065_v31 = vpop.f32.mrb[131].mxu1  ;;  %v14816_v21 = vadd.f32 %v20579_v61, %v20555_v4 }
 0x680   : > { %v16498_v7 = vpop.f32.mrb[132].mxu0  ;;  %v15189_v53 = vmax.f32 %v15063_v55, 0.0  ;;  %v15066_v30 = vadd.f32 %v15065_v31, %v20567_v16 }
 0x681   : > { %v16499_v62 = vpop.f32.mrb[133].mxu0  ;;  %15223 = vst.msk [vmem:[%s20664_s23 + $0x10] sm:$0xff] %vm2550_vm9, %v15191_v13  ;;  %v15192_v63 = vmax.f32 %v15074_v9, 0.0 }
 0x682   : > { %v16500_v27 = vadd.f32 %v16499_v62, %v16498_v7  ;;  %v16501_v0 = vpop.f32.mrb[134].mxu0  ;;  %15221 = vst.msk [vmem:[%s20664_s23] sm:$0xff] %vm2550_vm9, %v15189_v53  ;;  %v15190_v24 = vmax.f32 %v15066_v30, 0.0 }
 0x683   : > { %v16502_v12 = vpop.f32.mrb[135].mxu0  ;;  %15224 = vst.msk [vmem:[%s20664_s23 + $0x18] sm:$0xff] %vm2550_vm9, %v15192_v63 }
 0x684   : > { %v16503_v17 = vadd.f32 %v16502_v12, %v16501_v0  ;;  %15222 = vst.msk [vmem:[%s20664_s23 + $0x8] sm:$0xff] %vm2550_vm9, %v15190_v24  ;;  %v16614_v16 = vpop.f32.mrb[132].mxu1  ;;  %v20683_v51 = vadd.f32 %v16500_v27, %v14813_v36 }
 0x685   : > { %v15087_v33 = vadd.f32 %v16614_v16, %v20597_v44  ;;  %v15078_v59 = vpop.f32.mrb[133].mxu1 }
 0x686   : > { %v15079_v8 = vadd.f32 %v15078_v59, %v20585_v43  ;;  %v16615_v29 = vpop.f32.mrb[134].mxu1  ;;  %v20687_v3 = vadd.f32 %v16503_v17, %v14816_v21  ;;  %v14821_v43 = vadd.f32 %v20587_v56, %v20555_v4 }
 0x687   : > { %v15195_v42 = vmax.f32 %v15087_v33, 0.0  ;;  %v15090_v61 = vadd.f32 %v16615_v29, %v20599_v41  ;;  %v15081_v2 = vpop.f32.mrb[135].mxu1  ;;  %v14824_v41 = vadd.f32 %v20591_v22, %v20555_v4 }
 0x688   : > { %v16504_v28 = vpop.f32.mrb[136].mxu0  ;;  %v15193_v49 = vmax.f32 %v15079_v8, 0.0  ;;  %v15082_v18 = vadd.f32 %v15081_v2, %v20589_v1 }
 0x689   : > { %v16505_v34 = vpop.f32.mrb[137].mxu0  ;;  %15227 = vst.msk [vmem:[%s20664_s23 + $0x30] sm:$0xff] %vm2550_vm9, %v15195_v42  ;;  %v15196_v44 = vmax.f32 %v15090_v61, 0.0 }
 0x68a   : > { %v16506_v15 = vadd.f32 %v16505_v34, %v16504_v28  ;;  %v16507_v52 = vpop.f32.mrb[138].mxu0  ;;  %15225 = vst.msk [vmem:[%s20664_s23 + $0x20] sm:$0xff] %vm2550_vm9, %v15193_v49  ;;  %v15194_v11 = vmax.f32 %v15082_v18, 0.0  ;;  %v14837_v49 = vadd.f32 %v20611_v6, %v20555_v4 }
 0x68b   : > { %v16508_v10 = vpop.f32.mrb[139].mxu0  ;;  %15228 = vst.msk [vmem:[%s20664_s23 + $0x38] sm:$0xff] %vm2550_vm9, %v15196_v44 }
 0x68c   : > { %v16509_v38 = vadd.f32 %v16508_v10, %v16507_v52  ;;  %15226 = vst.msk [vmem:[%s20664_s23 + $0x28] sm:$0xff] %vm2550_vm9, %v15194_v11  ;;  %v16618_v1 = vpop.f32.mrb[136].mxu1  ;;  %v20703_v35 = vadd.f32 %v16506_v15, %v14821_v43 }
 0x68d   : > { %v15103_v56 = vadd.f32 %v16618_v1, %v20621_v23  ;;  %v15094_v55 = vpop.f32.mrb[137].mxu1 }
 0x68e   : > { %v15095_v54 = vadd.f32 %v15094_v55, %v20609_v48  ;;  %v16619_v13 = vpop.f32.mrb[138].mxu1  ;;  %v20707_v9 = vadd.f32 %v16509_v38, %v14824_v41  ;;  %v14829_v48 = vadd.f32 %v20601_v46, %v20555_v4 }
 0x68f   : > { %v15199_v31 = vmax.f32 %v15103_v56, 0.0  ;;  %v15106_v22 = vadd.f32 %v16619_v13, %v20623_v58  ;;  %v15097_v7 = vpop.f32.mrb[139].mxu1  ;;  %v14832_v58 = vadd.f32 %v20603_v50, %v20555_v4 }
 0x690   : > { %v16510_v53 = vpop.f32.mrb[140].mxu0  ;;  %v15197_v30 = vmax.f32 %v15095_v54, 0.0  ;;  %v15098_v62 = vadd.f32 %v15097_v7, %v20613_v47 }
 0x691   : > { %v16511_v63 = vpop.f32.mrb[141].mxu0  ;;  %15231 = vst.msk [vmem:[%s20664_s23 + $0x50] sm:$0xff] %vm2550_vm9, %v15199_v31  ;;  %v15200_v23 = vmax.f32 %v15106_v22, 0.0  ;;  %v14845_v31 = vadd.f32 %v20625_v40, %v20555_v4 }
 0x692   : > { %v16512_v36 = vadd.f32 %v16511_v63, %v16510_v53  ;;  %v16513_v27 = vpop.f32.mrb[142].mxu0  ;;  %15229 = vst.msk [vmem:[%s20664_s23 + $0x40] sm:$0xff] %vm2550_vm9, %v15197_v30  ;;  %v15198_v0 = vmax.f32 %v15098_v62, 0.0 }
 0x693   : > { %v16514_v24 = vpop.f32.mrb[143].mxu0  ;;  %15232 = vst.msk [vmem:[%s20664_s23 + $0x58] sm:$0xff] %vm2550_vm9, %v15200_v23 }
 0x694   : > { %v16515_v12 = vadd.f32 %v16514_v24, %v16513_v27  ;;  %15230 = vst.msk [vmem:[%s20664_s23 + $0x48] sm:$0xff] %vm2550_vm9, %v15198_v0  ;;  %v16622_v47 = vpop.f32.mrb[140].mxu1  ;;  %v14990_v21 = vadd.f32 %v16512_v36, %v14829_v48 }
 0x695   : > { %v15119_v17 = vadd.f32 %v16622_v47, %v20645_v14  ;;  %v15110_v46 = vpop.f32.mrb[141].mxu1 }
 0x696   : > { %v15111_v16 = vadd.f32 %v15110_v46, %v20633_v37  ;;  %v16623_v33 = vpop.f32.mrb[142].mxu1  ;;  %v14993_v59 = vadd.f32 %v16515_v12, %v14832_v58 }
 0x697   : > { %v15203_v8 = vmax.f32 %v15119_v17, 0.0  ;;  %v15122_v29 = vadd.f32 %v16623_v33, %v20649_v57  ;;  %v15113_v42 = vpop.f32.mrb[143].mxu1  ;;  %v14840_v57 = vadd.f32 %v20615_v26, %v20555_v4 }
 0x698   : > { %v16516_v50 = vpop.f32.mrb[144].mxu0  ;;  %v15201_v61 = vmax.f32 %v15111_v16, 0.0  ;;  %v15114_v2 = vadd.f32 %v15113_v42, %v20637_v39 }
 0x699   : > { %v16517_v28 = vpop.f32.mrb[145].mxu0  ;;  %15235 = vst.msk [vmem:[%s20664_s23 + $0x70] sm:$0xff] %vm2550_vm9, %v15203_v8  ;;  %v15204_v14 = vmax.f32 %v15122_v29, 0.0 }
 0x69a   : > { %v16518_v37 = vadd.f32 %v16517_v28, %v16516_v50  ;;  %v16519_v18 = vpop.f32.mrb[146].mxu0  ;;  %15233 = vst.msk [vmem:[%s20664_s23 + $0x60] sm:$0xff] %vm2550_vm9, %v15201_v61  ;;  %v15202_v34 = vmax.f32 %v15114_v2, 0.0 }
 0x69b   : > { %v16520_v44 = vpop.f32.mrb[147].mxu0  ;;  %15236 = vst.msk [vmem:[%s20664_s23 + $0x78] sm:$0xff] %vm2550_vm9, %v15204_v14 }
 0x69c   : > { %v16521_v43 = vadd.f32 %v16520_v44, %v16519_v18  ;;  %15234 = vst.msk [vmem:[%s20664_s23 + $0x68] sm:$0xff] %vm2550_vm9, %v15202_v34  ;;  %v16626_v39 = vpop.f32.mrb[144].mxu1  ;;  %v14998_v15 = vadd.f32 %v16518_v37, %v14837_v49 }
 0x69d   : > { %v15135_v52 = vadd.f32 %v16626_v39, %v20683_v51  ;;  %v15126_v6 = vpop.f32.mrb[145].mxu1 }
 0x69e   : > { %v15127_v11 = vadd.f32 %v15126_v6, %v20658_v60  ;;  %v16627_v10 = vpop.f32.mrb[146].mxu1  ;;  %v15001_v41 = vadd.f32 %v16521_v43, %v14840_v57  ;;  %v14861_v57 = vadd.f32 %v20647_v45, %v20555_v4  ;;  %v14864_v6 = vadd.f32 %v20651_v32, %v20555_v4 }
 0x69f   : > { %v15207_v38 = vmax.f32 %v15135_v52, 0.0  ;;  %v15138_v1 = vadd.f32 %v16627_v10, %v20687_v3  ;;  %v15129_v56 = vpop.f32.mrb[147].mxu1  ;;  %v14848_v3 = vadd.f32 %v20627_v25, %v20555_v4 }
 0x6a0   : > { %v16522_v26 = vpop.f32.mrb[148].mxu0  ;;  %v15205_v55 = vmax.f32 %v15127_v11, 0.0  ;;  %v15130_v54 = vadd.f32 %v15129_v56, %v20667_v20 }
 0x6a1   : > { %v16523_v13 = vpop.f32.mrb[149].mxu0  ;;  %15239 = vst.msk [vmem:[%s20664_s23 + $0x90] sm:$0xff] %vm2550_vm9, %v15207_v38  ;;  %v15208_v51 = vmax.f32 %v15138_v1, 0.0 }
 0x6a2   : > { %v16524_v60 = vadd.f32 %v16523_v13, %v16522_v26  ;;  %v16525_v22 = vpop.f32.mrb[150].mxu0  ;;  %15237 = vst.msk [vmem:[%s20664_s23 + $0x80] sm:$0xff] %vm2550_vm9, %v15205_v55  ;;  %v15206_v7 = vmax.f32 %v15130_v54, 0.0 }
 0x6a3   : > { %v16526_v53 = vpop.f32.mrb[151].mxu0  ;;  %15240 = vst.msk [vmem:[%s20664_s23 + $0x98] sm:$0xff] %vm2550_vm9, %v15208_v51 }
 0x6a4   : > { %v16527_v30 = vadd.f32 %v16526_v53, %v16525_v22  ;;  %15238 = vst.msk [vmem:[%s20664_s23 + $0x88] sm:$0xff] %vm2550_vm9, %v15206_v7  ;;  %v16630_v20 = vpop.f32.mrb[148].mxu1  ;;  %v15006_v62 = vadd.f32 %v16524_v60, %v14845_v31 }
 0x6a5   : > { %v15151_v63 = vadd.f32 %v16630_v20, %v14990_v21  ;;  %v15142_v23 = vpop.f32.mrb[149].mxu1  ;;  %v14853_v21 = vadd.f32 %v20635_v5, %v20555_v4 }
 0x6a6   : > { %v15143_v40 = vadd.f32 %v15142_v23, %v20703_v35  ;;  %v16631_v48 = vpop.f32.mrb[150].mxu1  ;;  %v15009_v36 = vadd.f32 %v16527_v30, %v14848_v3 }
 0x6a7   : > { %v15211_v27 = vmax.f32 %v15151_v63, 0.0  ;;  %v15154_v0 = vadd.f32 %v16631_v48, %v14993_v59  ;;  %v15145_v24 = vpop.f32.mrb[151].mxu1  ;;  %v14856_v59 = vadd.f32 %v20639_v19, %v20555_v4 }
 0x6a8   : > { %v16528_v58 = vpop.f32.mrb[152].mxu0  ;;  %v15209_v25 = vmax.f32 %v15143_v40, 0.0  ;;  %v15146_v12 = vadd.f32 %v15145_v24, %v20707_v9 }
 0x6a9   : > { %v16529_v47 = vpop.f32.mrb[153].mxu0  ;;  %15243 = vst.msk [vmem:[%s20664_s23 + $0xb0] sm:$0xff] %vm2550_vm9, %v15211_v27  ;;  %v15212_v17 = vmax.f32 %v15154_v0, 0.0 }
 0x6aa   : > { %v16530_v46 = vadd.f32 %v16529_v47, %v16528_v58  ;;  %v16531_v35 = vpop.f32.mrb[154].mxu0  ;;  %15241 = vst.msk [vmem:[%s20664_s23 + $0xa0] sm:$0xff] %vm2550_vm9, %v15209_v25  ;;  %v15210_v16 = vmax.f32 %v15146_v12, 0.0 }
 0x6ab   : > { %v16532_v33 = vpop.f32.mrb[155].mxu0  ;;  %15244 = vst.msk [vmem:[%s20664_s23 + $0xb8] sm:$0xff] %vm2550_vm9, %v15212_v17 }
 0x6ac   : > { %v16533_v8 = vadd.f32 %v16532_v33, %v16531_v35  ;;  %15242 = vst.msk [vmem:[%s20664_s23 + $0xa8] sm:$0xff] %vm2550_vm9, %v15210_v16  ;;  %v16634_v9 = vpop.f32.mrb[152].mxu1  ;;  %v15014_v29 = vadd.f32 %v16530_v46, %v14853_v21 }
 0x6ad   : > { %v15167_v42 = vadd.f32 %v16634_v9, %v15006_v62  ;;  %v15158_v50 = vpop.f32.mrb[153].mxu1 }
 0x6ae   : > { %v15159_v5 = vadd.f32 %v15158_v50, %v14998_v15  ;;  %v16635_v61 = vpop.f32.mrb[154].mxu1  ;;  %v15017_v2 = vadd.f32 %v16533_v8, %v14856_v59 }
 0x6af   : > { %v15215_v28 = vmax.f32 %v15167_v42, 0.0  ;;  %v15170_v14 = vadd.f32 %v16635_v61, %v15009_v36  ;;  %v15161_v49 = vpop.f32.mrb[155].mxu1 }
 0x6b0   : > { %v16534_v37 = vpop.f32.mrb[156].mxu0  ;;  %v15213_v18 = vmax.f32 %v15159_v5, 0.0  ;;  %v15162_v19 = vadd.f32 %v15161_v49, %v15001_v41 }
 0x6b1   : > { %v16535_v34 = vpop.f32.mrb[157].mxu0  ;;  %15247 = vst.msk [vmem:[%s20664_s23 + $0xd0] sm:$0xff] %vm2550_vm9, %v15215_v28  ;;  %v15216_v44 = vmax.f32 %v15170_v14, 0.0 }
 0x6b2   : > { %v16536_v43 = vadd.f32 %v16535_v34, %v16534_v37  ;;  %v16537_v39 = vpop.f32.mrb[158].mxu0  ;;  %15245 = vst.msk [vmem:[%s20664_s23 + $0xc0] sm:$0xff] %vm2550_vm9, %v15213_v18  ;;  %v15214_v15 = vmax.f32 %v15162_v19, 0.0 }
 0x6b3   : > { %v16538_v52 = vpop.f32.mrb[159].mxu0  ;;  %15248 = vst.msk [vmem:[%s20664_s23 + $0xd8] sm:$0xff] %vm2550_vm9, %v15216_v44 }
 0x6b4   : > { %v16539_v11 = vadd.f32 %v16538_v52, %v16537_v39  ;;  %15246 = vst.msk [vmem:[%s20664_s23 + $0xc8] sm:$0xff] %vm2550_vm9, %v15214_v15  ;;  %v15022_v10 = vadd.f32 %v16536_v43, %v14861_v57  ;;  %v16638_v41 = vpop.f32.mrb[156].mxu1 }
 0x6b5   : > { %v15174_v45 = vpop.f32.mrb[157].mxu1 }
 0x6b6   : > { %v15183_v38 = vadd.f32 %v16638_v41, %v15022_v10  ;;  %v15175_v1 = vadd.f32 %v15174_v45, %v15014_v29  ;;  %v15025_v56 = vadd.f32 %v16539_v11, %v14864_v6  ;;  %v16639_v26 = vpop.f32.mrb[158].mxu1 }
 0x6b7   : > { %v15177_v55 = vpop.f32.mrb[159].mxu1 }
 0x6b8   : > { %v15219_v54 = vmax.f32 %v15183_v38, 0.0  ;;  %v15217_v13 = vmax.f32 %v15175_v1, 0.0  ;;  %v15186_v51 = vadd.f32 %v16639_v26, %v15025_v56  ;;  %v15178_v31 = vadd.f32 %v15177_v55, %v15017_v2 }
 0x6ba   : > { %15251 = vst.msk [vmem:[%s20664_s23 + $0xf0] sm:$0xff] %vm2550_vm9, %v15219_v54  ;;  %15249 = vst.msk [vmem:[%s20664_s23 + $0xe0] sm:$0xff] %vm2550_vm9, %v15217_v13  ;;  %v15220_v4 = vmax.f32 %v15186_v51, 0.0  ;;  %v15218_v32 = vmax.f32 %v15178_v31, 0.0 }
 0x6bc   : > { %15252 = vst.msk [vmem:[%s20664_s23 + $0xf8] sm:$0xff] %vm2550_vm9, %v15220_v4  ;;  %15250 = vst.msk [vmem:[%s20664_s23 + $0xe8] sm:$0xff] %vm2550_vm9, %v15218_v32 }
 0x6bd PF: > { %s15_s18 = sadd.s32 1, %s16922_s18  }
 0x6be   : > { %p12_p4 = scmp.ge.s32.totalorder %s15_s18, 10  }
 0x6c0   :  { %14 = sbr.rel (!%p12_p4) target bundleno = 1 (0x1), region = 83 }

</bundles_post_ra>
